<compile_context>
chip_gen: v7x
topology: tpu7x:2x2x1
jax: 0.10.0
libtpu: 0.0.40
codegen_flags: <defaults>
</compile_context>

<pallas_src>
import functools

import jax
import jax.numpy as jnp
import numpy as np
from jax import lax
from jax.experimental import pallas as pl
from jax.experimental.pallas import tpu as pltpu

BN_EPS = 1e-5

# ResNet-34 stage config: (planes, num_blocks, stride). Kept as a Python constant so
# strides stay static under jit (they are used as slice strides).
STAGES = ((64, 3, 1), (128, 4, 2), (256, 6, 2), (512, 3, 2))


# --------------------------- Pallas kernels ---------------------------------

def _mm_kernel(a_ref, b_ref, bias_ref, *rest, relu, has_res):
    """Tiled (M,K)@(K,N) with fp32 accumulation; epilogue = +bias (+res) (+ReLU)."""
    if has_res:
        res_ref, o_ref, acc_ref = rest
    else:
        o_ref, acc_ref = rest

    k = pl.program_id(2)

    @pl.when(k == 0)
    def _():
        acc_ref[...] = jnp.zeros_like(acc_ref)

    acc_ref[...] += jnp.dot(a_ref[...], b_ref[...],
                            preferred_element_type=jnp.float32)

    @pl.when(k == pl.num_programs(2) - 1)
    def _():
        out = acc_ref[...] + bias_ref[...]
        if has_res:
            out = out + res_ref[...].astype(jnp.float32)
        if relu:
            out = jnp.maximum(out, 0.0)
        o_ref[...] = out.astype(o_ref.dtype)


def _max9_kernel(x_ref, o_ref):
    # x: (9, R, L) -> elementwise max over the 9 shifted 3x3 window taps.
    o_ref[...] = jnp.max(x_ref[...], axis=0)


def _global_pool_kernel(x_ref, o_ref):
    # x: (N, HW, C) -> gap + gmp over the spatial axis, fp32.
    x = x_ref[...].astype(jnp.float32)
    o_ref[...] = jnp.mean(x, axis=1) + jnp.max(x, axis=1)


def _embed_l2_kernel(x_ref, w_ref, b_ref, o_ref, *, is_norm):
    y = jnp.dot(x_ref[...], w_ref[...], preferred_element_type=jnp.float32)
    y = y + b_ref[...]
    if is_norm:
        y = y * lax.rsqrt(jnp.sum(y * y, axis=1, keepdims=True) + 1e-12)
    o_ref[...] = y


_VMEM_SPEC = pl.BlockSpec(memory_space=pltpu.MemorySpace.VMEM)


# --------------------------- tiled matmul wrapper -----------------------------

def _round_up(x, m):
    return (x + m - 1) // m * m


def _pad2(a, m_pad, n_pad):
    m, n = a.shape
    if m == m_pad and n == n_pad:
        return a
    return jnp.pad(a, ((0, m_pad - m), (0, n_pad - n)))


def matmul_bias_act(a, b, bias, residual=None, relu=False):
    """a:(M,K), b:(K,N) -> bf16 (M,N); fused +bias (+residual) (+ReLU)."""
    m, k = a.shape
    _, n = b.shape

    tm = min(256, _round_up(m, 8))
    m_pad = _round_up(m, tm)
    tn = min(256, _round_up(n, 128))
    n_pad = _round_up(n, tn)
    k_pad = _round_up(k, 128)
    tk = next(t for t in (512, 384, 256, 128) if k_pad % t == 0)

    a_p = _pad2(a.astype(jnp.bfloat16), m_pad, k_pad)
    b_p = _pad2(b.astype(jnp.bfloat16), k_pad, n_pad)
    bias_p = _pad2(bias.reshape(1, n).astype(jnp.float32), 1, n_pad)

    in_specs = [
        pl.BlockSpec((tm, tk), lambda i, j, kk: (i, kk)),
        pl.BlockSpec((tk, tn), lambda i, j, kk: (kk, j)),
        pl.BlockSpec((1, tn), lambda i, j, kk: (0, j)),
    ]
    inputs = [a_p, b_p, bias_p]
    has_res = residual is not None
    if has_res:
        inputs.append(_pad2(residual.astype(jnp.bfloat16), m_pad, n_pad))
        in_specs.append(pl.BlockSpec((tm, tn), lambda i, j, kk: (i, j)))

    out = pl.pallas_call(
        functools.partial(_mm_kernel, relu=relu, has_res=has_res),
        out_shape=jax.ShapeDtypeStruct((m_pad, n_pad), jnp.bfloat16),
        grid_spec=pltpu.PrefetchScalarGridSpec(
            num_scalar_prefetch=0,
            grid=(m_pad // tm, n_pad // tn, k_pad // tk),
            in_specs=in_specs,
            out_specs=pl.BlockSpec((tm, tn), lambda i, j, kk: (i, j)),
            scratch_shapes=[pltpu.VMEM((tm, tn), jnp.float32)],
        ),
        compiler_params=pltpu.CompilerParams(
            dimension_semantics=("parallel", "parallel", "arbitrary"),
            vmem_limit_bytes=32 * 1024 * 1024,
        ),
    )(*inputs)
    return out[:m, :n]


# --------------------------- JAX glue (NHWC) ----------------------------------

def conv_bn(x, w, bn, stride, pad, relu, residual=None):
    """Conv2d(bias=False) + folded eval-mode BN (+ residual) (+ ReLU). NHWC bf16."""
    cout, cin, kh, kw = w.shape
    n, h, wdim, c = x.shape
    ho = (h + 2 * pad - kh) // stride + 1
    wo = (wdim + 2 * pad - kw) // stride + 1

    if kh == 1 and kw == 1:
        cols = x[:, ::stride, ::stride, :].reshape(n * ho * wo, c)
    else:
        xp = jnp.pad(x, ((0, 0), (pad, pad), (pad, pad), (0, 0)))
        taps = []
        for i in range(kh):
            for j in range(kw):
                taps.append(xp[:, i:i + stride * (ho - 1) + 1:stride,
                                j:j + stride * (wo - 1) + 1:stride, :])
        cols = jnp.concatenate(taps, axis=-1).reshape(n * ho * wo, kh * kw * c)

    # Fold eval-mode BN: scale into the weight columns, bias added in the epilogue.
    scale = bn["gamma"] * lax.rsqrt(bn["var"] + BN_EPS)
    bias = bn["beta"] - bn["mean"] * scale
    wm = w.transpose(2, 3, 1, 0).reshape(kh * kw * cin, cout) * scale[None, :]

    res2d = None if residual is None else residual.reshape(n * ho * wo, cout)
    out = matmul_bias_act(cols, wm, bias, residual=res2d, relu=relu)
    return out.reshape(n, ho, wo, cout)


def maxpool_3x3_s2(x):
    n, h, w, c = x.shape
    ho = (h + 2 - 3) // 2 + 1
    wo = (w + 2 - 3) // 2 + 1
    xp = jnp.pad(x, ((0, 0), (1, 1), (1, 1), (0, 0)), constant_values=-jnp.inf)
    taps = [xp[:, i:i + 2 * (ho - 1) + 1:2, j:j + 2 * (wo - 1) + 1:2, :]
            for i in range(3) for j in range(3)]
    # Lane-dense last dim (wo*c >= 128 after stage 1); max over taps is elementwise.
    stacked = jnp.stack(taps, axis=0).reshape(9, n * ho, wo * c)
    out = pl.pallas_call(
        _max9_kernel,
        out_shape=jax.ShapeDtypeStruct((n * ho, wo * c), x.dtype),
        in_specs=[_VMEM_SPEC],
        out_specs=_VMEM_SPEC,
    )(stacked)
    return out.reshape(n, ho, wo, c)


def basic_block(x, blk, stride):
    # torchvision BasicBlock: 3x3(stride)->BN->ReLU, 3x3->BN, +identity, ReLU.
    identity = x
    if "wd" in blk:
        identity = conv_bn(x, blk["wd"], blk["bnd"], stride, 0, relu=False)
    out = conv_bn(x, blk["w1"], blk["bn1"], stride, 1, relu=True)
    # residual add + ReLU fused into the second conv's matmul epilogue.
    out = conv_bn(out, blk["w2"], blk["bn2"], 1, 1, relu=True, residual=identity)
    return out


def global_pool(x3d):
    n, hw, c = x3d.shape
    return pl.pallas_call(
        _global_pool_kernel,
        out_shape=jax.ShapeDtypeStruct((n, c), jnp.float32),
        in_specs=[_VMEM_SPEC],
        out_specs=_VMEM_SPEC,
    )(x3d)


def embed(pooled, emb_w, emb_b, is_norm):
    n, f = pooled.shape
    e = emb_w.shape[1]
    return pl.pallas_call(
        functools.partial(_embed_l2_kernel, is_norm=bool(is_norm)),
        out_shape=jax.ShapeDtypeStruct((n, e), jnp.float32),
        in_specs=[_VMEM_SPEC, _VMEM_SPEC, _VMEM_SPEC],
        out_specs=_VMEM_SPEC,
    )(pooled, emb_w, emb_b.reshape(1, e))


@functools.partial(jax.jit, static_argnames=("is_norm",))
def resnet34_forward(params, x, is_norm=True):
    # NCHW (public interface) -> NHWC bf16 internal layout.
    x = jnp.transpose(x, (0, 2, 3, 1)).astype(jnp.bfloat16)
    x = conv_bn(x, params["conv1_w"], params["bn1"], stride=2, pad=3, relu=True)
    x = maxpool_3x3_s2(x)
    for stage_blocks, (_, _, stride) in zip(params["layers"], STAGES):
        for bi, blk in enumerate(stage_blocks):
            x = basic_block(x, blk, stride if bi == 0 else 1)
    n, h, w, c = x.shape
    pooled = global_pool(x.reshape(n, h * w, c))          # gap + gmp, (n, 512) fp32
    return embed(pooled, params["emb_w"], params["emb_b"], is_norm)


# --------------------------- parameters --------------------------------------

class _KeyGen:
    def __init__(self, key):
        self._key = key

    def __call__(self):
        self._key, sub = jax.random.split(self._key)
        return sub


def make_params(key, embedding_size):
    kg = _KeyGen(key)

    def conv_w(cin, cout, k):
        fan_in = cin * k * k
        return (jax.random.normal(kg(), (cout, cin, k, k), jnp.float32)
                * np.float32(np.sqrt(2.0 / fan_in)))

    def bn_p(c):
        return dict(
            gamma=1.0 + 0.1 * jax.random.normal(kg(), (c,), jnp.float32),
            beta=0.1 * jax.random.normal(kg(), (c,), jnp.float32),
            mean=0.1 * jax.random.normal(kg(), (c,), jnp.float32),
            var=1.0 + 0.1 * jax.random.uniform(kg(), (c,), jnp.float32),
        )

    params = dict(conv1_w=conv_w(3, 64, 7), bn1=bn_p(64))
    inplanes = 64
    layers = []
    # ResNet-34: BasicBlock (expansion=1), depths (3, 4, 6, 3).
    for planes, nblocks, stride in STAGES:
        blocks = []
        for bi in range(nblocks):
            cin = inplanes if bi == 0 else planes
            blk = dict(
                w1=conv_w(cin, planes, 3), bn1=bn_p(planes),
                w2=conv_w(planes, planes, 3), bn2=bn_p(planes),
            )
            if bi == 0 and (stride != 1 or cin != planes):
                blk["wd"] = conv_w(cin, planes, 1)
                blk["bnd"] = bn_p(planes)
            blocks.append(blk)
        inplanes = planes
        layers.append(blocks)
    params["layers"] = layers

    num_ftrs = 512                                        # BasicBlock expansion = 1
    # nn.Linear(num_ftrs, embedding_size), kaiming_normal_(mode='fan_out'):
    # std = sqrt(2 / embedding_size); bias = 0. Stored pre-transposed (F, E).
    params["emb_w"] = (jax.random.normal(kg(), (num_ftrs, embedding_size),
                                         jnp.float32)
                       * np.float32(np.sqrt(2.0 / embedding_size)))
    params["emb_b"] = jnp.zeros((embedding_size,), jnp.float32)
    return params


# --------------------------- main ---------------------------------------------

if __name__ == "__main__":
    key = jax.random.PRNGKey(0)
    pkey, xkey = jax.random.split(key)

    embedding_size = 128
    params = make_params(pkey, embedding_size)

    # Small but architecture-consistent input: NCHW, 3 input channels.
    x = jax.random.normal(xkey, (2, 3, 64, 64), jnp.float32)

    out = resnet34_forward(params, x, is_norm=True)
    out = jax.block_until_ready(out)

    assert out.shape == (2, embedding_size), out.shape
    assert bool(jnp.all(jnp.isfinite(out)))
    # l2_norm => each row has unit norm.
    norms = jnp.linalg.norm(out, axis=1)
    assert bool(jnp.all(jnp.abs(norms - 1.0) < 1e-3)), norms

    print("KERNEL_OK")
</pallas_src>

<mosaic_0001>
module attributes {stable_mosaic.version = 11 : i64} {
  func.func @_mm_kernel(%arg0: i32, %arg1: i32, %arg2: i32, %arg3: memref<256x256xbf16, #tpu.memory_space<vmem>>, %arg4: memref<256x128xbf16, #tpu.memory_space<vmem>>, %arg5: memref<1x128xf32, #tpu.memory_space<vmem>>, %arg6: memref<256x128xbf16, #tpu.memory_space<vmem>>, %arg7: memref<256x128xf32, #tpu.memory_space<vmem>>) attributes {dimension_semantics = [#tpu.dimension_semantics<parallel>, #tpu.dimension_semantics<parallel>, #tpu.dimension_semantics<arbitrary>], iteration_bounds = array<i64: 8, 1, 1>, scalar_prefetch = 0 : i64, scratch_operands = 1 : i64, tpu.core_type = #tpu.core_type<tc>, window_params = [{transform_indices = @transform_0, window_bounds = array<i64: 256, 256>}, {transform_indices = @transform_1, window_bounds = array<i64: 256, 128>}, {transform_indices = @transform_2, window_bounds = array<i64: 1, 128>}, {transform_indices = @transform_3, window_bounds = array<i64: 256, 128>}]} {
    %c0_i32 = arith.constant 0 : i32
    %0 = arith.cmpi eq, %arg2, %c0_i32 : i32
    %1 = arith.extui %0 : i1 to i32
    %c0_i32_0 = arith.constant 0 : i32
    %2 = arith.cmpi ne, %1, %c0_i32_0 : i32
    scf.if %2 {
      %cst_10 = arith.constant 0.000000e+00 : f32
      %12 = vector.broadcast %cst_10 : f32 to vector<256x128xf32>
      %c0_11 = arith.constant 0 : index
      %c0_12 = arith.constant 0 : index
      %13 = vector.load %arg7[%c0_11, %c0_12] : memref<256x128xf32, #tpu.memory_space<vmem>>, vector<256x128xf32>
      tpu.vector_store %arg7[%c0_11, %c0_12], %12 {strides = array<i32>} : memref<256x128xf32, #tpu.memory_space<vmem>>, vector<256x128xf32>,
    } else {
    }
    %c0 = arith.constant 0 : index
    %c0_1 = arith.constant 0 : index
    %3 = vector.load %arg7[%c0, %c0_1] : memref<256x128xf32, #tpu.memory_space<vmem>>, vector<256x128xf32>
    %c0_2 = arith.constant 0 : index
    %c0_3 = arith.constant 0 : index
    %4 = vector.load %arg3[%c0_2, %c0_3] : memref<256x256xbf16, #tpu.memory_space<vmem>>, vector<256x256xbf16>
    %c0_4 = arith.constant 0 : index
    %c0_5 = arith.constant 0 : index
    %5 = vector.load %arg4[%c0_4, %c0_5] : memref<256x128xbf16, #tpu.memory_space<vmem>>, vector<256x128xbf16>
    %cst = arith.constant dense<0.000000e+00> : vector<256x128xf32>
    %6 = tpu.matmul %4, %5, %cst {dimension_numbers = #tpu.dot_dimension_numbers<[1], [0], [0], [1], [0, 0, 1, 1], [], []>} : vector<256x256xbf16>, vector<256x128xbf16>, vector<256x128xf32> -> vector<256x128xf32>
    %7 = arith.addf %3, %6 : vector<256x128xf32>
    %c0_6 = arith.constant 0 : index
    %c0_7 = arith.constant 0 : index
    %8 = vector.load %arg7[%c0_6, %c0_7] : memref<256x128xf32, #tpu.memory_space<vmem>>, vector<256x128xf32>
    tpu.vector_store %arg7[%c0_6, %c0_7], %7 {strides = array<i32>} : memref<256x128xf32, #tpu.memory_space<vmem>>, vector<256x128xf32>,
    %c0_i32_8 = arith.constant 0 : i32
    %9 = arith.cmpi eq, %arg2, %c0_i32_8 : i32
    %10 = arith.extui %9 : i1 to i32
    %c0_i32_9 = arith.constant 0 : i32
    %11 = arith.cmpi ne, %10, %c0_i32_9 : i32
    scf.if %11 {
      %c0_10 = arith.constant 0 : index
      %c0_11 = arith.constant 0 : index
      %12 = vector.load %arg7[%c0_10, %c0_11] : memref<256x128xf32, #tpu.memory_space<vmem>>, vector<256x128xf32>
      %c0_12 = arith.constant 0 : index
      %c0_13 = arith.constant 0 : index
      %13 = vector.load %arg5[%c0_12, %c0_13] : memref<1x128xf32, #tpu.memory_space<vmem>>, vector<1x128xf32>
      %14 = vector.broadcast %13 : vector<1x128xf32> to vector<256x128xf32>
      %15 = arith.addf %12, %14 : vector<256x128xf32>
      %cst_14 = arith.constant 0.000000e+00 : f32
      %16 = vector.broadcast %cst_14 : f32 to vector<256x128xf32>
      %17 = arith.maximumf %15, %16 : vector<256x128xf32>
      %18 = arith.truncf %17 : vector<256x128xf32> to vector<256x128xbf16>
      %c0_15 = arith.constant 0 : index
      %c0_16 = arith.constant 0 : index
      %19 = vector.load %arg6[%c0_15, %c0_16] : memref<256x128xbf16, #tpu.memory_space<vmem>>, vector<256x128xbf16>
      tpu.vector_store %arg6[%c0_15, %c0_16], %18 {strides = array<i32>} : memref<256x128xbf16, #tpu.memory_space<vmem>>, vector<256x128xbf16>,
    } else {
    }
    return
  }
  func.func @transform_0(%arg0: i32, %arg1: i32, %arg2: i32) -> (i32, i32) {
    %c0_i32 = arith.constant 0 : i32
    return %arg0, %arg2 : i32, i32
  }
  func.func @transform_1(%arg0: i32, %arg1: i32, %arg2: i32) -> (i32, i32) {
    %c0_i32 = arith.constant 0 : i32
    return %arg2, %arg1 : i32, i32
  }
  func.func @transform_2(%arg0: i32, %arg1: i32, %arg2: i32) -> (i32, i32) {
    %c0_i32 = arith.constant 0 : i32
    %c0_i32_0 = arith.constant 0 : i32
    return %c0_i32, %arg1 : i32, i32
  }
  func.func @transform_3(%arg0: i32, %arg1: i32, %arg2: i32) -> (i32, i32) {
    %c0_i32 = arith.constant 0 : i32
    return %arg0, %arg1 : i32, i32
  }
}

module attributes {stable_mosaic.version = 11 : i64} {
  func.func @_max9_kernel(%arg0: memref<9x32x1024xbf16, #tpu.memory_space<vmem>>, %arg1: memref<32x1024xbf16, #tpu.memory_space<vmem>>) attributes {dimension_semantics = [], scalar_prefetch = 0 : i64, scratch_operands = 0 : i64, tpu.core_type = #tpu.core_type<tc>} {
    %c0 = arith.constant 0 : index
    %c0_0 = arith.constant 0 : index
    %c0_1 = arith.constant 0 : index
    %0 = vector.load %arg0[%c0, %c0_0, %c0_1] : memref<9x32x1024xbf16, #tpu.memory_space<vmem>>, vector<9x32x1024xbf16>
    %cst = arith.constant dense<0xFF80> : vector<32x1024xbf16>
    %1 = vector.multi_reduction <maximumf>, %0, %cst [0] : vector<9x32x1024xbf16> to vector<32x1024xbf16>
    %c0_2 = arith.constant 0 : index
    %c0_3 = arith.constant 0 : index
    %2 = vector.load %arg1[%c0_2, %c0_3] : memref<32x1024xbf16, #tpu.memory_space<vmem>>, vector<32x1024xbf16>
    tpu.vector_store %arg1[%c0_2, %c0_3], %1 {strides = array<i32>} : memref<32x1024xbf16, #tpu.memory_space<vmem>>, vector<32x1024xbf16>,
    return
  }
}

module attributes {stable_mosaic.version = 11 : i64} {
  func.func @_mm_kernel(%arg0: i32, %arg1: i32, %arg2: i32, %arg3: memref<256x128xbf16, #tpu.memory_space<vmem>>, %arg4: memref<128x128xbf16, #tpu.memory_space<vmem>>, %arg5: memref<1x128xf32, #tpu.memory_space<vmem>>, %arg6: memref<256x128xbf16, #tpu.memory_space<vmem>>, %arg7: memref<256x128xf32, #tpu.memory_space<vmem>>) attributes {dimension_semantics = [#tpu.dimension_semantics<parallel>, #tpu.dimension_semantics<parallel>, #tpu.dimension_semantics<arbitrary>], iteration_bounds = array<i64: 2, 1, 5>, scalar_prefetch = 0 : i64, scratch_operands = 1 : i64, tpu.core_type = #tpu.core_type<tc>, window_params = [{transform_indices = @transform_0, window_bounds = array<i64: 256, 128>}, {transform_indices = @transform_1, window_bounds = array<i64: 128, 128>}, {transform_indices = @transform_2, window_bounds = array<i64: 1, 128>}, {transform_indices = @transform_3, window_bounds = array<i64: 256, 128>}]} {
    %c0_i32 = arith.constant 0 : i32
    %0 = arith.cmpi eq, %arg2, %c0_i32 : i32
    %1 = arith.extui %0 : i1 to i32
    %c0_i32_0 = arith.constant 0 : i32
    %2 = arith.cmpi ne, %1, %c0_i32_0 : i32
    scf.if %2 {
      %cst_9 = arith.constant 0.000000e+00 : f32
      %12 = vector.broadcast %cst_9 : f32 to vector<256x128xf32>
      %c0_10 = arith.constant 0 : index
      %c0_11 = arith.constant 0 : index
      %13 = vector.load %arg7[%c0_10, %c0_11] : memref<256x128xf32, #tpu.memory_space<vmem>>, vector<256x128xf32>
      tpu.vector_store %arg7[%c0_10, %c0_11], %12 {strides = array<i32>} : memref<256x128xf32, #tpu.memory_space<vmem>>, vector<256x128xf32>,
    } else {
    }
    %c0 = arith.constant 0 : index
    %c0_1 = arith.constant 0 : index
    %3 = vector.load %arg7[%c0, %c0_1] : memref<256x128xf32, #tpu.memory_space<vmem>>, vector<256x128xf32>
    %c0_2 = arith.constant 0 : index
    %c0_3 = arith.constant 0 : index
    %4 = vector.load %arg3[%c0_2, %c0_3] : memref<256x128xbf16, #tpu.memory_space<vmem>>, vector<256x128xbf16>
    %c0_4 = arith.constant 0 : index
    %c0_5 = arith.constant 0 : index
    %5 = vector.load %arg4[%c0_4, %c0_5] : memref<128x128xbf16, #tpu.memory_space<vmem>>, vector<128x128xbf16>
    %cst = arith.constant dense<0.000000e+00> : vector<256x128xf32>
    %6 = tpu.matmul %4, %5, %cst {dimension_numbers = #tpu.dot_dimension_numbers<[1], [0], [0], [1], [0, 0, 1, 1], [], []>} : vector<256x128xbf16>, vector<128x128xbf16>, vector<256x128xf32> -> vector<256x128xf32>
    %7 = arith.addf %3, %6 : vector<256x128xf32>
    %c0_6 = arith.constant 0 : index
    %c0_7 = arith.constant 0 : index
    %8 = vector.load %arg7[%c0_6, %c0_7] : memref<256x128xf32, #tpu.memory_space<vmem>>, vector<256x128xf32>
    tpu.vector_store %arg7[%c0_6, %c0_7], %7 {strides = array<i32>} : memref<256x128xf32, #tpu.memory_space<vmem>>, vector<256x128xf32>,
    %c4_i32 = arith.constant 4 : i32
    %9 = arith.cmpi eq, %arg2, %c4_i32 : i32
    %10 = arith.extui %9 : i1 to i32
    %c0_i32_8 = arith.constant 0 : i32
    %11 = arith.cmpi ne, %10, %c0_i32_8 : i32
    scf.if %11 {
      %c0_9 = arith.constant 0 : index
      %c0_10 = arith.constant 0 : index
      %12 = vector.load %arg7[%c0_9, %c0_10] : memref<256x128xf32, #tpu.memory_space<vmem>>, vector<256x128xf32>
      %c0_11 = arith.constant 0 : index
      %c0_12 = arith.constant 0 : index
      %13 = vector.load %arg5[%c0_11, %c0_12] : memref<1x128xf32, #tpu.memory_space<vmem>>, vector<1x128xf32>
      %14 = vector.broadcast %13 : vector<1x128xf32> to vector<256x128xf32>
      %15 = arith.addf %12, %14 : vector<256x128xf32>
      %cst_13 = arith.constant 0.000000e+00 : f32
      %16 = vector.broadcast %cst_13 : f32 to vector<256x128xf32>
      %17 = arith.maximumf %15, %16 : vector<256x128xf32>
      %18 = arith.truncf %17 : vector<256x128xf32> to vector<256x128xbf16>
      %c0_14 = arith.constant 0 : index
      %c0_15 = arith.constant 0 : index
      %19 = vector.load %arg6[%c0_14, %c0_15] : memref<256x128xbf16, #tpu.memory_space<vmem>>, vector<256x128xbf16>
      tpu.vector_store %arg6[%c0_14, %c0_15], %18 {strides = array<i32>} : memref<256x128xbf16, #tpu.memory_space<vmem>>, vector<256x128xbf16>,
    } else {
    }
    return
  }
  func.func @transform_0(%arg0: i32, %arg1: i32, %arg2: i32) -> (i32, i32) {
    %c0_i32 = arith.constant 0 : i32
    return %arg0, %arg2 : i32, i32
  }
  func.func @transform_1(%arg0: i32, %arg1: i32, %arg2: i32) -> (i32, i32) {
    %c0_i32 = arith.constant 0 : i32
    return %arg2, %arg1 : i32, i32
  }
  func.func @transform_2(%arg0: i32, %arg1: i32, %arg2: i32) -> (i32, i32) {
    %c0_i32 = arith.constant 0 : i32
    %c0_i32_0 = arith.constant 0 : i32
    return %c0_i32, %arg1 : i32, i32
  }
  func.func @transform_3(%arg0: i32, %arg1: i32, %arg2: i32) -> (i32, i32) {
    %c0_i32 = arith.constant 0 : i32
    return %arg0, %arg1 : i32, i32
  }
}

module attributes {stable_mosaic.version = 11 : i64} {
  func.func @_mm_kernel(%arg0: i32, %arg1: i32, %arg2: i32, %arg3: memref<256x128xbf16, #tpu.memory_space<vmem>>, %arg4: memref<128x128xbf16, #tpu.memory_space<vmem>>, %arg5: memref<1x128xf32, #tpu.memory_space<vmem>>, %arg6: memref<256x128xbf16, #tpu.memory_space<vmem>>, %arg7: memref<256x128xbf16, #tpu.memory_space<vmem>>, %arg8: memref<256x128xf32, #tpu.memory_space<vmem>>) attributes {dimension_semantics = [#tpu.dimension_semantics<parallel>, #tpu.dimension_semantics<parallel>, #tpu.dimension_semantics<arbitrary>], iteration_bounds = array<i64: 2, 1, 5>, scalar_prefetch = 0 : i64, scratch_operands = 1 : i64, tpu.core_type = #tpu.core_type<tc>, window_params = [{transform_indices = @transform_0, window_bounds = array<i64: 256, 128>}, {transform_indices = @transform_1, window_bounds = array<i64: 128, 128>}, {transform_indices = @transform_2, window_bounds = array<i64: 1, 128>}, {transform_indices = @transform_3, window_bounds = array<i64: 256, 128>}, {transform_indices = @transform_4, window_bounds = array<i64: 256, 128>}]} {
    %c0_i32 = arith.constant 0 : i32
    %0 = arith.cmpi eq, %arg2, %c0_i32 : i32
    %1 = arith.extui %0 : i1 to i32
    %c0_i32_0 = arith.constant 0 : i32
    %2 = arith.cmpi ne, %1, %c0_i32_0 : i32
    scf.if %2 {
      %cst_9 = arith.constant 0.000000e+00 : f32
      %12 = vector.broadcast %cst_9 : f32 to vector<256x128xf32>
      %c0_10 = arith.constant 0 : index
      %c0_11 = arith.constant 0 : index
      %13 = vector.load %arg8[%c0_10, %c0_11] : memref<256x128xf32, #tpu.memory_space<vmem>>, vector<256x128xf32>
      tpu.vector_store %arg8[%c0_10, %c0_11], %12 {strides = array<i32>} : memref<256x128xf32, #tpu.memory_space<vmem>>, vector<256x128xf32>,
    } else {
    }
    %c0 = arith.constant 0 : index
    %c0_1 = arith.constant 0 : index
    %3 = vector.load %arg8[%c0, %c0_1] : memref<256x128xf32, #tpu.memory_space<vmem>>, vector<256x128xf32>
    %c0_2 = arith.constant 0 : index
    %c0_3 = arith.constant 0 : index
    %4 = vector.load %arg3[%c0_2, %c0_3] : memref<256x128xbf16, #tpu.memory_space<vmem>>, vector<256x128xbf16>
    %c0_4 = arith.constant 0 : index
    %c0_5 = arith.constant 0 : index
    %5 = vector.load %arg4[%c0_4, %c0_5] : memref<128x128xbf16, #tpu.memory_space<vmem>>, vector<128x128xbf16>
    %cst = arith.constant dense<0.000000e+00> : vector<256x128xf32>
    %6 = tpu.matmul %4, %5, %cst {dimension_numbers = #tpu.dot_dimension_numbers<[1], [0], [0], [1], [0, 0, 1, 1], [], []>} : vector<256x128xbf16>, vector<128x128xbf16>, vector<256x128xf32> -> vector<256x128xf32>
    %7 = arith.addf %3, %6 : vector<256x128xf32>
    %c0_6 = arith.constant 0 : index
    %c0_7 = arith.constant 0 : index
    %8 = vector.load %arg8[%c0_6, %c0_7] : memref<256x128xf32, #tpu.memory_space<vmem>>, vector<256x128xf32>
    tpu.vector_store %arg8[%c0_6, %c0_7], %7 {strides = array<i32>} : memref<256x128xf32, #tpu.memory_space<vmem>>, vector<256x128xf32>,
    %c4_i32 = arith.constant 4 : i32
    %9 = arith.cmpi eq, %arg2, %c4_i32 : i32
    %10 = arith.extui %9 : i1 to i32
    %c0_i32_8 = arith.constant 0 : i32
    %11 = arith.cmpi ne, %10, %c0_i32_8 : i32
    scf.if %11 {
      %c0_9 = arith.constant 0 : index
      %c0_10 = arith.constant 0 : index
      %12 = vector.load %arg8[%c0_9, %c0_10] : memref<256x128xf32, #tpu.memory_space<vmem>>, vector<256x128xf32>
      %c0_11 = arith.constant 0 : index
      %c0_12 = arith.constant 0 : index
      %13 = vector.load %arg5[%c0_11, %c0_12] : memref<1x128xf32, #tpu.memory_space<vmem>>, vector<1x128xf32>
      %14 = vector.broadcast %13 : vector<1x128xf32> to vector<256x128xf32>
      %15 = arith.addf %12, %14 : vector<256x128xf32>
      %c0_13 = arith.constant 0 : index
      %c0_14 = arith.constant 0 : index
      %16 = vector.load %arg6[%c0_13, %c0_14] : memref<256x128xbf16, #tpu.memory_space<vmem>>, vector<256x128xbf16>
      %17 = arith.extf %16 : vector<256x128xbf16> to vector<256x128xf32>
      %18 = arith.addf %15, %17 : vector<256x128xf32>
      %cst_15 = arith.constant 0.000000e+00 : f32
      %19 = vector.broadcast %cst_15 : f32 to vector<256x128xf32>
      %20 = arith.maximumf %18, %19 : vector<256x128xf32>
      %21 = arith.truncf %20 : vector<256x128xf32> to vector<256x128xbf16>
      %c0_16 = arith.constant 0 : index
      %c0_17 = arith.constant 0 : index
      %22 = vector.load %arg7[%c0_16, %c0_17] : memref<256x128xbf16, #tpu.memory_space<vmem>>, vector<256x128xbf16>
      tpu.vector_store %arg7[%c0_16, %c0_17], %21 {strides = array<i32>} : memref<256x128xbf16, #tpu.memory_space<vmem>>, vector<256x128xbf16>,
    } else {
    }
    return
  }
  func.func @transform_0(%arg0: i32, %arg1: i32, %arg2: i32) -> (i32, i32) {
    %c0_i32 = arith.constant 0 : i32
    return %arg0, %arg2 : i32, i32
  }
  func.func @transform_1(%arg0: i32, %arg1: i32, %arg2: i32) -> (i32, i32) {
    %c0_i32 = arith.constant 0 : i32
    return %arg2, %arg1 : i32, i32
  }
  func.func @transform_2(%arg0: i32, %arg1: i32, %arg2: i32) -> (i32, i32) {
    %c0_i32 = arith.constant 0 : i32
    %c0_i32_0 = arith.constant 0 : i32
    return %c0_i32, %arg1 : i32, i32
  }
  func.func @transform_3(%arg0: i32, %arg1: i32, %arg2: i32) -> (i32, i32) {
    %c0_i32 = arith.constant 0 : i32
    return %arg0, %arg1 : i32, i32
  }
  func.func @transform_4(%arg0: i32, %arg1: i32, %arg2: i32) -> (i32, i32) {
    %c0_i32 = arith.constant 0 : i32
    return %arg0, %arg1 : i32, i32
  }
}

module attributes {stable_mosaic.version = 11 : i64} {
  func.func @_mm_kernel(%arg0: i32, %arg1: i32, %arg2: i32, %arg3: memref<128x128xbf16, #tpu.memory_space<vmem>>, %arg4: memref<128x128xbf16, #tpu.memory_space<vmem>>, %arg5: memref<1x128xf32, #tpu.memory_space<vmem>>, %arg6: memref<128x128xbf16, #tpu.memory_space<vmem>>, %arg7: memref<128x128xf32, #tpu.memory_space<vmem>>) attributes {dimension_semantics = [#tpu.dimension_semantics<parallel>, #tpu.dimension_semantics<parallel>, #tpu.dimension_semantics<arbitrary>], iteration_bounds = array<i64: 1, 1, 5>, scalar_prefetch = 0 : i64, scratch_operands = 1 : i64, tpu.core_type = #tpu.core_type<tc>, window_params = [{transform_indices = @transform_0, window_bounds = array<i64: 128, 128>}, {transform_indices = @transform_1, window_bounds = array<i64: 128, 128>}, {transform_indices = @transform_2, window_bounds = array<i64: 1, 128>}, {transform_indices = @transform_3, window_bounds = array<i64: 128, 128>}]} {
    %c0_i32 = arith.constant 0 : i32
    %0 = arith.cmpi eq, %arg2, %c0_i32 : i32
    %1 = arith.extui %0 : i1 to i32
    %c0_i32_0 = arith.constant 0 : i32
    %2 = arith.cmpi ne, %1, %c0_i32_0 : i32
    scf.if %2 {
      %cst_9 = arith.constant 0.000000e+00 : f32
      %12 = vector.broadcast %cst_9 : f32 to vector<128x128xf32>
      %c0_10 = arith.constant 0 : index
      %c0_11 = arith.constant 0 : index
      %13 = vector.load %arg7[%c0_10, %c0_11] : memref<128x128xf32, #tpu.memory_space<vmem>>, vector<128x128xf32>
      tpu.vector_store %arg7[%c0_10, %c0_11], %12 {strides = array<i32>} : memref<128x128xf32, #tpu.memory_space<vmem>>, vector<128x128xf32>,
    } else {
    }
    %c0 = arith.constant 0 : index
    %c0_1 = arith.constant 0 : index
    %3 = vector.load %arg7[%c0, %c0_1] : memref<128x128xf32, #tpu.memory_space<vmem>>, vector<128x128xf32>
    %c0_2 = arith.constant 0 : index
    %c0_3 = arith.constant 0 : index
    %4 = vector.load %arg3[%c0_2, %c0_3] : memref<128x128xbf16, #tpu.memory_space<vmem>>, vector<128x128xbf16>
    %c0_4 = arith.constant 0 : index
    %c0_5 = arith.constant 0 : index
    %5 = vector.load %arg4[%c0_4, %c0_5] : memref<128x128xbf16, #tpu.memory_space<vmem>>, vector<128x128xbf16>
    %cst = arith.constant dense<0.000000e+00> : vector<128x128xf32>
    %6 = tpu.matmul %4, %5, %cst {dimension_numbers = #tpu.dot_dimension_numbers<[1], [0], [0], [1], [0, 0, 1, 1], [], []>} : vector<128x128xbf16>, vector<128x128xbf16>, vector<128x128xf32> -> vector<128x128xf32>
    %7 = arith.addf %3, %6 : vector<128x128xf32>
    %c0_6 = arith.constant 0 : index
    %c0_7 = arith.constant 0 : index
    %8 = vector.load %arg7[%c0_6, %c0_7] : memref<128x128xf32, #tpu.memory_space<vmem>>, vector<128x128xf32>
    tpu.vector_store %arg7[%c0_6, %c0_7], %7 {strides = array<i32>} : memref<128x128xf32, #tpu.memory_space<vmem>>, vector<128x128xf32>,
    %c4_i32 = arith.constant 4 : i32
    %9 = arith.cmpi eq, %arg2, %c4_i32 : i32
    %10 = arith.extui %9 : i1 to i32
    %c0_i32_8 = arith.constant 0 : i32
    %11 = arith.cmpi ne, %10, %c0_i32_8 : i32
    scf.if %11 {
      %c0_9 = arith.constant 0 : index
      %c0_10 = arith.constant 0 : index
      %12 = vector.load %arg7[%c0_9, %c0_10] : memref<128x128xf32, #tpu.memory_space<vmem>>, vector<128x128xf32>
      %c0_11 = arith.constant 0 : index
      %c0_12 = arith.constant 0 : index
      %13 = vector.load %arg5[%c0_11, %c0_12] : memref<1x128xf32, #tpu.memory_space<vmem>>, vector<1x128xf32>
      %14 = vector.broadcast %13 : vector<1x128xf32> to vector<128x128xf32>
      %15 = arith.addf %12, %14 : vector<128x128xf32>
      %cst_13 = arith.constant 0.000000e+00 : f32
      %16 = vector.broadcast %cst_13 : f32 to vector<128x128xf32>
      %17 = arith.maximumf %15, %16 : vector<128x128xf32>
      %18 = arith.truncf %17 : vector<128x128xf32> to vector<128x128xbf16>
      %c0_14 = arith.constant 0 : index
      %c0_15 = arith.constant 0 : index
      %19 = vector.load %arg6[%c0_14, %c0_15] : memref<128x128xbf16, #tpu.memory_space<vmem>>, vector<128x128xbf16>
      tpu.vector_store %arg6[%c0_14, %c0_15], %18 {strides = array<i32>} : memref<128x128xbf16, #tpu.memory_space<vmem>>, vector<128x128xbf16>,
    } else {
    }
    return
  }
  func.func @transform_0(%arg0: i32, %arg1: i32, %arg2: i32) -> (i32, i32) {
    %c0_i32 = arith.constant 0 : i32
    return %arg0, %arg2 : i32, i32
  }
  func.func @transform_1(%arg0: i32, %arg1: i32, %arg2: i32) -> (i32, i32) {
    %c0_i32 = arith.constant 0 : i32
    return %arg2, %arg1 : i32, i32
  }
  func.func @transform_2(%arg0: i32, %arg1: i32, %arg2: i32) -> (i32, i32) {
    %c0_i32 = arith.constant 0 : i32
    %c0_i32_0 = arith.constant 0 : i32
    return %c0_i32, %arg1 : i32, i32
  }
  func.func @transform_3(%arg0: i32, %arg1: i32, %arg2: i32) -> (i32, i32) {
    %c0_i32 = arith.constant 0 : i32
    return %arg0, %arg1 : i32, i32
  }
}

module attributes {stable_mosaic.version = 11 : i64} {
  func.func @_mm_kernel(%arg0: i32, %arg1: i32, %arg2: i32, %arg3: memref<128x128xbf16, #tpu.memory_space<vmem>>, %arg4: memref<128x128xbf16, #tpu.memory_space<vmem>>, %arg5: memref<1x128xf32, #tpu.memory_space<vmem>>, %arg6: memref<128x128xbf16, #tpu.memory_space<vmem>>, %arg7: memref<128x128xf32, #tpu.memory_space<vmem>>) attributes {dimension_semantics = [#tpu.dimension_semantics<parallel>, #tpu.dimension_semantics<parallel>, #tpu.dimension_semantics<arbitrary>], iteration_bounds = array<i64: 1, 1, 1>, scalar_prefetch = 0 : i64, scratch_operands = 1 : i64, tpu.core_type = #tpu.core_type<tc>, window_params = [{transform_indices = @transform_0, window_bounds = array<i64: 128, 128>}, {transform_indices = @transform_1, window_bounds = array<i64: 128, 128>}, {transform_indices = @transform_2, window_bounds = array<i64: 1, 128>}, {transform_indices = @transform_3, window_bounds = array<i64: 128, 128>}]} {
    %c0_i32 = arith.constant 0 : i32
    %0 = arith.cmpi eq, %arg2, %c0_i32 : i32
    %1 = arith.extui %0 : i1 to i32
    %c0_i32_0 = arith.constant 0 : i32
    %2 = arith.cmpi ne, %1, %c0_i32_0 : i32
    scf.if %2 {
      %cst_10 = arith.constant 0.000000e+00 : f32
      %12 = vector.broadcast %cst_10 : f32 to vector<128x128xf32>
      %c0_11 = arith.constant 0 : index
      %c0_12 = arith.constant 0 : index
      %13 = vector.load %arg7[%c0_11, %c0_12] : memref<128x128xf32, #tpu.memory_space<vmem>>, vector<128x128xf32>
      tpu.vector_store %arg7[%c0_11, %c0_12], %12 {strides = array<i32>} : memref<128x128xf32, #tpu.memory_space<vmem>>, vector<128x128xf32>,
    } else {
    }
    %c0 = arith.constant 0 : index
    %c0_1 = arith.constant 0 : index
    %3 = vector.load %arg7[%c0, %c0_1] : memref<128x128xf32, #tpu.memory_space<vmem>>, vector<128x128xf32>
    %c0_2 = arith.constant 0 : index
    %c0_3 = arith.constant 0 : index
    %4 = vector.load %arg3[%c0_2, %c0_3] : memref<128x128xbf16, #tpu.memory_space<vmem>>, vector<128x128xbf16>
    %c0_4 = arith.constant 0 : index
    %c0_5 = arith.constant 0 : index
    %5 = vector.load %arg4[%c0_4, %c0_5] : memref<128x128xbf16, #tpu.memory_space<vmem>>, vector<128x128xbf16>
    %cst = arith.constant dense<0.000000e+00> : vector<128x128xf32>
    %6 = tpu.matmul %4, %5, %cst {dimension_numbers = #tpu.dot_dimension_numbers<[1], [0], [0], [1], [0, 0, 1, 1], [], []>} : vector<128x128xbf16>, vector<128x128xbf16>, vector<128x128xf32> -> vector<128x128xf32>
    %7 = arith.addf %3, %6 : vector<128x128xf32>
    %c0_6 = arith.constant 0 : index
    %c0_7 = arith.constant 0 : index
    %8 = vector.load %arg7[%c0_6, %c0_7] : memref<128x128xf32, #tpu.memory_space<vmem>>, vector<128x128xf32>
    tpu.vector_store %arg7[%c0_6, %c0_7], %7 {strides = array<i32>} : memref<128x128xf32, #tpu.memory_space<vmem>>, vector<128x128xf32>,
    %c0_i32_8 = arith.constant 0 : i32
    %9 = arith.cmpi eq, %arg2, %c0_i32_8 : i32
    %10 = arith.extui %9 : i1 to i32
    %c0_i32_9 = arith.constant 0 : i32
    %11 = arith.cmpi ne, %10, %c0_i32_9 : i32
    scf.if %11 {
      %c0_10 = arith.constant 0 : index
      %c0_11 = arith.constant 0 : index
      %12 = vector.load %arg7[%c0_10, %c0_11] : memref<128x128xf32, #tpu.memory_space<vmem>>, vector<128x128xf32>
      %c0_12 = arith.constant 0 : index
      %c0_13 = arith.constant 0 : index
      %13 = vector.load %arg5[%c0_12, %c0_13] : memref<1x128xf32, #tpu.memory_space<vmem>>, vector<1x128xf32>
      %14 = vector.broadcast %13 : vector<1x128xf32> to vector<128x128xf32>
      %15 = arith.addf %12, %14 : vector<128x128xf32>
      %16 = arith.truncf %15 : vector<128x128xf32> to vector<128x128xbf16>
      %c0_14 = arith.constant 0 : index
      %c0_15 = arith.constant 0 : index
      %17 = vector.load %arg6[%c0_14, %c0_15] : memref<128x128xbf16, #tpu.memory_space<vmem>>, vector<128x128xbf16>
      tpu.vector_store %arg6[%c0_14, %c0_15], %16 {strides = array<i32>} : memref<128x128xbf16, #tpu.memory_space<vmem>>, vector<128x128xbf16>,
    } else {
    }
    return
  }
  func.func @transform_0(%arg0: i32, %arg1: i32, %arg2: i32) -> (i32, i32) {
    %c0_i32 = arith.constant 0 : i32
    return %arg0, %arg2 : i32, i32
  }
  func.func @transform_1(%arg0: i32, %arg1: i32, %arg2: i32) -> (i32, i32) {
    %c0_i32 = arith.constant 0 : i32
    return %arg2, %arg1 : i32, i32
  }
  func.func @transform_2(%arg0: i32, %arg1: i32, %arg2: i32) -> (i32, i32) {
    %c0_i32 = arith.constant 0 : i32
    %c0_i32_0 = arith.constant 0 : i32
    return %c0_i32, %arg1 : i32, i32
  }
  func.func @transform_3(%arg0: i32, %arg1: i32, %arg2: i32) -> (i32, i32) {
    %c0_i32 = arith.constant 0 : i32
    return %arg0, %arg1 : i32, i32
  }
}

module attributes {stable_mosaic.version = 11 : i64} {
  func.func @_mm_kernel(%arg0: i32, %arg1: i32, %arg2: i32, %arg3: memref<128x384xbf16, #tpu.memory_space<vmem>>, %arg4: memref<384x128xbf16, #tpu.memory_space<vmem>>, %arg5: memref<1x128xf32, #tpu.memory_space<vmem>>, %arg6: memref<128x128xbf16, #tpu.memory_space<vmem>>, %arg7: memref<128x128xbf16, #tpu.memory_space<vmem>>, %arg8: memref<128x128xf32, #tpu.memory_space<vmem>>) attributes {dimension_semantics = [#tpu.dimension_semantics<parallel>, #tpu.dimension_semantics<parallel>, #tpu.dimension_semantics<arbitrary>], iteration_bounds = array<i64: 1, 1, 3>, scalar_prefetch = 0 : i64, scratch_operands = 1 : i64, tpu.core_type = #tpu.core_type<tc>, window_params = [{transform_indices = @transform_0, window_bounds = array<i64: 128, 384>}, {transform_indices = @transform_1, window_bounds = array<i64: 384, 128>}, {transform_indices = @transform_2, window_bounds = array<i64: 1, 128>}, {transform_indices = @transform_3, window_bounds = array<i64: 128, 128>}, {transform_indices = @transform_4, window_bounds = array<i64: 128, 128>}]} {
    %c0_i32 = arith.constant 0 : i32
    %0 = arith.cmpi eq, %arg2, %c0_i32 : i32
    %1 = arith.extui %0 : i1 to i32
    %c0_i32_0 = arith.constant 0 : i32
    %2 = arith.cmpi ne, %1, %c0_i32_0 : i32
    scf.if %2 {
      %cst_9 = arith.constant 0.000000e+00 : f32
      %12 = vector.broadcast %cst_9 : f32 to vector<128x128xf32>
      %c0_10 = arith.constant 0 : index
      %c0_11 = arith.constant 0 : index
      %13 = vector.load %arg8[%c0_10, %c0_11] : memref<128x128xf32, #tpu.memory_space<vmem>>, vector<128x128xf32>
      tpu.vector_store %arg8[%c0_10, %c0_11], %12 {strides = array<i32>} : memref<128x128xf32, #tpu.memory_space<vmem>>, vector<128x128xf32>,
    } else {
    }
    %c0 = arith.constant 0 : index
    %c0_1 = arith.constant 0 : index
    %3 = vector.load %arg8[%c0, %c0_1] : memref<128x128xf32, #tpu.memory_space<vmem>>, vector<128x128xf32>
    %c0_2 = arith.constant 0 : index
    %c0_3 = arith.constant 0 : index
    %4 = vector.load %arg3[%c0_2, %c0_3] : memref<128x384xbf16, #tpu.memory_space<vmem>>, vector<128x384xbf16>
    %c0_4 = arith.constant 0 : index
    %c0_5 = arith.constant 0 : index
    %5 = vector.load %arg4[%c0_4, %c0_5] : memref<384x128xbf16, #tpu.memory_space<vmem>>, vector<384x128xbf16>
    %cst = arith.constant dense<0.000000e+00> : vector<128x128xf32>
    %6 = tpu.matmul %4, %5, %cst {dimension_numbers = #tpu.dot_dimension_numbers<[1], [0], [0], [1], [0, 0, 1, 1], [], []>} : vector<128x384xbf16>, vector<384x128xbf16>, vector<128x128xf32> -> vector<128x128xf32>
    %7 = arith.addf %3, %6 : vector<128x128xf32>
    %c0_6 = arith.constant 0 : index
    %c0_7 = arith.constant 0 : index
    %8 = vector.load %arg8[%c0_6, %c0_7] : memref<128x128xf32, #tpu.memory_space<vmem>>, vector<128x128xf32>
    tpu.vector_store %arg8[%c0_6, %c0_7], %7 {strides = array<i32>} : memref<128x128xf32, #tpu.memory_space<vmem>>, vector<128x128xf32>,
    %c2_i32 = arith.constant 2 : i32
    %9 = arith.cmpi eq, %arg2, %c2_i32 : i32
    %10 = arith.extui %9 : i1 to i32
    %c0_i32_8 = arith.constant 0 : i32
    %11 = arith.cmpi ne, %10, %c0_i32_8 : i32
    scf.if %11 {
      %c0_9 = arith.constant 0 : index
      %c0_10 = arith.constant 0 : index
      %12 = vector.load %arg8[%c0_9, %c0_10] : memref<128x128xf32, #tpu.memory_space<vmem>>, vector<128x128xf32>
      %c0_11 = arith.constant 0 : index
      %c0_12 = arith.constant 0 : index
      %13 = vector.load %arg5[%c0_11, %c0_12] : memref<1x128xf32, #tpu.memory_space<vmem>>, vector<1x128xf32>
      %14 = vector.broadcast %13 : vector<1x128xf32> to vector<128x128xf32>
      %15 = arith.addf %12, %14 : vector<128x128xf32>
      %c0_13 = arith.constant 0 : index
      %c0_14 = arith.constant 0 : index
      %16 = vector.load %arg6[%c0_13, %c0_14] : memref<128x128xbf16, #tpu.memory_space<vmem>>, vector<128x128xbf16>
      %17 = arith.extf %16 : vector<128x128xbf16> to vector<128x128xf32>
      %18 = arith.addf %15, %17 : vector<128x128xf32>
      %cst_15 = arith.constant 0.000000e+00 : f32
      %19 = vector.broadcast %cst_15 : f32 to vector<128x128xf32>
      %20 = arith.maximumf %18, %19 : vector<128x128xf32>
      %21 = arith.truncf %20 : vector<128x128xf32> to vector<128x128xbf16>
      %c0_16 = arith.constant 0 : index
      %c0_17 = arith.constant 0 : index
      %22 = vector.load %arg7[%c0_16, %c0_17] : memref<128x128xbf16, #tpu.memory_space<vmem>>, vector<128x128xbf16>
      tpu.vector_store %arg7[%c0_16, %c0_17], %21 {strides = array<i32>} : memref<128x128xbf16, #tpu.memory_space<vmem>>, vector<128x128xbf16>,
    } else {
    }
    return
  }
  func.func @transform_0(%arg0: i32, %arg1: i32, %arg2: i32) -> (i32, i32) {
    %c0_i32 = arith.constant 0 : i32
    return %arg0, %arg2 : i32, i32
  }
  func.func @transform_1(%arg0: i32, %arg1: i32, %arg2: i32) -> (i32, i32) {
    %c0_i32 = arith.constant 0 : i32
    return %arg2, %arg1 : i32, i32
  }
  func.func @transform_2(%arg0: i32, %arg1: i32, %arg2: i32) -> (i32, i32) {
    %c0_i32 = arith.constant 0 : i32
    %c0_i32_0 = arith.constant 0 : i32
    return %c0_i32, %arg1 : i32, i32
  }
  func.func @transform_3(%arg0: i32, %arg1: i32, %arg2: i32) -> (i32, i32) {
    %c0_i32 = arith.constant 0 : i32
    return %arg0, %arg1 : i32, i32
  }
  func.func @transform_4(%arg0: i32, %arg1: i32, %arg2: i32) -> (i32, i32) {
    %c0_i32 = arith.constant 0 : i32
    return %arg0, %arg1 : i32, i32
  }
}

module attributes {stable_mosaic.version = 11 : i64} {
  func.func @_mm_kernel(%arg0: i32, %arg1: i32, %arg2: i32, %arg3: memref<128x384xbf16, #tpu.memory_space<vmem>>, %arg4: memref<384x128xbf16, #tpu.memory_space<vmem>>, %arg5: memref<1x128xf32, #tpu.memory_space<vmem>>, %arg6: memref<128x128xbf16, #tpu.memory_space<vmem>>, %arg7: memref<128x128xf32, #tpu.memory_space<vmem>>) attributes {dimension_semantics = [#tpu.dimension_semantics<parallel>, #tpu.dimension_semantics<parallel>, #tpu.dimension_semantics<arbitrary>], iteration_bounds = array<i64: 1, 1, 3>, scalar_prefetch = 0 : i64, scratch_operands = 1 : i64, tpu.core_type = #tpu.core_type<tc>, window_params = [{transform_indices = @transform_0, window_bounds = array<i64: 128, 384>}, {transform_indices = @transform_1, window_bounds = array<i64: 384, 128>}, {transform_indices = @transform_2, window_bounds = array<i64: 1, 128>}, {transform_indices = @transform_3, window_bounds = array<i64: 128, 128>}]} {
    %c0_i32 = arith.constant 0 : i32
    %0 = arith.cmpi eq, %arg2, %c0_i32 : i32
    %1 = arith.extui %0 : i1 to i32
    %c0_i32_0 = arith.constant 0 : i32
    %2 = arith.cmpi ne, %1, %c0_i32_0 : i32
    scf.if %2 {
      %cst_9 = arith.constant 0.000000e+00 : f32
      %12 = vector.broadcast %cst_9 : f32 to vector<128x128xf32>
      %c0_10 = arith.constant 0 : index
      %c0_11 = arith.constant 0 : index
      %13 = vector.load %arg7[%c0_10, %c0_11] : memref<128x128xf32, #tpu.memory_space<vmem>>, vector<128x128xf32>
      tpu.vector_store %arg7[%c0_10, %c0_11], %12 {strides = array<i32>} : memref<128x128xf32, #tpu.memory_space<vmem>>, vector<128x128xf32>,
    } else {
    }
    %c0 = arith.constant 0 : index
    %c0_1 = arith.constant 0 : index
    %3 = vector.load %arg7[%c0, %c0_1] : memref<128x128xf32, #tpu.memory_space<vmem>>, vector<128x128xf32>
    %c0_2 = arith.constant 0 : index
    %c0_3 = arith.constant 0 : index
    %4 = vector.load %arg3[%c0_2, %c0_3] : memref<128x384xbf16, #tpu.memory_space<vmem>>, vector<128x384xbf16>
    %c0_4 = arith.constant 0 : index
    %c0_5 = arith.constant 0 : index
    %5 = vector.load %arg4[%c0_4, %c0_5] : memref<384x128xbf16, #tpu.memory_space<vmem>>, vector<384x128xbf16>
    %cst = arith.constant dense<0.000000e+00> : vector<128x128xf32>
    %6 = tpu.matmul %4, %5, %cst {dimension_numbers = #tpu.dot_dimension_numbers<[1], [0], [0], [1], [0, 0, 1, 1], [], []>} : vector<128x384xbf16>, vector<384x128xbf16>, vector<128x128xf32> -> vector<128x128xf32>
    %7 = arith.addf %3, %6 : vector<128x128xf32>
    %c0_6 = arith.constant 0 : index
    %c0_7 = arith.constant 0 : index
    %8 = vector.load %arg7[%c0_6, %c0_7] : memref<128x128xf32, #tpu.memory_space<vmem>>, vector<128x128xf32>
    tpu.vector_store %arg7[%c0_6, %c0_7], %7 {strides = array<i32>} : memref<128x128xf32, #tpu.memory_space<vmem>>, vector<128x128xf32>,
    %c2_i32 = arith.constant 2 : i32
    %9 = arith.cmpi eq, %arg2, %c2_i32 : i32
    %10 = arith.extui %9 : i1 to i32
    %c0_i32_8 = arith.constant 0 : i32
    %11 = arith.cmpi ne, %10, %c0_i32_8 : i32
    scf.if %11 {
      %c0_9 = arith.constant 0 : index
      %c0_10 = arith.constant 0 : index
      %12 = vector.load %arg7[%c0_9, %c0_10] : memref<128x128xf32, #tpu.memory_space<vmem>>, vector<128x128xf32>
      %c0_11 = arith.constant 0 : index
      %c0_12 = arith.constant 0 : index
      %13 = vector.load %arg5[%c0_11, %c0_12] : memref<1x128xf32, #tpu.memory_space<vmem>>, vector<1x128xf32>
      %14 = vector.broadcast %13 : vector<1x128xf32> to vector<128x128xf32>
      %15 = arith.addf %12, %14 : vector<128x128xf32>
      %cst_13 = arith.constant 0.000000e+00 : f32
      %16 = vector.broadcast %cst_13 : f32 to vector<128x128xf32>
      %17 = arith.maximumf %15, %16 : vector<128x128xf32>
      %18 = arith.truncf %17 : vector<128x128xf32> to vector<128x128xbf16>
      %c0_14 = arith.constant 0 : index
      %c0_15 = arith.constant 0 : index
      %19 = vector.load %arg6[%c0_14, %c0_15] : memref<128x128xbf16, #tpu.memory_space<vmem>>, vector<128x128xbf16>
      tpu.vector_store %arg6[%c0_14, %c0_15], %18 {strides = array<i32>} : memref<128x128xbf16, #tpu.memory_space<vmem>>, vector<128x128xbf16>,
    } else {
    }
    return
  }
  func.func @transform_0(%arg0: i32, %arg1: i32, %arg2: i32) -> (i32, i32) {
    %c0_i32 = arith.constant 0 : i32
    return %arg0, %arg2 : i32, i32
  }
  func.func @transform_1(%arg0: i32, %arg1: i32, %arg2: i32) -> (i32, i32) {
    %c0_i32 = arith.constant 0 : i32
    return %arg2, %arg1 : i32, i32
  }
  func.func @transform_2(%arg0: i32, %arg1: i32, %arg2: i32) -> (i32, i32) {
    %c0_i32 = arith.constant 0 : i32
    %c0_i32_0 = arith.constant 0 : i32
    return %c0_i32, %arg1 : i32, i32
  }
  func.func @transform_3(%arg0: i32, %arg1: i32, %arg2: i32) -> (i32, i32) {
    %c0_i32 = arith.constant 0 : i32
    return %arg0, %arg1 : i32, i32
  }
}

module attributes {stable_mosaic.version = 11 : i64} {
  func.func @_mm_kernel(%arg0: i32, %arg1: i32, %arg2: i32, %arg3: memref<32x384xbf16, #tpu.memory_space<vmem>>, %arg4: memref<384x256xbf16, #tpu.memory_space<vmem>>, %arg5: memref<1x256xf32, #tpu.memory_space<vmem>>, %arg6: memref<32x256xbf16, #tpu.memory_space<vmem>>, %arg7: memref<32x256xf32, #tpu.memory_space<vmem>>) attributes {dimension_semantics = [#tpu.dimension_semantics<parallel>, #tpu.dimension_semantics<parallel>, #tpu.dimension_semantics<arbitrary>], iteration_bounds = array<i64: 1, 1, 3>, scalar_prefetch = 0 : i64, scratch_operands = 1 : i64, tpu.core_type = #tpu.core_type<tc>, window_params = [{transform_indices = @transform_0, window_bounds = array<i64: 32, 384>}, {transform_indices = @transform_1, window_bounds = array<i64: 384, 256>}, {transform_indices = @transform_2, window_bounds = array<i64: 1, 256>}, {transform_indices = @transform_3, window_bounds = array<i64: 32, 256>}]} {
    %c0_i32 = arith.constant 0 : i32
    %0 = arith.cmpi eq, %arg2, %c0_i32 : i32
    %1 = arith.extui %0 : i1 to i32
    %c0_i32_0 = arith.constant 0 : i32
    %2 = arith.cmpi ne, %1, %c0_i32_0 : i32
    scf.if %2 {
      %cst_9 = arith.constant 0.000000e+00 : f32
      %12 = vector.broadcast %cst_9 : f32 to vector<32x256xf32>
      %c0_10 = arith.constant 0 : index
      %c0_11 = arith.constant 0 : index
      %13 = vector.load %arg7[%c0_10, %c0_11] : memref<32x256xf32, #tpu.memory_space<vmem>>, vector<32x256xf32>
      tpu.vector_store %arg7[%c0_10, %c0_11], %12 {strides = array<i32>} : memref<32x256xf32, #tpu.memory_space<vmem>>, vector<32x256xf32>,
    } else {
    }
    %c0 = arith.constant 0 : index
    %c0_1 = arith.constant 0 : index
    %3 = vector.load %arg7[%c0, %c0_1] : memref<32x256xf32, #tpu.memory_space<vmem>>, vector<32x256xf32>
    %c0_2 = arith.constant 0 : index
    %c0_3 = arith.constant 0 : index
    %4 = vector.load %arg3[%c0_2, %c0_3] : memref<32x384xbf16, #tpu.memory_space<vmem>>, vector<32x384xbf16>
    %c0_4 = arith.constant 0 : index
    %c0_5 = arith.constant 0 : index
    %5 = vector.load %arg4[%c0_4, %c0_5] : memref<384x256xbf16, #tpu.memory_space<vmem>>, vector<384x256xbf16>
    %cst = arith.constant dense<0.000000e+00> : vector<32x256xf32>
    %6 = tpu.matmul %4, %5, %cst {dimension_numbers = #tpu.dot_dimension_numbers<[1], [0], [0], [1], [0, 0, 1, 1], [], []>} : vector<32x384xbf16>, vector<384x256xbf16>, vector<32x256xf32> -> vector<32x256xf32>
    %7 = arith.addf %3, %6 : vector<32x256xf32>
    %c0_6 = arith.constant 0 : index
    %c0_7 = arith.constant 0 : index
    %8 = vector.load %arg7[%c0_6, %c0_7] : memref<32x256xf32, #tpu.memory_space<vmem>>, vector<32x256xf32>
    tpu.vector_store %arg7[%c0_6, %c0_7], %7 {strides = array<i32>} : memref<32x256xf32, #tpu.memory_space<vmem>>, vector<32x256xf32>,
    %c2_i32 = arith.constant 2 : i32
    %9 = arith.cmpi eq, %arg2, %c2_i32 : i32
    %10 = arith.extui %9 : i1 to i32
    %c0_i32_8 = arith.constant 0 : i32
    %11 = arith.cmpi ne, %10, %c0_i32_8 : i32
    scf.if %11 {
      %c0_9 = arith.constant 0 : index
      %c0_10 = arith.constant 0 : index
      %12 = vector.load %arg7[%c0_9, %c0_10] : memref<32x256xf32, #tpu.memory_space<vmem>>, vector<32x256xf32>
      %c0_11 = arith.constant 0 : index
      %c0_12 = arith.constant 0 : index
      %13 = vector.load %arg5[%c0_11, %c0_12] : memref<1x256xf32, #tpu.memory_space<vmem>>, vector<1x256xf32>
      %14 = vector.broadcast %13 : vector<1x256xf32> to vector<32x256xf32>
      %15 = arith.addf %12, %14 : vector<32x256xf32>
      %cst_13 = arith.constant 0.000000e+00 : f32
      %16 = vector.broadcast %cst_13 : f32 to vector<32x256xf32>
      %17 = arith.maximumf %15, %16 : vector<32x256xf32>
      %18 = arith.truncf %17 : vector<32x256xf32> to vector<32x256xbf16>
      %c0_14 = arith.constant 0 : index
      %c0_15 = arith.constant 0 : index
      %19 = vector.load %arg6[%c0_14, %c0_15] : memref<32x256xbf16, #tpu.memory_space<vmem>>, vector<32x256xbf16>
      tpu.vector_store %arg6[%c0_14, %c0_15], %18 {strides = array<i32>} : memref<32x256xbf16, #tpu.memory_space<vmem>>, vector<32x256xbf16>,
    } else {
    }
    return
  }
  func.func @transform_0(%arg0: i32, %arg1: i32, %arg2: i32) -> (i32, i32) {
    %c0_i32 = arith.constant 0 : i32
    return %arg0, %arg2 : i32, i32
  }
  func.func @transform_1(%arg0: i32, %arg1: i32, %arg2: i32) -> (i32, i32) {
    %c0_i32 = arith.constant 0 : i32
    return %arg2, %arg1 : i32, i32
  }
  func.func @transform_2(%arg0: i32, %arg1: i32, %arg2: i32) -> (i32, i32) {
    %c0_i32 = arith.constant 0 : i32
    %c0_i32_0 = arith.constant 0 : i32
    return %c0_i32, %arg1 : i32, i32
  }
  func.func @transform_3(%arg0: i32, %arg1: i32, %arg2: i32) -> (i32, i32) {
    %c0_i32 = arith.constant 0 : i32
    return %arg0, %arg1 : i32, i32
  }
}

module attributes {stable_mosaic.version = 11 : i64} {
  func.func @_mm_kernel(%arg0: i32, %arg1: i32, %arg2: i32, %arg3: memref<32x128xbf16, #tpu.memory_space<vmem>>, %arg4: memref<128x256xbf16, #tpu.memory_space<vmem>>, %arg5: memref<1x256xf32, #tpu.memory_space<vmem>>, %arg6: memref<32x256xbf16, #tpu.memory_space<vmem>>, %arg7: memref<32x256xf32, #tpu.memory_space<vmem>>) attributes {dimension_semantics = [#tpu.dimension_semantics<parallel>, #tpu.dimension_semantics<parallel>, #tpu.dimension_semantics<arbitrary>], iteration_bounds = array<i64: 1, 1, 1>, scalar_prefetch = 0 : i64, scratch_operands = 1 : i64, tpu.core_type = #tpu.core_type<tc>, window_params = [{transform_indices = @transform_0, window_bounds = array<i64: 32, 128>}, {transform_indices = @transform_1, window_bounds = array<i64: 128, 256>}, {transform_indices = @transform_2, window_bounds = array<i64: 1, 256>}, {transform_indices = @transform_3, window_bounds = array<i64: 32, 256>}]} {
    %c0_i32 = arith.constant 0 : i32
    %0 = arith.cmpi eq, %arg2, %c0_i32 : i32
    %1 = arith.extui %0 : i1 to i32
    %c0_i32_0 = arith.constant 0 : i32
    %2 = arith.cmpi ne, %1, %c0_i32_0 : i32
    scf.if %2 {
      %cst_10 = arith.constant 0.000000e+00 : f32
      %12 = vector.broadcast %cst_10 : f32 to vector<32x256xf32>
      %c0_11 = arith.constant 0 : index
      %c0_12 = arith.constant 0 : index
      %13 = vector.load %arg7[%c0_11, %c0_12] : memref<32x256xf32, #tpu.memory_space<vmem>>, vector<32x256xf32>
      tpu.vector_store %arg7[%c0_11, %c0_12], %12 {strides = array<i32>} : memref<32x256xf32, #tpu.memory_space<vmem>>, vector<32x256xf32>,
    } else {
    }
    %c0 = arith.constant 0 : index
    %c0_1 = arith.constant 0 : index
    %3 = vector.load %arg7[%c0, %c0_1] : memref<32x256xf32, #tpu.memory_space<vmem>>, vector<32x256xf32>
    %c0_2 = arith.constant 0 : index
    %c0_3 = arith.constant 0 : index
    %4 = vector.load %arg3[%c0_2, %c0_3] : memref<32x128xbf16, #tpu.memory_space<vmem>>, vector<32x128xbf16>
    %c0_4 = arith.constant 0 : index
    %c0_5 = arith.constant 0 : index
    %5 = vector.load %arg4[%c0_4, %c0_5] : memref<128x256xbf16, #tpu.memory_space<vmem>>, vector<128x256xbf16>
    %cst = arith.constant dense<0.000000e+00> : vector<32x256xf32>
    %6 = tpu.matmul %4, %5, %cst {dimension_numbers = #tpu.dot_dimension_numbers<[1], [0], [0], [1], [0, 0, 1, 1], [], []>} : vector<32x128xbf16>, vector<128x256xbf16>, vector<32x256xf32> -> vector<32x256xf32>
    %7 = arith.addf %3, %6 : vector<32x256xf32>
    %c0_6 = arith.constant 0 : index
    %c0_7 = arith.constant 0 : index
    %8 = vector.load %arg7[%c0_6, %c0_7] : memref<32x256xf32, #tpu.memory_space<vmem>>, vector<32x256xf32>
    tpu.vector_store %arg7[%c0_6, %c0_7], %7 {strides = array<i32>} : memref<32x256xf32, #tpu.memory_space<vmem>>, vector<32x256xf32>,
    %c0_i32_8 = arith.constant 0 : i32
    %9 = arith.cmpi eq, %arg2, %c0_i32_8 : i32
    %10 = arith.extui %9 : i1 to i32
    %c0_i32_9 = arith.constant 0 : i32
    %11 = arith.cmpi ne, %10, %c0_i32_9 : i32
    scf.if %11 {
      %c0_10 = arith.constant 0 : index
      %c0_11 = arith.constant 0 : index
      %12 = vector.load %arg7[%c0_10, %c0_11] : memref<32x256xf32, #tpu.memory_space<vmem>>, vector<32x256xf32>
      %c0_12 = arith.constant 0 : index
      %c0_13 = arith.constant 0 : index
      %13 = vector.load %arg5[%c0_12, %c0_13] : memref<1x256xf32, #tpu.memory_space<vmem>>, vector<1x256xf32>
      %14 = vector.broadcast %13 : vector<1x256xf32> to vector<32x256xf32>
      %15 = arith.addf %12, %14 : vector<32x256xf32>
      %16 = arith.truncf %15 : vector<32x256xf32> to vector<32x256xbf16>
      %c0_14 = arith.constant 0 : index
      %c0_15 = arith.constant 0 : index
      %17 = vector.load %arg6[%c0_14, %c0_15] : memref<32x256xbf16, #tpu.memory_space<vmem>>, vector<32x256xbf16>
      tpu.vector_store %arg6[%c0_14, %c0_15], %16 {strides = array<i32>} : memref<32x256xbf16, #tpu.memory_space<vmem>>, vector<32x256xbf16>,
    } else {
    }
    return
  }
  func.func @transform_0(%arg0: i32, %arg1: i32, %arg2: i32) -> (i32, i32) {
    %c0_i32 = arith.constant 0 : i32
    return %arg0, %arg2 : i32, i32
  }
  func.func @transform_1(%arg0: i32, %arg1: i32, %arg2: i32) -> (i32, i32) {
    %c0_i32 = arith.constant 0 : i32
    return %arg2, %arg1 : i32, i32
  }
  func.func @transform_2(%arg0: i32, %arg1: i32, %arg2: i32) -> (i32, i32) {
    %c0_i32 = arith.constant 0 : i32
    %c0_i32_0 = arith.constant 0 : i32
    return %c0_i32, %arg1 : i32, i32
  }
  func.func @transform_3(%arg0: i32, %arg1: i32, %arg2: i32) -> (i32, i32) {
    %c0_i32 = arith.constant 0 : i32
    return %arg0, %arg1 : i32, i32
  }
}

module attributes {stable_mosaic.version = 11 : i64} {
  func.func @_mm_kernel(%arg0: i32, %arg1: i32, %arg2: i32, %arg3: memref<32x384xbf16, #tpu.memory_space<vmem>>, %arg4: memref<384x256xbf16, #tpu.memory_space<vmem>>, %arg5: memref<1x256xf32, #tpu.memory_space<vmem>>, %arg6: memref<32x256xbf16, #tpu.memory_space<vmem>>, %arg7: memref<32x256xbf16, #tpu.memory_space<vmem>>, %arg8: memref<32x256xf32, #tpu.memory_space<vmem>>) attributes {dimension_semantics = [#tpu.dimension_semantics<parallel>, #tpu.dimension_semantics<parallel>, #tpu.dimension_semantics<arbitrary>], iteration_bounds = array<i64: 1, 1, 6>, scalar_prefetch = 0 : i64, scratch_operands = 1 : i64, tpu.core_type = #tpu.core_type<tc>, window_params = [{transform_indices = @transform_0, window_bounds = array<i64: 32, 384>}, {transform_indices = @transform_1, window_bounds = array<i64: 384, 256>}, {transform_indices = @transform_2, window_bounds = array<i64: 1, 256>}, {transform_indices = @transform_3, window_bounds = array<i64: 32, 256>}, {transform_indices = @transform_4, window_bounds = array<i64: 32, 256>}]} {
    %c0_i32 = arith.constant 0 : i32
    %0 = arith.cmpi eq, %arg2, %c0_i32 : i32
    %1 = arith.extui %0 : i1 to i32
    %c0_i32_0 = arith.constant 0 : i32
    %2 = arith.cmpi ne, %1, %c0_i32_0 : i32
    scf.if %2 {
      %cst_9 = arith.constant 0.000000e+00 : f32
      %12 = vector.broadcast %cst_9 : f32 to vector<32x256xf32>
      %c0_10 = arith.constant 0 : index
      %c0_11 = arith.constant 0 : index
      %13 = vector.load %arg8[%c0_10, %c0_11] : memref<32x256xf32, #tpu.memory_space<vmem>>, vector<32x256xf32>
      tpu.vector_store %arg8[%c0_10, %c0_11], %12 {strides = array<i32>} : memref<32x256xf32, #tpu.memory_space<vmem>>, vector<32x256xf32>,
    } else {
    }
    %c0 = arith.constant 0 : index
    %c0_1 = arith.constant 0 : index
    %3 = vector.load %arg8[%c0, %c0_1] : memref<32x256xf32, #tpu.memory_space<vmem>>, vector<32x256xf32>
    %c0_2 = arith.constant 0 : index
    %c0_3 = arith.constant 0 : index
    %4 = vector.load %arg3[%c0_2, %c0_3] : memref<32x384xbf16, #tpu.memory_space<vmem>>, vector<32x384xbf16>
    %c0_4 = arith.constant 0 : index
    %c0_5 = arith.constant 0 : index
    %5 = vector.load %arg4[%c0_4, %c0_5] : memref<384x256xbf16, #tpu.memory_space<vmem>>, vector<384x256xbf16>
    %cst = arith.constant dense<0.000000e+00> : vector<32x256xf32>
    %6 = tpu.matmul %4, %5, %cst {dimension_numbers = #tpu.dot_dimension_numbers<[1], [0], [0], [1], [0, 0, 1, 1], [], []>} : vector<32x384xbf16>, vector<384x256xbf16>, vector<32x256xf32> -> vector<32x256xf32>
    %7 = arith.addf %3, %6 : vector<32x256xf32>
    %c0_6 = arith.constant 0 : index
    %c0_7 = arith.constant 0 : index
    %8 = vector.load %arg8[%c0_6, %c0_7] : memref<32x256xf32, #tpu.memory_space<vmem>>, vector<32x256xf32>
    tpu.vector_store %arg8[%c0_6, %c0_7], %7 {strides = array<i32>} : memref<32x256xf32, #tpu.memory_space<vmem>>, vector<32x256xf32>,
    %c5_i32 = arith.constant 5 : i32
    %9 = arith.cmpi eq, %arg2, %c5_i32 : i32
    %10 = arith.extui %9 : i1 to i32
    %c0_i32_8 = arith.constant 0 : i32
    %11 = arith.cmpi ne, %10, %c0_i32_8 : i32
    scf.if %11 {
      %c0_9 = arith.constant 0 : index
      %c0_10 = arith.constant 0 : index
      %12 = vector.load %arg8[%c0_9, %c0_10] : memref<32x256xf32, #tpu.memory_space<vmem>>, vector<32x256xf32>
      %c0_11 = arith.constant 0 : index
      %c0_12 = arith.constant 0 : index
      %13 = vector.load %arg5[%c0_11, %c0_12] : memref<1x256xf32, #tpu.memory_space<vmem>>, vector<1x256xf32>
      %14 = vector.broadcast %13 : vector<1x256xf32> to vector<32x256xf32>
      %15 = arith.addf %12, %14 : vector<32x256xf32>
      %c0_13 = arith.constant 0 : index
      %c0_14 = arith.constant 0 : index
      %16 = vector.load %arg6[%c0_13, %c0_14] : memref<32x256xbf16, #tpu.memory_space<vmem>>, vector<32x256xbf16>
      %17 = arith.extf %16 : vector<32x256xbf16> to vector<32x256xf32>
      %18 = arith.addf %15, %17 : vector<32x256xf32>
      %cst_15 = arith.constant 0.000000e+00 : f32
      %19 = vector.broadcast %cst_15 : f32 to vector<32x256xf32>
      %20 = arith.maximumf %18, %19 : vector<32x256xf32>
      %21 = arith.truncf %20 : vector<32x256xf32> to vector<32x256xbf16>
      %c0_16 = arith.constant 0 : index
      %c0_17 = arith.constant 0 : index
      %22 = vector.load %arg7[%c0_16, %c0_17] : memref<32x256xbf16, #tpu.memory_space<vmem>>, vector<32x256xbf16>
      tpu.vector_store %arg7[%c0_16, %c0_17], %21 {strides = array<i32>} : memref<32x256xbf16, #tpu.memory_space<vmem>>, vector<32x256xbf16>,
    } else {
    }
    return
  }
  func.func @transform_0(%arg0: i32, %arg1: i32, %arg2: i32) -> (i32, i32) {
    %c0_i32 = arith.constant 0 : i32
    return %arg0, %arg2 : i32, i32
  }
  func.func @transform_1(%arg0: i32, %arg1: i32, %arg2: i32) -> (i32, i32) {
    %c0_i32 = arith.constant 0 : i32
    return %arg2, %arg1 : i32, i32
  }
  func.func @transform_2(%arg0: i32, %arg1: i32, %arg2: i32) -> (i32, i32) {
    %c0_i32 = arith.constant 0 : i32
    %c0_i32_0 = arith.constant 0 : i32
    return %c0_i32, %arg1 : i32, i32
  }
  func.func @transform_3(%arg0: i32, %arg1: i32, %arg2: i32) -> (i32, i32) {
    %c0_i32 = arith.constant 0 : i32
    return %arg0, %arg1 : i32, i32
  }
  func.func @transform_4(%arg0: i32, %arg1: i32, %arg2: i32) -> (i32, i32) {
    %c0_i32 = arith.constant 0 : i32
    return %arg0, %arg1 : i32, i32
  }
}

module attributes {stable_mosaic.version = 11 : i64} {
  func.func @_mm_kernel(%arg0: i32, %arg1: i32, %arg2: i32, %arg3: memref<32x384xbf16, #tpu.memory_space<vmem>>, %arg4: memref<384x256xbf16, #tpu.memory_space<vmem>>, %arg5: memref<1x256xf32, #tpu.memory_space<vmem>>, %arg6: memref<32x256xbf16, #tpu.memory_space<vmem>>, %arg7: memref<32x256xf32, #tpu.memory_space<vmem>>) attributes {dimension_semantics = [#tpu.dimension_semantics<parallel>, #tpu.dimension_semantics<parallel>, #tpu.dimension_semantics<arbitrary>], iteration_bounds = array<i64: 1, 1, 6>, scalar_prefetch = 0 : i64, scratch_operands = 1 : i64, tpu.core_type = #tpu.core_type<tc>, window_params = [{transform_indices = @transform_0, window_bounds = array<i64: 32, 384>}, {transform_indices = @transform_1, window_bounds = array<i64: 384, 256>}, {transform_indices = @transform_2, window_bounds = array<i64: 1, 256>}, {transform_indices = @transform_3, window_bounds = array<i64: 32, 256>}]} {
    %c0_i32 = arith.constant 0 : i32
    %0 = arith.cmpi eq, %arg2, %c0_i32 : i32
    %1 = arith.extui %0 : i1 to i32
    %c0_i32_0 = arith.constant 0 : i32
    %2 = arith.cmpi ne, %1, %c0_i32_0 : i32
    scf.if %2 {
      %cst_9 = arith.constant 0.000000e+00 : f32
      %12 = vector.broadcast %cst_9 : f32 to vector<32x256xf32>
      %c0_10 = arith.constant 0 : index
      %c0_11 = arith.constant 0 : index
      %13 = vector.load %arg7[%c0_10, %c0_11] : memref<32x256xf32, #tpu.memory_space<vmem>>, vector<32x256xf32>
      tpu.vector_store %arg7[%c0_10, %c0_11], %12 {strides = array<i32>} : memref<32x256xf32, #tpu.memory_space<vmem>>, vector<32x256xf32>,
    } else {
    }
    %c0 = arith.constant 0 : index
    %c0_1 = arith.constant 0 : index
    %3 = vector.load %arg7[%c0, %c0_1] : memref<32x256xf32, #tpu.memory_space<vmem>>, vector<32x256xf32>
    %c0_2 = arith.constant 0 : index
    %c0_3 = arith.constant 0 : index
    %4 = vector.load %arg3[%c0_2, %c0_3] : memref<32x384xbf16, #tpu.memory_space<vmem>>, vector<32x384xbf16>
    %c0_4 = arith.constant 0 : index
    %c0_5 = arith.constant 0 : index
    %5 = vector.load %arg4[%c0_4, %c0_5] : memref<384x256xbf16, #tpu.memory_space<vmem>>, vector<384x256xbf16>
    %cst = arith.constant dense<0.000000e+00> : vector<32x256xf32>
    %6 = tpu.matmul %4, %5, %cst {dimension_numbers = #tpu.dot_dimension_numbers<[1], [0], [0], [1], [0, 0, 1, 1], [], []>} : vector<32x384xbf16>, vector<384x256xbf16>, vector<32x256xf32> -> vector<32x256xf32>
    %7 = arith.addf %3, %6 : vector<32x256xf32>
    %c0_6 = arith.constant 0 : index
    %c0_7 = arith.constant 0 : index
    %8 = vector.load %arg7[%c0_6, %c0_7] : memref<32x256xf32, #tpu.memory_space<vmem>>, vector<32x256xf32>
    tpu.vector_store %arg7[%c0_6, %c0_7], %7 {strides = array<i32>} : memref<32x256xf32, #tpu.memory_space<vmem>>, vector<32x256xf32>,
    %c5_i32 = arith.constant 5 : i32
    %9 = arith.cmpi eq, %arg2, %c5_i32 : i32
    %10 = arith.extui %9 : i1 to i32
    %c0_i32_8 = arith.constant 0 : i32
    %11 = arith.cmpi ne, %10, %c0_i32_8 : i32
    scf.if %11 {
      %c0_9 = arith.constant 0 : index
      %c0_10 = arith.constant 0 : index
      %12 = vector.load %arg7[%c0_9, %c0_10] : memref<32x256xf32, #tpu.memory_space<vmem>>, vector<32x256xf32>
      %c0_11 = arith.constant 0 : index
      %c0_12 = arith.constant 0 : index
      %13 = vector.load %arg5[%c0_11, %c0_12] : memref<1x256xf32, #tpu.memory_space<vmem>>, vector<1x256xf32>
      %14 = vector.broadcast %13 : vector<1x256xf32> to vector<32x256xf32>
      %15 = arith.addf %12, %14 : vector<32x256xf32>
      %cst_13 = arith.constant 0.000000e+00 : f32
      %16 = vector.broadcast %cst_13 : f32 to vector<32x256xf32>
      %17 = arith.maximumf %15, %16 : vector<32x256xf32>
      %18 = arith.truncf %17 : vector<32x256xf32> to vector<32x256xbf16>
      %c0_14 = arith.constant 0 : index
      %c0_15 = arith.constant 0 : index
      %19 = vector.load %arg6[%c0_14, %c0_15] : memref<32x256xbf16, #tpu.memory_space<vmem>>, vector<32x256xbf16>
      tpu.vector_store %arg6[%c0_14, %c0_15], %18 {strides = array<i32>} : memref<32x256xbf16, #tpu.memory_space<vmem>>, vector<32x256xbf16>,
    } else {
    }
    return
  }
  func.func @transform_0(%arg0: i32, %arg1: i32, %arg2: i32) -> (i32, i32) {
    %c0_i32 = arith.constant 0 : i32
    return %arg0, %arg2 : i32, i32
  }
  func.func @transform_1(%arg0: i32, %arg1: i32, %arg2: i32) -> (i32, i32) {
    %c0_i32 = arith.constant 0 : i32
    return %arg2, %arg1 : i32, i32
  }
  func.func @transform_2(%arg0: i32, %arg1: i32, %arg2: i32) -> (i32, i32) {
    %c0_i32 = arith.constant 0 : i32
    %c0_i32_0 = arith.constant 0 : i32
    return %c0_i32, %arg1 : i32, i32
  }
  func.func @transform_3(%arg0: i32, %arg1: i32, %arg2: i32) -> (i32, i32) {
    %c0_i32 = arith.constant 0 : i32
    return %arg0, %arg1 : i32, i32
  }
}

module attributes {stable_mosaic.version = 11 : i64} {
  func.func @_mm_kernel(%arg0: i32, %arg1: i32, %arg2: i32, %arg3: memref<8x384xbf16, #tpu.memory_space<vmem>>, %arg4: memref<384x256xbf16, #tpu.memory_space<vmem>>, %arg5: memref<1x256xf32, #tpu.memory_space<vmem>>, %arg6: memref<8x256xbf16, #tpu.memory_space<vmem>>, %arg7: memref<8x256xf32, #tpu.memory_space<vmem>>) attributes {dimension_semantics = [#tpu.dimension_semantics<parallel>, #tpu.dimension_semantics<parallel>, #tpu.dimension_semantics<arbitrary>], iteration_bounds = array<i64: 1, 2, 6>, scalar_prefetch = 0 : i64, scratch_operands = 1 : i64, tpu.core_type = #tpu.core_type<tc>, window_params = [{transform_indices = @transform_0, window_bounds = array<i64: 8, 384>}, {transform_indices = @transform_1, window_bounds = array<i64: 384, 256>}, {transform_indices = @transform_2, window_bounds = array<i64: 1, 256>}, {transform_indices = @transform_3, window_bounds = array<i64: 8, 256>}]} {
    %c0_i32 = arith.constant 0 : i32
    %0 = arith.cmpi eq, %arg2, %c0_i32 : i32
    %1 = arith.extui %0 : i1 to i32
    %c0_i32_0 = arith.constant 0 : i32
    %2 = arith.cmpi ne, %1, %c0_i32_0 : i32
    scf.if %2 {
      %cst_9 = arith.constant 0.000000e+00 : f32
      %12 = vector.broadcast %cst_9 : f32 to vector<8x256xf32>
      %c0_10 = arith.constant 0 : index
      %c0_11 = arith.constant 0 : index
      %13 = vector.load %arg7[%c0_10, %c0_11] : memref<8x256xf32, #tpu.memory_space<vmem>>, vector<8x256xf32>
      tpu.vector_store %arg7[%c0_10, %c0_11], %12 {strides = array<i32>} : memref<8x256xf32, #tpu.memory_space<vmem>>, vector<8x256xf32>,
    } else {
    }
    %c0 = arith.constant 0 : index
    %c0_1 = arith.constant 0 : index
    %3 = vector.load %arg7[%c0, %c0_1] : memref<8x256xf32, #tpu.memory_space<vmem>>, vector<8x256xf32>
    %c0_2 = arith.constant 0 : index
    %c0_3 = arith.constant 0 : index
    %4 = vector.load %arg3[%c0_2, %c0_3] : memref<8x384xbf16, #tpu.memory_space<vmem>>, vector<8x384xbf16>
    %c0_4 = arith.constant 0 : index
    %c0_5 = arith.constant 0 : index
    %5 = vector.load %arg4[%c0_4, %c0_5] : memref<384x256xbf16, #tpu.memory_space<vmem>>, vector<384x256xbf16>
    %cst = arith.constant dense<0.000000e+00> : vector<8x256xf32>
    %6 = tpu.matmul %4, %5, %cst {dimension_numbers = #tpu.dot_dimension_numbers<[1], [0], [0], [1], [0, 0, 1, 1], [], []>} : vector<8x384xbf16>, vector<384x256xbf16>, vector<8x256xf32> -> vector<8x256xf32>
    %7 = arith.addf %3, %6 : vector<8x256xf32>
    %c0_6 = arith.constant 0 : index
    %c0_7 = arith.constant 0 : index
    %8 = vector.load %arg7[%c0_6, %c0_7] : memref<8x256xf32, #tpu.memory_space<vmem>>, vector<8x256xf32>
    tpu.vector_store %arg7[%c0_6, %c0_7], %7 {strides = array<i32>} : memref<8x256xf32, #tpu.memory_space<vmem>>, vector<8x256xf32>,
    %c5_i32 = arith.constant 5 : i32
    %9 = arith.cmpi eq, %arg2, %c5_i32 : i32
    %10 = arith.extui %9 : i1 to i32
    %c0_i32_8 = arith.constant 0 : i32
    %11 = arith.cmpi ne, %10, %c0_i32_8 : i32
    scf.if %11 {
      %c0_9 = arith.constant 0 : index
      %c0_10 = arith.constant 0 : index
      %12 = vector.load %arg7[%c0_9, %c0_10] : memref<8x256xf32, #tpu.memory_space<vmem>>, vector<8x256xf32>
      %c0_11 = arith.constant 0 : index
      %c0_12 = arith.constant 0 : index
      %13 = vector.load %arg5[%c0_11, %c0_12] : memref<1x256xf32, #tpu.memory_space<vmem>>, vector<1x256xf32>
      %14 = vector.broadcast %13 : vector<1x256xf32> to vector<8x256xf32>
      %15 = arith.addf %12, %14 : vector<8x256xf32>
      %cst_13 = arith.constant 0.000000e+00 : f32
      %16 = vector.broadcast %cst_13 : f32 to vector<8x256xf32>
      %17 = arith.maximumf %15, %16 : vector<8x256xf32>
      %18 = arith.truncf %17 : vector<8x256xf32> to vector<8x256xbf16>
      %c0_14 = arith.constant 0 : index
      %c0_15 = arith.constant 0 : index
      %19 = vector.load %arg6[%c0_14, %c0_15] : memref<8x256xbf16, #tpu.memory_space<vmem>>, vector<8x256xbf16>
      tpu.vector_store %arg6[%c0_14, %c0_15], %18 {strides = array<i32>} : memref<8x256xbf16, #tpu.memory_space<vmem>>, vector<8x256xbf16>,
    } else {
    }
    return
  }
  func.func @transform_0(%arg0: i32, %arg1: i32, %arg2: i32) -> (i32, i32) {
    %c0_i32 = arith.constant 0 : i32
    return %arg0, %arg2 : i32, i32
  }
  func.func @transform_1(%arg0: i32, %arg1: i32, %arg2: i32) -> (i32, i32) {
    %c0_i32 = arith.constant 0 : i32
    return %arg2, %arg1 : i32, i32
  }
  func.func @transform_2(%arg0: i32, %arg1: i32, %arg2: i32) -> (i32, i32) {
    %c0_i32 = arith.constant 0 : i32
    %c0_i32_0 = arith.constant 0 : i32
    return %c0_i32, %arg1 : i32, i32
  }
  func.func @transform_3(%arg0: i32, %arg1: i32, %arg2: i32) -> (i32, i32) {
    %c0_i32 = arith.constant 0 : i32
    return %arg0, %arg1 : i32, i32
  }
}

module attributes {stable_mosaic.version = 11 : i64} {
  func.func @_mm_kernel(%arg0: i32, %arg1: i32, %arg2: i32, %arg3: memref<8x256xbf16, #tpu.memory_space<vmem>>, %arg4: memref<256x256xbf16, #tpu.memory_space<vmem>>, %arg5: memref<1x256xf32, #tpu.memory_space<vmem>>, %arg6: memref<8x256xbf16, #tpu.memory_space<vmem>>, %arg7: memref<8x256xf32, #tpu.memory_space<vmem>>) attributes {dimension_semantics = [#tpu.dimension_semantics<parallel>, #tpu.dimension_semantics<parallel>, #tpu.dimension_semantics<arbitrary>], iteration_bounds = array<i64: 1, 2, 1>, scalar_prefetch = 0 : i64, scratch_operands = 1 : i64, tpu.core_type = #tpu.core_type<tc>, window_params = [{transform_indices = @transform_0, window_bounds = array<i64: 8, 256>}, {transform_indices = @transform_1, window_bounds = array<i64: 256, 256>}, {transform_indices = @transform_2, window_bounds = array<i64: 1, 256>}, {transform_indices = @transform_3, window_bounds = array<i64: 8, 256>}]} {
    %c0_i32 = arith.constant 0 : i32
    %0 = arith.cmpi eq, %arg2, %c0_i32 : i32
    %1 = arith.extui %0 : i1 to i32
    %c0_i32_0 = arith.constant 0 : i32
    %2 = arith.cmpi ne, %1, %c0_i32_0 : i32
    scf.if %2 {
      %cst_10 = arith.constant 0.000000e+00 : f32
      %12 = vector.broadcast %cst_10 : f32 to vector<8x256xf32>
      %c0_11 = arith.constant 0 : index
      %c0_12 = arith.constant 0 : index
      %13 = vector.load %arg7[%c0_11, %c0_12] : memref<8x256xf32, #tpu.memory_space<vmem>>, vector<8x256xf32>
      tpu.vector_store %arg7[%c0_11, %c0_12], %12 {strides = array<i32>} : memref<8x256xf32, #tpu.memory_space<vmem>>, vector<8x256xf32>,
    } else {
    }
    %c0 = arith.constant 0 : index
    %c0_1 = arith.constant 0 : index
    %3 = vector.load %arg7[%c0, %c0_1] : memref<8x256xf32, #tpu.memory_space<vmem>>, vector<8x256xf32>
    %c0_2 = arith.constant 0 : index
    %c0_3 = arith.constant 0 : index
    %4 = vector.load %arg3[%c0_2, %c0_3] : memref<8x256xbf16, #tpu.memory_space<vmem>>, vector<8x256xbf16>
    %c0_4 = arith.constant 0 : index
    %c0_5 = arith.constant 0 : index
    %5 = vector.load %arg4[%c0_4, %c0_5] : memref<256x256xbf16, #tpu.memory_space<vmem>>, vector<256x256xbf16>
    %cst = arith.constant dense<0.000000e+00> : vector<8x256xf32>
    %6 = tpu.matmul %4, %5, %cst {dimension_numbers = #tpu.dot_dimension_numbers<[1], [0], [0], [1], [0, 0, 1, 1], [], []>} : vector<8x256xbf16>, vector<256x256xbf16>, vector<8x256xf32> -> vector<8x256xf32>
    %7 = arith.addf %3, %6 : vector<8x256xf32>
    %c0_6 = arith.constant 0 : index
    %c0_7 = arith.constant 0 : index
    %8 = vector.load %arg7[%c0_6, %c0_7] : memref<8x256xf32, #tpu.memory_space<vmem>>, vector<8x256xf32>
    tpu.vector_store %arg7[%c0_6, %c0_7], %7 {strides = array<i32>} : memref<8x256xf32, #tpu.memory_space<vmem>>, vector<8x256xf32>,
    %c0_i32_8 = arith.constant 0 : i32
    %9 = arith.cmpi eq, %arg2, %c0_i32_8 : i32
    %10 = arith.extui %9 : i1 to i32
    %c0_i32_9 = arith.constant 0 : i32
    %11 = arith.cmpi ne, %10, %c0_i32_9 : i32
    scf.if %11 {
      %c0_10 = arith.constant 0 : index
      %c0_11 = arith.constant 0 : index
      %12 = vector.load %arg7[%c0_10, %c0_11] : memref<8x256xf32, #tpu.memory_space<vmem>>, vector<8x256xf32>
      %c0_12 = arith.constant 0 : index
      %c0_13 = arith.constant 0 : index
      %13 = vector.load %arg5[%c0_12, %c0_13] : memref<1x256xf32, #tpu.memory_space<vmem>>, vector<1x256xf32>
      %14 = vector.broadcast %13 : vector<1x256xf32> to vector<8x256xf32>
      %15 = arith.addf %12, %14 : vector<8x256xf32>
      %16 = arith.truncf %15 : vector<8x256xf32> to vector<8x256xbf16>
      %c0_14 = arith.constant 0 : index
      %c0_15 = arith.constant 0 : index
      %17 = vector.load %arg6[%c0_14, %c0_15] : memref<8x256xbf16, #tpu.memory_space<vmem>>, vector<8x256xbf16>
      tpu.vector_store %arg6[%c0_14, %c0_15], %16 {strides = array<i32>} : memref<8x256xbf16, #tpu.memory_space<vmem>>, vector<8x256xbf16>,
    } else {
    }
    return
  }
  func.func @transform_0(%arg0: i32, %arg1: i32, %arg2: i32) -> (i32, i32) {
    %c0_i32 = arith.constant 0 : i32
    return %arg0, %arg2 : i32, i32
  }
  func.func @transform_1(%arg0: i32, %arg1: i32, %arg2: i32) -> (i32, i32) {
    %c0_i32 = arith.constant 0 : i32
    return %arg2, %arg1 : i32, i32
  }
  func.func @transform_2(%arg0: i32, %arg1: i32, %arg2: i32) -> (i32, i32) {
    %c0_i32 = arith.constant 0 : i32
    %c0_i32_0 = arith.constant 0 : i32
    return %c0_i32, %arg1 : i32, i32
  }
  func.func @transform_3(%arg0: i32, %arg1: i32, %arg2: i32) -> (i32, i32) {
    %c0_i32 = arith.constant 0 : i32
    return %arg0, %arg1 : i32, i32
  }
}

module attributes {stable_mosaic.version = 11 : i64} {
  func.func @_mm_kernel(%arg0: i32, %arg1: i32, %arg2: i32, %arg3: memref<8x512xbf16, #tpu.memory_space<vmem>>, %arg4: memref<512x256xbf16, #tpu.memory_space<vmem>>, %arg5: memref<1x256xf32, #tpu.memory_space<vmem>>, %arg6: memref<8x256xbf16, #tpu.memory_space<vmem>>, %arg7: memref<8x256xbf16, #tpu.memory_space<vmem>>, %arg8: memref<8x256xf32, #tpu.memory_space<vmem>>) attributes {dimension_semantics = [#tpu.dimension_semantics<parallel>, #tpu.dimension_semantics<parallel>, #tpu.dimension_semantics<arbitrary>], iteration_bounds = array<i64: 1, 2, 9>, scalar_prefetch = 0 : i64, scratch_operands = 1 : i64, tpu.core_type = #tpu.core_type<tc>, window_params = [{transform_indices = @transform_0, window_bounds = array<i64: 8, 512>}, {transform_indices = @transform_1, window_bounds = array<i64: 512, 256>}, {transform_indices = @transform_2, window_bounds = array<i64: 1, 256>}, {transform_indices = @transform_3, window_bounds = array<i64: 8, 256>}, {transform_indices = @transform_4, window_bounds = array<i64: 8, 256>}]} {
    %c0_i32 = arith.constant 0 : i32
    %0 = arith.cmpi eq, %arg2, %c0_i32 : i32
    %1 = arith.extui %0 : i1 to i32
    %c0_i32_0 = arith.constant 0 : i32
    %2 = arith.cmpi ne, %1, %c0_i32_0 : i32
    scf.if %2 {
      %cst_9 = arith.constant 0.000000e+00 : f32
      %12 = vector.broadcast %cst_9 : f32 to vector<8x256xf32>
      %c0_10 = arith.constant 0 : index
      %c0_11 = arith.constant 0 : index
      %13 = vector.load %arg8[%c0_10, %c0_11] : memref<8x256xf32, #tpu.memory_space<vmem>>, vector<8x256xf32>
      tpu.vector_store %arg8[%c0_10, %c0_11], %12 {strides = array<i32>} : memref<8x256xf32, #tpu.memory_space<vmem>>, vector<8x256xf32>,
    } else {
    }
    %c0 = arith.constant 0 : index
    %c0_1 = arith.constant 0 : index
    %3 = vector.load %arg8[%c0, %c0_1] : memref<8x256xf32, #tpu.memory_space<vmem>>, vector<8x256xf32>
    %c0_2 = arith.constant 0 : index
    %c0_3 = arith.constant 0 : index
    %4 = vector.load %arg3[%c0_2, %c0_3] : memref<8x512xbf16, #tpu.memory_space<vmem>>, vector<8x512xbf16>
    %c0_4 = arith.constant 0 : index
    %c0_5 = arith.constant 0 : index
    %5 = vector.load %arg4[%c0_4, %c0_5] : memref<512x256xbf16, #tpu.memory_space<vmem>>, vector<512x256xbf16>
    %cst = arith.constant dense<0.000000e+00> : vector<8x256xf32>
    %6 = tpu.matmul %4, %5, %cst {dimension_numbers = #tpu.dot_dimension_numbers<[1], [0], [0], [1], [0, 0, 1, 1], [], []>} : vector<8x512xbf16>, vector<512x256xbf16>, vector<8x256xf32> -> vector<8x256xf32>
    %7 = arith.addf %3, %6 : vector<8x256xf32>
    %c0_6 = arith.constant 0 : index
    %c0_7 = arith.constant 0 : index
    %8 = vector.load %arg8[%c0_6, %c0_7] : memref<8x256xf32, #tpu.memory_space<vmem>>, vector<8x256xf32>
    tpu.vector_store %arg8[%c0_6, %c0_7], %7 {strides = array<i32>} : memref<8x256xf32, #tpu.memory_space<vmem>>, vector<8x256xf32>,
    %c8_i32 = arith.constant 8 : i32
    %9 = arith.cmpi eq, %arg2, %c8_i32 : i32
    %10 = arith.extui %9 : i1 to i32
    %c0_i32_8 = arith.constant 0 : i32
    %11 = arith.cmpi ne, %10, %c0_i32_8 : i32
    scf.if %11 {
      %c0_9 = arith.constant 0 : index
      %c0_10 = arith.constant 0 : index
      %12 = vector.load %arg8[%c0_9, %c0_10] : memref<8x256xf32, #tpu.memory_space<vmem>>, vector<8x256xf32>
      %c0_11 = arith.constant 0 : index
      %c0_12 = arith.constant 0 : index
      %13 = vector.load %arg5[%c0_11, %c0_12] : memref<1x256xf32, #tpu.memory_space<vmem>>, vector<1x256xf32>
      %14 = vector.broadcast %13 : vector<1x256xf32> to vector<8x256xf32>
      %15 = arith.addf %12, %14 : vector<8x256xf32>
      %c0_13 = arith.constant 0 : index
      %c0_14 = arith.constant 0 : index
      %16 = vector.load %arg6[%c0_13, %c0_14] : memref<8x256xbf16, #tpu.memory_space<vmem>>, vector<8x256xbf16>
      %17 = arith.extf %16 : vector<8x256xbf16> to vector<8x256xf32>
      %18 = arith.addf %15, %17 : vector<8x256xf32>
      %cst_15 = arith.constant 0.000000e+00 : f32
      %19 = vector.broadcast %cst_15 : f32 to vector<8x256xf32>
      %20 = arith.maximumf %18, %19 : vector<8x256xf32>
      %21 = arith.truncf %20 : vector<8x256xf32> to vector<8x256xbf16>
      %c0_16 = arith.constant 0 : index
      %c0_17 = arith.constant 0 : index
      %22 = vector.load %arg7[%c0_16, %c0_17] : memref<8x256xbf16, #tpu.memory_space<vmem>>, vector<8x256xbf16>
      tpu.vector_store %arg7[%c0_16, %c0_17], %21 {strides = array<i32>} : memref<8x256xbf16, #tpu.memory_space<vmem>>, vector<8x256xbf16>,
    } else {
    }
    return
  }
  func.func @transform_0(%arg0: i32, %arg1: i32, %arg2: i32) -> (i32, i32) {
    %c0_i32 = arith.constant 0 : i32
    return %arg0, %arg2 : i32, i32
  }
  func.func @transform_1(%arg0: i32, %arg1: i32, %arg2: i32) -> (i32, i32) {
    %c0_i32 = arith.constant 0 : i32
    return %arg2, %arg1 : i32, i32
  }
  func.func @transform_2(%arg0: i32, %arg1: i32, %arg2: i32) -> (i32, i32) {
    %c0_i32 = arith.constant 0 : i32
    %c0_i32_0 = arith.constant 0 : i32
    return %c0_i32, %arg1 : i32, i32
  }
  func.func @transform_3(%arg0: i32, %arg1: i32, %arg2: i32) -> (i32, i32) {
    %c0_i32 = arith.constant 0 : i32
    return %arg0, %arg1 : i32, i32
  }
  func.func @transform_4(%arg0: i32, %arg1: i32, %arg2: i32) -> (i32, i32) {
    %c0_i32 = arith.constant 0 : i32
    return %arg0, %arg1 : i32, i32
  }
}

module attributes {stable_mosaic.version = 11 : i64} {
  func.func @_mm_kernel(%arg0: i32, %arg1: i32, %arg2: i32, %arg3: memref<8x512xbf16, #tpu.memory_space<vmem>>, %arg4: memref<512x256xbf16, #tpu.memory_space<vmem>>, %arg5: memref<1x256xf32, #tpu.memory_space<vmem>>, %arg6: memref<8x256xbf16, #tpu.memory_space<vmem>>, %arg7: memref<8x256xf32, #tpu.memory_space<vmem>>) attributes {dimension_semantics = [#tpu.dimension_semantics<parallel>, #tpu.dimension_semantics<parallel>, #tpu.dimension_semantics<arbitrary>], iteration_bounds = array<i64: 1, 2, 9>, scalar_prefetch = 0 : i64, scratch_operands = 1 : i64, tpu.core_type = #tpu.core_type<tc>, window_params = [{transform_indices = @transform_0, window_bounds = array<i64: 8, 512>}, {transform_indices = @transform_1, window_bounds = array<i64: 512, 256>}, {transform_indices = @transform_2, window_bounds = array<i64: 1, 256>}, {transform_indices = @transform_3, window_bounds = array<i64: 8, 256>}]} {
    %c0_i32 = arith.constant 0 : i32
    %0 = arith.cmpi eq, %arg2, %c0_i32 : i32
    %1 = arith.extui %0 : i1 to i32
    %c0_i32_0 = arith.constant 0 : i32
    %2 = arith.cmpi ne, %1, %c0_i32_0 : i32
    scf.if %2 {
      %cst_9 = arith.constant 0.000000e+00 : f32
      %12 = vector.broadcast %cst_9 : f32 to vector<8x256xf32>
      %c0_10 = arith.constant 0 : index
      %c0_11 = arith.constant 0 : index
      %13 = vector.load %arg7[%c0_10, %c0_11] : memref<8x256xf32, #tpu.memory_space<vmem>>, vector<8x256xf32>
      tpu.vector_store %arg7[%c0_10, %c0_11], %12 {strides = array<i32>} : memref<8x256xf32, #tpu.memory_space<vmem>>, vector<8x256xf32>,
    } else {
    }
    %c0 = arith.constant 0 : index
    %c0_1 = arith.constant 0 : index
    %3 = vector.load %arg7[%c0, %c0_1] : memref<8x256xf32, #tpu.memory_space<vmem>>, vector<8x256xf32>
    %c0_2 = arith.constant 0 : index
    %c0_3 = arith.constant 0 : index
    %4 = vector.load %arg3[%c0_2, %c0_3] : memref<8x512xbf16, #tpu.memory_space<vmem>>, vector<8x512xbf16>
    %c0_4 = arith.constant 0 : index
    %c0_5 = arith.constant 0 : index
    %5 = vector.load %arg4[%c0_4, %c0_5] : memref<512x256xbf16, #tpu.memory_space<vmem>>, vector<512x256xbf16>
    %cst = arith.constant dense<0.000000e+00> : vector<8x256xf32>
    %6 = tpu.matmul %4, %5, %cst {dimension_numbers = #tpu.dot_dimension_numbers<[1], [0], [0], [1], [0, 0, 1, 1], [], []>} : vector<8x512xbf16>, vector<512x256xbf16>, vector<8x256xf32> -> vector<8x256xf32>
    %7 = arith.addf %3, %6 : vector<8x256xf32>
    %c0_6 = arith.constant 0 : index
    %c0_7 = arith.constant 0 : index
    %8 = vector.load %arg7[%c0_6, %c0_7] : memref<8x256xf32, #tpu.memory_space<vmem>>, vector<8x256xf32>
    tpu.vector_store %arg7[%c0_6, %c0_7], %7 {strides = array<i32>} : memref<8x256xf32, #tpu.memory_space<vmem>>, vector<8x256xf32>,
    %c8_i32 = arith.constant 8 : i32
    %9 = arith.cmpi eq, %arg2, %c8_i32 : i32
    %10 = arith.extui %9 : i1 to i32
    %c0_i32_8 = arith.constant 0 : i32
    %11 = arith.cmpi ne, %10, %c0_i32_8 : i32
    scf.if %11 {
      %c0_9 = arith.constant 0 : index
      %c0_10 = arith.constant 0 : index
      %12 = vector.load %arg7[%c0_9, %c0_10] : memref<8x256xf32, #tpu.memory_space<vmem>>, vector<8x256xf32>
      %c0_11 = arith.constant 0 : index
      %c0_12 = arith.constant 0 : index
      %13 = vector.load %arg5[%c0_11, %c0_12] : memref<1x256xf32, #tpu.memory_space<vmem>>, vector<1x256xf32>
      %14 = vector.broadcast %13 : vector<1x256xf32> to vector<8x256xf32>
      %15 = arith.addf %12, %14 : vector<8x256xf32>
      %cst_13 = arith.constant 0.000000e+00 : f32
      %16 = vector.broadcast %cst_13 : f32 to vector<8x256xf32>
      %17 = arith.maximumf %15, %16 : vector<8x256xf32>
      %18 = arith.truncf %17 : vector<8x256xf32> to vector<8x256xbf16>
      %c0_14 = arith.constant 0 : index
      %c0_15 = arith.constant 0 : index
      %19 = vector.load %arg6[%c0_14, %c0_15] : memref<8x256xbf16, #tpu.memory_space<vmem>>, vector<8x256xbf16>
      tpu.vector_store %arg6[%c0_14, %c0_15], %18 {strides = array<i32>} : memref<8x256xbf16, #tpu.memory_space<vmem>>, vector<8x256xbf16>,
    } else {
    }
    return
  }
  func.func @transform_0(%arg0: i32, %arg1: i32, %arg2: i32) -> (i32, i32) {
    %c0_i32 = arith.constant 0 : i32
    return %arg0, %arg2 : i32, i32
  }
  func.func @transform_1(%arg0: i32, %arg1: i32, %arg2: i32) -> (i32, i32) {
    %c0_i32 = arith.constant 0 : i32
    return %arg2, %arg1 : i32, i32
  }
  func.func @transform_2(%arg0: i32, %arg1: i32, %arg2: i32) -> (i32, i32) {
    %c0_i32 = arith.constant 0 : i32
    %c0_i32_0 = arith.constant 0 : i32
    return %c0_i32, %arg1 : i32, i32
  }
  func.func @transform_3(%arg0: i32, %arg1: i32, %arg2: i32) -> (i32, i32) {
    %c0_i32 = arith.constant 0 : i32
    return %arg0, %arg1 : i32, i32
  }
}

module attributes {stable_mosaic.version = 11 : i64} {
  func.func @_global_pool_kernel(%arg0: memref<2x4x512xbf16, #tpu.memory_space<vmem>>, %arg1: memref<2x512xf32, #tpu.memory_space<vmem>>) attributes {dimension_semantics = [], scalar_prefetch = 0 : i64, scratch_operands = 0 : i64, tpu.core_type = #tpu.core_type<tc>} {
    %c0 = arith.constant 0 : index
    %c0_0 = arith.constant 0 : index
    %c0_1 = arith.constant 0 : index
    %0 = vector.load %arg0[%c0, %c0_0, %c0_1] : memref<2x4x512xbf16, #tpu.memory_space<vmem>>, vector<2x4x512xbf16>
    %1 = arith.extf %0 : vector<2x4x512xbf16> to vector<2x4x512xf32>
    %cst = arith.constant dense<0.000000e+00> : vector<2x512xf32>
    %2 = vector.multi_reduction <add>, %1, %cst [1] : vector<2x4x512xf32> to vector<2x512xf32>
    %cst_2 = arith.constant 4.000000e+00 : f32
    %3 = vector.broadcast %cst_2 : f32 to vector<2x512xf32>
    %4 = arith.divf %2, %3 : vector<2x512xf32>
    %cst_3 = arith.constant dense<0xFF800000> : vector<2x512xf32>
    %5 = vector.multi_reduction <maximumf>, %1, %cst_3 [1] : vector<2x4x512xf32> to vector<2x512xf32>
    %6 = arith.addf %4, %5 : vector<2x512xf32>
    %c0_4 = arith.constant 0 : index
    %c0_5 = arith.constant 0 : index
    %7 = vector.load %arg1[%c0_4, %c0_5] : memref<2x512xf32, #tpu.memory_space<vmem>>, vector<2x512xf32>
    tpu.vector_store %arg1[%c0_4, %c0_5], %6 {strides = array<i32>} : memref<2x512xf32, #tpu.memory_space<vmem>>, vector<2x512xf32>,
    return
  }
}

module attributes {stable_mosaic.version = 11 : i64} {
  func.func @_embed_l2_kernel(%arg0: memref<2x512xf32, #tpu.memory_space<vmem>>, %arg1: memref<512x128xf32, #tpu.memory_space<vmem>>, %arg2: memref<1x128xf32, #tpu.memory_space<vmem>>, %arg3: memref<2x128xf32, #tpu.memory_space<vmem>>) attributes {dimension_semantics = [], scalar_prefetch = 0 : i64, scratch_operands = 0 : i64, tpu.core_type = #tpu.core_type<tc>} {
    %c0 = arith.constant 0 : index
    %c0_0 = arith.constant 0 : index
    %0 = vector.load %arg0[%c0, %c0_0] : memref<2x512xf32, #tpu.memory_space<vmem>>, vector<2x512xf32>
    %c0_1 = arith.constant 0 : index
    %c0_2 = arith.constant 0 : index
    %1 = vector.load %arg1[%c0_1, %c0_2] : memref<512x128xf32, #tpu.memory_space<vmem>>, vector<512x128xf32>
    %cst = arith.constant dense<0.000000e+00> : vector<2x128xf32>
    %2 = tpu.matmul %0, %1, %cst {dimension_numbers = #tpu.dot_dimension_numbers<[1], [0], [0], [1], [0, 0, 1, 1], [], []>} : vector<2x512xf32>, vector<512x128xf32>, vector<2x128xf32> -> vector<2x128xf32>
    %c0_3 = arith.constant 0 : index
    %c0_4 = arith.constant 0 : index
    %3 = vector.load %arg2[%c0_3, %c0_4] : memref<1x128xf32, #tpu.memory_space<vmem>>, vector<1x128xf32>
    %4 = vector.broadcast %3 : vector<1x128xf32> to vector<2x128xf32>
    %5 = arith.addf %2, %4 : vector<2x128xf32>
    %6 = arith.mulf %5, %5 : vector<2x128xf32>
    %cst_5 = arith.constant dense<0.000000e+00> : vector<2xf32>
    %7 = vector.multi_reduction <add>, %6, %cst_5 [1] : vector<2x128xf32> to vector<2xf32>
    %8 = vector.shape_cast %7 : vector<2xf32> to vector<2x1xf32>
    %cst_6 = arith.constant 9.99999996E-13 : f32
    %9 = vector.broadcast %cst_6 : f32 to vector<2x1xf32>
    %10 = arith.addf %8, %9 : vector<2x1xf32>
    %11 = math.rsqrt %10 : vector<2x1xf32>
    %12 = vector.broadcast %11 : vector<2x1xf32> to vector<2x128xf32>
    %13 = arith.mulf %5, %12 : vector<2x128xf32>
    %c0_7 = arith.constant 0 : index
    %c0_8 = arith.constant 0 : index
    %14 = vector.load %arg3[%c0_7, %c0_8] : memref<2x128xf32, #tpu.memory_space<vmem>>, vector<2x128xf32>
    tpu.vector_store %arg3[%c0_7, %c0_8], %13 {strides = array<i32>} : memref<2x128xf32, #tpu.memory_space<vmem>>, vector<2x128xf32>,
    return
  }
}

</mosaic_0001>

<bundles_post_ra>
// kernel: resnet34_forward.39
= control target key start
LH: loop header
LB: loop body
LE: loop exit
PB: predicated region body
PF: predicated region fallthrough
CT: control target
= control target key end

     0   :  { %s1744_s12 = smov 0   ;;  %s1746_s13 = smov 0   ;;  %s1918_s0 = inlined_call_operand.vmem [shape: bf16[2048,256], index: 0, kind: input, shape index: {}]   ;;  %s1919_s1 = inlined_call_operand.vmem [shape: bf16[256,128], index: 1, kind: input, shape index: {}]   ;;  %s1920_s2 = inlined_call_operand.vmem [shape: f32[1,128], index: 2, kind: input, shape index: {}]   ;;  %s1921_s3 = inlined_call_operand.vmem [shape: bf16[2048,128], index: 3, kind: output, shape index: {}]  }
   0x1   :  { %s1748_s14 = smov 0  }
   0x2 LB: > { %s32_s15 = sadd.s32 1, %s1718_s13  ;;  %p1267_p0 = scmp.ge.s32.totalorder %s1722_s14, 1  ;;  %s1722_s14 = sphi %s1748_s14, %s13_s14   ;;  %s1718_s13 = sphi %s1746_s13, %s1923_s13   ;;  %s1714_s12 = sphi %s1744_s12, %s1922_s12  }
   0x3   : > { %p34_p1 = scmp.ge.s32.totalorder %s32_s15, 8  ;;  %p191_p2 = scmp.lt.s32.totalorder %s1722_s14, 9 }
   0x5   : > { %s1925_s15 = smov (%p34_p1, %s32_s15), 0  ;;  %p192_p3 = pnand %p1267_p0, %p191_p2 }
   0x6   : > { %v1636_v0 = vld [vmem:[%s1919_s1 + $0x40] sm:$0xff] (!%p192_p3)   ;;  %s1268_s18 = sshll.u32 (!%p192_p3), %s1714_s12, 5  ;;  %v1638_v2 = vld [vmem:[%s1919_s1 + $0x48] sm:$0xff] (!%p192_p3)   ;;  %v1640_v4 = vld [vmem:[%s1919_s1 + $0x50] sm:$0xff] (!%p192_p3)  }
   0x7   : > { %195 = sbr.rel (%p192_p3) target bundleno = 320 (0x140), region = 32  ;;  %v1637_v1 = vld [vmem:[%s1919_s1] sm:$0xff] (!%p192_p3)   ;;  %1484 = vmatprep.subr.bf16.mxu0 (!%p192_p3), %v1636_v0  ;;  %1596 = vmatprep.subr.bf16.mxu1 (!%p192_p3), %v1636_v0  ;;  %v1639_v3 = vld [vmem:[%s1919_s1 + $0x8] sm:$0xff] (!%p192_p3)   ;;  %p236_p4 = scmp.lt.s32.totalorder (!%p192_p3), %s1268_s18, 255  ;;  %v1641_v5 = vld [vmem:[%s1919_s1 + $0x10] sm:$0xff] (!%p192_p3)  }
   0x8   : > { %1485 = vmatpush3.bf16.msra.mxu0 (!%p192_p3), %v1637_v1  ;;  %1604 = vmatpush3.bf16.msra.mxu1 (!%p192_p3), %v1637_v1  ;;  %v1642_v6 = vld [vmem:[%s1919_s1 + $0x58] sm:$0xff] (!%p192_p3)   ;;  %v1644_v8 = vld [vmem:[%s1919_s1 + $0x60] sm:$0xff] (!%p192_p3)   ;;  %v1646_v10 = vld [vmem:[%s1919_s1 + $0x68] sm:$0xff] (!%p192_p3)  }
   0x9   : > { %1486 = vmatprep.subr.bf16.mxu0 (!%p192_p3), %v1638_v2  ;;  %1597 = vmatprep.subr.bf16.mxu1 (!%p192_p3), %v1638_v2  ;;  %v1643_v7 = vld [vmem:[%s1919_s1 + $0x18] sm:$0xff] (!%p192_p3)   ;;  %v1645_v9 = vld [vmem:[%s1919_s1 + $0x20] sm:$0xff] (!%p192_p3)   ;;  %v1647_v13 = vld [vmem:[%s1919_s1 + $0x28] sm:$0xff] (!%p192_p3)  }
   0xa   : > { %v1648_v14 = vld [vmem:[%s1919_s1 + $0x70] sm:$0xff] (!%p192_p3)   ;;  %v1650_v16 = vld [vmem:[%s1919_s1 + $0x78] sm:$0xff] (!%p192_p3)   ;;  %v1853_v51 = vld [vmem:[%s1920_s2] ss:$0 sm:$0xff] (!%p192_p3) }
   0xb   : > { %v1649_v15 = vld [vmem:[%s1919_s1 + $0x30] sm:$0xff] (!%p192_p3)   ;;  %v1651_v17 = vld [vmem:[%s1919_s1 + $0x38] sm:$0xff] (!%p192_p3)  }
   0xc   : > { %1487 = vmatpush3.bf16.msra.mxu0 (!%p192_p3), %v1639_v3  ;;  %1605 = vmatpush3.bf16.msra.mxu1 (!%p192_p3), %v1639_v3 }
   0xd   : > { %1488 = vmatprep.subr.bf16.mxu0 (!%p192_p3), %v1640_v4  ;;  %1598 = vmatprep.subr.bf16.mxu1 (!%p192_p3), %v1640_v4 }
   0xe   : > { %s1927_s18 = smov (!%p236_p4, %s1268_s18), 255 }
   0xf   : > { %s1356_s6 = sshll.u32 %s1927_s18, 3  ;;  %s1272_s5 = sshll.u32 %s1927_s18, 2 }
  0x10   : > { %1489 = vmatpush3.bf16.msra.mxu0 %v1641_v5  ;;  %1606 = vmatpush3.bf16.msra.mxu1 %v1641_v5  ;;  %s1795_s11 = scalar_lea.vmem %s1918_s0, %s1356_s6  ;;  %s1863_s8 = scalar_lea.vmem %s1921_s3, %s1272_s5 }
  0x11   : > { %1490 = vmatprep.subr.bf16.mxu0 %v1642_v6  ;;  %1599 = vmatprep.subr.bf16.mxu1 %v1642_v6  ;;  %v1654_v11 = vld [vmem:[%s1795_s11 + $0x4] ss:$8 sps:$4 sm:$0xff]   ;;  %v1652_v18 = vld [vmem:[%s1795_s11] ss:$8 sps:$4 sm:$0xff]   ;;  %v1658_v20 = vld [vmem:[%s1795_s11 + $0x14] ss:$8 sps:$4 sm:$0xff]  }
  0x12   : > { %v1657_v12 = vld [vmem:[%s1795_s11 + $0x84] ss:$8 sps:$4 sm:$0xff]   ;;  %688 = vmatprep.mubr.bf16.mxu0 %v1654_v11  ;;  %v1655_v19 = vld [vmem:[%s1795_s11 + $0x80] ss:$8 sps:$4 sm:$0xff]   ;;  %v1660_v21 = vld [vmem:[%s1795_s11 + $0x94] ss:$8 sps:$4 sm:$0xff]  }
  0x13   : > { %752 = vmatprep.mubr.bf16.mxu1 %v1657_v12  ;;  %v1662_v22 = vld [vmem:[%s1795_s11 + $0x10] ss:$8 sps:$4 sm:$0xff]   ;;  %v1664_v24 = vld [vmem:[%s1795_s11 + $0x24] ss:$8 sps:$4 sm:$0xff]   ;;  %v1668_v26 = vld [vmem:[%s1795_s11 + $0x20] ss:$8 sps:$4 sm:$0xff]  }
  0x14   : > { %1491 = vmatpush3.bf16.msra.mxu0 %v1643_v7  ;;  %1607 = vmatpush3.bf16.msra.mxu1 %v1643_v7  ;;  %v1663_v23 = vld [vmem:[%s1795_s11 + $0x90] ss:$8 sps:$4 sm:$0xff]   ;;  %v1666_v25 = vld [vmem:[%s1795_s11 + $0xa4] ss:$8 sps:$4 sm:$0xff]   ;;  %v1669_v27 = vld [vmem:[%s1795_s11 + $0xa0] ss:$8 sps:$4 sm:$0xff]  }
  0x15   : > { %1492 = vmatprep.subr.bf16.mxu0 %v1644_v8  ;;  %1600 = vmatprep.subr.bf16.mxu1 %v1644_v8  ;;  %v1670_v28 = vld [vmem:[%s1795_s11 + $0x34] ss:$8 sps:$4 sm:$0xff]   ;;  %v1674_v30 = vld [vmem:[%s1795_s11 + $0x30] ss:$8 sps:$4 sm:$0xff]   ;;  %v1676_v32 = vld [vmem:[%s1795_s11 + $0x44] ss:$8 sps:$4 sm:$0xff]  }
  0x16   : > { %v1672_v29 = vld [vmem:[%s1795_s11 + $0xb4] ss:$8 sps:$4 sm:$0xff]   ;;  %v1675_v31 = vld [vmem:[%s1795_s11 + $0xb0] ss:$8 sps:$4 sm:$0xff]   ;;  %v1678_v33 = vld [vmem:[%s1795_s11 + $0xc4] ss:$8 sps:$4 sm:$0xff]  }
  0x17   : > { %v1680_v34 = vld [vmem:[%s1795_s11 + $0x40] ss:$8 sps:$4 sm:$0xff]   ;;  %v1682_v36 = vld [vmem:[%s1795_s11 + $0x54] ss:$8 sps:$4 sm:$0xff]   ;;  %v1686_v38 = vld [vmem:[%s1795_s11 + $0x50] ss:$8 sps:$4 sm:$0xff]  }
  0x18   : > { %1493 = vmatpush3.bf16.msra.mxu0 %v1645_v9  ;;  %1608 = vmatpush3.bf16.msra.mxu1 %v1645_v9  ;;  %v1681_v35 = vld [vmem:[%s1795_s11 + $0xc0] ss:$8 sps:$4 sm:$0xff]   ;;  %v1684_v37 = vld [vmem:[%s1795_s11 + $0xd4] ss:$8 sps:$4 sm:$0xff]   ;;  %v1687_v39 = vld [vmem:[%s1795_s11 + $0xd0] ss:$8 sps:$4 sm:$0xff]  }
  0x19   : > { %1494 = vmatprep.subr.bf16.mxu0 %v1646_v10  ;;  %1601 = vmatprep.subr.bf16.mxu1 %v1646_v10  ;;  %v1688_v40 = vld [vmem:[%s1795_s11 + $0x64] ss:$8 sps:$4 sm:$0xff]   ;;  %v1692_v42 = vld [vmem:[%s1795_s11 + $0x60] ss:$8 sps:$4 sm:$0xff]   ;;  %v1694_v44 = vld [vmem:[%s1795_s11 + $0x74] ss:$8 sps:$4 sm:$0xff]  }
  0x1a   : > { %v1690_v41 = vld [vmem:[%s1795_s11 + $0xe4] ss:$8 sps:$4 sm:$0xff]   ;;  %v1693_v43 = vld [vmem:[%s1795_s11 + $0xe0] ss:$8 sps:$4 sm:$0xff]   ;;  %v1696_v45 = vld [vmem:[%s1795_s11 + $0xf4] ss:$8 sps:$4 sm:$0xff]  }
  0x1b   : > { %v1698_v46 = vld [vmem:[%s1795_s11 + $0x70] ss:$8 sps:$4 sm:$0xff]  }
  0x1c   : > { %1495 = vmatpush3.bf16.msra.mxu0 %v1647_v13  ;;  %1609 = vmatpush3.bf16.msra.mxu1 %v1647_v13  ;;  %v1699_v47 = vld [vmem:[%s1795_s11 + $0xf0] ss:$8 sps:$4 sm:$0xff]  }
  0x1d   : > { %1496 = vmatprep.subr.bf16.mxu0 %v1648_v14  ;;  %1602 = vmatprep.subr.bf16.mxu1 %v1648_v14 }
  0x20   : > { %1497 = vmatpush3.bf16.msra.mxu0 %v1649_v15  ;;  %1610 = vmatpush3.bf16.msra.mxu1 %v1649_v15 }
  0x21   : > { %1498 = vmatprep.subr.bf16.mxu0 %v1650_v16  ;;  %1603 = vmatprep.subr.bf16.mxu1 %v1650_v16 }
  0x24   : > { %1499 = vmatpush3.bf16.msra.mxu0 %v1651_v17  ;;  %1611 = vmatpush3.bf16.msra.mxu1 %v1651_v17 }
  0x27   : > { %689 = vmatmul.mubr.bf16.vlgmr.msra.gmra.mrb[0].mxu0 %v1652_v18  ;;  %753 = vmatmul.mubr.bf16.vlgmr.msra.gmra.mrb[0].mxu1 %v1655_v19 }
  0x28   : > { %696 = vmatprep.mubr.bf16.mxu0 %v1658_v20  ;;  %760 = vmatprep.mubr.bf16.mxu1 %v1660_v21 }
  0x2f   : > { %697 = vmatmul.mubr.bf16.gmra.mrb[4].mxu0 %v1662_v22  ;;  %761 = vmatmul.mubr.bf16.gmra.mrb[4].mxu1 %v1663_v23 }
  0x30   : > { %704 = vmatprep.mubr.bf16.mxu0 %v1664_v24  ;;  %768 = vmatprep.mubr.bf16.mxu1 %v1666_v25 }
  0x37   : > { %705 = vmatmul.mubr.bf16.gmra.mrb[8].mxu0 %v1668_v26  ;;  %769 = vmatmul.mubr.bf16.gmra.mrb[8].mxu1 %v1669_v27 }
  0x38   : > { %712 = vmatprep.mubr.bf16.mxu0 %v1670_v28  ;;  %776 = vmatprep.mubr.bf16.mxu1 %v1672_v29 }
  0x3f   : > { %713 = vmatmul.mubr.bf16.gmra.mrb[12].mxu0 %v1674_v30  ;;  %777 = vmatmul.mubr.bf16.gmra.mrb[12].mxu1 %v1675_v31 }
  0x40   : > { %720 = vmatprep.mubr.bf16.mxu0 %v1676_v32  ;;  %784 = vmatprep.mubr.bf16.mxu1 %v1678_v33 }
  0x47   : > { %721 = vmatmul.mubr.bf16.gmra.mrb[16].mxu0 %v1680_v34  ;;  %785 = vmatmul.mubr.bf16.gmra.mrb[16].mxu1 %v1681_v35 }
  0x48   : > { %728 = vmatprep.mubr.bf16.mxu0 %v1682_v36  ;;  %792 = vmatprep.mubr.bf16.mxu1 %v1684_v37 }
  0x4f   : > { %729 = vmatmul.mubr.bf16.gmra.mrb[20].mxu0 %v1686_v38  ;;  %793 = vmatmul.mubr.bf16.gmra.mrb[20].mxu1 %v1687_v39 }
  0x50   : > { %736 = vmatprep.mubr.bf16.mxu0 %v1688_v40  ;;  %800 = vmatprep.mubr.bf16.mxu1 %v1690_v41 }
  0x57   : > { %737 = vmatmul.mubr.bf16.gmra.mrb[24].mxu0 %v1692_v42  ;;  %801 = vmatmul.mubr.bf16.gmra.mrb[24].mxu1 %v1693_v43 }
  0x58   : > { %744 = vmatprep.mubr.bf16.mxu0 %v1694_v44  ;;  %808 = vmatprep.mubr.bf16.mxu1 %v1696_v45 }
  0x5f   : > { %745 = vmatmul.mubr.bf16.gmra.mrb[28].mxu0 %v1698_v46  ;;  %809 = vmatmul.mubr.bf16.gmra.mrb[28].mxu1 %v1699_v47 }
  0xfa   : > { %v1500_v48 = vpop.f32.mrb[0].mxu0  ;;  %v1548_v49 = vpop.f32.mrb[0].mxu1 }
  0xfb   : > { %v1501_v50 = vpop.f32.mrb[1].mxu0  ;;  %v1549_v52 = vpop.f32.mrb[1].mxu1 }
  0xfc   : > { %v1502_v53 = vadd.f32 %v1501_v50, %v1500_v48  ;;  %v1550_v54 = vadd.f32 %v1549_v52, %v1548_v49  ;;  %v1503_v55 = vpop.f32.mrb[2].mxu0  ;;  %v1551_v56 = vpop.f32.mrb[2].mxu1 }
  0xfd   : > { %v1504_v57 = vpop.f32.mrb[3].mxu0  ;;  %v1552_v58 = vpop.f32.mrb[3].mxu1 }
  0xfe   : > { %v923_v59 = vadd.f32 %v1502_v53, %v1853_v51  ;;  %v939_v60 = vadd.f32 %v1550_v54, %v1853_v51  ;;  %v1505_v61 = vadd.f32 %v1504_v57, %v1503_v55  ;;  %v1553_v62 = vadd.f32 %v1552_v58, %v1551_v56 }
 0x100   : > { %v924_v63 = vadd.f32 %v1505_v61, %v1853_v51  ;;  %v940_v0 = vadd.f32 %v1553_v62, %v1853_v51  ;;  %v955_v1 = vmax.f32 %v923_v59, 0.0  ;;  %v971_v2 = vmax.f32 %v939_v60, 0.0 }
 0x102   : > { %v956_v3 = vmax.f32 %v924_v63, 0.0  ;;  %v972_v4 = vmax.f32 %v940_v0, 0.0  ;;  %v1506_v5 = vpop.f32.mrb[4].mxu0  ;;  %v1554_v6 = vpop.f32.mrb[4].mxu1 }
 0x103   : > { %v1507_v7 = vpop.f32.mrb[5].mxu0  ;;  %v1555_v8 = vpop.f32.mrb[5].mxu1 }
 0x104   : > { %v1392_v9 = vpack.c.bf16 %v956_v3, %v955_v1  ;;  %v1432_v10 = vpack.c.bf16 %v972_v4, %v971_v2  ;;  %v1508_v11 = vadd.f32 %v1507_v7, %v1506_v5  ;;  %v1556_v12 = vadd.f32 %v1555_v8, %v1554_v6  ;;  %v1509_v13 = vpop.f32.mrb[6].mxu0  ;;  %v1557_v14 = vpop.f32.mrb[6].mxu1 }
 0x105   : > { %v1510_v15 = vpop.f32.mrb[7].mxu0  ;;  %v1558_v16 = vpop.f32.mrb[7].mxu1 }
 0x106   : > { %1393 = vst [vmem:[%s1863_s8] sm:$0xff] %v1392_v9   ;;  %1476 = vst [vmem:[%s1863_s8 + $0x40] sm:$0xff] %v1432_v10   ;;  %v925_v17 = vadd.f32 %v1508_v11, %v1853_v51  ;;  %v941_v18 = vadd.f32 %v1556_v12, %v1853_v51  ;;  %v1511_v19 = vadd.f32 %v1510_v15, %v1509_v13 }
 0x107   : > { %v1559_v20 = vadd.f32 %v1558_v16, %v1557_v14 }
 0x108   : > { %v926_v21 = vadd.f32 %v1511_v19, %v1853_v51  ;;  %v957_v23 = vmax.f32 %v925_v17, 0.0  ;;  %v973_v24 = vmax.f32 %v941_v18, 0.0 }
 0x109   : > { %v942_v22 = vadd.f32 %v1559_v20, %v1853_v51 }
 0x10a   : > { %v958_v25 = vmax.f32 %v926_v21, 0.0  ;;  %v1512_v27 = vpop.f32.mrb[8].mxu0  ;;  %v1560_v28 = vpop.f32.mrb[8].mxu1 }
 0x10b   : > { %v974_v26 = vmax.f32 %v942_v22, 0.0  ;;  %v1513_v29 = vpop.f32.mrb[9].mxu0  ;;  %v1561_v30 = vpop.f32.mrb[9].mxu1 }
 0x10c   : > { %v1397_v31 = vpack.c.bf16 %v958_v25, %v957_v23  ;;  %v1514_v33 = vadd.f32 %v1513_v29, %v1512_v27  ;;  %v1562_v34 = vadd.f32 %v1561_v30, %v1560_v28  ;;  %v1515_v35 = vpop.f32.mrb[10].mxu0  ;;  %v1563_v36 = vpop.f32.mrb[10].mxu1 }
 0x10d   : > { %v1437_v32 = vpack.c.bf16 %v974_v26, %v973_v24  ;;  %v1516_v37 = vpop.f32.mrb[11].mxu0  ;;  %v1564_v38 = vpop.f32.mrb[11].mxu1 }
 0x10e   : > { %1469 = vst [vmem:[%s1863_s8 + $0x8] sm:$0xff] %v1397_v31   ;;  %v927_v39 = vadd.f32 %v1514_v33, %v1853_v51  ;;  %v943_v40 = vadd.f32 %v1562_v34, %v1853_v51  ;;  %v1517_v41 = vadd.f32 %v1516_v37, %v1515_v35  ;;  %v1565_v42 = vadd.f32 %v1564_v38, %v1563_v36 }
 0x10f   : > { %1477 = vst [vmem:[%s1863_s8 + $0x48] sm:$0xff] %v1437_v32  }
 0x110   : > { %v928_v43 = vadd.f32 %v1517_v41, %v1853_v51  ;;  %v944_v44 = vadd.f32 %v1565_v42, %v1853_v51  ;;  %v959_v45 = vmax.f32 %v927_v39, 0.0  ;;  %v975_v46 = vmax.f32 %v943_v40, 0.0 }
 0x112   : > { %v960_v47 = vmax.f32 %v928_v43, 0.0  ;;  %v976_v48 = vmax.f32 %v944_v44, 0.0  ;;  %v1518_v49 = vpop.f32.mrb[12].mxu0  ;;  %v1566_v50 = vpop.f32.mrb[12].mxu1 }
 0x113   : > { %v1519_v52 = vpop.f32.mrb[13].mxu0  ;;  %v1567_v53 = vpop.f32.mrb[13].mxu1 }
 0x114   : > { %v1402_v54 = vpack.c.bf16 %v960_v47, %v959_v45  ;;  %v1442_v55 = vpack.c.bf16 %v976_v48, %v975_v46  ;;  %v1520_v56 = vadd.f32 %v1519_v52, %v1518_v49  ;;  %v1568_v57 = vadd.f32 %v1567_v53, %v1566_v50  ;;  %v1521_v58 = vpop.f32.mrb[14].mxu0  ;;  %v1569_v59 = vpop.f32.mrb[14].mxu1 }
 0x115   : > { %v1522_v60 = vpop.f32.mrb[15].mxu0  ;;  %v1570_v61 = vpop.f32.mrb[15].mxu1 }
 0x116   : > { %1470 = vst [vmem:[%s1863_s8 + $0x10] sm:$0xff] %v1402_v54   ;;  %1478 = vst [vmem:[%s1863_s8 + $0x50] sm:$0xff] %v1442_v55   ;;  %v929_v62 = vadd.f32 %v1520_v56, %v1853_v51  ;;  %v945_v63 = vadd.f32 %v1568_v57, %v1853_v51  ;;  %v1523_v0 = vadd.f32 %v1522_v60, %v1521_v58 }
 0x117   : > { %v1571_v1 = vadd.f32 %v1570_v61, %v1569_v59 }
 0x118   : > { %v930_v2 = vadd.f32 %v1523_v0, %v1853_v51  ;;  %v961_v4 = vmax.f32 %v929_v62, 0.0  ;;  %v977_v5 = vmax.f32 %v945_v63, 0.0 }
 0x119   : > { %v946_v3 = vadd.f32 %v1571_v1, %v1853_v51 }
 0x11a   : > { %v962_v6 = vmax.f32 %v930_v2, 0.0  ;;  %v1524_v8 = vpop.f32.mrb[16].mxu0  ;;  %v1572_v9 = vpop.f32.mrb[16].mxu1 }
 0x11b   : > { %v978_v7 = vmax.f32 %v946_v3, 0.0  ;;  %v1525_v10 = vpop.f32.mrb[17].mxu0  ;;  %v1573_v11 = vpop.f32.mrb[17].mxu1 }
 0x11c   : > { %v1407_v12 = vpack.c.bf16 %v962_v6, %v961_v4  ;;  %v1526_v14 = vadd.f32 %v1525_v10, %v1524_v8  ;;  %v1574_v15 = vadd.f32 %v1573_v11, %v1572_v9  ;;  %v1527_v16 = vpop.f32.mrb[18].mxu0  ;;  %v1575_v17 = vpop.f32.mrb[18].mxu1 }
 0x11d   : > { %v1447_v13 = vpack.c.bf16 %v978_v7, %v977_v5  ;;  %v1528_v18 = vpop.f32.mrb[19].mxu0  ;;  %v1576_v19 = vpop.f32.mrb[19].mxu1 }
 0x11e   : > { %1471 = vst [vmem:[%s1863_s8 + $0x18] sm:$0xff] %v1407_v12   ;;  %v931_v20 = vadd.f32 %v1526_v14, %v1853_v51  ;;  %v947_v21 = vadd.f32 %v1574_v15, %v1853_v51  ;;  %v1529_v22 = vadd.f32 %v1528_v18, %v1527_v16  ;;  %v1577_v23 = vadd.f32 %v1576_v19, %v1575_v17 }
 0x11f   : > { %1479 = vst [vmem:[%s1863_s8 + $0x58] sm:$0xff] %v1447_v13  }
 0x120   : > { %v932_v24 = vadd.f32 %v1529_v22, %v1853_v51  ;;  %v948_v25 = vadd.f32 %v1577_v23, %v1853_v51  ;;  %v963_v26 = vmax.f32 %v931_v20, 0.0  ;;  %v979_v27 = vmax.f32 %v947_v21, 0.0 }
 0x122   : > { %v964_v28 = vmax.f32 %v932_v24, 0.0  ;;  %v980_v29 = vmax.f32 %v948_v25, 0.0  ;;  %v1530_v30 = vpop.f32.mrb[20].mxu0  ;;  %v1578_v31 = vpop.f32.mrb[20].mxu1 }
 0x123   : > { %v1531_v32 = vpop.f32.mrb[21].mxu0  ;;  %v1579_v33 = vpop.f32.mrb[21].mxu1 }
 0x124   : > { %v1412_v34 = vpack.c.bf16 %v964_v28, %v963_v26  ;;  %v1452_v35 = vpack.c.bf16 %v980_v29, %v979_v27  ;;  %v1532_v36 = vadd.f32 %v1531_v32, %v1530_v30  ;;  %v1580_v37 = vadd.f32 %v1579_v33, %v1578_v31  ;;  %v1533_v38 = vpop.f32.mrb[22].mxu0  ;;  %v1581_v39 = vpop.f32.mrb[22].mxu1 }
 0x125   : > { %v1534_v40 = vpop.f32.mrb[23].mxu0  ;;  %v1582_v41 = vpop.f32.mrb[23].mxu1 }
 0x126   : > { %1472 = vst [vmem:[%s1863_s8 + $0x20] sm:$0xff] %v1412_v34   ;;  %1480 = vst [vmem:[%s1863_s8 + $0x60] sm:$0xff] %v1452_v35   ;;  %v933_v42 = vadd.f32 %v1532_v36, %v1853_v51  ;;  %v949_v43 = vadd.f32 %v1580_v37, %v1853_v51  ;;  %v1535_v44 = vadd.f32 %v1534_v40, %v1533_v38 }
 0x127   : > { %v1583_v45 = vadd.f32 %v1582_v41, %v1581_v39 }
 0x128   : > { %v934_v46 = vadd.f32 %v1535_v44, %v1853_v51  ;;  %v965_v48 = vmax.f32 %v933_v42, 0.0  ;;  %v981_v49 = vmax.f32 %v949_v43, 0.0 }
 0x129   : > { %v950_v47 = vadd.f32 %v1583_v45, %v1853_v51 }
 0x12a   : > { %v966_v50 = vmax.f32 %v934_v46, 0.0  ;;  %v1536_v53 = vpop.f32.mrb[24].mxu0  ;;  %v1584_v54 = vpop.f32.mrb[24].mxu1 }
 0x12b   : > { %v982_v52 = vmax.f32 %v950_v47, 0.0  ;;  %v1537_v55 = vpop.f32.mrb[25].mxu0  ;;  %v1585_v56 = vpop.f32.mrb[25].mxu1 }
 0x12c   : > { %v1417_v57 = vpack.c.bf16 %v966_v50, %v965_v48  ;;  %v1538_v59 = vadd.f32 %v1537_v55, %v1536_v53  ;;  %v1586_v60 = vadd.f32 %v1585_v56, %v1584_v54  ;;  %v1539_v61 = vpop.f32.mrb[26].mxu0  ;;  %v1587_v62 = vpop.f32.mrb[26].mxu1 }
 0x12d   : > { %v1457_v58 = vpack.c.bf16 %v982_v52, %v981_v49  ;;  %v1540_v63 = vpop.f32.mrb[27].mxu0  ;;  %v1588_v0 = vpop.f32.mrb[27].mxu1 }
 0x12e   : > { %1473 = vst [vmem:[%s1863_s8 + $0x28] sm:$0xff] %v1417_v57   ;;  %v935_v1 = vadd.f32 %v1538_v59, %v1853_v51  ;;  %v951_v2 = vadd.f32 %v1586_v60, %v1853_v51  ;;  %v1541_v3 = vadd.f32 %v1540_v63, %v1539_v61  ;;  %v1589_v4 = vadd.f32 %v1588_v0, %v1587_v62 }
 0x12f   : > { %1481 = vst [vmem:[%s1863_s8 + $0x68] sm:$0xff] %v1457_v58  }
 0x130   : > { %v936_v5 = vadd.f32 %v1541_v3, %v1853_v51  ;;  %v952_v6 = vadd.f32 %v1589_v4, %v1853_v51  ;;  %v967_v7 = vmax.f32 %v935_v1, 0.0  ;;  %v983_v8 = vmax.f32 %v951_v2, 0.0 }
 0x132   : > { %v968_v9 = vmax.f32 %v936_v5, 0.0  ;;  %v984_v10 = vmax.f32 %v952_v6, 0.0  ;;  %v1542_v11 = vpop.f32.mrb[28].mxu0  ;;  %v1590_v12 = vpop.f32.mrb[28].mxu1 }
 0x133   : > { %v1543_v13 = vpop.f32.mrb[29].mxu0  ;;  %v1591_v14 = vpop.f32.mrb[29].mxu1 }
 0x134   : > { %v1422_v15 = vpack.c.bf16 %v968_v9, %v967_v7  ;;  %v1462_v16 = vpack.c.bf16 %v984_v10, %v983_v8  ;;  %v1544_v17 = vadd.f32 %v1543_v13, %v1542_v11  ;;  %v1592_v18 = vadd.f32 %v1591_v14, %v1590_v12  ;;  %v1545_v19 = vpop.f32.mrb[30].mxu0  ;;  %v1593_v20 = vpop.f32.mrb[30].mxu1 }
 0x135   : > { %v1546_v21 = vpop.f32.mrb[31].mxu0  ;;  %v1594_v22 = vpop.f32.mrb[31].mxu1 }
 0x136   : > { %1474 = vst [vmem:[%s1863_s8 + $0x30] sm:$0xff] %v1422_v15   ;;  %1482 = vst [vmem:[%s1863_s8 + $0x70] sm:$0xff] %v1462_v16   ;;  %v937_v23 = vadd.f32 %v1544_v17, %v1853_v51  ;;  %v953_v24 = vadd.f32 %v1592_v18, %v1853_v51  ;;  %v1547_v25 = vadd.f32 %v1546_v21, %v1545_v19 }
 0x137   : > { %v1595_v26 = vadd.f32 %v1594_v22, %v1593_v20 }
 0x138   : > { %v938_v27 = vadd.f32 %v1547_v25, %v1853_v51  ;;  %v969_v29 = vmax.f32 %v937_v23, 0.0  ;;  %v985_v30 = vmax.f32 %v953_v24, 0.0 }
 0x139   : > { %v954_v28 = vadd.f32 %v1595_v26, %v1853_v51 }
 0x13a   : > { %v970_v31 = vmax.f32 %v938_v27, 0.0 }
 0x13b   : > { %v986_v32 = vmax.f32 %v954_v28, 0.0 }
 0x13c   : > { %v1427_v33 = vpack.c.bf16 %v970_v31, %v969_v29 }
 0x13d   : > { %v1467_v34 = vpack.c.bf16 %v986_v32, %v985_v30 }
 0x13e   : > { %1475 = vst [vmem:[%s1863_s8 + $0x38] sm:$0xff] %v1427_v33  }
 0x13f   : > { %1483 = vst [vmem:[%s1863_s8 + $0x78] sm:$0xff] %v1467_v34  }
 0x140 PF: > { %s13_s14 = sadd.s32 1, %s1722_s14   ;;  %s1922_s12 = smov %s1718_s13 }
 0x141   : > { %p10_p5 = scmp.ge.s32.totalorder %s13_s14, 10   ;;  %s1923_s13 = smov %s1925_s15 }
 0x143   :  { %12 = sbr.rel (!%p10_p5) target bundleno = 2 (0x2), region = 76 }

// kernel: resnet34_forward.40
= control target key start
LH: loop header
LB: loop body
LE: loop exit
PB: predicated region body
PF: predicated region fallthrough
CT: control target
= control target key end

     0   :  { %s790_s0 = inlined_call_operand.vmem [shape: bf16[9,32,1024], index: 0, kind: input, shape index: {}]   ;;  %s791_s1 = inlined_call_operand.vmem [shape: bf16[32,1024], index: 1, kind: output, shape index: {}]  }
   0x1   :  { %v8_v0 = vld [vmem:[%s790_s0] sm:$0xff]  ;;  %v9_v6 = vld [vmem:[%s790_s0 + $0x8] sm:$0xff]  ;;  %v10_v15 = vld [vmem:[%s790_s0 + $0x10] sm:$0xff] }
   0x2   :  { %v24_v1 = vld [vmem:[%s790_s0 + $0x80] sm:$0xff]  ;;  %v25_v7 = vld [vmem:[%s790_s0 + $0x88] sm:$0xff]  ;;  %v26_v16 = vld [vmem:[%s790_s0 + $0x90] sm:$0xff] }
   0x3   :  { %v40_v2 = vld [vmem:[%s790_s0 + $0x100] sm:$0xff]  ;;  %v152_v3 = vmax.bf16 %v24_v1, %v8_v0  ;;  %v41_v8 = vld [vmem:[%s790_s0 + $0x108] sm:$0xff]  ;;  %v160_v10 = vmax.bf16 %v25_v7, %v9_v6  ;;  %v42_v17 = vld [vmem:[%s790_s0 + $0x110] sm:$0xff]  ;;  %v168_v20 = vmax.bf16 %v26_v16, %v10_v15 }
   0x4   :  { %v56_v4 = vld [vmem:[%s790_s0 + $0x180] sm:$0xff]  ;;  %v57_v13 = vld [vmem:[%s790_s0 + $0x188] sm:$0xff]  ;;  %v58_v24 = vld [vmem:[%s790_s0 + $0x190] sm:$0xff] }
   0x5   :  { %v153_v5 = vmax.bf16 %v152_v3, %v40_v2  ;;  %v72_v9 = vld [vmem:[%s790_s0 + $0x200] sm:$0xff]  ;;  %v161_v14 = vmax.bf16 %v160_v10, %v41_v8  ;;  %v73_v19 = vld [vmem:[%s790_s0 + $0x208] sm:$0xff]  ;;  %v169_v26 = vmax.bf16 %v168_v20, %v42_v17  ;;  %v11_v27 = vld [vmem:[%s790_s0 + $0x18] sm:$0xff] }
   0x6   :  { %v88_v11 = vld [vmem:[%s790_s0 + $0x280] sm:$0xff]  ;;  %v89_v22 = vld [vmem:[%s790_s0 + $0x288] sm:$0xff]  ;;  %v27_v28 = vld [vmem:[%s790_s0 + $0x98] sm:$0xff] }
   0x7   :  { %v154_v12 = vmax.bf16 %v153_v5, %v56_v4  ;;  %v104_v21 = vld [vmem:[%s790_s0 + $0x300] sm:$0xff]  ;;  %v162_v23 = vmax.bf16 %v161_v14, %v57_v13  ;;  %v43_v29 = vld [vmem:[%s790_s0 + $0x118] sm:$0xff]  ;;  %v74_v33 = vld [vmem:[%s790_s0 + $0x210] sm:$0xff]  ;;  %v176_v34 = vmax.bf16 %v27_v28, %v11_v27  ;;  %v170_v38 = vmax.bf16 %v169_v26, %v58_v24 }
   0x8   :  { %v120_v30 = vld [vmem:[%s790_s0 + $0x380] sm:$0xff]  ;;  %v105_v36 = vld [vmem:[%s790_s0 + $0x308] sm:$0xff]  ;;  %v90_v37 = vld [vmem:[%s790_s0 + $0x290] sm:$0xff] }
   0x9   :  { %v155_v18 = vmax.bf16 %v154_v12, %v72_v9  ;;  %v136_v31 = vld [vmem:[%s790_s0 + $0x400] sm:$0xff]  ;;  %v163_v32 = vmax.bf16 %v162_v23, %v73_v19  ;;  %v59_v39 = vld [vmem:[%s790_s0 + $0x198] sm:$0xff]  ;;  %v177_v41 = vmax.bf16 %v176_v34, %v43_v29  ;;  %v121_v46 = vld [vmem:[%s790_s0 + $0x388] sm:$0xff]  ;;  %v171_v48 = vmax.bf16 %v170_v38, %v74_v33 }
   0xa   :  { %v12_v42 = vld [vmem:[%s790_s0 + $0x20] sm:$0xff]  ;;  %v137_v47 = vld [vmem:[%s790_s0 + $0x408] sm:$0xff]  ;;  %v75_v49 = vld [vmem:[%s790_s0 + $0x218] sm:$0xff] }
   0xb   :  { %v156_v25 = vmax.bf16 %v155_v18, %v88_v11  ;;  %v164_v40 = vmax.bf16 %v163_v32, %v89_v22  ;;  %v28_v43 = vld [vmem:[%s790_s0 + $0xa0] sm:$0xff]  ;;  %v106_v52 = vld [vmem:[%s790_s0 + $0x310] sm:$0xff]  ;;  %v91_v53 = vld [vmem:[%s790_s0 + $0x298] sm:$0xff]  ;;  %v178_v54 = vmax.bf16 %v177_v41, %v59_v39  ;;  %v172_v57 = vmax.bf16 %v171_v48, %v90_v37 }
   0xc   :  { %v44_v44 = vld [vmem:[%s790_s0 + $0x120] sm:$0xff]  ;;  %v184_v50 = vmax.bf16 %v28_v43, %v12_v42  ;;  %v13_v59 = vld [vmem:[%s790_s0 + $0x28] sm:$0xff]  ;;  %v122_v63 = vld [vmem:[%s790_s0 + $0x390] sm:$0xff] }
   0xd   :  { %v157_v35 = vmax.bf16 %v156_v25, %v104_v21  ;;  %v165_v51 = vmax.bf16 %v164_v40, %v105_v36  ;;  %v60_v55 = vld [vmem:[%s790_s0 + $0x1a0] sm:$0xff]  ;;  %v29_v60 = vld [vmem:[%s790_s0 + $0xa8] sm:$0xff]  ;;  %v138_v0 = vld [vmem:[%s790_s0 + $0x410] sm:$0xff]  ;;  %v179_v1 = vmax.bf16 %v178_v54, %v75_v49  ;;  %v173_v4 = vmax.bf16 %v172_v57, %v106_v52 }
   0xe   :  { %v185_v58 = vmax.bf16 %v184_v50, %v44_v44  ;;  %v45_v61 = vld [vmem:[%s790_s0 + $0x128] sm:$0xff]  ;;  %v76_v2 = vld [vmem:[%s790_s0 + $0x220] sm:$0xff]  ;;  %v192_v3 = vmax.bf16 %v29_v60, %v13_v59  ;;  %v107_v5 = vld [vmem:[%s790_s0 + $0x318] sm:$0xff] }
   0xf   :  { %v158_v45 = vmax.bf16 %v157_v35, %v120_v30  ;;  %v166_v62 = vmax.bf16 %v165_v51, %v121_v46  ;;  %v92_v6 = vld [vmem:[%s790_s0 + $0x2a0] sm:$0xff]  ;;  %v61_v8 = vld [vmem:[%s790_s0 + $0x1a8] sm:$0xff]  ;;  %v180_v10 = vmax.bf16 %v179_v1, %v91_v53  ;;  %v14_v12 = vld [vmem:[%s790_s0 + $0x30] sm:$0xff]  ;;  %v174_v15 = vmax.bf16 %v173_v4, %v122_v63 }
  0x10   :  { %v186_v7 = vmax.bf16 %v185_v58, %v60_v55  ;;  %v193_v11 = vmax.bf16 %v192_v3, %v45_v61  ;;  %v30_v13 = vld [vmem:[%s790_s0 + $0xb0] sm:$0xff]  ;;  %v123_v16 = vld [vmem:[%s790_s0 + $0x398] sm:$0xff]  ;;  %v77_v19 = vld [vmem:[%s790_s0 + $0x228] sm:$0xff] }
  0x11   :  { %v159_v56 = vmax.bf16 %v158_v45, %v136_v31  ;;  %v167_v9 = vmax.bf16 %v166_v62, %v137_v47  ;;  %v46_v14 = vld [vmem:[%s790_s0 + $0x130] sm:$0xff]  ;;  %v139_v17 = vld [vmem:[%s790_s0 + $0x418] sm:$0xff]  ;;  %v200_v20 = vmax.bf16 %v30_v13, %v14_v12  ;;  %v181_v21 = vmax.bf16 %v180_v10, %v107_v5  ;;  %v108_v22 = vld [vmem:[%s790_s0 + $0x320] sm:$0xff] }
  0x12   :  { %v187_v18 = vmax.bf16 %v186_v7, %v76_v2  ;;  %v93_v23 = vld [vmem:[%s790_s0 + $0x2a8] sm:$0xff]  ;;  %v194_v24 = vmax.bf16 %v193_v11, %v61_v8  ;;  %v62_v25 = vld [vmem:[%s790_s0 + $0x1b0] sm:$0xff]  ;;  %v175_v26 = vmax.bf16 %v174_v15, %v138_v0  ;;  %v15_v29 = vld [vmem:[%s790_s0 + $0x38] sm:$0xff] }
  0x13   :  { %280 = vst [vmem:[%s791_s1] sm:$0xff] %v159_v56  ;;  %281 = vst [vmem:[%s791_s1 + $0x8] sm:$0xff] %v167_v9  ;;  %v201_v28 = vmax.bf16 %v200_v20, %v46_v14  ;;  %v31_v30 = vld [vmem:[%s790_s0 + $0xb8] sm:$0xff]  ;;  %v182_v32 = vmax.bf16 %v181_v21, %v123_v16  ;;  %v124_v33 = vld [vmem:[%s790_s0 + $0x3a0] sm:$0xff] }
  0x14   :  { %v188_v27 = vmax.bf16 %v187_v18, %v92_v6  ;;  %v47_v31 = vld [vmem:[%s790_s0 + $0x138] sm:$0xff]  ;;  %v140_v34 = vld [vmem:[%s790_s0 + $0x420] sm:$0xff]  ;;  %v195_v35 = vmax.bf16 %v194_v24, %v77_v19  ;;  %v78_v36 = vld [vmem:[%s790_s0 + $0x230] sm:$0xff]  ;;  %v208_v37 = vmax.bf16 %v31_v30, %v15_v29  ;;  %282 = vst [vmem:[%s791_s1 + $0x10] sm:$0xff] %v175_v26 }
  0x15   :  { %v109_v39 = vld [vmem:[%s790_s0 + $0x328] sm:$0xff]  ;;  %v94_v40 = vld [vmem:[%s790_s0 + $0x2b0] sm:$0xff]  ;;  %v202_v41 = vmax.bf16 %v201_v28, %v62_v25  ;;  %v63_v42 = vld [vmem:[%s790_s0 + $0x1b8] sm:$0xff]  ;;  %v183_v43 = vmax.bf16 %v182_v32, %v139_v17 }
  0x16   :  { %v189_v38 = vmax.bf16 %v188_v27, %v108_v22  ;;  %v196_v44 = vmax.bf16 %v195_v35, %v93_v23  ;;  %v209_v45 = vmax.bf16 %v208_v37, %v47_v31  ;;  %v16_v46 = vld [vmem:[%s790_s0 + $0x40] sm:$0xff]  ;;  %v125_v50 = vld [vmem:[%s790_s0 + $0x3a8] sm:$0xff]  ;;  %v79_v53 = vld [vmem:[%s790_s0 + $0x238] sm:$0xff] }
  0x17   :  { %v32_v47 = vld [vmem:[%s790_s0 + $0xc0] sm:$0xff]  ;;  %v141_v51 = vld [vmem:[%s790_s0 + $0x428] sm:$0xff]  ;;  %v203_v52 = vmax.bf16 %v202_v41, %v78_v36  ;;  %283 = vst [vmem:[%s791_s1 + $0x18] sm:$0xff] %v183_v43  ;;  %v110_v56 = vld [vmem:[%s790_s0 + $0x330] sm:$0xff] }
  0x18   :  { %v48_v48 = vld [vmem:[%s790_s0 + $0x140] sm:$0xff]  ;;  %v190_v49 = vmax.bf16 %v189_v38, %v124_v33  ;;  %v216_v54 = vmax.bf16 %v32_v47, %v16_v46  ;;  %v197_v55 = vmax.bf16 %v196_v44, %v109_v39  ;;  %v95_v57 = vld [vmem:[%s790_s0 + $0x2b8] sm:$0xff]  ;;  %v210_v58 = vmax.bf16 %v209_v45, %v63_v42  ;;  %v17_v63 = vld [vmem:[%s790_s0 + $0x48] sm:$0xff] }
  0x19   :  { %v64_v59 = vld [vmem:[%s790_s0 + $0x1c0] sm:$0xff]  ;;  %v204_v61 = vmax.bf16 %v203_v52, %v94_v40  ;;  %v33_v0 = vld [vmem:[%s790_s0 + $0xc8] sm:$0xff]  ;;  %v126_v3 = vld [vmem:[%s790_s0 + $0x3b0] sm:$0xff] }
  0x1a   :  { %v191_v60 = vmax.bf16 %v190_v49, %v140_v34  ;;  %v217_v62 = vmax.bf16 %v216_v54, %v48_v48  ;;  %v49_v1 = vld [vmem:[%s790_s0 + $0x148] sm:$0xff]  ;;  %v198_v2 = vmax.bf16 %v197_v55, %v125_v50  ;;  %v142_v4 = vld [vmem:[%s790_s0 + $0x430] sm:$0xff]  ;;  %v211_v5 = vmax.bf16 %v210_v58, %v79_v53  ;;  %v80_v6 = vld [vmem:[%s790_s0 + $0x240] sm:$0xff] }
  0x1b   :  { %v224_v7 = vmax.bf16 %v33_v0, %v17_v63  ;;  %v205_v8 = vmax.bf16 %v204_v61, %v110_v56  ;;  %v111_v9 = vld [vmem:[%s790_s0 + $0x338] sm:$0xff]  ;;  %v96_v10 = vld [vmem:[%s790_s0 + $0x2c0] sm:$0xff]  ;;  %v65_v12 = vld [vmem:[%s790_s0 + $0x1c8] sm:$0xff] }
  0x1c   :  { %284 = vst [vmem:[%s791_s1 + $0x20] sm:$0xff] %v191_v60  ;;  %v218_v11 = vmax.bf16 %v217_v62, %v64_v59  ;;  %v199_v13 = vmax.bf16 %v198_v2, %v141_v51  ;;  %v212_v14 = vmax.bf16 %v211_v5, %v95_v57  ;;  %v18_v16 = vld [vmem:[%s790_s0 + $0x50] sm:$0xff]  ;;  %v127_v20 = vld [vmem:[%s790_s0 + $0x3b8] sm:$0xff]  ;;  %v81_v23 = vld [vmem:[%s790_s0 + $0x248] sm:$0xff] }
  0x1d   :  { %v225_v15 = vmax.bf16 %v224_v7, %v49_v1  ;;  %v34_v17 = vld [vmem:[%s790_s0 + $0xd0] sm:$0xff]  ;;  %v206_v19 = vmax.bf16 %v205_v8, %v126_v3  ;;  %v143_v21 = vld [vmem:[%s790_s0 + $0x438] sm:$0xff]  ;;  %v112_v26 = vld [vmem:[%s790_s0 + $0x340] sm:$0xff] }
  0x1e   :  { %v50_v18 = vld [vmem:[%s790_s0 + $0x150] sm:$0xff]  ;;  %v219_v22 = vmax.bf16 %v218_v11, %v80_v6  ;;  %v232_v24 = vmax.bf16 %v34_v17, %v18_v16  ;;  %285 = vst [vmem:[%s791_s1 + $0x28] sm:$0xff] %v199_v13  ;;  %v213_v25 = vmax.bf16 %v212_v14, %v111_v9  ;;  %v97_v27 = vld [vmem:[%s790_s0 + $0x2c8] sm:$0xff]  ;;  %v19_v33 = vld [vmem:[%s790_s0 + $0x58] sm:$0xff] }
  0x1f   :  { %v226_v28 = vmax.bf16 %v225_v15, %v65_v12  ;;  %v66_v29 = vld [vmem:[%s790_s0 + $0x1d0] sm:$0xff]  ;;  %v207_v30 = vmax.bf16 %v206_v19, %v142_v4  ;;  %v35_v34 = vld [vmem:[%s790_s0 + $0xd8] sm:$0xff]  ;;  %v128_v37 = vld [vmem:[%s790_s0 + $0x3c0] sm:$0xff] }
  0x20   :  { %v220_v31 = vmax.bf16 %v219_v22, %v96_v10  ;;  %v233_v32 = vmax.bf16 %v232_v24, %v50_v18  ;;  %v51_v35 = vld [vmem:[%s790_s0 + $0x158] sm:$0xff]  ;;  %v214_v36 = vmax.bf16 %v213_v25, %v127_v20  ;;  %v144_v38 = vld [vmem:[%s790_s0 + $0x440] sm:$0xff]  ;;  %v82_v40 = vld [vmem:[%s790_s0 + $0x250] sm:$0xff]  ;;  %v240_v41 = vmax.bf16 %v35_v34, %v19_v33 }
  0x21   :  { %v227_v39 = vmax.bf16 %v226_v28, %v81_v23  ;;  %286 = vst [vmem:[%s791_s1 + $0x30] sm:$0xff] %v207_v30  ;;  %v113_v43 = vld [vmem:[%s790_s0 + $0x348] sm:$0xff]  ;;  %v98_v44 = vld [vmem:[%s790_s0 + $0x2d0] sm:$0xff]  ;;  %v67_v46 = vld [vmem:[%s790_s0 + $0x1d8] sm:$0xff] }
  0x22   :  { %v221_v42 = vmax.bf16 %v220_v31, %v112_v26  ;;  %v234_v45 = vmax.bf16 %v233_v32, %v66_v29  ;;  %v215_v47 = vmax.bf16 %v214_v36, %v143_v21  ;;  %v241_v49 = vmax.bf16 %v240_v41, %v51_v35  ;;  %v20_v50 = vld [vmem:[%s790_s0 + $0x60] sm:$0xff]  ;;  %v129_v54 = vld [vmem:[%s790_s0 + $0x3c8] sm:$0xff]  ;;  %v83_v57 = vld [vmem:[%s790_s0 + $0x258] sm:$0xff] }
  0x23   :  { %v228_v48 = vmax.bf16 %v227_v39, %v97_v27  ;;  %v36_v51 = vld [vmem:[%s790_s0 + $0xe0] sm:$0xff]  ;;  %v145_v55 = vld [vmem:[%s790_s0 + $0x448] sm:$0xff]  ;;  %v114_v60 = vld [vmem:[%s790_s0 + $0x350] sm:$0xff] }
  0x24   :  { %v52_v52 = vld [vmem:[%s790_s0 + $0x160] sm:$0xff]  ;;  %v222_v53 = vmax.bf16 %v221_v42, %v128_v37  ;;  %v235_v56 = vmax.bf16 %v234_v45, %v82_v40  ;;  %v248_v58 = vmax.bf16 %v36_v51, %v20_v50  ;;  %287 = vst [vmem:[%s791_s1 + $0x38] sm:$0xff] %v215_v47  ;;  %v99_v61 = vld [vmem:[%s790_s0 + $0x2d8] sm:$0xff]  ;;  %v242_v62 = vmax.bf16 %v241_v49, %v67_v46  ;;  %v21_v3 = vld [vmem:[%s790_s0 + $0x68] sm:$0xff] }
  0x25   :  { %v229_v59 = vmax.bf16 %v228_v48, %v113_v43  ;;  %v68_v63 = vld [vmem:[%s790_s0 + $0x1e0] sm:$0xff]  ;;  %v37_v4 = vld [vmem:[%s790_s0 + $0xe8] sm:$0xff]  ;;  %v130_v7 = vld [vmem:[%s790_s0 + $0x3d0] sm:$0xff] }
  0x26   :  { %v223_v0 = vmax.bf16 %v222_v53, %v144_v38  ;;  %v236_v1 = vmax.bf16 %v235_v56, %v98_v44  ;;  %v249_v2 = vmax.bf16 %v248_v58, %v52_v52  ;;  %v53_v5 = vld [vmem:[%s790_s0 + $0x168] sm:$0xff]  ;;  %v146_v8 = vld [vmem:[%s790_s0 + $0x450] sm:$0xff]  ;;  %v243_v9 = vmax.bf16 %v242_v62, %v83_v57  ;;  %v84_v10 = vld [vmem:[%s790_s0 + $0x260] sm:$0xff] }
  0x27   :  { %v230_v6 = vmax.bf16 %v229_v59, %v129_v54  ;;  %v256_v11 = vmax.bf16 %v37_v4, %v21_v3  ;;  %v115_v13 = vld [vmem:[%s790_s0 + $0x358] sm:$0xff]  ;;  %v100_v14 = vld [vmem:[%s790_s0 + $0x2e0] sm:$0xff]  ;;  %v69_v16 = vld [vmem:[%s790_s0 + $0x1e8] sm:$0xff] }
  0x28   :  { %288 = vst [vmem:[%s791_s1 + $0x40] sm:$0xff] %v223_v0  ;;  %v237_v12 = vmax.bf16 %v236_v1, %v114_v60  ;;  %v250_v15 = vmax.bf16 %v249_v2, %v68_v63  ;;  %v244_v18 = vmax.bf16 %v243_v9, %v99_v61  ;;  %v22_v20 = vld [vmem:[%s790_s0 + $0x70] sm:$0xff]  ;;  %v131_v24 = vld [vmem:[%s790_s0 + $0x3d8] sm:$0xff]  ;;  %v85_v27 = vld [vmem:[%s790_s0 + $0x268] sm:$0xff] }
  0x29   :  { %v231_v17 = vmax.bf16 %v230_v6, %v145_v55  ;;  %v257_v19 = vmax.bf16 %v256_v11, %v53_v5  ;;  %v38_v21 = vld [vmem:[%s790_s0 + $0xf0] sm:$0xff]  ;;  %v147_v25 = vld [vmem:[%s790_s0 + $0x458] sm:$0xff]  ;;  %v116_v30 = vld [vmem:[%s790_s0 + $0x360] sm:$0xff] }
  0x2a   :  { %v54_v22 = vld [vmem:[%s790_s0 + $0x170] sm:$0xff]  ;;  %v238_v23 = vmax.bf16 %v237_v12, %v130_v7  ;;  %v251_v26 = vmax.bf16 %v250_v15, %v84_v10  ;;  %v264_v28 = vmax.bf16 %v38_v21, %v22_v20  ;;  %v245_v29 = vmax.bf16 %v244_v18, %v115_v13  ;;  %v101_v31 = vld [vmem:[%s790_s0 + $0x2e8] sm:$0xff]  ;;  %v23_v37 = vld [vmem:[%s790_s0 + $0x78] sm:$0xff] }
  0x2b   :  { %289 = vst [vmem:[%s791_s1 + $0x48] sm:$0xff] %v231_v17  ;;  %v258_v32 = vmax.bf16 %v257_v19, %v69_v16  ;;  %v70_v33 = vld [vmem:[%s790_s0 + $0x1f0] sm:$0xff]  ;;  %v39_v38 = vld [vmem:[%s790_s0 + $0xf8] sm:$0xff]  ;;  %v132_v41 = vld [vmem:[%s790_s0 + $0x3e0] sm:$0xff] }
  0x2c   :  { %v239_v34 = vmax.bf16 %v238_v23, %v146_v8  ;;  %v252_v35 = vmax.bf16 %v251_v26, %v100_v14  ;;  %v265_v36 = vmax.bf16 %v264_v28, %v54_v22  ;;  %v55_v39 = vld [vmem:[%s790_s0 + $0x178] sm:$0xff]  ;;  %v246_v40 = vmax.bf16 %v245_v29, %v131_v24  ;;  %v86_v43 = vld [vmem:[%s790_s0 + $0x270] sm:$0xff]  ;;  %v117_v46 = vld [vmem:[%s790_s0 + $0x368] sm:$0xff] }
  0x2d   :  { %v259_v42 = vmax.bf16 %v258_v32, %v85_v27  ;;  %v272_v44 = vmax.bf16 %v39_v38, %v23_v37  ;;  %v71_v48 = vld [vmem:[%s790_s0 + $0x1f8] sm:$0xff]  ;;  %v148_v50 = vld [vmem:[%s790_s0 + $0x460] sm:$0xff]  ;;  %v102_v52 = vld [vmem:[%s790_s0 + $0x2f0] sm:$0xff] }
  0x2e   :  { %290 = vst [vmem:[%s791_s1 + $0x50] sm:$0xff] %v239_v34  ;;  %v253_v45 = vmax.bf16 %v252_v35, %v116_v30  ;;  %v266_v47 = vmax.bf16 %v265_v36, %v70_v33  ;;  %v247_v49 = vmax.bf16 %v246_v40, %v147_v25  ;;  %v133_v55 = vld [vmem:[%s790_s0 + $0x3e8] sm:$0xff]  ;;  %v87_v57 = vld [vmem:[%s790_s0 + $0x278] sm:$0xff]  ;;  %v118_v59 = vld [vmem:[%s790_s0 + $0x370] sm:$0xff] }
  0x2f   :  { %v260_v51 = vmax.bf16 %v259_v42, %v101_v31  ;;  %v273_v53 = vmax.bf16 %v272_v44, %v55_v39  ;;  %v149_v62 = vld [vmem:[%s790_s0 + $0x468] sm:$0xff]  ;;  %v103_v0 = vld [vmem:[%s790_s0 + $0x2f8] sm:$0xff]  ;;  %v134_v2 = vld [vmem:[%s790_s0 + $0x3f0] sm:$0xff] }
  0x30   :  { %v254_v54 = vmax.bf16 %v253_v45, %v132_v41  ;;  %v267_v56 = vmax.bf16 %v266_v47, %v86_v43  ;;  %291 = vst [vmem:[%s791_s1 + $0x58] sm:$0xff] %v247_v49  ;;  %v119_v5 = vld [vmem:[%s790_s0 + $0x378] sm:$0xff]  ;;  %v150_v7 = vld [vmem:[%s790_s0 + $0x470] sm:$0xff] }
  0x31   :  { %v261_v58 = vmax.bf16 %v260_v51, %v117_v46  ;;  %v274_v60 = vmax.bf16 %v273_v53, %v71_v48  ;;  %v135_v10 = vld [vmem:[%s790_s0 + $0x3f8] sm:$0xff] }
  0x32   :  { %v255_v61 = vmax.bf16 %v254_v54, %v148_v50  ;;  %v268_v63 = vmax.bf16 %v267_v56, %v102_v52  ;;  %v151_v13 = vld [vmem:[%s790_s0 + $0x478] sm:$0xff] }
  0x33   :  { %v262_v1 = vmax.bf16 %v261_v58, %v133_v55  ;;  %v275_v3 = vmax.bf16 %v274_v60, %v87_v57 }
  0x34   :  { %292 = vst [vmem:[%s791_s1 + $0x60] sm:$0xff] %v255_v61  ;;  %v269_v4 = vmax.bf16 %v268_v63, %v118_v59 }
  0x35   :  { %v263_v6 = vmax.bf16 %v262_v1, %v149_v62  ;;  %v276_v8 = vmax.bf16 %v275_v3, %v103_v0 }
  0x36   :  { %v270_v9 = vmax.bf16 %v269_v4, %v134_v2 }
  0x37   :  { %293 = vst [vmem:[%s791_s1 + $0x68] sm:$0xff] %v263_v6  ;;  %v277_v11 = vmax.bf16 %v276_v8, %v119_v5 }
  0x38   :  { %v271_v12 = vmax.bf16 %v270_v9, %v150_v7 }
  0x39   :  { %v278_v14 = vmax.bf16 %v277_v11, %v135_v10 }
  0x3a   :  { %294 = vst [vmem:[%s791_s1 + $0x70] sm:$0xff] %v271_v12 }
  0x3b   :  { %v279_v15 = vmax.bf16 %v278_v14, %v151_v13 }
  0x3d   :  { %295 = vst [vmem:[%s791_s1 + $0x78] sm:$0xff] %v279_v15 }

// kernel: resnet34_forward.41
= control target key start
LH: loop header
LB: loop body
LE: loop exit
PB: predicated region body
PF: predicated region fallthrough
CT: control target
= control target key end

     0   :  { %s1736_s12 = smov 0   ;;  %s1738_s13 = smov 0   ;;  %s1981_s0 = inlined_call_operand.vmem [shape: bf16[512,640], index: 0, kind: input, shape index: {}]   ;;  %s1982_s1 = inlined_call_operand.vmem [shape: bf16[640,128], index: 1, kind: input, shape index: {}]   ;;  %s1983_s2 = inlined_call_operand.vmem [shape: f32[1,128], index: 2, kind: input, shape index: {}]   ;;  %s1984_s3 = inlined_call_operand.vmem [shape: bf16[512,128], index: 3, kind: output, shape index: {}]  }
   0x1   :  { %s1740_s14 = smov 0   ;;  %s1742_s15 = smov 0  }
   0x2   :  { %s1744_s16 = smov 0   ;;  %s1746_s17 = smov 0  }
   0x3   :  { %s1748_s18 = smov 0  }
   0x4 LB: > { %s25_s19 = sadd.s32 1, %s1705_s16  ;;  %s32_s20 = sadd.s32 1, %s1709_s17  ;;  %s1713_s18 = sphi %s1748_s18, %s13_s18   ;;  %s1709_s17 = sphi %s1746_s17, %s1990_s17   ;;  %s1705_s16 = sphi %s1744_s16, %s1989_s16   ;;  %s1701_s15 = sphi %s1742_s15, %s1988_s15   ;;  %s1697_s14 = sphi %s1740_s14, %s1987_s14   ;;  %s1693_s13 = sphi %s1738_s13, %s1986_s13   ;;  %s1689_s12 = sphi %s1736_s12, %s1985_s12  }
   0x5   : > { %p26_p0 = scmp.ge.s32.totalorder %s25_s19, 5  ;;  %p48_p1 = scmp.ne.s32.totalorder %s1693_s13, %s1689_s12 }
   0x6   : > { %p49_p2 = scmp.eq.s32.totalorder %s1713_s18, 0  ;;  %s41_s24 = sadd.s32 1, %s1693_s13 }
   0x7   : > { %s1992_s19 = smov (%p26_p0, %s25_s19), 0  ;;  %s1994_s20 = smov (!%p26_p0, %s32_s20), %s1709_s17 }
   0x8   : > { %p50_p3 = por %p49_p2, %p48_p1  ;;  %p34_p4 = scmp.ge.s32.totalorder %s1994_s20, 2 }
   0x9   : > { %s37_s21 = ssub.s32 %s1705_s16, %s1992_s19  ;;  %p1290_p6 = scmp.ge.s32.totalorder %s1713_s18, 10 }
   0xa   : > { %s1996_s20 = smov (%p34_p4, %s1994_s20), 0 }
   0xb   : > { %s36_s22 = ssub.s32 %s1709_s17, %s1996_s20  ;;  %162 = sbr.rel (%p1290_p6) target bundleno = 46 (0x2e), region = 20 }
   0xc   : > { %s38_s23 = sor.u32 %s37_s21, %s36_s22 }
   0xd   : > { %p39_p5 = scmp.eq.s32.totalorder %s38_s23, 0 }
   0xf   : > { %s1787_s25 = scalar_select %p39_p5, %s1693_s13, %s41_s24  }
  0x12   : > { %165 = sbr.rel (!%p50_p3) target bundleno = 46 (0x2e), region = 24  ;;  %s167_s26 = sand.u32 (%p50_p3), 1, %s1693_s13  }
  0x13   : > { %s1577_s27 = smul.u32 (%p50_p3), 160, %s1709_s17  ;;  %s1291_s28 = sshll.u32 (%p50_p3), %s167_s26, 7 }
  0x14   : > { %s1801_s7 = scalar_lea.vmem (%p50_p3), [#allocation3], %s1291_s28 }
  0x15   : > { %s172_s29 = sadd.s32 (%p50_p3), %s1705_s16, %s1577_s27 }
  0x16   : > { %s1294_s30 = sshll.u32 (%p50_p3), %s172_s29, 2 }
  0x17   : > { %s1796_s6 = scalar_lea.vmem (%p50_p3), %s1981_s0, %s1294_s30 }
  0x18   : > { %v190_v0 = vld [vmem:[%s1796_s6] sm:$0xf] (%p50_p3)  ;;  %v192_v1 = vld [vmem:[%s1796_s6 + $0x14] sm:$0xf] (%p50_p3)  ;;  %v194_v2 = vld [vmem:[%s1796_s6 + $0x28] sm:$0xf] (%p50_p3) }
  0x19   : > { %191 = vst [vmem:[%s1801_s7] sm:$0xf] %v190_v0  ;;  %193 = vst [vmem:[%s1801_s7 + $0x4] sm:$0xf] %v192_v1  ;;  %v196_v3 = vld [vmem:[%s1796_s6 + $0x3c] sm:$0xf] }
  0x1a   : > { %195 = vst [vmem:[%s1801_s7 + $0x8] sm:$0xf] %v194_v2  ;;  %v198_v4 = vld [vmem:[%s1796_s6 + $0x50] sm:$0xf]  ;;  %v200_v5 = vld [vmem:[%s1796_s6 + $0x64] sm:$0xf] }
  0x1b   : > { %197 = vst [vmem:[%s1801_s7 + $0xc] sm:$0xf] %v196_v3  ;;  %199 = vst [vmem:[%s1801_s7 + $0x10] sm:$0xf] %v198_v4  ;;  %v202_v6 = vld [vmem:[%s1796_s6 + $0x78] sm:$0xf] }
  0x1c   : > { %201 = vst [vmem:[%s1801_s7 + $0x14] sm:$0xf] %v200_v5  ;;  %v204_v7 = vld [vmem:[%s1796_s6 + $0x8c] sm:$0xf]  ;;  %v206_v8 = vld [vmem:[%s1796_s6 + $0xa0] sm:$0xf] }
  0x1d   : > { %203 = vst [vmem:[%s1801_s7 + $0x18] sm:$0xf] %v202_v6  ;;  %205 = vst [vmem:[%s1801_s7 + $0x1c] sm:$0xf] %v204_v7  ;;  %v208_v9 = vld [vmem:[%s1796_s6 + $0xb4] sm:$0xf] }
  0x1e   : > { %207 = vst [vmem:[%s1801_s7 + $0x20] sm:$0xf] %v206_v8  ;;  %v210_v10 = vld [vmem:[%s1796_s6 + $0xc8] sm:$0xf]  ;;  %v212_v11 = vld [vmem:[%s1796_s6 + $0xdc] sm:$0xf] }
  0x1f   : > { %209 = vst [vmem:[%s1801_s7 + $0x24] sm:$0xf] %v208_v9  ;;  %211 = vst [vmem:[%s1801_s7 + $0x28] sm:$0xf] %v210_v10  ;;  %v214_v12 = vld [vmem:[%s1796_s6 + $0xf0] sm:$0xf] }
  0x20   : > { %213 = vst [vmem:[%s1801_s7 + $0x2c] sm:$0xf] %v212_v11  ;;  %v216_v13 = vld [vmem:[%s1796_s6 + $0x104] sm:$0xf]  ;;  %v218_v14 = vld [vmem:[%s1796_s6 + $0x118] sm:$0xf] }
  0x21   : > { %215 = vst [vmem:[%s1801_s7 + $0x30] sm:$0xf] %v214_v12  ;;  %217 = vst [vmem:[%s1801_s7 + $0x34] sm:$0xf] %v216_v13  ;;  %v220_v15 = vld [vmem:[%s1796_s6 + $0x12c] sm:$0xf] }
  0x22   : > { %219 = vst [vmem:[%s1801_s7 + $0x38] sm:$0xf] %v218_v14  ;;  %v222_v16 = vld [vmem:[%s1796_s6 + $0x140] sm:$0xf]  ;;  %v224_v17 = vld [vmem:[%s1796_s6 + $0x154] sm:$0xf] }
  0x23   : > { %221 = vst [vmem:[%s1801_s7 + $0x3c] sm:$0xf] %v220_v15  ;;  %223 = vst [vmem:[%s1801_s7 + $0x40] sm:$0xf] %v222_v16  ;;  %v226_v18 = vld [vmem:[%s1796_s6 + $0x168] sm:$0xf] }
  0x24   : > { %225 = vst [vmem:[%s1801_s7 + $0x44] sm:$0xf] %v224_v17  ;;  %v228_v19 = vld [vmem:[%s1796_s6 + $0x17c] sm:$0xf]  ;;  %v230_v20 = vld [vmem:[%s1796_s6 + $0x190] sm:$0xf] }
  0x25   : > { %227 = vst [vmem:[%s1801_s7 + $0x48] sm:$0xf] %v226_v18  ;;  %229 = vst [vmem:[%s1801_s7 + $0x4c] sm:$0xf] %v228_v19  ;;  %v232_v21 = vld [vmem:[%s1796_s6 + $0x1a4] sm:$0xf] }
  0x26   : > { %231 = vst [vmem:[%s1801_s7 + $0x50] sm:$0xf] %v230_v20  ;;  %v234_v22 = vld [vmem:[%s1796_s6 + $0x1b8] sm:$0xf]  ;;  %v236_v23 = vld [vmem:[%s1796_s6 + $0x1cc] sm:$0xf] }
  0x27   : > { %233 = vst [vmem:[%s1801_s7 + $0x54] sm:$0xf] %v232_v21  ;;  %235 = vst [vmem:[%s1801_s7 + $0x58] sm:$0xf] %v234_v22  ;;  %v238_v24 = vld [vmem:[%s1796_s6 + $0x1e0] sm:$0xf] }
  0x28   : > { %237 = vst [vmem:[%s1801_s7 + $0x5c] sm:$0xf] %v236_v23  ;;  %v240_v25 = vld [vmem:[%s1796_s6 + $0x1f4] sm:$0xf]  ;;  %v242_v26 = vld [vmem:[%s1796_s6 + $0x208] sm:$0xf] }
  0x29   : > { %239 = vst [vmem:[%s1801_s7 + $0x60] sm:$0xf] %v238_v24  ;;  %241 = vst [vmem:[%s1801_s7 + $0x64] sm:$0xf] %v240_v25  ;;  %v244_v27 = vld [vmem:[%s1796_s6 + $0x21c] sm:$0xf] }
  0x2a   : > { %243 = vst [vmem:[%s1801_s7 + $0x68] sm:$0xf] %v242_v26  ;;  %v246_v28 = vld [vmem:[%s1796_s6 + $0x230] sm:$0xf]  ;;  %v248_v29 = vld [vmem:[%s1796_s6 + $0x244] sm:$0xf] }
  0x2b   : > { %245 = vst [vmem:[%s1801_s7 + $0x6c] sm:$0xf] %v244_v27  ;;  %247 = vst [vmem:[%s1801_s7 + $0x70] sm:$0xf] %v246_v28  ;;  %v250_v30 = vld [vmem:[%s1796_s6 + $0x258] sm:$0xf] }
  0x2c   : > { %249 = vst [vmem:[%s1801_s7 + $0x74] sm:$0xf] %v248_v29  ;;  %v252_v31 = vld [vmem:[%s1796_s6 + $0x26c] sm:$0xf]  ;;  %251 = vst [vmem:[%s1801_s7 + $0x78] sm:$0xf] %v250_v30 }
  0x2d   : > { %253 = vst [vmem:[%s1801_s7 + $0x7c] sm:$0xf] %v252_v31 }
  0x2e PF: > { %p1295_p7 = scmp.ge.s32.totalorder %s1713_s18, 1  ;;  %p351_p8 = scmp.lt.s32.totalorder %s1713_s18, 11 }
  0x30   : > { %p352_p9 = pnand %p1295_p7, %p351_p8 }
  0x31   : > { %s358_s8 = sand.u32 (!%p352_p9), 1, %s1689_s12   ;;  %s1297_s9 = sshll.u32 (!%p352_p9), %s1697_s14, 4 }
  0x32   : > { %355 = sbr.rel (%p352_p9) target bundleno = 366 (0x16e), region = 69  ;;  %s1296_s10 = sshll.u32 (!%p352_p9), %s358_s8, 7 }
  0x33   : > { %p397_p10 = scmp.lt.s32.totalorder (!%p352_p9), %s1297_s9, 79  ;;  %s1299_s11 = sshll.u32 (!%p352_p9), %s1701_s15, 5 }
  0x34   : > { %p409_p11 = scmp.lt.s32.totalorder (!%p352_p9), %s1299_s11, 63  ;;  %s1879_s12 = scalar_lea.vmem (!%p352_p9), [#allocation3], %s1296_s10 }
  0x35   : > { %p1301_p12 = scmp.ne.s32.totalorder (!%p352_p9), %s1697_s14, 0 }
  0x39   : > { %s1998_s9 = smov (!%p397_p10, %s1297_s9), 79  ;;  %s2000_s11 = smov (!%p409_p11, %s1299_s11), 63 }
  0x3a   : > { %s1298_s21 = sshll.u32 %s1998_s9, 2  ;;  %s1300_s26 = sshll.u32 %s2000_s11, 2  ;;  %v1715_v32 = vmov (!%p1301_p12), 0.0  }
  0x3b   : > { %s1872_s24 = scalar_lea.vmem %s1982_s1, %s1298_s21  ;;  %s1877_s29 = scalar_lea.vmem %s1984_s3, %s1300_s26  ;;  %422 = vst [vmem:[#allocation2] sm:$0xff] (!%p1301_p12), %v1715_v32  ;;  %423 = vst [vmem:[#allocation2 + $0x8] sm:$0xff] (!%p1301_p12), %v1715_v32 }
  0x3c   : > { %421 = sbr.rel (%p1301_p12) target bundleno = 75 (0x4b), region = 77  ;;  %424 = vst [vmem:[#allocation2 + $0x10] sm:$0xff] (!%p1301_p12), %v1715_v32  ;;  %425 = vst [vmem:[#allocation2 + $0x18] sm:$0xff] (!%p1301_p12), %v1715_v32 }
  0x3d   : > { %426 = vst [vmem:[#allocation2 + $0x20] sm:$0xff] (!%p1301_p12), %v1715_v32  ;;  %427 = vst [vmem:[#allocation2 + $0x28] sm:$0xff] (!%p1301_p12), %v1715_v32 }
  0x3e   : > { %428 = vst [vmem:[#allocation2 + $0x30] sm:$0xff] (!%p1301_p12), %v1715_v32  ;;  %429 = vst [vmem:[#allocation2 + $0x38] sm:$0xff] (!%p1301_p12), %v1715_v32 }
  0x3f   : > { %430 = vst [vmem:[#allocation2 + $0x40] sm:$0xff] (!%p1301_p12), %v1715_v32  ;;  %431 = vst [vmem:[#allocation2 + $0x48] sm:$0xff] (!%p1301_p12), %v1715_v32 }
  0x40   : > { %432 = vst [vmem:[#allocation2 + $0x50] sm:$0xff] (!%p1301_p12), %v1715_v32  ;;  %433 = vst [vmem:[#allocation2 + $0x58] sm:$0xff] (!%p1301_p12), %v1715_v32 }
  0x41   : > { %434 = vst [vmem:[#allocation2 + $0x60] sm:$0xff] (!%p1301_p12), %v1715_v32  ;;  %435 = vst [vmem:[#allocation2 + $0x68] sm:$0xff] (!%p1301_p12), %v1715_v32 }
  0x42   : > { %436 = vst [vmem:[#allocation2 + $0x70] sm:$0xff] (!%p1301_p12), %v1715_v32  ;;  %437 = vst [vmem:[#allocation2 + $0x78] sm:$0xff] (!%p1301_p12), %v1715_v32 }
  0x43   : > { %438 = vst [vmem:[#allocation2 + $0x80] sm:$0xff] %v1715_v32  ;;  %439 = vst [vmem:[#allocation2 + $0x88] sm:$0xff] %v1715_v32 }
  0x44   : > { %440 = vst [vmem:[#allocation2 + $0x90] sm:$0xff] %v1715_v32  ;;  %441 = vst [vmem:[#allocation2 + $0x98] sm:$0xff] %v1715_v32 }
  0x45   : > { %442 = vst [vmem:[#allocation2 + $0xa0] sm:$0xff] %v1715_v32  ;;  %443 = vst [vmem:[#allocation2 + $0xa8] sm:$0xff] %v1715_v32 }
  0x46   : > { %444 = vst [vmem:[#allocation2 + $0xb0] sm:$0xff] %v1715_v32  ;;  %445 = vst [vmem:[#allocation2 + $0xb8] sm:$0xff] %v1715_v32 }
  0x47   : > { %446 = vst [vmem:[#allocation2 + $0xc0] sm:$0xff] %v1715_v32  ;;  %447 = vst [vmem:[#allocation2 + $0xc8] sm:$0xff] %v1715_v32 }
  0x48   : > { %448 = vst [vmem:[#allocation2 + $0xd0] sm:$0xff] %v1715_v32  ;;  %449 = vst [vmem:[#allocation2 + $0xd8] sm:$0xff] %v1715_v32 }
  0x49   : > { %450 = vst [vmem:[#allocation2 + $0xe0] sm:$0xff] %v1715_v32  ;;  %451 = vst [vmem:[#allocation2 + $0xe8] sm:$0xff] %v1715_v32 }
  0x4a   : > { %452 = vst [vmem:[#allocation2 + $0xf0] sm:$0xff] %v1715_v32  ;;  %453 = vst [vmem:[#allocation2 + $0xf8] sm:$0xff] %v1715_v32 }
  0x4b PF: > { %v1635_v33 = vld [vmem:[%s1872_s24] sm:$0xff]   ;;  %v1636_v34 = vld [vmem:[%s1872_s24 + $0x8] sm:$0xff]   ;;  %v1637_v35 = vld [vmem:[%s1872_s24 + $0x10] sm:$0xff]   ;;  %p1326_p13 = scmp.ne.s32.totalorder %s1697_s14, 4 }
  0x4c   : > { %1513 = vmatprep.subr.bf16.mxu0 %v1635_v33  ;;  %1561 = vmatprep.subr.bf16.mxu1 %v1635_v33  ;;  %v1638_v36 = vld [vmem:[%s1872_s24 + $0x18] sm:$0xff]   ;;  %v1643_v37 = vld [vmem:[%s1879_s12] sm:$0xff]   ;;  %v1640_v40 = vld [vmem:[%s1872_s24 + $0x28] sm:$0xff]  }
  0x4d   : > { %1514 = vmatpush3.bf16.msra.mxu0 %v1635_v33  ;;  %1569 = vmatpush3.bf16.msra.mxu1 %v1635_v33  ;;  %v1644_v38 = vld [vmem:[%s1879_s12 + $0x40] sm:$0xff]   ;;  %v1641_v41 = vld [vmem:[%s1872_s24 + $0x30] sm:$0xff]   ;;  %v1642_v42 = vld [vmem:[%s1872_s24 + $0x38] sm:$0xff]  }
  0x4e   : > { %1515 = vmatprep.subr.bf16.mxu0 %v1636_v34  ;;  %1562 = vmatprep.subr.bf16.mxu1 %v1636_v34  ;;  %v1639_v39 = vld [vmem:[%s1872_s24 + $0x20] sm:$0xff]   ;;  %v1645_v43 = vld [vmem:[%s1879_s12 + $0x8] sm:$0xff]   ;;  %v1647_v45 = vld [vmem:[%s1879_s12 + $0x10] sm:$0xff]  }
  0x4f   : > { %1529 = vmatprep.mubr.bf16.mxu0 %v1643_v37  ;;  %1545 = vmatprep.mubr.bf16.mxu1 %v1644_v38  ;;  %v1646_v44 = vld [vmem:[%s1879_s12 + $0x48] sm:$0xff]   ;;  %v1648_v46 = vld [vmem:[%s1879_s12 + $0x50] sm:$0xff]   ;;  %v1649_v47 = vld [vmem:[%s1879_s12 + $0x18] sm:$0xff]  }
  0x50   : > { %v1650_v48 = vld [vmem:[%s1879_s12 + $0x58] sm:$0xff]   ;;  %v1651_v49 = vld [vmem:[%s1879_s12 + $0x20] sm:$0xff]   ;;  %v1653_v51 = vld [vmem:[%s1879_s12 + $0x28] sm:$0xff]  }
  0x51   : > { %1516 = vmatpush3.bf16.msra.mxu0 %v1636_v34  ;;  %1570 = vmatpush3.bf16.msra.mxu1 %v1636_v34  ;;  %v1652_v50 = vld [vmem:[%s1879_s12 + $0x60] sm:$0xff]   ;;  %v1654_v52 = vld [vmem:[%s1879_s12 + $0x68] sm:$0xff]   ;;  %v1655_v53 = vld [vmem:[%s1879_s12 + $0x30] sm:$0xff]  }
  0x52   : > { %1517 = vmatprep.subr.bf16.mxu0 %v1637_v35  ;;  %1563 = vmatprep.subr.bf16.mxu1 %v1637_v35  ;;  %v1656_v54 = vld [vmem:[%s1879_s12 + $0x70] sm:$0xff]   ;;  %v1657_v55 = vld [vmem:[%s1879_s12 + $0x38] sm:$0xff]   ;;  %v454_v59 = vld [vmem:[#allocation2] sm:$0xff] }
  0x53   : > { %v1658_v56 = vld [vmem:[%s1879_s12 + $0x78] sm:$0xff]   ;;  %v456_v57 = vld [vmem:[#allocation2 + $0x10] sm:$0xff]  ;;  %v470_v60 = vld [vmem:[#allocation2 + $0x80] sm:$0xff] }
  0x54   : > { %v472_v58 = vld [vmem:[#allocation2 + $0x90] sm:$0xff]  ;;  %v457_v63 = vld [vmem:[#allocation2 + $0x18] sm:$0xff]  ;;  %v455_v5 = vld [vmem:[#allocation2 + $0x8] sm:$0xff] }
  0x55   : > { %1518 = vmatpush3.bf16.msra.mxu0 %v1637_v35  ;;  %1571 = vmatpush3.bf16.msra.mxu1 %v1637_v35  ;;  %v473_v0 = vld [vmem:[#allocation2 + $0x98] sm:$0xff]  ;;  %v471_v6 = vld [vmem:[#allocation2 + $0x88] sm:$0xff]  ;;  %v460_v17 = vld [vmem:[#allocation2 + $0x30] sm:$0xff] }
  0x56   : > { %1519 = vmatprep.subr.bf16.mxu0 %v1638_v36  ;;  %1564 = vmatprep.subr.bf16.mxu1 %v1638_v36  ;;  %v476_v18 = vld [vmem:[#allocation2 + $0xb0] sm:$0xff]  ;;  %v458_v19 = vld [vmem:[#allocation2 + $0x20] sm:$0xff]  ;;  %v461_v23 = vld [vmem:[#allocation2 + $0x38] sm:$0xff] }
  0x57   : > { %v474_v20 = vld [vmem:[#allocation2 + $0xa0] sm:$0xff]  ;;  %v477_v24 = vld [vmem:[#allocation2 + $0xb8] sm:$0xff]  ;;  %v459_v29 = vld [vmem:[#allocation2 + $0x28] sm:$0xff] }
  0x58   : > { %v475_v30 = vld [vmem:[#allocation2 + $0xa8] sm:$0xff] }
  0x59   : > { %1520 = vmatpush3.bf16.msra.mxu0 %v1638_v36  ;;  %1572 = vmatpush3.bf16.msra.mxu1 %v1638_v36 }
  0x5a   : > { %1521 = vmatprep.subr.bf16.mxu0 %v1639_v39  ;;  %1565 = vmatprep.subr.bf16.mxu1 %v1639_v39 }
  0x5d   : > { %1522 = vmatpush3.bf16.msra.mxu0 %v1639_v39  ;;  %1573 = vmatpush3.bf16.msra.mxu1 %v1639_v39 }
  0x5e   : > { %1523 = vmatprep.subr.bf16.mxu0 %v1640_v40  ;;  %1566 = vmatprep.subr.bf16.mxu1 %v1640_v40 }
  0x61   : > { %1524 = vmatpush3.bf16.msra.mxu0 %v1640_v40  ;;  %1574 = vmatpush3.bf16.msra.mxu1 %v1640_v40 }
  0x62   : > { %1525 = vmatprep.subr.bf16.mxu0 %v1641_v41  ;;  %1567 = vmatprep.subr.bf16.mxu1 %v1641_v41 }
  0x65   : > { %1526 = vmatpush3.bf16.msra.mxu0 %v1641_v41  ;;  %1575 = vmatpush3.bf16.msra.mxu1 %v1641_v41  ;;  %v464_v41 = vld [vmem:[#allocation2 + $0x50] sm:$0xff] }
  0x66   : > { %1527 = vmatprep.subr.bf16.mxu0 %v1642_v42  ;;  %1568 = vmatprep.subr.bf16.mxu1 %v1642_v42 }
  0x69   : > { %1528 = vmatpush3.bf16.msra.mxu0 %v1642_v42  ;;  %1576 = vmatpush3.bf16.msra.mxu1 %v1642_v42  ;;  %v480_v42 = vld [vmem:[#allocation2 + $0xd0] sm:$0xff] }
  0x6c   : > { %1530 = vmatmul.mubr.bf16.vlgmr.msra.gmra.mrb[0].mxu0 %v1645_v43  ;;  %1546 = vmatmul.mubr.bf16.vlgmr.msra.gmra.mrb[0].mxu1 %v1646_v44  ;;  %v462_v43 = vld [vmem:[#allocation2 + $0x40] sm:$0xff] }
  0x6d   : > { %1533 = vmatprep.mubr.bf16.mxu0 %v1647_v45  ;;  %1549 = vmatprep.mubr.bf16.mxu1 %v1648_v46  ;;  %v478_v44 = vld [vmem:[#allocation2 + $0xc0] sm:$0xff] }
  0x74   : > { %1534 = vmatmul.mubr.bf16.gmra.mrb[4].mxu0 %v1649_v47  ;;  %1550 = vmatmul.mubr.bf16.gmra.mrb[4].mxu1 %v1650_v48  ;;  %v465_v47 = vld [vmem:[#allocation2 + $0x58] sm:$0xff] }
  0x75   : > { %1537 = vmatprep.mubr.bf16.mxu0 %v1651_v49  ;;  %1553 = vmatprep.mubr.bf16.mxu1 %v1652_v50  ;;  %v481_v48 = vld [vmem:[#allocation2 + $0xd8] sm:$0xff] }
  0x7c   : > { %1538 = vmatmul.mubr.bf16.gmra.mrb[8].mxu0 %v1653_v51  ;;  %1554 = vmatmul.mubr.bf16.gmra.mrb[8].mxu1 %v1654_v52 }
  0x7d   : > { %1541 = vmatprep.mubr.bf16.mxu0 %v1655_v53  ;;  %1557 = vmatprep.mubr.bf16.mxu1 %v1656_v54  ;;  %v463_v53 = vld [vmem:[#allocation2 + $0x48] sm:$0xff] }
  0x7e   : > { %v479_v54 = vld [vmem:[#allocation2 + $0xc8] sm:$0xff] }
  0x84   : > { %1542 = vmatmul.mubr.bf16.gmra.mrb[12].mxu0 %v1657_v55  ;;  %1558 = vmatmul.mubr.bf16.gmra.mrb[12].mxu1 %v1658_v56 }
 0x13f   : > { %v1531_v61 = vpop.f32.mrb[0].mxu0  ;;  %v1547_v62 = vpop.f32.mrb[0].mxu1 }
 0x140   : > { %v841_v1 = vadd.f32 %v1531_v61, %v456_v57  ;;  %v857_v2 = vadd.f32 %v1547_v62, %v472_v58  ;;  %v712_v3 = vpop.f32.mrb[1].mxu0  ;;  %v776_v4 = vpop.f32.mrb[1].mxu1 }
 0x141   : > { %v839_v7 = vadd.f32 %v712_v3, %v454_v59  ;;  %v855_v8 = vadd.f32 %v776_v4, %v470_v60  ;;  %v1532_v9 = vpop.f32.mrb[2].mxu0  ;;  %v1548_v10 = vpop.f32.mrb[2].mxu1  ;;  %v466_v3 = vld [vmem:[#allocation2 + $0x60] sm:$0xff] }
 0x142   : > { %873 = vst [vmem:[#allocation2 + $0x10] sm:$0xff] %v841_v1  ;;  %889 = vst [vmem:[#allocation2 + $0x90] sm:$0xff] %v857_v2  ;;  %v842_v11 = vadd.f32 %v1532_v9, %v457_v63  ;;  %v858_v12 = vadd.f32 %v1548_v10, %v473_v0  ;;  %v715_v13 = vpop.f32.mrb[3].mxu0  ;;  %v779_v14 = vpop.f32.mrb[3].mxu1  ;;  %v468_v1 = vld [vmem:[#allocation2 + $0x70] sm:$0xff]  ;;  %v482_v4 = vld [vmem:[#allocation2 + $0xe0] sm:$0xff] }
 0x143   : > { %871 = vst [vmem:[#allocation2] sm:$0xff] %v839_v7  ;;  %887 = vst [vmem:[#allocation2 + $0x80] sm:$0xff] %v855_v8  ;;  %v840_v15 = vadd.f32 %v715_v13, %v455_v5  ;;  %v856_v16 = vadd.f32 %v779_v14, %v471_v6  ;;  %v484_v2 = vld [vmem:[#allocation2 + $0xf0] sm:$0xff]  ;;  %v469_v7 = vld [vmem:[#allocation2 + $0x78] sm:$0xff] }
 0x144   : > { %874 = vst [vmem:[#allocation2 + $0x18] sm:$0xff] %v842_v11  ;;  %890 = vst [vmem:[#allocation2 + $0x98] sm:$0xff] %v858_v12  ;;  %v485_v8 = vld [vmem:[#allocation2 + $0xf8] sm:$0xff]  ;;  %v467_v13 = vld [vmem:[#allocation2 + $0x68] sm:$0xff] }
 0x145   : > { %872 = vst [vmem:[#allocation2 + $0x8] sm:$0xff] %v840_v15  ;;  %888 = vst [vmem:[#allocation2 + $0x88] sm:$0xff] %v856_v16  ;;  %v483_v14 = vld [vmem:[#allocation2 + $0xe8] sm:$0xff] }
 0x147   : > { %v1535_v21 = vpop.f32.mrb[4].mxu0  ;;  %v1551_v22 = vpop.f32.mrb[4].mxu1 }
 0x148   : > { %v845_v25 = vadd.f32 %v1535_v21, %v460_v17  ;;  %v861_v26 = vadd.f32 %v1551_v22, %v476_v18  ;;  %v728_v27 = vpop.f32.mrb[5].mxu0  ;;  %v792_v28 = vpop.f32.mrb[5].mxu1 }
 0x149   : > { %v843_v31 = vadd.f32 %v728_v27, %v458_v19  ;;  %v859_v32 = vadd.f32 %v792_v28, %v474_v20  ;;  %v1536_v33 = vpop.f32.mrb[6].mxu0  ;;  %v1552_v34 = vpop.f32.mrb[6].mxu1  ;;  %v1910_v27 = vld [vmem:[%s1983_s2] ss:$0 sm:$0xff] (!%p1326_p13) }
 0x14a   : > { %877 = vst [vmem:[#allocation2 + $0x30] sm:$0xff] %v845_v25  ;;  %893 = vst [vmem:[#allocation2 + $0xb0] sm:$0xff] %v861_v26  ;;  %v846_v35 = vadd.f32 %v1536_v33, %v461_v23  ;;  %v862_v36 = vadd.f32 %v1552_v34, %v477_v24  ;;  %v731_v37 = vpop.f32.mrb[7].mxu0  ;;  %v795_v38 = vpop.f32.mrb[7].mxu1  ;;  %v907_v25 = vld [vmem:[#allocation2] sm:$0xff] (!%p1326_p13) }
 0x14b   : > { %875 = vst [vmem:[#allocation2 + $0x20] sm:$0xff] %v843_v31  ;;  %891 = vst [vmem:[#allocation2 + $0xa0] sm:$0xff] %v859_v32  ;;  %v844_v39 = vadd.f32 %v731_v37, %v459_v29  ;;  %v860_v40 = vadd.f32 %v795_v38, %v475_v30  ;;  %v946_v28 = vadd.f32 (!%p1326_p13), %v1910_v27, %v907_v25  ;;  %v909_v30 = vld [vmem:[#allocation2 + $0x10] sm:$0xff] (!%p1326_p13)  ;;  %v910_v31 = vld [vmem:[#allocation2 + $0x18] sm:$0xff] (!%p1326_p13) }
 0x14c   : > { %878 = vst [vmem:[#allocation2 + $0x38] sm:$0xff] %v846_v35  ;;  %894 = vst [vmem:[#allocation2 + $0xb8] sm:$0xff] %v862_v36  ;;  %v908_v26 = vld [vmem:[#allocation2 + $0x8] sm:$0xff] (!%p1326_p13)  ;;  %v948_v33 = vadd.f32 (!%p1326_p13), %v1910_v27, %v909_v30  ;;  %v949_v34 = vadd.f32 (!%p1326_p13), %v1910_v27, %v910_v31 }
 0x14d   : > { %876 = vst [vmem:[#allocation2 + $0x28] sm:$0xff] %v844_v39  ;;  %892 = vst [vmem:[#allocation2 + $0xa8] sm:$0xff] %v860_v40  ;;  %v947_v29 = vadd.f32 (!%p1326_p13), %v1910_v27, %v908_v26  ;;  %v978_v39 = vmax.f32 (!%p1326_p13), %v946_v28, 0.0 }
 0x14f   : > { %v1539_v45 = vpop.f32.mrb[8].mxu0  ;;  %v1555_v46 = vpop.f32.mrb[8].mxu1  ;;  %v979_v40 = vmax.f32 (!%p1326_p13), %v947_v29, 0.0 }
 0x150   : > { %v849_v49 = vadd.f32 %v1539_v45, %v464_v41  ;;  %v865_v50 = vadd.f32 %v1555_v46, %v480_v42  ;;  %v744_v51 = vpop.f32.mrb[9].mxu0  ;;  %v808_v52 = vpop.f32.mrb[9].mxu1  ;;  %v980_v46 = vmax.f32 (!%p1326_p13), %v948_v33, 0.0 }
 0x151   : > { %v847_v55 = vadd.f32 %v744_v51, %v462_v43  ;;  %v863_v56 = vadd.f32 %v808_v52, %v478_v44  ;;  %v1540_v57 = vpop.f32.mrb[10].mxu0  ;;  %v1556_v58 = vpop.f32.mrb[10].mxu1  ;;  %v913_v37 = vld [vmem:[#allocation2 + $0x30] sm:$0xff] (!%p1326_p13)  ;;  %v1397_v52 = vpack.c.bf16 (!%p1326_p13), %v979_v40, %v978_v39 }
 0x152   : > { %881 = vst [vmem:[#allocation2 + $0x50] sm:$0xff] %v849_v49  ;;  %897 = vst [vmem:[#allocation2 + $0xd0] sm:$0xff] %v865_v50  ;;  %v850_v59 = vadd.f32 %v1540_v57, %v465_v47  ;;  %v866_v60 = vadd.f32 %v1556_v58, %v481_v48  ;;  %v747_v61 = vpop.f32.mrb[11].mxu0  ;;  %v811_v62 = vpop.f32.mrb[11].mxu1  ;;  %v911_v32 = vld [vmem:[#allocation2 + $0x20] sm:$0xff] (!%p1326_p13)  ;;  %v952_v42 = vadd.f32 (!%p1326_p13), %v1910_v27, %v913_v37  ;;  %v981_v47 = vmax.f32 (!%p1326_p13), %v949_v34, 0.0 }
 0x153   : > { %879 = vst [vmem:[#allocation2 + $0x40] sm:$0xff] %v847_v55  ;;  %895 = vst [vmem:[#allocation2 + $0xc0] sm:$0xff] %v863_v56  ;;  %v848_v63 = vadd.f32 %v747_v61, %v463_v53  ;;  %v864_v0 = vadd.f32 %v811_v62, %v479_v54  ;;  %v950_v36 = vadd.f32 (!%p1326_p13), %v1910_v27, %v911_v32  ;;  %v914_v38 = vld [vmem:[#allocation2 + $0x38] sm:$0xff] (!%p1326_p13)  ;;  %v929_v25 = vld [vmem:[#allocation2 + $0xb0] sm:$0xff] (!%p1326_p13) }
 0x154   : > { %882 = vst [vmem:[#allocation2 + $0x58] sm:$0xff] %v850_v59  ;;  %898 = vst [vmem:[#allocation2 + $0xd8] sm:$0xff] %v866_v60  ;;  %v912_v35 = vld [vmem:[#allocation2 + $0x28] sm:$0xff] (!%p1326_p13)  ;;  %v953_v49 = vadd.f32 (!%p1326_p13), %v1910_v27, %v914_v38  ;;  %v984_v54 = vmax.f32 (!%p1326_p13), %v952_v42, 0.0  ;;  %v1402_v57 = vpack.c.bf16 (!%p1326_p13), %v981_v47, %v980_v46  ;;  %v930_v26 = vld [vmem:[#allocation2 + $0xb8] sm:$0xff] (!%p1326_p13) }
 0x155   : > { %880 = vst [vmem:[#allocation2 + $0x48] sm:$0xff] %v848_v63  ;;  %896 = vst [vmem:[#allocation2 + $0xc8] sm:$0xff] %v864_v0  ;;  %v951_v41 = vadd.f32 (!%p1326_p13), %v1910_v27, %v912_v35  ;;  %v982_v48 = vmax.f32 (!%p1326_p13), %v950_v36, 0.0  ;;  %v969_v42 = vadd.f32 (!%p1326_p13), %v1910_v27, %v930_v26 }
 0x156   : > { %v985_v58 = vmax.f32 (!%p1326_p13), %v953_v49, 0.0  ;;  %1398 = vst [vmem:[%s1877_s29] sm:$0xff] (!%p1326_p13), %v1397_v52   ;;  %1474 = vst [vmem:[%s1877_s29 + $0x8] sm:$0xff] (!%p1326_p13), %v1402_v57  }
 0x157   : > { %v1543_v5 = vpop.f32.mrb[12].mxu0  ;;  %v1559_v6 = vpop.f32.mrb[12].mxu1  ;;  %906 = sbr.rel (%p1326_p13) target bundleno = 366 (0x16e), region = 81  ;;  %v983_v53 = vmax.f32 (!%p1326_p13), %v951_v41, 0.0  ;;  %v968_v41 = vadd.f32 (!%p1326_p13), %v1910_v27, %v929_v25  ;;  %v1001_v52 = vmax.f32 (!%p1326_p13), %v969_v42, 0.0 }
 0x158   : > { %v853_v9 = vadd.f32 %v1543_v5, %v468_v1  ;;  %v869_v10 = vadd.f32 %v1559_v6, %v484_v2  ;;  %v760_v11 = vpop.f32.mrb[13].mxu0  ;;  %v824_v12 = vpop.f32.mrb[13].mxu1  ;;  %v1412_v5 = vpack.c.bf16 (!%p1326_p13), %v985_v58, %v984_v54 }
 0x159   : > { %v851_v15 = vadd.f32 %v760_v11, %v466_v3  ;;  %v867_v16 = vadd.f32 %v824_v12, %v482_v4  ;;  %v1544_v17 = vpop.f32.mrb[14].mxu0  ;;  %v1560_v18 = vpop.f32.mrb[14].mxu1  ;;  %v917_v45 = vld [vmem:[#allocation2 + $0x50] sm:$0xff] (!%p1326_p13)  ;;  %v1407_v63 = vpack.c.bf16 (!%p1326_p13), %v983_v53, %v982_v48  ;;  %v923_v3 = vld [vmem:[#allocation2 + $0x80] sm:$0xff] (!%p1326_p13)  ;;  %v924_v4 = vld [vmem:[#allocation2 + $0x88] sm:$0xff] (!%p1326_p13) }
 0x15a   : > { %885 = vst [vmem:[#allocation2 + $0x70] sm:$0xff] %v853_v9  ;;  %901 = vst [vmem:[#allocation2 + $0xf0] sm:$0xff] %v869_v10  ;;  %v854_v19 = vadd.f32 %v1544_v17, %v469_v7  ;;  %v870_v20 = vadd.f32 %v1560_v18, %v485_v8  ;;  %v763_v21 = vpop.f32.mrb[15].mxu0  ;;  %v827_v22 = vpop.f32.mrb[15].mxu1  ;;  %v915_v43 = vld [vmem:[#allocation2 + $0x40] sm:$0xff] (!%p1326_p13)  ;;  %v956_v60 = vadd.f32 (!%p1326_p13), %v1910_v27, %v917_v45  ;;  %v925_v9 = vld [vmem:[#allocation2 + $0x90] sm:$0xff] (!%p1326_p13) }
 0x15b   : > { %883 = vst [vmem:[#allocation2 + $0x60] sm:$0xff] %v851_v15  ;;  %899 = vst [vmem:[#allocation2 + $0xe0] sm:$0xff] %v867_v16  ;;  %v852_v23 = vadd.f32 %v763_v21, %v467_v13  ;;  %v868_v24 = vadd.f32 %v827_v22, %v483_v14  ;;  %v918_v50 = vld [vmem:[#allocation2 + $0x58] sm:$0xff] (!%p1326_p13)  ;;  %v954_v55 = vadd.f32 (!%p1326_p13), %v1910_v27, %v915_v43  ;;  %v931_v32 = vld [vmem:[#allocation2 + $0xc0] sm:$0xff] (!%p1326_p13) }
 0x15c   : > { %886 = vst [vmem:[#allocation2 + $0x78] sm:$0xff] %v854_v19  ;;  %902 = vst [vmem:[#allocation2 + $0xf8] sm:$0xff] %v870_v20  ;;  %v916_v44 = vld [vmem:[#allocation2 + $0x48] sm:$0xff] (!%p1326_p13)  ;;  %v957_v1 = vadd.f32 (!%p1326_p13), %v1910_v27, %v918_v50  ;;  %v988_v7 = vmax.f32 (!%p1326_p13), %v956_v60, 0.0  ;;  %v926_v14 = vld [vmem:[#allocation2 + $0x98] sm:$0xff] (!%p1326_p13)  ;;  %v962_v17 = vadd.f32 (!%p1326_p13), %v1910_v27, %v923_v3  ;;  %v963_v18 = vadd.f32 (!%p1326_p13), %v1910_v27, %v924_v4 }
 0x15d   : > { %884 = vst [vmem:[#allocation2 + $0x68] sm:$0xff] %v852_v23  ;;  %900 = vst [vmem:[#allocation2 + $0xe8] sm:$0xff] %v868_v24  ;;  %v955_v59 = vadd.f32 (!%p1326_p13), %v1910_v27, %v916_v44  ;;  %v986_v0 = vmax.f32 (!%p1326_p13), %v954_v55, 0.0  ;;  %v927_v19 = vld [vmem:[#allocation2 + $0xa0] sm:$0xff] (!%p1326_p13)  ;;  %v928_v20 = vld [vmem:[#allocation2 + $0xa8] sm:$0xff] (!%p1326_p13)  ;;  %v964_v24 = vadd.f32 (!%p1326_p13), %v1910_v27, %v925_v9  ;;  %v965_v31 = vadd.f32 (!%p1326_p13), %v1910_v27, %v926_v14 }
 0x15e   : > { %1475 = vst [vmem:[%s1877_s29 + $0x10] sm:$0xff] %v1407_v63   ;;  %v989_v10 = vmax.f32 %v957_v1, 0.0  ;;  %1476 = vst [vmem:[%s1877_s29 + $0x18] sm:$0xff] %v1412_v5   ;;  %v994_v29 = vmax.f32 %v962_v17, 0.0  ;;  %v995_v30 = vmax.f32 %v963_v18, 0.0  ;;  %v932_v33 = vld [vmem:[#allocation2 + $0xc8] sm:$0xff]  ;;  %v966_v36 = vadd.f32 %v1910_v27, %v927_v19 }
 0x15f   : > { %v987_v6 = vmax.f32 %v955_v59, 0.0  ;;  %v996_v35 = vmax.f32 %v964_v24, 0.0  ;;  %v967_v37 = vadd.f32 %v1910_v27, %v928_v20  ;;  %v933_v38 = vld [vmem:[#allocation2 + $0xd0] sm:$0xff]  ;;  %v997_v40 = vmax.f32 %v965_v31, 0.0  ;;  %v934_v43 = vld [vmem:[#allocation2 + $0xd8] sm:$0xff] }
 0x160   : > { %v1422_v21 = vpack.c.bf16 %v989_v10, %v988_v7  ;;  %v1437_v39 = vpack.c.bf16 %v995_v30, %v994_v29  ;;  %v998_v44 = vmax.f32 %v966_v36, 0.0  ;;  %v970_v46 = vadd.f32 %v1910_v27, %v931_v32 }
 0x161   : > { %v921_v61 = vld [vmem:[#allocation2 + $0x70] sm:$0xff]  ;;  %v1417_v15 = vpack.c.bf16 %v987_v6, %v986_v0  ;;  %v999_v45 = vmax.f32 %v967_v37, 0.0  ;;  %v971_v47 = vadd.f32 %v1910_v27, %v932_v33  ;;  %v1442_v50 = vpack.c.bf16 %v997_v40, %v996_v35 }
 0x162   : > { %v919_v51 = vld [vmem:[#allocation2 + $0x60] sm:$0xff]  ;;  %v960_v12 = vadd.f32 %v1910_v27, %v921_v61  ;;  %1478 = vst [vmem:[%s1877_s29 + $0x28] sm:$0xff] %v1422_v21   ;;  %1481 = vst [vmem:[%s1877_s29 + $0x40] sm:$0xff] %v1437_v39   ;;  %v972_v53 = vadd.f32 %v1910_v27, %v933_v38  ;;  %v937_v54 = vld [vmem:[#allocation2 + $0xf0] sm:$0xff]  ;;  %v1002_v57 = vmax.f32 %v970_v46, 0.0  ;;  %v973_v59 = vadd.f32 %v1910_v27, %v934_v43 }
 0x163   : > { %v922_v62 = vld [vmem:[#allocation2 + $0x78] sm:$0xff]  ;;  %v958_v2 = vadd.f32 %v1910_v27, %v919_v51  ;;  %1477 = vst [vmem:[%s1877_s29 + $0x20] sm:$0xff] %v1417_v15   ;;  %v935_v48 = vld [vmem:[#allocation2 + $0xe0] sm:$0xff]  ;;  %v1000_v51 = vmax.f32 %v968_v41, 0.0  ;;  %v1003_v58 = vmax.f32 %v971_v47, 0.0  ;;  %1482 = vst [vmem:[%s1877_s29 + $0x48] sm:$0xff] %v1442_v50  }
 0x164   : > { %v920_v56 = vld [vmem:[#allocation2 + $0x68] sm:$0xff]  ;;  %v961_v13 = vadd.f32 %v1910_v27, %v922_v62  ;;  %v992_v22 = vmax.f32 %v960_v12, 0.0  ;;  %v938_v55 = vld [vmem:[#allocation2 + $0xf8] sm:$0xff]  ;;  %v1004_v61 = vmax.f32 %v972_v53, 0.0  ;;  %v974_v62 = vadd.f32 %v1910_v27, %v935_v48 }
 0x165   : > { %v959_v8 = vadd.f32 %v1910_v27, %v920_v56  ;;  %v990_v11 = vmax.f32 %v958_v2, 0.0  ;;  %v936_v49 = vld [vmem:[#allocation2 + $0xe8] sm:$0xff]  ;;  %v1447_v56 = vpack.c.bf16 %v999_v45, %v998_v44  ;;  %v1452_v60 = vpack.c.bf16 %v1001_v52, %v1000_v51 }
 0x166   : > { %v993_v23 = vmax.f32 %v961_v13, 0.0  ;;  %v975_v63 = vadd.f32 %v1910_v27, %v936_v49  ;;  %v1457_v0 = vpack.c.bf16 %v1003_v58, %v1002_v57  ;;  %v1005_v1 = vmax.f32 %v973_v59, 0.0 }
 0x167   : > { %v991_v16 = vmax.f32 %v959_v8, 0.0  ;;  %1483 = vst [vmem:[%s1877_s29 + $0x50] sm:$0xff] %v1447_v56   ;;  %v976_v2 = vadd.f32 %v1910_v27, %v937_v54  ;;  %v977_v3 = vadd.f32 %v1910_v27, %v938_v55  ;;  %1484 = vst [vmem:[%s1877_s29 + $0x58] sm:$0xff] %v1452_v60   ;;  %v1006_v4 = vmax.f32 %v974_v62, 0.0 }
 0x168   : > { %v1432_v34 = vpack.c.bf16 %v993_v23, %v992_v22  ;;  %v1007_v5 = vmax.f32 %v975_v63, 0.0  ;;  %1485 = vst [vmem:[%s1877_s29 + $0x60] sm:$0xff] %v1457_v0   ;;  %v1462_v6 = vpack.c.bf16 %v1005_v1, %v1004_v61 }
 0x169   : > { %v1427_v28 = vpack.c.bf16 %v991_v16, %v990_v11  ;;  %v1008_v7 = vmax.f32 %v976_v2, 0.0  ;;  %v1009_v8 = vmax.f32 %v977_v3, 0.0 }
 0x16a   : > { %1480 = vst [vmem:[%s1877_s29 + $0x38] sm:$0xff] %v1432_v34   ;;  %v1467_v9 = vpack.c.bf16 %v1007_v5, %v1006_v4  ;;  %1486 = vst [vmem:[%s1877_s29 + $0x68] sm:$0xff] %v1462_v6  }
 0x16b   : > { %1479 = vst [vmem:[%s1877_s29 + $0x30] sm:$0xff] %v1427_v28   ;;  %v1472_v10 = vpack.c.bf16 %v1009_v8, %v1008_v7 }
 0x16c   : > { %1487 = vst [vmem:[%s1877_s29 + $0x70] sm:$0xff] %v1467_v9  }
 0x16d   : > { %1488 = vst [vmem:[%s1877_s29 + $0x78] sm:$0xff] %v1472_v10  }
 0x16e PF: > { %s13_s18 = sadd.s32 1, %s1713_s18   ;;  %s1985_s12 = smov %s1693_s13 }
 0x16f   : > { %p10_p0 = scmp.ge.s32.totalorder %s13_s18, 12   ;;  %s1986_s13 = smov %s1787_s25 }
 0x170   : > { %s1987_s14 = smov %s1705_s16  ;;  %s1988_s15 = smov %s1709_s17 }
 0x171   : > { %s1989_s16 = smov %s1992_s19  ;;  %s1990_s17 = smov %s1996_s20 }
 0x172   :  { %12 = sbr.rel (!%p10_p0) target bundleno = 4 (0x4), region = 122 }

// kernel: resnet34_forward.42
= control target key start
LH: loop header
LB: loop body
LE: loop exit
PB: predicated region body
PF: predicated region fallthrough
CT: control target
= control target key end

     0   :  { %s1993_s15 = smov 0   ;;  %s1995_s16 = smov 0   ;;  %s2259_s0 = inlined_call_operand.vmem [shape: bf16[512,640], index: 0, kind: input, shape index: {}]   ;;  %s2260_s1 = inlined_call_operand.vmem [shape: bf16[640,128], index: 1, kind: input, shape index: {}]   ;;  %s2261_s2 = inlined_call_operand.vmem [shape: f32[1,128], index: 2, kind: input, shape index: {}]   ;;  %s2262_s3 = inlined_call_operand.vmem [shape: bf16[512,128], index: 3, kind: input, shape index: {}]   ;;  %s2263_s4 = inlined_call_operand.vmem [shape: bf16[512,128], index: 4, kind: output, shape index: {}]  }
   0x1   :  { %s1997_s17 = smov 0   ;;  %s1999_s18 = smov 0  }
   0x2   :  { %s2001_s19 = smov 0   ;;  %s2003_s20 = smov 0  }
   0x3   :  { %s2005_s21 = smov 0  }
   0x4 LB: > { %s26_s22 = sadd.s32 1, %s1957_s19  ;;  %s33_s23 = sadd.s32 1, %s1961_s20  ;;  %s1965_s21 = sphi %s2005_s21, %s14_s21   ;;  %s1961_s20 = sphi %s2003_s20, %s2269_s20   ;;  %s1957_s19 = sphi %s2001_s19, %s2268_s19   ;;  %s1953_s18 = sphi %s1999_s18, %s2267_s18   ;;  %s1949_s17 = sphi %s1997_s17, %s2266_s17   ;;  %s1945_s16 = sphi %s1995_s16, %s2265_s16   ;;  %s1941_s15 = sphi %s1993_s15, %s2264_s15  }
   0x5   : > { %p27_p0 = scmp.ge.s32.totalorder %s26_s22, 5  ;;  %p49_p1 = scmp.ne.s32.totalorder %s1945_s16, %s1941_s15 }
   0x6   : > { %p50_p2 = scmp.eq.s32.totalorder %s1965_s21, 0  ;;  %s42_s27 = sadd.s32 1, %s1945_s16 }
   0x7   : > { %s2271_s22 = smov (%p27_p0, %s26_s22), 0  ;;  %s2273_s23 = smov (!%p27_p0, %s33_s23), %s1961_s20 }
   0x8   : > { %p51_p3 = por %p50_p2, %p49_p1  ;;  %p35_p4 = scmp.ge.s32.totalorder %s2273_s23, 2 }
   0x9   : > { %s38_s24 = ssub.s32 %s1957_s19, %s2271_s22  ;;  %p1461_p6 = scmp.ge.s32.totalorder %s1965_s21, 10 }
   0xa   : > { %s2275_s23 = smov (%p35_p4, %s2273_s23), 0 }
   0xb   : > { %s37_s25 = ssub.s32 %s1961_s20, %s2275_s23  ;;  %191 = sbr.rel (%p1461_p6) target bundleno = 46 (0x2e), region = 20 }
   0xc   : > { %s39_s26 = sor.u32 %s38_s24, %s37_s25 }
   0xd   : > { %p40_p5 = scmp.eq.s32.totalorder %s39_s26, 0 }
   0xf   : > { %s2044_s28 = scalar_select %p40_p5, %s1945_s16, %s42_s27  }
  0x12   : > { %194 = sbr.rel (!%p51_p3) target bundleno = 46 (0x2e), region = 24  ;;  %s196_s29 = sand.u32 (%p51_p3), 1, %s1945_s16  }
  0x13   : > { %s1829_s30 = smul.u32 (%p51_p3), 160, %s1961_s20  ;;  %s1462_s5 = sshll.u32 (%p51_p3), %s196_s29, 7 }
  0x14   : > { %s2058_s11 = scalar_lea.vmem (%p51_p3), [#allocation3], %s1462_s5 }
  0x15   : > { %s201_s6 = sadd.s32 (%p51_p3), %s1957_s19, %s1829_s30 }
  0x16   : > { %s1465_s7 = sshll.u32 (%p51_p3), %s201_s6, 2 }
  0x17   : > { %s2053_s10 = scalar_lea.vmem (%p51_p3), %s2259_s0, %s1465_s7 }
  0x18   : > { %v219_v0 = vld [vmem:[%s2053_s10] sm:$0xf] (%p51_p3)  ;;  %v221_v1 = vld [vmem:[%s2053_s10 + $0x14] sm:$0xf] (%p51_p3)  ;;  %v223_v2 = vld [vmem:[%s2053_s10 + $0x28] sm:$0xf] (%p51_p3) }
  0x19   : > { %220 = vst [vmem:[%s2058_s11] sm:$0xf] %v219_v0  ;;  %222 = vst [vmem:[%s2058_s11 + $0x4] sm:$0xf] %v221_v1  ;;  %v225_v3 = vld [vmem:[%s2053_s10 + $0x3c] sm:$0xf] }
  0x1a   : > { %224 = vst [vmem:[%s2058_s11 + $0x8] sm:$0xf] %v223_v2  ;;  %v227_v4 = vld [vmem:[%s2053_s10 + $0x50] sm:$0xf]  ;;  %v229_v5 = vld [vmem:[%s2053_s10 + $0x64] sm:$0xf] }
  0x1b   : > { %226 = vst [vmem:[%s2058_s11 + $0xc] sm:$0xf] %v225_v3  ;;  %228 = vst [vmem:[%s2058_s11 + $0x10] sm:$0xf] %v227_v4  ;;  %v231_v6 = vld [vmem:[%s2053_s10 + $0x78] sm:$0xf] }
  0x1c   : > { %230 = vst [vmem:[%s2058_s11 + $0x14] sm:$0xf] %v229_v5  ;;  %v233_v7 = vld [vmem:[%s2053_s10 + $0x8c] sm:$0xf]  ;;  %v235_v8 = vld [vmem:[%s2053_s10 + $0xa0] sm:$0xf] }
  0x1d   : > { %232 = vst [vmem:[%s2058_s11 + $0x18] sm:$0xf] %v231_v6  ;;  %234 = vst [vmem:[%s2058_s11 + $0x1c] sm:$0xf] %v233_v7  ;;  %v237_v9 = vld [vmem:[%s2053_s10 + $0xb4] sm:$0xf] }
  0x1e   : > { %236 = vst [vmem:[%s2058_s11 + $0x20] sm:$0xf] %v235_v8  ;;  %v239_v10 = vld [vmem:[%s2053_s10 + $0xc8] sm:$0xf]  ;;  %v241_v11 = vld [vmem:[%s2053_s10 + $0xdc] sm:$0xf] }
  0x1f   : > { %238 = vst [vmem:[%s2058_s11 + $0x24] sm:$0xf] %v237_v9  ;;  %240 = vst [vmem:[%s2058_s11 + $0x28] sm:$0xf] %v239_v10  ;;  %v243_v12 = vld [vmem:[%s2053_s10 + $0xf0] sm:$0xf] }
  0x20   : > { %242 = vst [vmem:[%s2058_s11 + $0x2c] sm:$0xf] %v241_v11  ;;  %v245_v13 = vld [vmem:[%s2053_s10 + $0x104] sm:$0xf]  ;;  %v247_v14 = vld [vmem:[%s2053_s10 + $0x118] sm:$0xf] }
  0x21   : > { %244 = vst [vmem:[%s2058_s11 + $0x30] sm:$0xf] %v243_v12  ;;  %246 = vst [vmem:[%s2058_s11 + $0x34] sm:$0xf] %v245_v13  ;;  %v249_v15 = vld [vmem:[%s2053_s10 + $0x12c] sm:$0xf] }
  0x22   : > { %248 = vst [vmem:[%s2058_s11 + $0x38] sm:$0xf] %v247_v14  ;;  %v251_v16 = vld [vmem:[%s2053_s10 + $0x140] sm:$0xf]  ;;  %v253_v17 = vld [vmem:[%s2053_s10 + $0x154] sm:$0xf] }
  0x23   : > { %250 = vst [vmem:[%s2058_s11 + $0x3c] sm:$0xf] %v249_v15  ;;  %252 = vst [vmem:[%s2058_s11 + $0x40] sm:$0xf] %v251_v16  ;;  %v255_v18 = vld [vmem:[%s2053_s10 + $0x168] sm:$0xf] }
  0x24   : > { %254 = vst [vmem:[%s2058_s11 + $0x44] sm:$0xf] %v253_v17  ;;  %v257_v19 = vld [vmem:[%s2053_s10 + $0x17c] sm:$0xf]  ;;  %v259_v20 = vld [vmem:[%s2053_s10 + $0x190] sm:$0xf] }
  0x25   : > { %256 = vst [vmem:[%s2058_s11 + $0x48] sm:$0xf] %v255_v18  ;;  %258 = vst [vmem:[%s2058_s11 + $0x4c] sm:$0xf] %v257_v19  ;;  %v261_v21 = vld [vmem:[%s2053_s10 + $0x1a4] sm:$0xf] }
  0x26   : > { %260 = vst [vmem:[%s2058_s11 + $0x50] sm:$0xf] %v259_v20  ;;  %v263_v22 = vld [vmem:[%s2053_s10 + $0x1b8] sm:$0xf]  ;;  %v265_v23 = vld [vmem:[%s2053_s10 + $0x1cc] sm:$0xf] }
  0x27   : > { %262 = vst [vmem:[%s2058_s11 + $0x54] sm:$0xf] %v261_v21  ;;  %264 = vst [vmem:[%s2058_s11 + $0x58] sm:$0xf] %v263_v22  ;;  %v267_v24 = vld [vmem:[%s2053_s10 + $0x1e0] sm:$0xf] }
  0x28   : > { %266 = vst [vmem:[%s2058_s11 + $0x5c] sm:$0xf] %v265_v23  ;;  %v269_v25 = vld [vmem:[%s2053_s10 + $0x1f4] sm:$0xf]  ;;  %v271_v26 = vld [vmem:[%s2053_s10 + $0x208] sm:$0xf] }
  0x29   : > { %268 = vst [vmem:[%s2058_s11 + $0x60] sm:$0xf] %v267_v24  ;;  %270 = vst [vmem:[%s2058_s11 + $0x64] sm:$0xf] %v269_v25  ;;  %v273_v27 = vld [vmem:[%s2053_s10 + $0x21c] sm:$0xf] }
  0x2a   : > { %272 = vst [vmem:[%s2058_s11 + $0x68] sm:$0xf] %v271_v26  ;;  %v275_v28 = vld [vmem:[%s2053_s10 + $0x230] sm:$0xf]  ;;  %v277_v29 = vld [vmem:[%s2053_s10 + $0x244] sm:$0xf] }
  0x2b   : > { %274 = vst [vmem:[%s2058_s11 + $0x6c] sm:$0xf] %v273_v27  ;;  %276 = vst [vmem:[%s2058_s11 + $0x70] sm:$0xf] %v275_v28  ;;  %v279_v30 = vld [vmem:[%s2053_s10 + $0x258] sm:$0xf] }
  0x2c   : > { %278 = vst [vmem:[%s2058_s11 + $0x74] sm:$0xf] %v277_v29  ;;  %v281_v31 = vld [vmem:[%s2053_s10 + $0x26c] sm:$0xf]  ;;  %280 = vst [vmem:[%s2058_s11 + $0x78] sm:$0xf] %v279_v30 }
  0x2d   : > { %282 = vst [vmem:[%s2058_s11 + $0x7c] sm:$0xf] %v281_v31 }
  0x2e PF: > { %p1466_p7 = scmp.ge.s32.totalorder %s1965_s21, 1  ;;  %p392_p8 = scmp.lt.s32.totalorder %s1965_s21, 11 }
  0x30   : > { %p393_p9 = pnand %p1466_p7, %p392_p8 }
  0x31   : > { %s399_s12 = sand.u32 (!%p393_p9), 1, %s1941_s15   ;;  %s1468_s13 = sshll.u32 (!%p393_p9), %s1949_s17, 4 }
  0x32   : > { %396 = sbr.rel (%p393_p9) target bundleno = 382 (0x17e), region = 73  ;;  %s1467_s14 = sshll.u32 (!%p393_p9), %s399_s12, 7 }
  0x33   : > { %p448_p10 = scmp.lt.s32.totalorder (!%p393_p9), %s1468_s13, 79  ;;  %s1470_s24 = sshll.u32 (!%p393_p9), %s1953_s18, 5 }
  0x34   : > { %p460_p11 = scmp.lt.s32.totalorder (!%p393_p9), %s1470_s24, 63  ;;  %s2141_s18 = scalar_lea.vmem (!%p393_p9), [#allocation3], %s1467_s14 }
  0x35   : > { %p1474_p12 = scmp.ne.s32.totalorder (!%p393_p9), %s1949_s17, 0 }
  0x39   : > { %s2277_s13 = smov (!%p448_p10, %s1468_s13), 79  ;;  %s2279_s24 = smov (!%p460_p11, %s1470_s24), 63 }
  0x3a   : > { %s1469_s25 = sshll.u32 %s2277_s13, 2  ;;  %s1471_s30 = sshll.u32 %s2279_s24, 2  ;;  %v1967_v32 = vmov (!%p1474_p12), 0.0  }
  0x3b   : > { %s2129_s29 = scalar_lea.vmem %s2260_s1, %s1469_s25  ;;  %s2134_s7 = scalar_lea.vmem %s2262_s3, %s1471_s30  ;;  %482 = vst [vmem:[#allocation2] sm:$0xff] (!%p1474_p12), %v1967_v32  ;;  %483 = vst [vmem:[#allocation2 + $0x8] sm:$0xff] (!%p1474_p12), %v1967_v32 }
  0x3c   : > { %s2139_s9 = scalar_lea.vmem %s2263_s4, %s1471_s30  ;;  %481 = sbr.rel (%p1474_p12) target bundleno = 75 (0x4b), region = 81  ;;  %484 = vst [vmem:[#allocation2 + $0x10] sm:$0xff] (!%p1474_p12), %v1967_v32  ;;  %485 = vst [vmem:[#allocation2 + $0x18] sm:$0xff] (!%p1474_p12), %v1967_v32 }
  0x3d   : > { %486 = vst [vmem:[#allocation2 + $0x20] sm:$0xff] (!%p1474_p12), %v1967_v32  ;;  %487 = vst [vmem:[#allocation2 + $0x28] sm:$0xff] (!%p1474_p12), %v1967_v32 }
  0x3e   : > { %488 = vst [vmem:[#allocation2 + $0x30] sm:$0xff] (!%p1474_p12), %v1967_v32  ;;  %489 = vst [vmem:[#allocation2 + $0x38] sm:$0xff] (!%p1474_p12), %v1967_v32 }
  0x3f   : > { %490 = vst [vmem:[#allocation2 + $0x40] sm:$0xff] (!%p1474_p12), %v1967_v32  ;;  %491 = vst [vmem:[#allocation2 + $0x48] sm:$0xff] (!%p1474_p12), %v1967_v32 }
  0x40   : > { %492 = vst [vmem:[#allocation2 + $0x50] sm:$0xff] (!%p1474_p12), %v1967_v32  ;;  %493 = vst [vmem:[#allocation2 + $0x58] sm:$0xff] (!%p1474_p12), %v1967_v32 }
  0x41   : > { %494 = vst [vmem:[#allocation2 + $0x60] sm:$0xff] (!%p1474_p12), %v1967_v32  ;;  %495 = vst [vmem:[#allocation2 + $0x68] sm:$0xff] (!%p1474_p12), %v1967_v32 }
  0x42   : > { %496 = vst [vmem:[#allocation2 + $0x70] sm:$0xff] (!%p1474_p12), %v1967_v32  ;;  %497 = vst [vmem:[#allocation2 + $0x78] sm:$0xff] (!%p1474_p12), %v1967_v32 }
  0x43   : > { %498 = vst [vmem:[#allocation2 + $0x80] sm:$0xff] %v1967_v32  ;;  %499 = vst [vmem:[#allocation2 + $0x88] sm:$0xff] %v1967_v32 }
  0x44   : > { %500 = vst [vmem:[#allocation2 + $0x90] sm:$0xff] %v1967_v32  ;;  %501 = vst [vmem:[#allocation2 + $0x98] sm:$0xff] %v1967_v32 }
  0x45   : > { %502 = vst [vmem:[#allocation2 + $0xa0] sm:$0xff] %v1967_v32  ;;  %503 = vst [vmem:[#allocation2 + $0xa8] sm:$0xff] %v1967_v32 }
  0x46   : > { %504 = vst [vmem:[#allocation2 + $0xb0] sm:$0xff] %v1967_v32  ;;  %505 = vst [vmem:[#allocation2 + $0xb8] sm:$0xff] %v1967_v32 }
  0x47   : > { %506 = vst [vmem:[#allocation2 + $0xc0] sm:$0xff] %v1967_v32  ;;  %507 = vst [vmem:[#allocation2 + $0xc8] sm:$0xff] %v1967_v32 }
  0x48   : > { %508 = vst [vmem:[#allocation2 + $0xd0] sm:$0xff] %v1967_v32  ;;  %509 = vst [vmem:[#allocation2 + $0xd8] sm:$0xff] %v1967_v32 }
  0x49   : > { %510 = vst [vmem:[#allocation2 + $0xe0] sm:$0xff] %v1967_v32  ;;  %511 = vst [vmem:[#allocation2 + $0xe8] sm:$0xff] %v1967_v32 }
  0x4a   : > { %512 = vst [vmem:[#allocation2 + $0xf0] sm:$0xff] %v1967_v32  ;;  %513 = vst [vmem:[#allocation2 + $0xf8] sm:$0xff] %v1967_v32 }
  0x4b PF: > { %v1887_v33 = vld [vmem:[%s2129_s29] sm:$0xff]   ;;  %v1888_v34 = vld [vmem:[%s2129_s29 + $0x8] sm:$0xff]   ;;  %v1889_v35 = vld [vmem:[%s2129_s29 + $0x10] sm:$0xff]   ;;  %p1499_p13 = scmp.ne.s32.totalorder %s1949_s17, 4 }
  0x4c   : > { %1765 = vmatprep.subr.bf16.mxu0 %v1887_v33  ;;  %1813 = vmatprep.subr.bf16.mxu1 %v1887_v33  ;;  %v1890_v36 = vld [vmem:[%s2129_s29 + $0x18] sm:$0xff]   ;;  %v1895_v37 = vld [vmem:[%s2141_s18] sm:$0xff]   ;;  %v1892_v40 = vld [vmem:[%s2129_s29 + $0x28] sm:$0xff]  }
  0x4d   : > { %1766 = vmatpush3.bf16.msra.mxu0 %v1887_v33  ;;  %1821 = vmatpush3.bf16.msra.mxu1 %v1887_v33  ;;  %v1896_v38 = vld [vmem:[%s2141_s18 + $0x40] sm:$0xff]   ;;  %v1893_v41 = vld [vmem:[%s2129_s29 + $0x30] sm:$0xff]   ;;  %v1894_v42 = vld [vmem:[%s2129_s29 + $0x38] sm:$0xff]  }
  0x4e   : > { %1767 = vmatprep.subr.bf16.mxu0 %v1888_v34  ;;  %1814 = vmatprep.subr.bf16.mxu1 %v1888_v34  ;;  %v1891_v39 = vld [vmem:[%s2129_s29 + $0x20] sm:$0xff]   ;;  %v1897_v43 = vld [vmem:[%s2141_s18 + $0x8] sm:$0xff]   ;;  %v1899_v45 = vld [vmem:[%s2141_s18 + $0x10] sm:$0xff]  }
  0x4f   : > { %1781 = vmatprep.mubr.bf16.mxu0 %v1895_v37  ;;  %1797 = vmatprep.mubr.bf16.mxu1 %v1896_v38  ;;  %v1898_v44 = vld [vmem:[%s2141_s18 + $0x48] sm:$0xff]   ;;  %v1900_v46 = vld [vmem:[%s2141_s18 + $0x50] sm:$0xff]   ;;  %v1901_v47 = vld [vmem:[%s2141_s18 + $0x18] sm:$0xff]  }
  0x50   : > { %v1902_v48 = vld [vmem:[%s2141_s18 + $0x58] sm:$0xff]   ;;  %v1903_v49 = vld [vmem:[%s2141_s18 + $0x20] sm:$0xff]   ;;  %v1905_v51 = vld [vmem:[%s2141_s18 + $0x28] sm:$0xff]  }
  0x51   : > { %1768 = vmatpush3.bf16.msra.mxu0 %v1888_v34  ;;  %1822 = vmatpush3.bf16.msra.mxu1 %v1888_v34  ;;  %v1904_v50 = vld [vmem:[%s2141_s18 + $0x60] sm:$0xff]   ;;  %v1906_v52 = vld [vmem:[%s2141_s18 + $0x68] sm:$0xff]   ;;  %v1907_v53 = vld [vmem:[%s2141_s18 + $0x30] sm:$0xff]  }
  0x52   : > { %1769 = vmatprep.subr.bf16.mxu0 %v1889_v35  ;;  %1815 = vmatprep.subr.bf16.mxu1 %v1889_v35  ;;  %v1908_v54 = vld [vmem:[%s2141_s18 + $0x70] sm:$0xff]   ;;  %v1909_v55 = vld [vmem:[%s2141_s18 + $0x38] sm:$0xff]   ;;  %v514_v59 = vld [vmem:[#allocation2] sm:$0xff] }
  0x53   : > { %v1910_v56 = vld [vmem:[%s2141_s18 + $0x78] sm:$0xff]   ;;  %v516_v57 = vld [vmem:[#allocation2 + $0x10] sm:$0xff]  ;;  %v530_v60 = vld [vmem:[#allocation2 + $0x80] sm:$0xff] }
  0x54   : > { %v532_v58 = vld [vmem:[#allocation2 + $0x90] sm:$0xff]  ;;  %v517_v63 = vld [vmem:[#allocation2 + $0x18] sm:$0xff]  ;;  %v515_v5 = vld [vmem:[#allocation2 + $0x8] sm:$0xff] }
  0x55   : > { %1770 = vmatpush3.bf16.msra.mxu0 %v1889_v35  ;;  %1823 = vmatpush3.bf16.msra.mxu1 %v1889_v35  ;;  %v533_v0 = vld [vmem:[#allocation2 + $0x98] sm:$0xff]  ;;  %v531_v6 = vld [vmem:[#allocation2 + $0x88] sm:$0xff]  ;;  %v520_v17 = vld [vmem:[#allocation2 + $0x30] sm:$0xff] }
  0x56   : > { %1771 = vmatprep.subr.bf16.mxu0 %v1890_v36  ;;  %1816 = vmatprep.subr.bf16.mxu1 %v1890_v36  ;;  %v536_v18 = vld [vmem:[#allocation2 + $0xb0] sm:$0xff]  ;;  %v518_v19 = vld [vmem:[#allocation2 + $0x20] sm:$0xff]  ;;  %v521_v23 = vld [vmem:[#allocation2 + $0x38] sm:$0xff] }
  0x57   : > { %v534_v20 = vld [vmem:[#allocation2 + $0xa0] sm:$0xff]  ;;  %v537_v24 = vld [vmem:[#allocation2 + $0xb8] sm:$0xff]  ;;  %v519_v29 = vld [vmem:[#allocation2 + $0x28] sm:$0xff] }
  0x58   : > { %v535_v30 = vld [vmem:[#allocation2 + $0xa8] sm:$0xff] }
  0x59   : > { %1772 = vmatpush3.bf16.msra.mxu0 %v1890_v36  ;;  %1824 = vmatpush3.bf16.msra.mxu1 %v1890_v36 }
  0x5a   : > { %1773 = vmatprep.subr.bf16.mxu0 %v1891_v39  ;;  %1817 = vmatprep.subr.bf16.mxu1 %v1891_v39 }
  0x5d   : > { %1774 = vmatpush3.bf16.msra.mxu0 %v1891_v39  ;;  %1825 = vmatpush3.bf16.msra.mxu1 %v1891_v39 }
  0x5e   : > { %1775 = vmatprep.subr.bf16.mxu0 %v1892_v40  ;;  %1818 = vmatprep.subr.bf16.mxu1 %v1892_v40 }
  0x61   : > { %1776 = vmatpush3.bf16.msra.mxu0 %v1892_v40  ;;  %1826 = vmatpush3.bf16.msra.mxu1 %v1892_v40 }
  0x62   : > { %1777 = vmatprep.subr.bf16.mxu0 %v1893_v41  ;;  %1819 = vmatprep.subr.bf16.mxu1 %v1893_v41 }
  0x65   : > { %1778 = vmatpush3.bf16.msra.mxu0 %v1893_v41  ;;  %1827 = vmatpush3.bf16.msra.mxu1 %v1893_v41  ;;  %v524_v41 = vld [vmem:[#allocation2 + $0x50] sm:$0xff] }
  0x66   : > { %1779 = vmatprep.subr.bf16.mxu0 %v1894_v42  ;;  %1820 = vmatprep.subr.bf16.mxu1 %v1894_v42 }
  0x69   : > { %1780 = vmatpush3.bf16.msra.mxu0 %v1894_v42  ;;  %1828 = vmatpush3.bf16.msra.mxu1 %v1894_v42  ;;  %v540_v42 = vld [vmem:[#allocation2 + $0xd0] sm:$0xff] }
  0x6c   : > { %1782 = vmatmul.mubr.bf16.vlgmr.msra.gmra.mrb[0].mxu0 %v1897_v43  ;;  %1798 = vmatmul.mubr.bf16.vlgmr.msra.gmra.mrb[0].mxu1 %v1898_v44  ;;  %v522_v43 = vld [vmem:[#allocation2 + $0x40] sm:$0xff] }
  0x6d   : > { %1785 = vmatprep.mubr.bf16.mxu0 %v1899_v45  ;;  %1801 = vmatprep.mubr.bf16.mxu1 %v1900_v46  ;;  %v538_v44 = vld [vmem:[#allocation2 + $0xc0] sm:$0xff] }
  0x74   : > { %1786 = vmatmul.mubr.bf16.gmra.mrb[4].mxu0 %v1901_v47  ;;  %1802 = vmatmul.mubr.bf16.gmra.mrb[4].mxu1 %v1902_v48  ;;  %v525_v47 = vld [vmem:[#allocation2 + $0x58] sm:$0xff] }
  0x75   : > { %1789 = vmatprep.mubr.bf16.mxu0 %v1903_v49  ;;  %1805 = vmatprep.mubr.bf16.mxu1 %v1904_v50  ;;  %v541_v48 = vld [vmem:[#allocation2 + $0xd8] sm:$0xff] }
  0x7c   : > { %1790 = vmatmul.mubr.bf16.gmra.mrb[8].mxu0 %v1905_v51  ;;  %1806 = vmatmul.mubr.bf16.gmra.mrb[8].mxu1 %v1906_v52 }
  0x7d   : > { %1793 = vmatprep.mubr.bf16.mxu0 %v1907_v53  ;;  %1809 = vmatprep.mubr.bf16.mxu1 %v1908_v54  ;;  %v523_v53 = vld [vmem:[#allocation2 + $0x48] sm:$0xff] }
  0x7e   : > { %v539_v54 = vld [vmem:[#allocation2 + $0xc8] sm:$0xff] }
  0x84   : > { %1794 = vmatmul.mubr.bf16.gmra.mrb[12].mxu0 %v1909_v55  ;;  %1810 = vmatmul.mubr.bf16.gmra.mrb[12].mxu1 %v1910_v56 }
 0x13f   : > { %v1783_v61 = vpop.f32.mrb[0].mxu0  ;;  %v1799_v62 = vpop.f32.mrb[0].mxu1 }
 0x140   : > { %v901_v1 = vadd.f32 %v1783_v61, %v516_v57  ;;  %v917_v2 = vadd.f32 %v1799_v62, %v532_v58  ;;  %v772_v3 = vpop.f32.mrb[1].mxu0  ;;  %v836_v4 = vpop.f32.mrb[1].mxu1 }
 0x141   : > { %v899_v7 = vadd.f32 %v772_v3, %v514_v59  ;;  %v915_v8 = vadd.f32 %v836_v4, %v530_v60  ;;  %v1784_v9 = vpop.f32.mrb[2].mxu0  ;;  %v1800_v10 = vpop.f32.mrb[2].mxu1  ;;  %v526_v3 = vld [vmem:[#allocation2 + $0x60] sm:$0xff] }
 0x142   : > { %933 = vst [vmem:[#allocation2 + $0x10] sm:$0xff] %v901_v1  ;;  %949 = vst [vmem:[#allocation2 + $0x90] sm:$0xff] %v917_v2  ;;  %v902_v11 = vadd.f32 %v1784_v9, %v517_v63  ;;  %v918_v12 = vadd.f32 %v1800_v10, %v533_v0  ;;  %v775_v13 = vpop.f32.mrb[3].mxu0  ;;  %v839_v14 = vpop.f32.mrb[3].mxu1  ;;  %v528_v1 = vld [vmem:[#allocation2 + $0x70] sm:$0xff]  ;;  %v542_v4 = vld [vmem:[#allocation2 + $0xe0] sm:$0xff] }
 0x143   : > { %931 = vst [vmem:[#allocation2] sm:$0xff] %v899_v7  ;;  %947 = vst [vmem:[#allocation2 + $0x80] sm:$0xff] %v915_v8  ;;  %v900_v15 = vadd.f32 %v775_v13, %v515_v5  ;;  %v916_v16 = vadd.f32 %v839_v14, %v531_v6  ;;  %v544_v2 = vld [vmem:[#allocation2 + $0xf0] sm:$0xff]  ;;  %v529_v7 = vld [vmem:[#allocation2 + $0x78] sm:$0xff] }
 0x144   : > { %934 = vst [vmem:[#allocation2 + $0x18] sm:$0xff] %v902_v11  ;;  %950 = vst [vmem:[#allocation2 + $0x98] sm:$0xff] %v918_v12  ;;  %v545_v8 = vld [vmem:[#allocation2 + $0xf8] sm:$0xff]  ;;  %v527_v13 = vld [vmem:[#allocation2 + $0x68] sm:$0xff] }
 0x145   : > { %932 = vst [vmem:[#allocation2 + $0x8] sm:$0xff] %v900_v15  ;;  %948 = vst [vmem:[#allocation2 + $0x88] sm:$0xff] %v916_v16  ;;  %v543_v14 = vld [vmem:[#allocation2 + $0xe8] sm:$0xff] }
 0x147   : > { %v1787_v21 = vpop.f32.mrb[4].mxu0  ;;  %v1803_v22 = vpop.f32.mrb[4].mxu1 }
 0x148   : > { %v905_v25 = vadd.f32 %v1787_v21, %v520_v17  ;;  %v921_v26 = vadd.f32 %v1803_v22, %v536_v18  ;;  %v788_v27 = vpop.f32.mrb[5].mxu0  ;;  %v852_v28 = vpop.f32.mrb[5].mxu1 }
 0x149   : > { %v903_v31 = vadd.f32 %v788_v27, %v518_v19  ;;  %v919_v32 = vadd.f32 %v852_v28, %v534_v20  ;;  %v1788_v33 = vpop.f32.mrb[6].mxu0  ;;  %v1804_v34 = vpop.f32.mrb[6].mxu1  ;;  %v2172_v27 = vld [vmem:[%s2261_s2] ss:$0 sm:$0xff] (!%p1499_p13) }
 0x14a   : > { %937 = vst [vmem:[#allocation2 + $0x30] sm:$0xff] %v905_v25  ;;  %953 = vst [vmem:[#allocation2 + $0xb0] sm:$0xff] %v921_v26  ;;  %v906_v35 = vadd.f32 %v1788_v33, %v521_v23  ;;  %v922_v36 = vadd.f32 %v1804_v34, %v537_v24  ;;  %v791_v37 = vpop.f32.mrb[7].mxu0  ;;  %v855_v38 = vpop.f32.mrb[7].mxu1  ;;  %v967_v25 = vld [vmem:[#allocation2] sm:$0xff] (!%p1499_p13) }
 0x14b   : > { %935 = vst [vmem:[#allocation2 + $0x20] sm:$0xff] %v903_v31  ;;  %951 = vst [vmem:[#allocation2 + $0xa0] sm:$0xff] %v919_v32  ;;  %v904_v39 = vadd.f32 %v791_v37, %v519_v29  ;;  %v920_v40 = vadd.f32 %v855_v38, %v535_v30  ;;  %v1006_v28 = vadd.f32 (!%p1499_p13), %v2172_v27, %v967_v25  ;;  %v1568_v30 = vld [vmem:[%s2134_s7] sm:$0xff] (!%p1499_p13)   ;;  %v969_v31 = vld [vmem:[#allocation2 + $0x10] sm:$0xff] (!%p1499_p13) }
 0x14c   : > { %938 = vst [vmem:[#allocation2 + $0x38] sm:$0xff] %v906_v35  ;;  %954 = vst [vmem:[#allocation2 + $0xb8] sm:$0xff] %v922_v36  ;;  %v968_v26 = vld [vmem:[#allocation2 + $0x8] sm:$0xff] (!%p1499_p13)  ;;  %v970_v32 = vld [vmem:[#allocation2 + $0x18] sm:$0xff] (!%p1499_p13)  ;;  %v1569_v33 = vunpack.c.l.bf16 (!%p1499_p13), %v1568_v30  ;;  %v1570_v34 = vunpack.c.h.bf16 (!%p1499_p13), %v1568_v30  ;;  %v1008_v35 = vadd.f32 (!%p1499_p13), %v2172_v27, %v969_v31 }
 0x14d   : > { %936 = vst [vmem:[#allocation2 + $0x28] sm:$0xff] %v904_v39  ;;  %952 = vst [vmem:[#allocation2 + $0xa8] sm:$0xff] %v920_v40  ;;  %v1007_v29 = vadd.f32 (!%p1499_p13), %v2172_v27, %v968_v26  ;;  %v1009_v36 = vadd.f32 (!%p1499_p13), %v2172_v27, %v970_v32  ;;  %v1711_v37 = vld [vmem:[%s2134_s7 + $0x8] sm:$0xff] (!%p1499_p13)  }
 0x14e   : > { %v1573_v40 = vunpack.c.l.bf16 (!%p1499_p13), %v1711_v37 }
 0x14f   : > { %v1791_v45 = vpop.f32.mrb[8].mxu0  ;;  %v1807_v46 = vpop.f32.mrb[8].mxu1 }
 0x150   : > { %v909_v49 = vadd.f32 %v1791_v45, %v524_v41  ;;  %v925_v50 = vadd.f32 %v1807_v46, %v540_v42  ;;  %v804_v51 = vpop.f32.mrb[9].mxu0  ;;  %v868_v52 = vpop.f32.mrb[9].mxu1  ;;  %v1574_v41 = vunpack.c.h.bf16 (!%p1499_p13), %v1711_v37 }
 0x151   : > { %v907_v55 = vadd.f32 %v804_v51, %v522_v43  ;;  %v923_v56 = vadd.f32 %v868_v52, %v538_v44  ;;  %v1792_v57 = vpop.f32.mrb[10].mxu0  ;;  %v1808_v58 = vpop.f32.mrb[10].mxu1  ;;  %v1712_v44 = vld [vmem:[%s2134_s7 + $0x10] sm:$0xff] (!%p1499_p13)   ;;  %v1713_v51 = vld [vmem:[%s2134_s7 + $0x18] sm:$0xff] (!%p1499_p13)   ;;  %v1104_v52 = vadd.f32 (!%p1499_p13), %v1573_v40, %v1008_v35 }
 0x152   : > { %941 = vst [vmem:[#allocation2 + $0x50] sm:$0xff] %v909_v49  ;;  %957 = vst [vmem:[#allocation2 + $0xd0] sm:$0xff] %v925_v50  ;;  %v910_v59 = vadd.f32 %v1792_v57, %v525_v47  ;;  %v926_v60 = vadd.f32 %v1808_v58, %v541_v48  ;;  %v807_v61 = vpop.f32.mrb[11].mxu0  ;;  %v871_v62 = vpop.f32.mrb[11].mxu1  ;;  %v971_v38 = vld [vmem:[#allocation2 + $0x20] sm:$0xff] (!%p1499_p13)  ;;  %v973_v45 = vld [vmem:[#allocation2 + $0x30] sm:$0xff] (!%p1499_p13)  ;;  %v1102_v47 = vadd.f32 (!%p1499_p13), %v1569_v33, %v1006_v28  ;;  %v1577_v49 = vunpack.c.l.bf16 (!%p1499_p13), %v1712_v44 }
 0x153   : > { %939 = vst [vmem:[#allocation2 + $0x40] sm:$0xff] %v907_v55  ;;  %955 = vst [vmem:[#allocation2 + $0xc0] sm:$0xff] %v923_v56  ;;  %v908_v63 = vadd.f32 %v807_v61, %v523_v53  ;;  %v924_v0 = vadd.f32 %v871_v62, %v539_v54  ;;  %v1010_v42 = vadd.f32 (!%p1499_p13), %v2172_v27, %v971_v38  ;;  %v974_v46 = vld [vmem:[#allocation2 + $0x38] sm:$0xff] (!%p1499_p13)  ;;  %v1578_v50 = vunpack.c.h.bf16 (!%p1499_p13), %v1712_v44 }
 0x154   : > { %942 = vst [vmem:[#allocation2 + $0x58] sm:$0xff] %v910_v59  ;;  %958 = vst [vmem:[#allocation2 + $0xd8] sm:$0xff] %v926_v60  ;;  %v972_v39 = vld [vmem:[#allocation2 + $0x28] sm:$0xff] (!%p1499_p13)  ;;  %v1103_v48 = vadd.f32 (!%p1499_p13), %v1570_v34, %v1007_v29  ;;  %v1105_v53 = vadd.f32 (!%p1499_p13), %v1574_v41, %v1009_v36  ;;  %v1012_v54 = vadd.f32 (!%p1499_p13), %v2172_v27, %v973_v45  ;;  %v1134_v57 = vmax.f32 (!%p1499_p13), %v1102_v47, 0.0  ;;  %v1717_v36 = vld [vmem:[%s2134_s7 + $0x38] sm:$0xff] (!%p1499_p13)  }
 0x155   : > { %940 = vst [vmem:[#allocation2 + $0x48] sm:$0xff] %v908_v63  ;;  %956 = vst [vmem:[#allocation2 + $0xc8] sm:$0xff] %v924_v0  ;;  %v1011_v43 = vadd.f32 (!%p1499_p13), %v2172_v27, %v972_v39  ;;  %v1013_v55 = vadd.f32 (!%p1499_p13), %v2172_v27, %v974_v46  ;;  %v1106_v59 = vadd.f32 (!%p1499_p13), %v1577_v49, %v1010_v42  ;;  %v1136_v62 = vmax.f32 (!%p1499_p13), %v1104_v52, 0.0  ;;  %v983_v41 = vld [vmem:[#allocation2 + $0x80] sm:$0xff] (!%p1499_p13)  ;;  %v984_v42 = vld [vmem:[#allocation2 + $0x88] sm:$0xff] (!%p1499_p13) }
 0x156   : > { %v1135_v58 = vmax.f32 (!%p1499_p13), %v1103_v48, 0.0  ;;  %v1137_v63 = vmax.f32 (!%p1499_p13), %v1105_v53, 0.0  ;;  %v1581_v0 = vunpack.c.l.bf16 (!%p1499_p13), %v1713_v51  ;;  %v1718_v47 = vld [vmem:[%s2134_s7 + $0x40] sm:$0xff] (!%p1499_p13)   ;;  %v985_v52 = vld [vmem:[#allocation2 + $0x90] sm:$0xff] (!%p1499_p13)  ;;  %v986_v53 = vld [vmem:[#allocation2 + $0x98] sm:$0xff] (!%p1499_p13) }
 0x157   : > { %v1795_v5 = vpop.f32.mrb[12].mxu0  ;;  %v1811_v6 = vpop.f32.mrb[12].mxu1  ;;  %966 = sbr.rel (%p1499_p13) target bundleno = 382 (0x17e), region = 85  ;;  %v1107_v60 = vadd.f32 (!%p1499_p13), %v1578_v50, %v1011_v43 }
 0x158   : > { %v913_v9 = vadd.f32 %v1795_v5, %v528_v1  ;;  %v929_v10 = vadd.f32 %v1811_v6, %v544_v2  ;;  %v820_v11 = vpop.f32.mrb[13].mxu0  ;;  %v884_v12 = vpop.f32.mrb[13].mxu1  ;;  %v1582_v1 = vunpack.c.h.bf16 (!%p1499_p13), %v1713_v51  ;;  %v1714_v2 = vld [vmem:[%s2134_s7 + $0x20] sm:$0xff] (!%p1499_p13)   ;;  %v1138_v5 = vmax.f32 (!%p1499_p13), %v1106_v59, 0.0 }
 0x159   : > { %v911_v15 = vadd.f32 %v820_v11, %v526_v3  ;;  %v927_v16 = vadd.f32 %v884_v12, %v542_v4  ;;  %v1796_v17 = vpop.f32.mrb[14].mxu0  ;;  %v1812_v18 = vpop.f32.mrb[14].mxu1  ;;  %v977_v3 = vld [vmem:[#allocation2 + $0x50] sm:$0xff] (!%p1499_p13)  ;;  %v1634_v4 = vpack.c.bf16 (!%p1499_p13), %v1135_v58, %v1134_v57  ;;  %v1139_v6 = vmax.f32 (!%p1499_p13), %v1107_v60, 0.0  ;;  %v1719_v58 = vld [vmem:[%s2134_s7 + $0x48] sm:$0xff] (!%p1499_p13)  }
 0x15a   : > { %945 = vst [vmem:[#allocation2 + $0x70] sm:$0xff] %v913_v9  ;;  %961 = vst [vmem:[#allocation2 + $0xf0] sm:$0xff] %v929_v10  ;;  %v914_v19 = vadd.f32 %v1796_v17, %v529_v7  ;;  %v930_v20 = vadd.f32 %v1812_v18, %v545_v8  ;;  %v823_v21 = vpop.f32.mrb[15].mxu0  ;;  %v887_v22 = vpop.f32.mrb[15].mxu1  ;;  %v975_v56 = vld [vmem:[#allocation2 + $0x40] sm:$0xff] (!%p1499_p13)  ;;  %v1715_v9 = vld [vmem:[%s2134_s7 + $0x28] sm:$0xff] (!%p1499_p13)   ;;  %v1639_v10 = vpack.c.bf16 (!%p1499_p13), %v1137_v63, %v1136_v62  ;;  %v1586_v17 = vunpack.c.h.bf16 (!%p1499_p13), %v1714_v2 }
 0x15b   : > { %943 = vst [vmem:[#allocation2 + $0x60] sm:$0xff] %v911_v15  ;;  %959 = vst [vmem:[#allocation2 + $0xe0] sm:$0xff] %v927_v16  ;;  %v912_v23 = vadd.f32 %v823_v21, %v527_v13  ;;  %v928_v24 = vadd.f32 %v887_v22, %v543_v14  ;;  %v1014_v7 = vadd.f32 (!%p1499_p13), %v2172_v27, %v975_v56  ;;  %v978_v8 = vld [vmem:[#allocation2 + $0x58] sm:$0xff] (!%p1499_p13)  ;;  %v1585_v16 = vunpack.c.l.bf16 (!%p1499_p13), %v1714_v2  ;;  %v987_v63 = vld [vmem:[#allocation2 + $0xa0] sm:$0xff] (!%p1499_p13) }
 0x15c   : > { %946 = vst [vmem:[#allocation2 + $0x78] sm:$0xff] %v914_v19  ;;  %962 = vst [vmem:[#allocation2 + $0xf8] sm:$0xff] %v930_v20  ;;  %v976_v61 = vld [vmem:[#allocation2 + $0x48] sm:$0xff] (!%p1499_p13)  ;;  %v1108_v11 = vadd.f32 (!%p1499_p13), %v1581_v0, %v1012_v54  ;;  %v1109_v12 = vadd.f32 (!%p1499_p13), %v1582_v1, %v1013_v55  ;;  %v1644_v15 = vpack.c.bf16 (!%p1499_p13), %v1139_v6, %v1138_v5  ;;  %v1716_v20 = vld [vmem:[%s2134_s7 + $0x30] sm:$0xff] (!%p1499_p13)   ;;  %v1590_v28 = vunpack.c.h.bf16 (!%p1499_p13), %v1715_v9 }
 0x15d   : > { %944 = vst [vmem:[#allocation2 + $0x68] sm:$0xff] %v912_v23  ;;  %960 = vst [vmem:[#allocation2 + $0xe8] sm:$0xff] %v928_v24  ;;  %v1015_v13 = vadd.f32 (!%p1499_p13), %v2172_v27, %v976_v61  ;;  %v1016_v18 = vadd.f32 (!%p1499_p13), %v2172_v27, %v977_v3  ;;  %v1017_v23 = vadd.f32 (!%p1499_p13), %v2172_v27, %v978_v8  ;;  %v1589_v24 = vunpack.c.l.bf16 (!%p1499_p13), %v1715_v9  ;;  %v1720_v5 = vld [vmem:[%s2134_s7 + $0x50] sm:$0xff] (!%p1499_p13)  }
 0x15e   : > { %1635 = vst [vmem:[%s2139_s9] sm:$0xff] %v1634_v4   ;;  %1726 = vst [vmem:[%s2139_s9 + $0x8] sm:$0xff] %v1639_v10   ;;  %v1140_v21 = vmax.f32 %v1108_v11, 0.0  ;;  %v1141_v22 = vmax.f32 %v1109_v12, 0.0  ;;  %v1110_v25 = vadd.f32 %v1585_v16, %v1014_v7  ;;  %v1593_v35 = vunpack.c.l.bf16 %v1716_v20  ;;  %v988_v4 = vld [vmem:[#allocation2 + $0xa8] sm:$0xff] }
 0x15f   : > { %1727 = vst [vmem:[%s2139_s9 + $0x10] sm:$0xff] %v1644_v15   ;;  %v1111_v26 = vadd.f32 %v1586_v17, %v1015_v13  ;;  %v1112_v33 = vadd.f32 %v1589_v24, %v1016_v18  ;;  %v1113_v39 = vadd.f32 %v1590_v28, %v1017_v23  ;;  %v1594_v40 = vunpack.c.h.bf16 %v1716_v20  ;;  %v990_v15 = vld [vmem:[#allocation2 + $0xb8] sm:$0xff] }
 0x160   : > { %v1649_v32 = vpack.c.bf16 %v1141_v22, %v1140_v21  ;;  %v1142_v37 = vmax.f32 %v1110_v25, 0.0  ;;  %v1597_v51 = vunpack.c.l.bf16 %v1717_v36  ;;  %v1598_v55 = vunpack.c.h.bf16 %v1717_v36  ;;  %v1721_v20 = vld [vmem:[%s2134_s7 + $0x58] sm:$0xff]   ;;  %v991_v25 = vld [vmem:[#allocation2 + $0xc0] sm:$0xff] }
 0x161   : > { %v981_v30 = vld [vmem:[#allocation2 + $0x70] sm:$0xff]  ;;  %v1143_v38 = vmax.f32 %v1111_v26, 0.0  ;;  %v1144_v43 = vmax.f32 %v1112_v33, 0.0  ;;  %v1145_v49 = vmax.f32 %v1113_v39, 0.0  ;;  %v1022_v56 = vadd.f32 %v2172_v27, %v983_v41  ;;  %v992_v26 = vld [vmem:[#allocation2 + $0xc8] sm:$0xff] }
 0x162   : > { %v979_v14 = vld [vmem:[#allocation2 + $0x60] sm:$0xff]  ;;  %1728 = vst [vmem:[%s2139_s9 + $0x18] sm:$0xff] %v1649_v32   ;;  %v1020_v45 = vadd.f32 %v2172_v27, %v981_v30  ;;  %v1023_v57 = vadd.f32 %v2172_v27, %v984_v42  ;;  %v1601_v62 = vunpack.c.l.bf16 %v1718_v47  ;;  %v1602_v1 = vunpack.c.h.bf16 %v1718_v47 }
 0x163   : > { %v1018_v29 = vadd.f32 %v2172_v27, %v979_v14  ;;  %v982_v31 = vld [vmem:[#allocation2 + $0x78] sm:$0xff]  ;;  %v1654_v48 = vpack.c.bf16 %v1143_v38, %v1142_v37  ;;  %v1659_v59 = vpack.c.bf16 %v1145_v49, %v1144_v43  ;;  %v1024_v2 = vadd.f32 %v2172_v27, %v985_v52  ;;  %v989_v14 = vld [vmem:[#allocation2 + $0xb0] sm:$0xff]  ;;  %v1722_v32 = vld [vmem:[%s2134_s7 + $0x60] sm:$0xff]  }
 0x164   : > { %v980_v19 = vld [vmem:[#allocation2 + $0x68] sm:$0xff]  ;;  %v1021_v46 = vadd.f32 %v2172_v27, %v982_v31  ;;  %v1116_v61 = vadd.f32 %v1597_v51, %v1020_v45  ;;  %v1025_v3 = vadd.f32 %v2172_v27, %v986_v53  ;;  %v1118_v8 = vadd.f32 %v1601_v62, %v1022_v56  ;;  %v993_v37 = vld [vmem:[#allocation2 + $0xd0] sm:$0xff]  ;;  %v994_v38 = vld [vmem:[#allocation2 + $0xd8] sm:$0xff] }
 0x165   : > { %v1019_v34 = vadd.f32 %v2172_v27, %v980_v19  ;;  %v1114_v44 = vadd.f32 %v1593_v35, %v1018_v29  ;;  %1729 = vst [vmem:[%s2139_s9 + $0x20] sm:$0xff] %v1654_v48   ;;  %1730 = vst [vmem:[%s2139_s9 + $0x28] sm:$0xff] %v1659_v59   ;;  %v1605_v9 = vunpack.c.l.bf16 %v1719_v58  ;;  %v1119_v11 = vadd.f32 %v1602_v1, %v1023_v57  ;;  %v1723_v43 = vld [vmem:[%s2134_s7 + $0x68] sm:$0xff]   ;;  %v995_v48 = vld [vmem:[#allocation2 + $0xe0] sm:$0xff] }
 0x166   : > { %v1117_v0 = vadd.f32 %v1598_v55, %v1021_v46  ;;  %v1148_v7 = vmax.f32 %v1116_v61, 0.0  ;;  %v1606_v12 = vunpack.c.h.bf16 %v1719_v58  ;;  %v1026_v13 = vadd.f32 %v2172_v27, %v987_v63  ;;  %v996_v53 = vld [vmem:[#allocation2 + $0xe8] sm:$0xff]  ;;  %v997_v63 = vld [vmem:[#allocation2 + $0xf0] sm:$0xff] }
 0x167   : > { %v1115_v50 = vadd.f32 %v1594_v40, %v1019_v34  ;;  %v1146_v54 = vmax.f32 %v1114_v44, 0.0  ;;  %v1150_v16 = vmax.f32 %v1118_v8, 0.0  ;;  %v1120_v17 = vadd.f32 %v1605_v9, %v1024_v2 }
 0x168   : > { %v1149_v10 = vmax.f32 %v1117_v0, 0.0  ;;  %v1027_v18 = vadd.f32 %v2172_v27, %v988_v4  ;;  %v1609_v19 = vunpack.c.l.bf16 %v1720_v5  ;;  %v1151_v22 = vmax.f32 %v1119_v11, 0.0  ;;  %v998_v0 = vld [vmem:[#allocation2 + $0xf8] sm:$0xff] }
 0x169   : > { %v1147_v60 = vmax.f32 %v1115_v50, 0.0  ;;  %v1121_v23 = vadd.f32 %v1606_v12, %v1025_v3  ;;  %v1610_v24 = vunpack.c.h.bf16 %v1720_v5  ;;  %v1152_v28 = vmax.f32 %v1120_v17, 0.0  ;;  %v1725_v5 = vld [vmem:[%s2134_s7 + $0x78] sm:$0xff]  }
 0x16a   : > { %v1669_v21 = vpack.c.bf16 %v1149_v10, %v1148_v7  ;;  %v1122_v29 = vadd.f32 %v1609_v19, %v1026_v13  ;;  %v1028_v30 = vadd.f32 %v2172_v27, %v989_v14  ;;  %v1029_v31 = vadd.f32 %v2172_v27, %v990_v15 }
 0x16b   : > { %v1664_v6 = vpack.c.bf16 %v1147_v60, %v1146_v54  ;;  %v1674_v33 = vpack.c.bf16 %v1151_v22, %v1150_v16  ;;  %v1153_v34 = vmax.f32 %v1121_v23, 0.0  ;;  %v1123_v35 = vadd.f32 %v1610_v24, %v1027_v18  ;;  %v1724_v54 = vld [vmem:[%s2134_s7 + $0x70] sm:$0xff]  }
 0x16c   : > { %1732 = vst [vmem:[%s2139_s9 + $0x38] sm:$0xff] %v1669_v21   ;;  %v1613_v36 = vunpack.c.l.bf16 %v1721_v20  ;;  %v1154_v39 = vmax.f32 %v1122_v29, 0.0  ;;  %v1614_v40 = vunpack.c.h.bf16 %v1721_v20  ;;  %v1030_v41 = vadd.f32 %v2172_v27, %v991_v25 }
 0x16d   : > { %1731 = vst [vmem:[%s2139_s9 + $0x30] sm:$0xff] %v1664_v6   ;;  %v1031_v42 = vadd.f32 %v2172_v27, %v992_v26  ;;  %1733 = vst [vmem:[%s2139_s9 + $0x40] sm:$0xff] %v1674_v33   ;;  %v1679_v44 = vpack.c.bf16 %v1153_v34, %v1152_v28  ;;  %v1155_v45 = vmax.f32 %v1123_v35, 0.0  ;;  %v1617_v47 = vunpack.c.l.bf16 %v1722_v32 }
 0x16e   : > { %v1124_v46 = vadd.f32 %v1613_v36, %v1028_v30  ;;  %v1125_v49 = vadd.f32 %v1614_v40, %v1029_v31  ;;  %v1618_v50 = vunpack.c.h.bf16 %v1722_v32  ;;  %v1032_v51 = vadd.f32 %v2172_v27, %v993_v37 }
 0x16f   : > { %v1033_v52 = vadd.f32 %v2172_v27, %v994_v38  ;;  %1734 = vst [vmem:[%s2139_s9 + $0x48] sm:$0xff] %v1679_v44   ;;  %v1684_v55 = vpack.c.bf16 %v1155_v45, %v1154_v39  ;;  %v1126_v57 = vadd.f32 %v1617_v47, %v1030_v41  ;;  %v1621_v58 = vunpack.c.l.bf16 %v1723_v43 }
 0x170   : > { %v1156_v56 = vmax.f32 %v1124_v46, 0.0  ;;  %v1157_v59 = vmax.f32 %v1125_v49, 0.0  ;;  %v1127_v60 = vadd.f32 %v1618_v50, %v1031_v42  ;;  %v1622_v61 = vunpack.c.h.bf16 %v1723_v43 }
 0x171   : > { %v1034_v62 = vadd.f32 %v2172_v27, %v995_v48  ;;  %1735 = vst [vmem:[%s2139_s9 + $0x50] sm:$0xff] %v1684_v55   ;;  %v1158_v1 = vmax.f32 %v1126_v57, 0.0  ;;  %v1128_v2 = vadd.f32 %v1621_v58, %v1032_v51  ;;  %v1035_v3 = vadd.f32 %v2172_v27, %v996_v53 }
 0x172   : > { %v1625_v4 = vunpack.c.l.bf16 %v1724_v54  ;;  %v1689_v6 = vpack.c.bf16 %v1157_v59, %v1156_v56  ;;  %v1159_v7 = vmax.f32 %v1127_v60, 0.0  ;;  %v1129_v8 = vadd.f32 %v1622_v61, %v1033_v52 }
 0x173   : > { %v1626_v9 = vunpack.c.h.bf16 %v1724_v54  ;;  %v1160_v10 = vmax.f32 %v1128_v2, 0.0  ;;  %v1036_v12 = vadd.f32 %v2172_v27, %v997_v63  ;;  %v1037_v13 = vadd.f32 %v2172_v27, %v998_v0 }
 0x174   : > { %v1130_v11 = vadd.f32 %v1625_v4, %v1034_v62  ;;  %1736 = vst [vmem:[%s2139_s9 + $0x58] sm:$0xff] %v1689_v6   ;;  %v1694_v14 = vpack.c.bf16 %v1159_v7, %v1158_v1  ;;  %v1161_v15 = vmax.f32 %v1129_v8, 0.0  ;;  %v1629_v17 = vunpack.c.l.bf16 %v1725_v5 }
 0x175   : > { %v1131_v16 = vadd.f32 %v1626_v9, %v1035_v3  ;;  %v1630_v19 = vunpack.c.h.bf16 %v1725_v5 }
 0x176   : > { %v1162_v18 = vmax.f32 %v1130_v11, 0.0  ;;  %1737 = vst [vmem:[%s2139_s9 + $0x60] sm:$0xff] %v1694_v14   ;;  %v1699_v20 = vpack.c.bf16 %v1161_v15, %v1160_v10  ;;  %v1132_v22 = vadd.f32 %v1629_v17, %v1036_v12 }
 0x177   : > { %v1163_v21 = vmax.f32 %v1131_v16, 0.0  ;;  %v1133_v23 = vadd.f32 %v1630_v19, %v1037_v13 }
 0x178   : > { %1738 = vst [vmem:[%s2139_s9 + $0x68] sm:$0xff] %v1699_v20   ;;  %v1164_v25 = vmax.f32 %v1132_v22, 0.0 }
 0x179   : > { %v1704_v24 = vpack.c.bf16 %v1163_v21, %v1162_v18  ;;  %v1165_v26 = vmax.f32 %v1133_v23, 0.0 }
 0x17b   : > { %1739 = vst [vmem:[%s2139_s9 + $0x70] sm:$0xff] %v1704_v24   ;;  %v1709_v27 = vpack.c.bf16 %v1165_v26, %v1164_v25 }
 0x17d   : > { %1740 = vst [vmem:[%s2139_s9 + $0x78] sm:$0xff] %v1709_v27  }
 0x17e PF: > { %s14_s21 = sadd.s32 1, %s1965_s21   ;;  %s2264_s15 = smov %s1945_s16 }
 0x17f   : > { %p11_p0 = scmp.ge.s32.totalorder %s14_s21, 12   ;;  %s2265_s16 = smov %s2044_s28 }
 0x180   : > { %s2266_s17 = smov %s1957_s19  ;;  %s2267_s18 = smov %s1961_s20 }
 0x181   : > { %s2268_s19 = smov %s2271_s22  ;;  %s2269_s20 = smov %s2275_s23 }
 0x182   :  { %13 = sbr.rel (!%p11_p0) target bundleno = 4 (0x4), region = 129 }

// kernel: resnet34_forward.48
= control target key start
LH: loop header
LB: loop body
LE: loop exit
PB: predicated region body
PF: predicated region fallthrough
CT: control target
= control target key end

     0   :  { %s1190_s12 = smov 0   ;;  %s1192_s13 = smov 0   ;;  %s1322_s0 = inlined_call_operand.vmem [shape: bf16[128,640], index: 0, kind: input, shape index: {}]   ;;  %s1323_s1 = inlined_call_operand.vmem [shape: bf16[640,128], index: 1, kind: input, shape index: {}]   ;;  %s1324_s2 = inlined_call_operand.vmem [shape: f32[1,128], index: 2, kind: input, shape index: {}]   ;;  %s1325_s3 = inlined_call_operand.vmem [shape: bf16[128,128], index: 3, kind: output, shape index: {}]  }
   0x1   :  { %s1194_s14 = smov 0   ;;  %s1196_s15 = smov 0  }
   0x2   :  { %s1198_s16 = smov 0  }
   0x3 LB: > { %s25_s17 = sadd.s32 1, %s1163_s15  ;;  %p48_p1 = scmp.ne.s32.totalorder %s1155_s13, %s1151_s12  ;;  %s1167_s16 = sphi %s1198_s16, %s13_s16   ;;  %s1163_s15 = sphi %s1196_s15, %s1329_s15   ;;  %s1159_s14 = sphi %s1194_s14, %s1328_s14   ;;  %s1155_s13 = sphi %s1192_s13, %s1327_s13   ;;  %s1151_s12 = sphi %s1190_s12, %s1326_s12  }
   0x4   : > { %p26_p0 = scmp.ge.s32.totalorder %s25_s17, 5  ;;  %p49_p2 = scmp.eq.s32.totalorder %s1167_s16, 0 }
   0x5   : > { %s41_s19 = sadd.s32 1, %s1155_s13  ;;  %p899_p5 = scmp.ge.s32.totalorder %s1167_s16, 5 }
   0x6   : > { %s1331_s17 = smov (%p26_p0, %s25_s17), 0  ;;  %p50_p3 = por %p49_p2, %p48_p1 }
   0x7   : > { %s37_s18 = ssub.s32 %s1163_s15, %s1331_s17  ;;  %162 = sbr.rel (%p899_p5) target bundleno = 28 (0x1c), region = 20 }
   0x8   : > { %p39_p4 = scmp.eq.s32.totalorder %s37_s18, 0 }
   0xa   : > { %s1225_s20 = scalar_select %p39_p4, %s1155_s13, %s41_s19  }
   0xe   : > { %165 = sbr.rel (!%p50_p3) target bundleno = 28 (0x1c), region = 24  ;;  %s167_s21 = sand.u32 (%p50_p3), 1, %s1155_s13  }
   0xf   : > { %s901_s22 = sshll.u32 (%p50_p3), %s1163_s15, 2  ;;  %s900_s23 = sshll.u32 (%p50_p3), %s167_s21, 6 }
  0x10   : > { %s1233_s26 = scalar_lea.vmem (%p50_p3), %s1322_s0, %s901_s22  ;;  %s169_s27 = scalar_lea.vmem (%p50_p3), [#allocation3], %s900_s23 }
  0x11   : > { %v190_v0 = vld [vmem:[%s1233_s26] sm:$0xf] (%p50_p3)  ;;  %v192_v1 = vld [vmem:[%s1233_s26 + $0x14] sm:$0xf] (%p50_p3)  ;;  %v194_v2 = vld [vmem:[%s1233_s26 + $0x28] sm:$0xf] (%p50_p3) }
  0x12   : > { %191 = vst [vmem:[%s169_s27] sm:$0xf] (%p50_p3), %v190_v0  ;;  %193 = vst [vmem:[%s169_s27 + $0x4] sm:$0xf] (%p50_p3), %v192_v1  ;;  %v196_v3 = vld [vmem:[%s1233_s26 + $0x3c] sm:$0xf] (%p50_p3) }
  0x13   : > { %v198_v4 = vld [vmem:[%s1233_s26 + $0x50] sm:$0xf] (%p50_p3)  ;;  %195 = vst [vmem:[%s169_s27 + $0x8] sm:$0xf] (%p50_p3), %v194_v2  ;;  %197 = vst [vmem:[%s169_s27 + $0xc] sm:$0xf] (%p50_p3), %v196_v3 }
  0x14   : > { %199 = vst [vmem:[%s169_s27 + $0x10] sm:$0xf] (%p50_p3), %v198_v4  ;;  %v200_v5 = vld [vmem:[%s1233_s26 + $0x64] sm:$0xf] (%p50_p3)  ;;  %v202_v6 = vld [vmem:[%s1233_s26 + $0x78] sm:$0xf] (%p50_p3) }
  0x15   : > { %v204_v7 = vld [vmem:[%s1233_s26 + $0x8c] sm:$0xf]  ;;  %201 = vst [vmem:[%s169_s27 + $0x14] sm:$0xf] %v200_v5  ;;  %203 = vst [vmem:[%s169_s27 + $0x18] sm:$0xf] %v202_v6 }
  0x16   : > { %205 = vst [vmem:[%s169_s27 + $0x1c] sm:$0xf] %v204_v7  ;;  %v206_v8 = vld [vmem:[%s1233_s26 + $0xa0] sm:$0xf]  ;;  %v208_v9 = vld [vmem:[%s1233_s26 + $0xb4] sm:$0xf] }
  0x17   : > { %v210_v10 = vld [vmem:[%s1233_s26 + $0xc8] sm:$0xf]  ;;  %207 = vst [vmem:[%s169_s27 + $0x20] sm:$0xf] %v206_v8  ;;  %209 = vst [vmem:[%s169_s27 + $0x24] sm:$0xf] %v208_v9 }
  0x18   : > { %211 = vst [vmem:[%s169_s27 + $0x28] sm:$0xf] %v210_v10  ;;  %v212_v11 = vld [vmem:[%s1233_s26 + $0xdc] sm:$0xf]  ;;  %v214_v12 = vld [vmem:[%s1233_s26 + $0xf0] sm:$0xf] }
  0x19   : > { %v216_v13 = vld [vmem:[%s1233_s26 + $0x104] sm:$0xf]  ;;  %213 = vst [vmem:[%s169_s27 + $0x2c] sm:$0xf] %v212_v11  ;;  %215 = vst [vmem:[%s169_s27 + $0x30] sm:$0xf] %v214_v12 }
  0x1a   : > { %217 = vst [vmem:[%s169_s27 + $0x34] sm:$0xf] %v216_v13  ;;  %v218_v14 = vld [vmem:[%s1233_s26 + $0x118] sm:$0xf]  ;;  %v220_v15 = vld [vmem:[%s1233_s26 + $0x12c] sm:$0xf] }
  0x1b   : > { %219 = vst [vmem:[%s169_s27 + $0x38] sm:$0xf] %v218_v14  ;;  %221 = vst [vmem:[%s169_s27 + $0x3c] sm:$0xf] %v220_v15 }
  0x1c PF: > { %p902_p6 = scmp.ge.s32.totalorder %s1167_s16, 1  ;;  %p287_p7 = scmp.lt.s32.totalorder %s1167_s16, 6 }
  0x1e   : > { %p288_p8 = pnand %p902_p6, %p287_p7 }
  0x1f   : > { %s294_s28 = sand.u32 (!%p288_p8), 1, %s1151_s12   ;;  %s904_s29 = sshll.u32 (!%p288_p8), %s1159_s14, 4 }
  0x20   : > { %291 = sbr.rel (%p288_p8) target bundleno = 323 (0x143), region = 69  ;;  %s903_s30 = sshll.u32 (!%p288_p8), %s294_s28, 6 }
  0x21   : > { %p333_p9 = scmp.lt.s32.totalorder (!%p288_p8), %s904_s29, 79  ;;  %s1260_s8 = scalar_lea.vmem (!%p288_p8), [#allocation3], %s903_s30 }
  0x22   : > { %p906_p10 = scmp.ne.s32.totalorder (!%p288_p8), %s1159_s14, 0 }
  0x27   : > { %s1333_s29 = smov (!%p333_p9, %s904_s29), 79  ;;  %357 = sbr.rel (%p906_p10) target bundleno = 49 (0x31), region = 77 }
  0x28   : > { %s905_s4 = sshll.u32 %s1333_s29, 2  ;;  %v1169_v16 = vmov (!%p906_p10), 0.0  }
  0x29   : > { %s1258_s7 = scalar_lea.vmem %s1323_s1, %s905_s4  ;;  %358 = vst [vmem:[#allocation2] sm:$0xff] (!%p906_p10), %v1169_v16  ;;  %359 = vst [vmem:[#allocation2 + $0x8] sm:$0xff] (!%p906_p10), %v1169_v16 }
  0x2a   : > { %360 = vst [vmem:[#allocation2 + $0x10] sm:$0xff] (!%p906_p10), %v1169_v16  ;;  %361 = vst [vmem:[#allocation2 + $0x18] sm:$0xff] (!%p906_p10), %v1169_v16 }
  0x2b   : > { %362 = vst [vmem:[#allocation2 + $0x20] sm:$0xff] (!%p906_p10), %v1169_v16  ;;  %363 = vst [vmem:[#allocation2 + $0x28] sm:$0xff] (!%p906_p10), %v1169_v16 }
  0x2c   : > { %364 = vst [vmem:[#allocation2 + $0x30] sm:$0xff] (!%p906_p10), %v1169_v16  ;;  %365 = vst [vmem:[#allocation2 + $0x38] sm:$0xff] (!%p906_p10), %v1169_v16 }
  0x2d   : > { %366 = vst [vmem:[#allocation2 + $0x40] sm:$0xff] (!%p906_p10), %v1169_v16  ;;  %367 = vst [vmem:[#allocation2 + $0x48] sm:$0xff] (!%p906_p10), %v1169_v16 }
  0x2e   : > { %368 = vst [vmem:[#allocation2 + $0x50] sm:$0xff] %v1169_v16  ;;  %369 = vst [vmem:[#allocation2 + $0x58] sm:$0xff] %v1169_v16 }
  0x2f   : > { %370 = vst [vmem:[#allocation2 + $0x60] sm:$0xff] %v1169_v16  ;;  %371 = vst [vmem:[#allocation2 + $0x68] sm:$0xff] %v1169_v16 }
  0x30   : > { %372 = vst [vmem:[#allocation2 + $0x70] sm:$0xff] %v1169_v16  ;;  %373 = vst [vmem:[#allocation2 + $0x78] sm:$0xff] %v1169_v16 }
  0x31 PF: > { %v1113_v17 = vld [vmem:[%s1258_s7] sm:$0xff]   ;;  %v1114_v18 = vld [vmem:[%s1258_s7 + $0x8] sm:$0xff]   ;;  %v1115_v19 = vld [vmem:[%s1258_s7 + $0x10] sm:$0xff]   ;;  %p923_p11 = scmp.ne.s32.totalorder %s1159_s14, 4 }
  0x32   : > { %1024 = vmatprep.subr.bf16.mxu0 %v1113_v17  ;;  %1056 = vmatprep.subr.bf16.mxu1 %v1113_v17  ;;  %v1116_v20 = vld [vmem:[%s1258_s7 + $0x18] sm:$0xff]   ;;  %v1121_v21 = vld [vmem:[%s1260_s8] sm:$0xff]   ;;  %v1118_v24 = vld [vmem:[%s1258_s7 + $0x28] sm:$0xff]  }
  0x33   : > { %1025 = vmatpush3.bf16.msra.mxu0 %v1113_v17  ;;  %1064 = vmatpush3.bf16.msra.mxu1 %v1113_v17  ;;  %v1122_v22 = vld [vmem:[%s1260_s8 + $0x20] sm:$0xff]   ;;  %v1119_v25 = vld [vmem:[%s1258_s7 + $0x30] sm:$0xff]   ;;  %v1120_v26 = vld [vmem:[%s1258_s7 + $0x38] sm:$0xff]  }
  0x34   : > { %1026 = vmatprep.subr.bf16.mxu0 %v1114_v18  ;;  %1057 = vmatprep.subr.bf16.mxu1 %v1114_v18  ;;  %v1117_v23 = vld [vmem:[%s1258_s7 + $0x20] sm:$0xff]   ;;  %v1123_v27 = vld [vmem:[%s1260_s8 + $0x8] sm:$0xff]   ;;  %v1125_v29 = vld [vmem:[%s1260_s8 + $0x10] sm:$0xff]  }
  0x35   : > { %1040 = vmatprep.mubr.bf16.mxu0 %v1121_v21  ;;  %1048 = vmatprep.mubr.bf16.mxu1 %v1122_v22  ;;  %v1124_v28 = vld [vmem:[%s1260_s8 + $0x28] sm:$0xff]   ;;  %v1126_v30 = vld [vmem:[%s1260_s8 + $0x30] sm:$0xff]   ;;  %v1127_v31 = vld [vmem:[%s1260_s8 + $0x18] sm:$0xff]  }
  0x36   : > { %v1128_v32 = vld [vmem:[%s1260_s8 + $0x38] sm:$0xff]   ;;  %v376_v33 = vld [vmem:[#allocation2 + $0x10] sm:$0xff]  ;;  %v374_v35 = vld [vmem:[#allocation2] sm:$0xff] }
  0x37   : > { %1027 = vmatpush3.bf16.msra.mxu0 %v1114_v18  ;;  %1065 = vmatpush3.bf16.msra.mxu1 %v1114_v18  ;;  %v384_v34 = vld [vmem:[#allocation2 + $0x50] sm:$0xff]  ;;  %v382_v36 = vld [vmem:[#allocation2 + $0x40] sm:$0xff]  ;;  %v377_v39 = vld [vmem:[#allocation2 + $0x18] sm:$0xff] }
  0x38   : > { %1028 = vmatprep.subr.bf16.mxu0 %v1115_v19  ;;  %1058 = vmatprep.subr.bf16.mxu1 %v1115_v19  ;;  %v385_v40 = vld [vmem:[#allocation2 + $0x58] sm:$0xff]  ;;  %v375_v45 = vld [vmem:[#allocation2 + $0x8] sm:$0xff]  ;;  %v380_v57 = vld [vmem:[#allocation2 + $0x30] sm:$0xff] }
  0x39   : > { %v383_v46 = vld [vmem:[#allocation2 + $0x48] sm:$0xff]  ;;  %v388_v58 = vld [vmem:[#allocation2 + $0x70] sm:$0xff]  ;;  %v378_v59 = vld [vmem:[#allocation2 + $0x20] sm:$0xff] }
  0x3a   : > { %v386_v60 = vld [vmem:[#allocation2 + $0x60] sm:$0xff]  ;;  %v381_v63 = vld [vmem:[#allocation2 + $0x38] sm:$0xff]  ;;  %v379_v5 = vld [vmem:[#allocation2 + $0x28] sm:$0xff] }
  0x3b   : > { %1029 = vmatpush3.bf16.msra.mxu0 %v1115_v19  ;;  %1066 = vmatpush3.bf16.msra.mxu1 %v1115_v19  ;;  %v389_v0 = vld [vmem:[#allocation2 + $0x78] sm:$0xff]  ;;  %v387_v6 = vld [vmem:[#allocation2 + $0x68] sm:$0xff]  ;;  %v924_v19 = vld [vmem:[%s1324_s2] ss:$0 sm:$0xff] (!%p923_p11) }
  0x3c   : > { %1030 = vmatprep.subr.bf16.mxu0 %v1116_v20  ;;  %1059 = vmatprep.subr.bf16.mxu1 %v1116_v20 }
  0x3f   : > { %1031 = vmatpush3.bf16.msra.mxu0 %v1116_v20  ;;  %1067 = vmatpush3.bf16.msra.mxu1 %v1116_v20 }
  0x40   : > { %1032 = vmatprep.subr.bf16.mxu0 %v1117_v23  ;;  %1060 = vmatprep.subr.bf16.mxu1 %v1117_v23 }
  0x43   : > { %1033 = vmatpush3.bf16.msra.mxu0 %v1117_v23  ;;  %1068 = vmatpush3.bf16.msra.mxu1 %v1117_v23 }
  0x44   : > { %1034 = vmatprep.subr.bf16.mxu0 %v1118_v24  ;;  %1061 = vmatprep.subr.bf16.mxu1 %v1118_v24 }
  0x47   : > { %1035 = vmatpush3.bf16.msra.mxu0 %v1118_v24  ;;  %1069 = vmatpush3.bf16.msra.mxu1 %v1118_v24 }
  0x48   : > { %1036 = vmatprep.subr.bf16.mxu0 %v1119_v25  ;;  %1062 = vmatprep.subr.bf16.mxu1 %v1119_v25 }
  0x4b   : > { %1037 = vmatpush3.bf16.msra.mxu0 %v1119_v25  ;;  %1070 = vmatpush3.bf16.msra.mxu1 %v1119_v25 }
  0x4c   : > { %1038 = vmatprep.subr.bf16.mxu0 %v1120_v26  ;;  %1063 = vmatprep.subr.bf16.mxu1 %v1120_v26 }
  0x4f   : > { %1039 = vmatpush3.bf16.msra.mxu0 %v1120_v26  ;;  %1071 = vmatpush3.bf16.msra.mxu1 %v1120_v26 }
  0x52   : > { %1041 = vmatmul.mubr.bf16.vlgmr.msra.gmra.mrb[0].mxu0 %v1123_v27  ;;  %1049 = vmatmul.mubr.bf16.vlgmr.msra.gmra.mrb[0].mxu1 %v1124_v28 }
  0x53   : > { %1044 = vmatprep.mubr.bf16.mxu0 %v1125_v29  ;;  %1052 = vmatprep.mubr.bf16.mxu1 %v1126_v30 }
  0x5a   : > { %1045 = vmatmul.mubr.bf16.gmra.mrb[4].mxu0 %v1127_v31  ;;  %1053 = vmatmul.mubr.bf16.gmra.mrb[4].mxu1 %v1128_v32 }
 0x125   : > { %v1042_v37 = vpop.f32.mrb[0].mxu0  ;;  %v1050_v38 = vpop.f32.mrb[0].mxu1 }
 0x126   : > { %v617_v41 = vadd.f32 %v1042_v37, %v376_v33  ;;  %v625_v42 = vadd.f32 %v1050_v38, %v384_v34  ;;  %v552_v43 = vpop.f32.mrb[1].mxu0  ;;  %v584_v44 = vpop.f32.mrb[1].mxu1 }
 0x127   : > { %v615_v47 = vadd.f32 %v552_v43, %v374_v35  ;;  %v623_v48 = vadd.f32 %v584_v44, %v382_v36  ;;  %v1043_v49 = vpop.f32.mrb[2].mxu0  ;;  %v1051_v50 = vpop.f32.mrb[2].mxu1 }
 0x128   : > { %633 = vst [vmem:[#allocation2 + $0x10] sm:$0xff] %v617_v41  ;;  %641 = vst [vmem:[#allocation2 + $0x50] sm:$0xff] %v625_v42  ;;  %v618_v51 = vadd.f32 %v1043_v49, %v377_v39  ;;  %v626_v52 = vadd.f32 %v1051_v50, %v385_v40  ;;  %v555_v53 = vpop.f32.mrb[3].mxu0  ;;  %v587_v54 = vpop.f32.mrb[3].mxu1 }
 0x129   : > { %631 = vst [vmem:[#allocation2] sm:$0xff] %v615_v47  ;;  %639 = vst [vmem:[#allocation2 + $0x40] sm:$0xff] %v623_v48  ;;  %v616_v55 = vadd.f32 %v555_v53, %v375_v45  ;;  %v624_v56 = vadd.f32 %v587_v54, %v383_v46 }
 0x12a   : > { %634 = vst [vmem:[#allocation2 + $0x18] sm:$0xff] %v618_v51  ;;  %642 = vst [vmem:[#allocation2 + $0x58] sm:$0xff] %v626_v52 }
 0x12b   : > { %632 = vst [vmem:[#allocation2 + $0x8] sm:$0xff] %v616_v55  ;;  %640 = vst [vmem:[#allocation2 + $0x48] sm:$0xff] %v624_v56 }
 0x12d   : > { %v1046_v61 = vpop.f32.mrb[4].mxu0  ;;  %v1054_v62 = vpop.f32.mrb[4].mxu1  ;;  %650 = sbr.rel (%p923_p11) target bundleno = 323 (0x143), region = 81 }
 0x12e   : > { %v621_v1 = vadd.f32 %v1046_v61, %v380_v57  ;;  %v629_v2 = vadd.f32 %v1054_v62, %v388_v58  ;;  %v568_v3 = vpop.f32.mrb[5].mxu0  ;;  %v600_v4 = vpop.f32.mrb[5].mxu1 }
 0x12f   : > { %v619_v7 = vadd.f32 %v568_v3, %v378_v59  ;;  %v627_v8 = vadd.f32 %v600_v4, %v386_v60  ;;  %v1047_v9 = vpop.f32.mrb[6].mxu0  ;;  %v1055_v10 = vpop.f32.mrb[6].mxu1  ;;  %v653_v22 = vld [vmem:[#allocation2 + $0x10] sm:$0xff] (!%p923_p11) }
 0x130   : > { %637 = vst [vmem:[#allocation2 + $0x30] sm:$0xff] %v621_v1  ;;  %645 = vst [vmem:[#allocation2 + $0x70] sm:$0xff] %v629_v2  ;;  %v622_v11 = vadd.f32 %v1047_v9, %v381_v63  ;;  %v630_v12 = vadd.f32 %v1055_v10, %v389_v0  ;;  %v571_v13 = vpop.f32.mrb[7].mxu0  ;;  %v603_v14 = vpop.f32.mrb[7].mxu1  ;;  %v651_v17 = vld [vmem:[#allocation2] sm:$0xff] (!%p923_p11)  ;;  %v676_v25 = vadd.f32 (!%p923_p11), %v924_v19, %v653_v22  ;;  %v661_v37 = vld [vmem:[#allocation2 + $0x50] sm:$0xff] (!%p923_p11) }
 0x131   : > { %635 = vst [vmem:[#allocation2 + $0x20] sm:$0xff] %v619_v7  ;;  %643 = vst [vmem:[#allocation2 + $0x60] sm:$0xff] %v627_v8  ;;  %v620_v15 = vadd.f32 %v571_v13, %v379_v5  ;;  %v628_v16 = vadd.f32 %v603_v14, %v387_v6  ;;  %v674_v20 = vadd.f32 (!%p923_p11), %v924_v19, %v651_v17  ;;  %v654_v23 = vld [vmem:[#allocation2 + $0x18] sm:$0xff] (!%p923_p11)  ;;  %v659_v35 = vld [vmem:[#allocation2 + $0x40] sm:$0xff] (!%p923_p11) }
 0x132   : > { %638 = vst [vmem:[#allocation2 + $0x38] sm:$0xff] %v622_v11  ;;  %646 = vst [vmem:[#allocation2 + $0x78] sm:$0xff] %v630_v12  ;;  %v652_v18 = vld [vmem:[#allocation2 + $0x8] sm:$0xff] (!%p923_p11)  ;;  %v677_v26 = vadd.f32 (!%p923_p11), %v924_v19, %v654_v23  ;;  %v692_v38 = vmax.f32 (!%p923_p11), %v676_v25, 0.0  ;;  %v662_v42 = vld [vmem:[#allocation2 + $0x58] sm:$0xff] (!%p923_p11)  ;;  %v682_v47 = vadd.f32 (!%p923_p11), %v924_v19, %v659_v35  ;;  %v684_v52 = vadd.f32 (!%p923_p11), %v924_v19, %v661_v37 }
 0x133   : > { %636 = vst [vmem:[#allocation2 + $0x28] sm:$0xff] %v620_v15  ;;  %644 = vst [vmem:[#allocation2 + $0x68] sm:$0xff] %v628_v16  ;;  %v675_v21 = vadd.f32 (!%p923_p11), %v924_v19, %v652_v18  ;;  %v690_v31 = vmax.f32 (!%p923_p11), %v674_v20, 0.0  ;;  %v660_v36 = vld [vmem:[#allocation2 + $0x48] sm:$0xff] (!%p923_p11)  ;;  %v685_v57 = vadd.f32 (!%p923_p11), %v924_v19, %v662_v42 }
 0x134   : > { %v693_v39 = vmax.f32 %v677_v26, 0.0  ;;  %v683_v51 = vadd.f32 %v924_v19, %v660_v36  ;;  %v698_v56 = vmax.f32 %v682_v47, 0.0  ;;  %v700_v61 = vmax.f32 %v684_v52, 0.0 }
 0x135   : > { %v691_v32 = vmax.f32 %v675_v21, 0.0  ;;  %v701_v63 = vmax.f32 %v685_v57, 0.0 }
 0x136   : > { %v969_v49 = vpack.c.bf16 %v693_v39, %v692_v38  ;;  %v699_v60 = vmax.f32 %v683_v51, 0.0 }
 0x137   : > { %v657_v29 = vld [vmem:[#allocation2 + $0x30] sm:$0xff]  ;;  %v964_v44 = vpack.c.bf16 %v691_v32, %v690_v31  ;;  %v989_v5 = vpack.c.bf16 %v701_v63, %v700_v61 }
 0x138   : > { %v655_v24 = vld [vmem:[#allocation2 + $0x20] sm:$0xff]  ;;  %v680_v34 = vadd.f32 %v924_v19, %v657_v29  ;;  %v665_v53 = vld [vmem:[#allocation2 + $0x70] sm:$0xff]  ;;  %1001 = vst [vmem:[%s1325_s3 + $0x8] sm:$0xff] %v969_v49   ;;  %v984_v3 = vpack.c.bf16 %v699_v60, %v698_v56 }
 0x139   : > { %v678_v28 = vadd.f32 %v924_v19, %v655_v24  ;;  %v658_v30 = vld [vmem:[#allocation2 + $0x38] sm:$0xff]  ;;  %v663_v43 = vld [vmem:[#allocation2 + $0x60] sm:$0xff]  ;;  %965 = vst [vmem:[%s1325_s3] sm:$0xff] %v964_v44   ;;  %v688_v1 = vadd.f32 %v924_v19, %v665_v53  ;;  %1005 = vst [vmem:[%s1325_s3 + $0x28] sm:$0xff] %v989_v5  }
 0x13a   : > { %v656_v27 = vld [vmem:[#allocation2 + $0x28] sm:$0xff]  ;;  %v681_v41 = vadd.f32 %v924_v19, %v658_v30  ;;  %v696_v46 = vmax.f32 %v680_v34, 0.0  ;;  %v666_v54 = vld [vmem:[#allocation2 + $0x78] sm:$0xff]  ;;  %v686_v58 = vadd.f32 %v924_v19, %v663_v43  ;;  %1004 = vst [vmem:[%s1325_s3 + $0x20] sm:$0xff] %v984_v3  }
 0x13b   : > { %v679_v33 = vadd.f32 %v924_v19, %v656_v27  ;;  %v694_v40 = vmax.f32 %v678_v28, 0.0  ;;  %v664_v48 = vld [vmem:[#allocation2 + $0x68] sm:$0xff]  ;;  %v689_v2 = vadd.f32 %v924_v19, %v666_v54  ;;  %v704_v6 = vmax.f32 %v688_v1, 0.0 }
 0x13c   : > { %v697_v50 = vmax.f32 %v681_v41, 0.0  ;;  %v687_v62 = vadd.f32 %v924_v19, %v664_v48  ;;  %v702_v0 = vmax.f32 %v686_v58, 0.0 }
 0x13d   : > { %v695_v45 = vmax.f32 %v679_v33, 0.0  ;;  %v705_v7 = vmax.f32 %v689_v2, 0.0 }
 0x13e   : > { %v979_v59 = vpack.c.bf16 %v697_v50, %v696_v46  ;;  %v703_v4 = vmax.f32 %v687_v62, 0.0 }
 0x13f   : > { %v974_v55 = vpack.c.bf16 %v695_v45, %v694_v40  ;;  %v999_v9 = vpack.c.bf16 %v705_v7, %v704_v6 }
 0x140   : > { %1003 = vst [vmem:[%s1325_s3 + $0x18] sm:$0xff] %v979_v59   ;;  %v994_v8 = vpack.c.bf16 %v703_v4, %v702_v0 }
 0x141   : > { %1002 = vst [vmem:[%s1325_s3 + $0x10] sm:$0xff] %v974_v55   ;;  %1007 = vst [vmem:[%s1325_s3 + $0x38] sm:$0xff] %v999_v9  }
 0x142   : > { %1006 = vst [vmem:[%s1325_s3 + $0x30] sm:$0xff] %v994_v8  }
 0x143 PF: > { %s13_s16 = sadd.s32 1, %s1167_s16   ;;  %s1326_s12 = smov %s1155_s13 }
 0x144   : > { %p10_p12 = scmp.ge.s32.totalorder %s13_s16, 7   ;;  %s1327_s13 = smov %s1225_s20 }
 0x145   : > { %s1328_s14 = smov %s1163_s15  ;;  %s1329_s15 = smov %s1331_s17 }
 0x146   :  { %12 = sbr.rel (!%p10_p12) target bundleno = 3 (0x3), region = 122 }

// kernel: resnet34_forward.47
= control target key start
LH: loop header
LB: loop body
LE: loop exit
PB: predicated region body
PF: predicated region fallthrough
CT: control target
= control target key end

     0   :  { %s705_s1 = inlined_call_operand.vmem [shape: bf16[128,128], index: 1, kind: input, shape index: {}]   ;;  %s706_s0 = inlined_call_operand.vmem [shape: bf16[128,128], index: 0, kind: input, shape index: {}]   ;;  %s707_s2 = inlined_call_operand.vmem [shape: f32[1,128], index: 2, kind: input, shape index: {}]   ;;  %s708_s3 = inlined_call_operand.vmem [shape: bf16[128,128], index: 3, kind: output, shape index: {}]  }
   0x1   :  { %v594_v0 = vld [vmem:[%s705_s1] sm:$0xff]   ;;  %v595_v1 = vld [vmem:[%s705_s1 + $0x8] sm:$0xff]   ;;  %v596_v2 = vld [vmem:[%s705_s1 + $0x10] sm:$0xff]  }
   0x2   :  { %546 = vmatprep.subr.bf16.mxu0 %v594_v0  ;;  %578 = vmatprep.subr.bf16.mxu1 %v594_v0  ;;  %v597_v3 = vld [vmem:[%s705_s1 + $0x18] sm:$0xff]   ;;  %v602_v4 = vld [vmem:[%s706_s0] sm:$0xff]   ;;  %v599_v7 = vld [vmem:[%s705_s1 + $0x28] sm:$0xff]  }
   0x3   :  { %547 = vmatpush3.bf16.msra.mxu0 %v594_v0  ;;  %586 = vmatpush3.bf16.msra.mxu1 %v594_v0  ;;  %v603_v5 = vld [vmem:[%s706_s0 + $0x20] sm:$0xff]   ;;  %v600_v8 = vld [vmem:[%s705_s1 + $0x30] sm:$0xff]   ;;  %v601_v9 = vld [vmem:[%s705_s1 + $0x38] sm:$0xff]  }
   0x4   :  { %548 = vmatprep.subr.bf16.mxu0 %v595_v1  ;;  %579 = vmatprep.subr.bf16.mxu1 %v595_v1  ;;  %v598_v6 = vld [vmem:[%s705_s1 + $0x20] sm:$0xff]   ;;  %v604_v10 = vld [vmem:[%s706_s0 + $0x8] sm:$0xff]   ;;  %v606_v12 = vld [vmem:[%s706_s0 + $0x10] sm:$0xff]  }
   0x5   :  { %562 = vmatprep.mubr.bf16.mxu0 %v602_v4  ;;  %570 = vmatprep.mubr.bf16.mxu1 %v603_v5  ;;  %v605_v11 = vld [vmem:[%s706_s0 + $0x28] sm:$0xff]   ;;  %v607_v13 = vld [vmem:[%s706_s0 + $0x30] sm:$0xff]   ;;  %v608_v14 = vld [vmem:[%s706_s0 + $0x18] sm:$0xff]  }
   0x6   :  { %v609_v15 = vld [vmem:[%s706_s0 + $0x38] sm:$0xff]   ;;  %v450_v17 = vld [vmem:[%s707_s2] ss:$0 sm:$0xff] }
   0x7   :  { %549 = vmatpush3.bf16.msra.mxu0 %v595_v1  ;;  %587 = vmatpush3.bf16.msra.mxu1 %v595_v1 }
   0x8   :  { %550 = vmatprep.subr.bf16.mxu0 %v596_v2  ;;  %580 = vmatprep.subr.bf16.mxu1 %v596_v2 }
   0xb   :  { %551 = vmatpush3.bf16.msra.mxu0 %v596_v2  ;;  %588 = vmatpush3.bf16.msra.mxu1 %v596_v2 }
   0xc   :  { %552 = vmatprep.subr.bf16.mxu0 %v597_v3  ;;  %581 = vmatprep.subr.bf16.mxu1 %v597_v3 }
   0xf   :  { %553 = vmatpush3.bf16.msra.mxu0 %v597_v3  ;;  %589 = vmatpush3.bf16.msra.mxu1 %v597_v3 }
  0x10   :  { %554 = vmatprep.subr.bf16.mxu0 %v598_v6  ;;  %582 = vmatprep.subr.bf16.mxu1 %v598_v6 }
  0x13   :  { %555 = vmatpush3.bf16.msra.mxu0 %v598_v6  ;;  %590 = vmatpush3.bf16.msra.mxu1 %v598_v6 }
  0x14   :  { %556 = vmatprep.subr.bf16.mxu0 %v599_v7  ;;  %583 = vmatprep.subr.bf16.mxu1 %v599_v7 }
  0x17   :  { %557 = vmatpush3.bf16.msra.mxu0 %v599_v7  ;;  %591 = vmatpush3.bf16.msra.mxu1 %v599_v7 }
  0x18   :  { %558 = vmatprep.subr.bf16.mxu0 %v600_v8  ;;  %584 = vmatprep.subr.bf16.mxu1 %v600_v8 }
  0x1b   :  { %559 = vmatpush3.bf16.msra.mxu0 %v600_v8  ;;  %592 = vmatpush3.bf16.msra.mxu1 %v600_v8 }
  0x1c   :  { %560 = vmatprep.subr.bf16.mxu0 %v601_v9  ;;  %585 = vmatprep.subr.bf16.mxu1 %v601_v9 }
  0x1f   :  { %561 = vmatpush3.bf16.msra.mxu0 %v601_v9  ;;  %593 = vmatpush3.bf16.msra.mxu1 %v601_v9 }
  0x22   :  { %563 = vmatmul.mubr.bf16.vlgmr.msra.gmra.mrb[0].mxu0 %v604_v10  ;;  %571 = vmatmul.mubr.bf16.vlgmr.msra.gmra.mrb[0].mxu1 %v605_v11 }
  0x23   :  { %566 = vmatprep.mubr.bf16.mxu0 %v606_v12  ;;  %574 = vmatprep.mubr.bf16.mxu1 %v607_v13 }
  0x2a   :  { %567 = vmatmul.mubr.bf16.gmra.mrb[4].mxu0 %v608_v14  ;;  %575 = vmatmul.mubr.bf16.gmra.mrb[4].mxu1 %v609_v15 }
  0xf5   :  { %v564_v16 = vpop.f32.mrb[0].mxu0  ;;  %v572_v18 = vpop.f32.mrb[0].mxu1 }
  0xf6   :  { %v213_v19 = vpop.f32.mrb[1].mxu0  ;;  %v245_v20 = vpop.f32.mrb[1].mxu1  ;;  %v336_v23 = vadd.f32 %v564_v16, %v450_v17  ;;  %v344_v24 = vadd.f32 %v572_v18, %v450_v17 }
  0xf7   :  { %v565_v21 = vpop.f32.mrb[2].mxu0  ;;  %v573_v22 = vpop.f32.mrb[2].mxu1  ;;  %v334_v29 = vadd.f32 %v450_v17, %v213_v19  ;;  %v342_v30 = vadd.f32 %v450_v17, %v245_v20 }
  0xf8   :  { %v337_v25 = vadd.f32 %v565_v21, %v450_v17  ;;  %v345_v26 = vadd.f32 %v573_v22, %v450_v17  ;;  %v216_v27 = vpop.f32.mrb[3].mxu0  ;;  %v248_v28 = vpop.f32.mrb[3].mxu1 }
  0xf9   :  { %v335_v31 = vadd.f32 %v450_v17, %v216_v27  ;;  %v343_v32 = vadd.f32 %v450_v17, %v248_v28 }
  0xfa   :  { %v491_v33 = vpack.c.bf16 %v337_v25, %v336_v23  ;;  %v511_v34 = vpack.c.bf16 %v345_v26, %v344_v24 }
  0xfb   :  { %v486_v35 = vpack.c.bf16 %v335_v31, %v334_v29  ;;  %v506_v36 = vpack.c.bf16 %v343_v32, %v342_v30 }
  0xfc   :  { %523 = vst [vmem:[%s708_s3 + $0x8] sm:$0xff] %v491_v33   ;;  %527 = vst [vmem:[%s708_s3 + $0x28] sm:$0xff] %v511_v34  }
  0xfd   :  { %487 = vst [vmem:[%s708_s3] sm:$0xff] %v486_v35   ;;  %526 = vst [vmem:[%s708_s3 + $0x20] sm:$0xff] %v506_v36   ;;  %v568_v37 = vpop.f32.mrb[4].mxu0  ;;  %v576_v38 = vpop.f32.mrb[4].mxu1 }
  0xfe   :  { %v229_v39 = vpop.f32.mrb[5].mxu0  ;;  %v261_v40 = vpop.f32.mrb[5].mxu1  ;;  %v340_v43 = vadd.f32 %v568_v37, %v450_v17  ;;  %v348_v44 = vadd.f32 %v576_v38, %v450_v17 }
  0xff   :  { %v569_v41 = vpop.f32.mrb[6].mxu0  ;;  %v577_v42 = vpop.f32.mrb[6].mxu1  ;;  %v338_v49 = vadd.f32 %v450_v17, %v229_v39  ;;  %v346_v50 = vadd.f32 %v450_v17, %v261_v40 }
 0x100   :  { %v341_v45 = vadd.f32 %v569_v41, %v450_v17  ;;  %v349_v46 = vadd.f32 %v577_v42, %v450_v17  ;;  %v232_v47 = vpop.f32.mrb[7].mxu0  ;;  %v264_v48 = vpop.f32.mrb[7].mxu1 }
 0x101   :  { %v339_v51 = vadd.f32 %v450_v17, %v232_v47  ;;  %v347_v52 = vadd.f32 %v450_v17, %v264_v48 }
 0x102   :  { %v501_v53 = vpack.c.bf16 %v341_v45, %v340_v43  ;;  %v521_v54 = vpack.c.bf16 %v349_v46, %v348_v44 }
 0x103   :  { %v496_v55 = vpack.c.bf16 %v339_v51, %v338_v49  ;;  %v516_v56 = vpack.c.bf16 %v347_v52, %v346_v50 }
 0x104   :  { %525 = vst [vmem:[%s708_s3 + $0x18] sm:$0xff] %v501_v53   ;;  %529 = vst [vmem:[%s708_s3 + $0x38] sm:$0xff] %v521_v54  }
 0x105   :  { %524 = vst [vmem:[%s708_s3 + $0x10] sm:$0xff] %v496_v55   ;;  %528 = vst [vmem:[%s708_s3 + $0x30] sm:$0xff] %v516_v56  }

// kernel: resnet34_forward.49
= control target key start
LH: loop header
LB: loop body
LE: loop exit
PB: predicated region body
PF: predicated region fallthrough
CT: control target
= control target key end

     0   :  { %s1830_s15 = smov 0   ;;  %s1832_s16 = smov 0   ;;  %s2086_s0 = inlined_call_operand.vmem [shape: bf16[128,1152], index: 0, kind: input, shape index: {}]   ;;  %s2087_s1 = inlined_call_operand.vmem [shape: bf16[1152,128], index: 1, kind: input, shape index: {}]   ;;  %s2088_s2 = inlined_call_operand.vmem [shape: f32[1,128], index: 2, kind: input, shape index: {}]   ;;  %s2089_s3 = inlined_call_operand.vmem [shape: bf16[128,128], index: 3, kind: input, shape index: {}]   ;;  %s2090_s4 = inlined_call_operand.vmem [shape: bf16[128,128], index: 4, kind: output, shape index: {}]  }
   0x1   :  { %s1834_s17 = smov 0   ;;  %s1836_s18 = smov 0  }
   0x2   :  { %s1838_s19 = smov 0  }
   0x3 LB: > { %s26_s20 = sadd.s32 1, %s1798_s18  ;;  %p49_p1 = scmp.ne.s32.totalorder %s1790_s16, %s1786_s15  ;;  %s1802_s19 = sphi %s1838_s19, %s14_s19   ;;  %s1798_s18 = sphi %s1836_s18, %s2094_s18   ;;  %s1794_s17 = sphi %s1834_s17, %s2093_s17   ;;  %s1790_s16 = sphi %s1832_s16, %s2092_s16   ;;  %s1786_s15 = sphi %s1830_s15, %s2091_s15  }
   0x4   : > { %p27_p0 = scmp.ge.s32.totalorder %s26_s20, 3  ;;  %p50_p2 = scmp.eq.s32.totalorder %s1802_s19, 0 }
   0x5   : > { %s42_s22 = sadd.s32 1, %s1790_s16  ;;  %p1343_p5 = scmp.ge.s32.totalorder %s1802_s19, 3 }
   0x6   : > { %s2096_s20 = smov (%p27_p0, %s26_s20), 0  ;;  %p51_p3 = por %p50_p2, %p49_p1 }
   0x7   : > { %s38_s21 = ssub.s32 %s1798_s18, %s2096_s20  ;;  %203 = sbr.rel (%p1343_p5) target bundleno = 37 (0x25), region = 24 }
   0x8   : > { %p40_p4 = scmp.eq.s32.totalorder %s38_s21, 0 }
   0xa   : > { %s1865_s23 = scalar_select %p40_p4, %s1790_s16, %s42_s22  }
   0xe   : > { %206 = sbr.rel (!%p51_p3) target bundleno = 37 (0x25), region = 28  ;;  %s208_s24 = sand.u32 (%p51_p3), 1, %s1790_s16  }
   0xf   : > { %s1450_s25 = smul.u32 (%p51_p3), 12, %s1798_s18 }
  0x10   : > { %s1665_s26 = smul.u32 (%p51_p3), 192, %s208_s24 }
  0x11   : > { %s1873_s29 = scalar_lea.vmem (%p51_p3), %s2086_s0, %s1450_s25 }
  0x12   : > { %v231_v0 = vld [vmem:[%s1873_s29] sm:$0xff] (%p51_p3)  ;;  %v235_v2 = vld [vmem:[%s1873_s29 + $0x48] sm:$0xff] (%p51_p3)  ;;  %s1878_s30 = scalar_lea.vmem (%p51_p3), [#allocation3], %s1665_s26  ;;  %v239_v4 = vld [vmem:[%s1873_s29 + $0x90] sm:$0xff] (%p51_p3) }
  0x13   : > { %v233_v1 = vld [vmem:[%s1873_s29 + $0x24] sm:$0xff] (%p51_p3)  ;;  %232 = vst [vmem:[%s1878_s30] sm:$0xff] (%p51_p3), %v231_v0  ;;  %236 = vst [vmem:[%s1878_s30 + $0x18] sm:$0xff] (%p51_p3), %v235_v2  ;;  %v237_v3 = vld [vmem:[%s1873_s29 + $0x6c] sm:$0xff] (%p51_p3) }
  0x14   : > { %234 = vst [vmem:[%s1878_s30 + $0xc] sm:$0xff] (%p51_p3), %v233_v1  ;;  %v241_v5 = vld [vmem:[%s1873_s29 + $0xb4] sm:$0xff] (%p51_p3)  ;;  %238 = vst [vmem:[%s1878_s30 + $0x24] sm:$0xff] (%p51_p3), %v237_v3  ;;  %v245_v7 = vld [vmem:[%s1873_s29 + $0xfc] sm:$0xff] (%p51_p3) }
  0x15   : > { %240 = vst [vmem:[%s1878_s30 + $0x30] sm:$0xff] %v239_v4  ;;  %242 = vst [vmem:[%s1878_s30 + $0x3c] sm:$0xff] %v241_v5  ;;  %v243_v6 = vld [vmem:[%s1873_s29 + $0xd8] sm:$0xff]  ;;  %v247_v8 = vld [vmem:[%s1873_s29 + $0x120] sm:$0xff] }
  0x16   : > { %244 = vst [vmem:[%s1878_s30 + $0x48] sm:$0xff] %v243_v6  ;;  %246 = vst [vmem:[%s1878_s30 + $0x54] sm:$0xff] %v245_v7  ;;  %v249_v9 = vld [vmem:[%s1873_s29 + $0x144] sm:$0xff]  ;;  %v253_v11 = vld [vmem:[%s1873_s29 + $0x18c] sm:$0xff] }
  0x17   : > { %248 = vst [vmem:[%s1878_s30 + $0x60] sm:$0xff] %v247_v8  ;;  %v251_v10 = vld [vmem:[%s1873_s29 + $0x168] sm:$0xff]  ;;  %250 = vst [vmem:[%s1878_s30 + $0x6c] sm:$0xff] %v249_v9  ;;  %v255_v12 = vld [vmem:[%s1873_s29 + $0x1b0] sm:$0xff] }
  0x18   : > { %252 = vst [vmem:[%s1878_s30 + $0x78] sm:$0xff] %v251_v10  ;;  %254 = vst [vmem:[%s1878_s30 + $0x84] sm:$0xff] %v253_v11  ;;  %v257_v13 = vld [vmem:[%s1873_s29 + $0x1d4] sm:$0xff]  ;;  %v261_v15 = vld [vmem:[%s1873_s29 + $0x21c] sm:$0xff] }
  0x19   : > { %v259_v14 = vld [vmem:[%s1873_s29 + $0x1f8] sm:$0xff]  ;;  %256 = vst [vmem:[%s1878_s30 + $0x90] sm:$0xff] %v255_v12  ;;  %258 = vst [vmem:[%s1878_s30 + $0x9c] sm:$0xff] %v257_v13  ;;  %v1345_v16 = vld [vmem:[%s1873_s29 + $0x8] sm:$0xf] }
  0x1a   : > { %260 = vst [vmem:[%s1878_s30 + $0xa8] sm:$0xff] %v259_v14  ;;  %v1347_v17 = vld [vmem:[%s1873_s29 + $0x2c] sm:$0xf]  ;;  %262 = vst [vmem:[%s1878_s30 + $0xb4] sm:$0xff] %v261_v15  ;;  %v1349_v18 = vld [vmem:[%s1873_s29 + $0x50] sm:$0xf] }
  0x1b   : > { %1346 = vst [vmem:[%s1878_s30 + $0x8] sm:$0xf] %v1345_v16  ;;  %1348 = vst [vmem:[%s1878_s30 + $0x14] sm:$0xf] %v1347_v17  ;;  %v1351_v19 = vld [vmem:[%s1873_s29 + $0x74] sm:$0xf] }
  0x1c   : > { %v1353_v20 = vld [vmem:[%s1873_s29 + $0x98] sm:$0xf]  ;;  %1350 = vst [vmem:[%s1878_s30 + $0x20] sm:$0xf] %v1349_v18  ;;  %1352 = vst [vmem:[%s1878_s30 + $0x2c] sm:$0xf] %v1351_v19 }
  0x1d   : > { %1354 = vst [vmem:[%s1878_s30 + $0x38] sm:$0xf] %v1353_v20  ;;  %v1355_v21 = vld [vmem:[%s1873_s29 + $0xbc] sm:$0xf]  ;;  %v1357_v22 = vld [vmem:[%s1873_s29 + $0xe0] sm:$0xf] }
  0x1e   : > { %v1359_v23 = vld [vmem:[%s1873_s29 + $0x104] sm:$0xf]  ;;  %1356 = vst [vmem:[%s1878_s30 + $0x44] sm:$0xf] %v1355_v21  ;;  %1358 = vst [vmem:[%s1878_s30 + $0x50] sm:$0xf] %v1357_v22 }
  0x1f   : > { %1360 = vst [vmem:[%s1878_s30 + $0x5c] sm:$0xf] %v1359_v23  ;;  %v1361_v24 = vld [vmem:[%s1873_s29 + $0x128] sm:$0xf]  ;;  %v1363_v25 = vld [vmem:[%s1873_s29 + $0x14c] sm:$0xf] }
  0x20   : > { %v1365_v26 = vld [vmem:[%s1873_s29 + $0x170] sm:$0xf]  ;;  %1362 = vst [vmem:[%s1878_s30 + $0x68] sm:$0xf] %v1361_v24  ;;  %1364 = vst [vmem:[%s1878_s30 + $0x74] sm:$0xf] %v1363_v25 }
  0x21   : > { %1366 = vst [vmem:[%s1878_s30 + $0x80] sm:$0xf] %v1365_v26  ;;  %v1367_v27 = vld [vmem:[%s1873_s29 + $0x194] sm:$0xf]  ;;  %v1369_v28 = vld [vmem:[%s1873_s29 + $0x1b8] sm:$0xf] }
  0x22   : > { %v1371_v29 = vld [vmem:[%s1873_s29 + $0x1dc] sm:$0xf]  ;;  %1368 = vst [vmem:[%s1878_s30 + $0x8c] sm:$0xf] %v1367_v27  ;;  %1370 = vst [vmem:[%s1878_s30 + $0x98] sm:$0xf] %v1369_v28 }
  0x23   : > { %1372 = vst [vmem:[%s1878_s30 + $0xa4] sm:$0xf] %v1371_v29  ;;  %v1373_v30 = vld [vmem:[%s1873_s29 + $0x200] sm:$0xf]  ;;  %v1375_v31 = vld [vmem:[%s1873_s29 + $0x224] sm:$0xf] }
  0x24   : > { %1374 = vst [vmem:[%s1878_s30 + $0xb0] sm:$0xf] %v1373_v30  ;;  %1376 = vst [vmem:[%s1878_s30 + $0xbc] sm:$0xf] %v1375_v31 }
  0x25 PF: > { %p1377_p6 = scmp.ge.s32.totalorder %s1802_s19, 1  ;;  %p318_p7 = scmp.lt.s32.totalorder %s1802_s19, 4 }
  0x27   : > { %p319_p8 = pnand %p1377_p6, %p318_p7 }
  0x28   : > { %s325_s5 = sand.u32 (!%p319_p8), 1, %s1786_s15   ;;  %s374_s6 = smul.u32 (!%p319_p8), 48, %s1794_s17 }
  0x29   : > { %322 = sbr.rel (%p319_p8) target bundleno = 385 (0x181), region = 58  ;;  %p1379_p10 = scmp.ne.s32.totalorder (!%p319_p8), %s1794_s17, 0 }
  0x2a   : > { %s1666_s7 = smul.u32 (!%p319_p8), 192, %s325_s5  ;;  %p375_p9 = scmp.lt.s32.totalorder (!%p319_p8), %s374_s6, 143 }
  0x2c   : > { %s1950_s12 = scalar_lea.vmem (!%p319_p8), [#allocation3], %s1666_s7 }
  0x30   : > { %s2098_s6 = smov (!%p375_p9, %s374_s6), 143  ;;  %408 = sbr.rel (%p1379_p10) target bundleno = 58 (0x3a), region = 66 }
  0x31   : > { %s1378_s8 = sshll.u32 %s2098_s6, 2  ;;  %v1804_v32 = vmov (!%p1379_p10), 0.0  }
  0x32   : > { %s1948_s11 = scalar_lea.vmem %s2087_s1, %s1378_s8  ;;  %409 = vst [vmem:[#allocation2] sm:$0xff] (!%p1379_p10), %v1804_v32  ;;  %410 = vst [vmem:[#allocation2 + $0x8] sm:$0xff] (!%p1379_p10), %v1804_v32 }
  0x33   : > { %411 = vst [vmem:[#allocation2 + $0x10] sm:$0xff] (!%p1379_p10), %v1804_v32  ;;  %412 = vst [vmem:[#allocation2 + $0x18] sm:$0xff] (!%p1379_p10), %v1804_v32 }
  0x34   : > { %413 = vst [vmem:[#allocation2 + $0x20] sm:$0xff] (!%p1379_p10), %v1804_v32  ;;  %414 = vst [vmem:[#allocation2 + $0x28] sm:$0xff] (!%p1379_p10), %v1804_v32 }
  0x35   : > { %415 = vst [vmem:[#allocation2 + $0x30] sm:$0xff] (!%p1379_p10), %v1804_v32  ;;  %416 = vst [vmem:[#allocation2 + $0x38] sm:$0xff] (!%p1379_p10), %v1804_v32 }
  0x36   : > { %417 = vst [vmem:[#allocation2 + $0x40] sm:$0xff] (!%p1379_p10), %v1804_v32  ;;  %418 = vst [vmem:[#allocation2 + $0x48] sm:$0xff] (!%p1379_p10), %v1804_v32 }
  0x37   : > { %419 = vst [vmem:[#allocation2 + $0x50] sm:$0xff] %v1804_v32  ;;  %420 = vst [vmem:[#allocation2 + $0x58] sm:$0xff] %v1804_v32 }
  0x38   : > { %421 = vst [vmem:[#allocation2 + $0x60] sm:$0xff] %v1804_v32  ;;  %422 = vst [vmem:[#allocation2 + $0x68] sm:$0xff] %v1804_v32 }
  0x39   : > { %423 = vst [vmem:[#allocation2 + $0x70] sm:$0xff] %v1804_v32  ;;  %424 = vst [vmem:[#allocation2 + $0x78] sm:$0xff] %v1804_v32 }
  0x3a PF: > { %v1708_v33 = vld [vmem:[%s1948_s11 + $0x40] sm:$0xff]   ;;  %v1711_v36 = vld [vmem:[%s1948_s11 + $0x48] sm:$0xff]   ;;  %v1714_v39 = vld [vmem:[%s1948_s11 + $0x50] sm:$0xff]   ;;  %p1428_p11 = scmp.ne.s32.totalorder %s1794_s17, 2 }
  0x3b   : > { %v1709_v34 = vld [vmem:[%s1948_s11] sm:$0xff]   ;;  %1553 = vmatprep.subr.bf16.mxu0 %v1708_v33  ;;  %v1712_v37 = vld [vmem:[%s1948_s11 + $0x8] sm:$0xff]   ;;  %v1715_v40 = vld [vmem:[%s1948_s11 + $0x10] sm:$0xff]  }
  0x3c   : > { %v1710_v35 = vld [vmem:[%s1948_s11 + $0x80] sm:$0xff]   ;;  %1554 = vmatpush3.bf16.msra.mxu0 %v1709_v34  ;;  %v1713_v38 = vld [vmem:[%s1948_s11 + $0x88] sm:$0xff]   ;;  %v1716_v41 = vld [vmem:[%s1948_s11 + $0x90] sm:$0xff]  }
  0x3d   : > { %1633 = vmatprep.subr.bf16.mxu1 %v1710_v35  ;;  %1555 = vmatprep.subr.bf16.mxu0 %v1711_v36  ;;  %v1717_v42 = vld [vmem:[%s1948_s11 + $0x58] sm:$0xff]   ;;  %v1720_v45 = vld [vmem:[%s1948_s11 + $0x60] sm:$0xff]   ;;  %v1723_v48 = vld [vmem:[%s1948_s11 + $0x68] sm:$0xff]  }
  0x3e   : > { %1634 = vmatpush3.bf16.msra.mxu1 %v1710_v35  ;;  %v1718_v43 = vld [vmem:[%s1948_s11 + $0x18] sm:$0xff]   ;;  %v1722_v46 = vld [vmem:[%s1948_s11 + $0xa0] sm:$0xff]   ;;  %v1725_v49 = vld [vmem:[%s1948_s11 + $0xa8] sm:$0xff]  }
  0x3f   : > { %1635 = vmatprep.subr.bf16.mxu1 %v1713_v38  ;;  %v1719_v44 = vld [vmem:[%s1948_s11 + $0x98] sm:$0xff]   ;;  %v1721_v47 = vld [vmem:[%s1948_s11 + $0x20] sm:$0xff]   ;;  %v1724_v50 = vld [vmem:[%s1948_s11 + $0x28] sm:$0xff]  }
  0x40   : > { %1556 = vmatpush3.bf16.msra.mxu0 %v1712_v37  ;;  %v1726_v51 = vld [vmem:[%s1948_s11 + $0x70] sm:$0xff]   ;;  %v1729_v54 = vld [vmem:[%s1948_s11 + $0x78] sm:$0xff]   ;;  %v1732_v59 = vld [vmem:[%s1950_s12] ss:$12 sps:$4 sm:$0xff]  }
  0x41   : > { %1557 = vmatprep.subr.bf16.mxu0 %v1714_v39  ;;  %v1727_v52 = vld [vmem:[%s1948_s11 + $0x30] sm:$0xff]   ;;  %v1731_v55 = vld [vmem:[%s1948_s11 + $0xb8] sm:$0xff]   ;;  %v1736_v61 = vld [vmem:[%s1950_s12 + $0x20] ss:$12 sps:$4 sm:$0xff]  }
  0x42   : > { %1636 = vmatpush3.bf16.msra.mxu1 %v1713_v38  ;;  %v1728_v53 = vld [vmem:[%s1948_s11 + $0xb0] sm:$0xff]   ;;  %v1730_v58 = vld [vmem:[%s1948_s11 + $0x38] sm:$0xff]   ;;  %v1752_v5 = vld [vmem:[%s1950_s12 + $0x80] ss:$12 sps:$4 sm:$0xff]  }
  0x43   : > { %1637 = vmatprep.subr.bf16.mxu1 %v1716_v41  ;;  %v1734_v56 = vld [vmem:[%s1950_s12 + $0x4] ss:$12 sps:$4 sm:$0xff]   ;;  %v1735_v57 = vld [vmem:[%s1950_s12 + $0x8] ss:$12 sps:$4 sm:$0xff]   ;;  %v1745_v4 = vld [vmem:[%s1950_s12 + $0x4c] ss:$12 sps:$4 sm:$0xff]  }
  0x44   : > { %1558 = vmatpush3.bf16.msra.mxu0 %v1715_v40  ;;  %825 = vmatprep.mubr.bf16.mxu0 %v1734_v56  ;;  %v1737_v60 = vld [vmem:[%s1950_s12 + $0x1c] ss:$12 sps:$4 sm:$0xff]   ;;  %v1743_v62 = vld [vmem:[%s1950_s12 + $0x38] ss:$12 sps:$4 sm:$0xff]   ;;  %v1740_v0 = vld [vmem:[%s1950_s12 + $0x34] ss:$12 sps:$4 sm:$0xff]  }
  0x45   : > { %1559 = vmatprep.subr.bf16.mxu0 %v1717_v42  ;;  %1649 = vmatprep.mubr.bf16.mxu1 %v1735_v57  ;;  %v1739_v63 = vld [vmem:[%s1950_s12 + $0x18] ss:$12 sps:$4 sm:$0xff]   ;;  %v1744_v1 = vld [vmem:[%s1950_s12 + $0x50] ss:$12 sps:$4 sm:$0xff]   ;;  %v1751_v2 = vld [vmem:[%s1950_s12 + $0x68] ss:$12 sps:$4 sm:$0xff]  }
  0x46   : > { %1638 = vmatpush3.bf16.msra.mxu1 %v1716_v41  ;;  %v1742_v3 = vld [vmem:[%s1950_s12 + $0x30] ss:$12 sps:$4 sm:$0xff]   ;;  %v1759_v6 = vld [vmem:[%s1950_s12 + $0x98] ss:$12 sps:$4 sm:$0xff]   ;;  %v1747_v7 = vld [vmem:[%s1950_s12 + $0x48] ss:$12 sps:$4 sm:$0xff]  }
  0x47   : > { %1639 = vmatprep.subr.bf16.mxu1 %v1719_v44  ;;  %v1748_v8 = vld [vmem:[%s1950_s12 + $0x64] ss:$12 sps:$4 sm:$0xff]   ;;  %v1750_v10 = vld [vmem:[%s1950_s12 + $0x60] ss:$12 sps:$4 sm:$0xff]   ;;  %v1753_v11 = vld [vmem:[%s1950_s12 + $0x7c] ss:$12 sps:$4 sm:$0xff]  }
  0x48   : > { %1560 = vmatpush3.bf16.msra.mxu0 %v1718_v43  ;;  %v1760_v9 = vld [vmem:[%s1950_s12 + $0xb0] ss:$12 sps:$4 sm:$0xff]   ;;  %v1755_v12 = vld [vmem:[%s1950_s12 + $0x78] ss:$12 sps:$4 sm:$0xff]   ;;  %v1756_v13 = vld [vmem:[%s1950_s12 + $0x94] ss:$12 sps:$4 sm:$0xff]  }
  0x49   : > { %1561 = vmatprep.subr.bf16.mxu0 %v1720_v45  ;;  %v1758_v14 = vld [vmem:[%s1950_s12 + $0x90] ss:$12 sps:$4 sm:$0xff]   ;;  %v1761_v15 = vld [vmem:[%s1950_s12 + $0xac] ss:$12 sps:$4 sm:$0xff]   ;;  %v1763_v16 = vld [vmem:[%s1950_s12 + $0xa8] ss:$12 sps:$4 sm:$0xff]  }
  0x4a   : > { %1640 = vmatpush3.bf16.msra.mxu1 %v1719_v44  ;;  %v425_v23 = vld [vmem:[#allocation2] sm:$0xff]  ;;  %v426_v28 = vld [vmem:[#allocation2 + $0x8] sm:$0xff]  ;;  %v427_v38 = vld [vmem:[#allocation2 + $0x10] sm:$0xff] }
  0x4b   : > { %1641 = vmatprep.subr.bf16.mxu1 %v1722_v46  ;;  %v428_v44 = vld [vmem:[#allocation2 + $0x18] sm:$0xff] }
  0x4c   : > { %1562 = vmatpush3.bf16.msra.mxu0 %v1721_v47 }
  0x4d   : > { %1563 = vmatprep.subr.bf16.mxu0 %v1723_v48 }
  0x4e   : > { %1642 = vmatpush3.bf16.msra.mxu1 %v1722_v46 }
  0x4f   : > { %1643 = vmatprep.subr.bf16.mxu1 %v1725_v49 }
  0x50   : > { %1564 = vmatpush3.bf16.msra.mxu0 %v1724_v50 }
  0x51   : > { %1565 = vmatprep.subr.bf16.mxu0 %v1726_v51 }
  0x52   : > { %1644 = vmatpush3.bf16.msra.mxu1 %v1725_v49 }
  0x53   : > { %1645 = vmatprep.subr.bf16.mxu1 %v1728_v53 }
  0x54   : > { %1566 = vmatpush3.bf16.msra.mxu0 %v1727_v52 }
  0x55   : > { %1567 = vmatprep.subr.bf16.mxu0 %v1729_v54 }
  0x56   : > { %1646 = vmatpush3.bf16.msra.mxu1 %v1728_v53 }
  0x57   : > { %1647 = vmatprep.subr.bf16.mxu1 %v1731_v55 }
  0x58   : > { %1568 = vmatpush3.bf16.msra.mxu0 %v1730_v58 }
  0x5a   : > { %1648 = vmatpush3.bf16.msra.mxu1 %v1731_v55  ;;  %v429_v55 = vld [vmem:[#allocation2 + $0x20] sm:$0xff] }
  0x5b   : > { %826 = vmatmul.mubr.bf16.vlgmr.msra.gmra.mrb[0].mxu0 %v1732_v59 }
  0x5c   : > { %833 = vmatprep.mubr.bf16.mxu0 %v1737_v60  ;;  %v430_v60 = vld [vmem:[#allocation2 + $0x28] sm:$0xff] }
  0x5d   : > { %1650 = vmatmul.mubr.bf16.vlgmr.msra.gmra.mrb[0].mxu1 %v1736_v61 }
  0x5e   : > { %1653 = vmatprep.mubr.bf16.mxu1 %v1743_v62 }
  0x63   : > { %834 = vmatmul.mubr.bf16.gmra.mrb[4].mxu0 %v1739_v63 }
  0x64   : > { %841 = vmatprep.mubr.bf16.mxu0 %v1740_v0 }
  0x65   : > { %1654 = vmatmul.mubr.bf16.gmra.mrb[4].mxu1 %v1744_v1 }
  0x66   : > { %1657 = vmatprep.mubr.bf16.mxu1 %v1751_v2 }
  0x6b   : > { %842 = vmatmul.mubr.bf16.gmra.mrb[8].mxu0 %v1742_v3 }
  0x6c   : > { %849 = vmatprep.mubr.bf16.mxu0 %v1745_v4 }
  0x6d   : > { %1658 = vmatmul.mubr.bf16.gmra.mrb[8].mxu1 %v1752_v5 }
  0x6e   : > { %1661 = vmatprep.mubr.bf16.mxu1 %v1759_v6  ;;  %v431_v6 = vld [vmem:[#allocation2 + $0x30] sm:$0xff] }
  0x73   : > { %850 = vmatmul.mubr.bf16.gmra.mrb[12].mxu0 %v1747_v7 }
  0x74   : > { %857 = vmatprep.mubr.bf16.mxu0 %v1748_v8 }
  0x75   : > { %1662 = vmatmul.mubr.bf16.gmra.mrb[12].mxu1 %v1760_v9 }
  0x7b   : > { %858 = vmatmul.mubr.bf16.gmra.mrb[16].mxu0 %v1750_v10 }
  0x7c   : > { %865 = vmatprep.mubr.bf16.mxu0 %v1753_v11 }
  0x83   : > { %866 = vmatmul.mubr.bf16.gmra.mrb[20].mxu0 %v1755_v12  ;;  %v432_v12 = vld [vmem:[#allocation2 + $0x38] sm:$0xff] }
  0x84   : > { %873 = vmatprep.mubr.bf16.mxu0 %v1756_v13 }
  0x8b   : > { %874 = vmatmul.mubr.bf16.gmra.mrb[24].mxu0 %v1758_v14 }
  0x8c   : > { %881 = vmatprep.mubr.bf16.mxu0 %v1761_v15 }
  0x93   : > { %882 = vmatmul.mubr.bf16.gmra.mrb[28].mxu0 %v1763_v16 }
 0x12e   : > { %v1569_v17 = vpop.f32.mrb[0].mxu0 }
 0x12f   : > { %v1570_v18 = vpop.f32.mrb[1].mxu0 }
 0x130   : > { %v1571_v19 = vadd.f32 %v1570_v18, %v1569_v17  ;;  %v1572_v20 = vpop.f32.mrb[2].mxu0  ;;  %v1651_v21 = vpop.f32.mrb[0].mxu1 }
 0x131   : > { %v1573_v22 = vpop.f32.mrb[3].mxu0  ;;  %v924_v24 = vpop.f32.mrb[1].mxu1 }
 0x132   : > { %v1574_v25 = vadd.f32 %v1573_v22, %v1572_v20  ;;  %v925_v26 = vadd.f32 %v1571_v19, %v924_v24  ;;  %v1652_v27 = vpop.f32.mrb[2].mxu1  ;;  %v433_v22 = vld [vmem:[#allocation2 + $0x40] sm:$0xff] }
 0x133   : > { %v927_v29 = vpop.f32.mrb[3].mxu1 }
 0x134   : > { %v987_v30 = vadd.f32 %v925_v26, %v425_v23  ;;  %v928_v31 = vadd.f32 %v1574_v25, %v927_v29  ;;  %v434_v25 = vld [vmem:[#allocation2 + $0x48] sm:$0xff] }
 0x136   : > { %1003 = vst [vmem:[#allocation2] sm:$0xff] %v987_v30  ;;  %v988_v32 = vadd.f32 %v928_v31, %v426_v28  ;;  %v1575_v33 = vpop.f32.mrb[4].mxu0 }
 0x137   : > { %v1576_v34 = vpop.f32.mrb[5].mxu0 }
 0x138   : > { %1004 = vst [vmem:[#allocation2 + $0x8] sm:$0xff] %v988_v32  ;;  %v1577_v35 = vadd.f32 %v1576_v34, %v1575_v33  ;;  %v1578_v36 = vpop.f32.mrb[6].mxu0  ;;  %v1655_v37 = vpop.f32.mrb[4].mxu1  ;;  %v435_v33 = vld [vmem:[#allocation2 + $0x50] sm:$0xff] }
 0x139   : > { %v1579_v39 = vpop.f32.mrb[7].mxu0  ;;  %v940_v40 = vpop.f32.mrb[5].mxu1 }
 0x13a   : > { %v933_v41 = vadd.f32 %v1651_v21, %v1577_v35  ;;  %v1580_v42 = vadd.f32 %v1579_v39, %v1578_v36  ;;  %v1656_v43 = vpop.f32.mrb[6].mxu1 }
 0x13b   : > { %v943_v45 = vpop.f32.mrb[7].mxu1 }
 0x13c   : > { %v989_v46 = vadd.f32 %v933_v41, %v427_v38  ;;  %v936_v47 = vadd.f32 %v1652_v27, %v1580_v42 }
 0x13e   : > { %1005 = vst [vmem:[#allocation2 + $0x10] sm:$0xff] %v989_v46  ;;  %v990_v48 = vadd.f32 %v936_v47, %v428_v44  ;;  %v1581_v49 = vpop.f32.mrb[8].mxu0  ;;  %v437_v46 = vld [vmem:[#allocation2 + $0x60] sm:$0xff] }
 0x13f   : > { %v1582_v50 = vpop.f32.mrb[9].mxu0 }
 0x140   : > { %1006 = vst [vmem:[#allocation2 + $0x18] sm:$0xff] %v990_v48  ;;  %v1583_v51 = vadd.f32 %v1582_v50, %v1581_v49  ;;  %v1584_v52 = vpop.f32.mrb[10].mxu0  ;;  %v1659_v53 = vpop.f32.mrb[8].mxu1  ;;  %v438_v49 = vld [vmem:[#allocation2 + $0x68] sm:$0xff] }
 0x141   : > { %v1585_v54 = vpop.f32.mrb[11].mxu0  ;;  %v956_v56 = vpop.f32.mrb[9].mxu1 }
 0x142   : > { %v1586_v57 = vadd.f32 %v1585_v54, %v1584_v52  ;;  %v941_v58 = vadd.f32 %v1583_v51, %v940_v40  ;;  %v1660_v59 = vpop.f32.mrb[10].mxu1 }
 0x143   : > { %v959_v61 = vpop.f32.mrb[11].mxu1 }
 0x144   : > { %v991_v62 = vadd.f32 %v941_v58, %v429_v55  ;;  %v944_v63 = vadd.f32 %v1586_v57, %v943_v45  ;;  %v439_v57 = vld [vmem:[#allocation2 + $0x70] sm:$0xff] }
 0x146   : > { %1007 = vst [vmem:[#allocation2 + $0x20] sm:$0xff] %v991_v62  ;;  %v992_v0 = vadd.f32 %v944_v63, %v430_v60  ;;  %v1587_v1 = vpop.f32.mrb[12].mxu0 }
 0x147   : > { %v1588_v2 = vpop.f32.mrb[13].mxu0 }
 0x148   : > { %1008 = vst [vmem:[#allocation2 + $0x28] sm:$0xff] %v992_v0  ;;  %v1589_v3 = vadd.f32 %v1588_v2, %v1587_v1  ;;  %v1590_v4 = vpop.f32.mrb[14].mxu0  ;;  %v1663_v5 = vpop.f32.mrb[12].mxu1  ;;  %v1023_v1 = vld [vmem:[#allocation2] sm:$0xff] (!%p1428_p11)  ;;  %v1024_v2 = vld [vmem:[#allocation2 + $0x8] sm:$0xff] (!%p1428_p11) }
 0x149   : > { %v1591_v7 = vpop.f32.mrb[15].mxu0  ;;  %v972_v8 = vpop.f32.mrb[13].mxu1 }
 0x14a   : > { %v949_v9 = vadd.f32 %v1655_v37, %v1589_v3  ;;  %v1592_v10 = vadd.f32 %v1591_v7, %v1590_v4  ;;  %v1664_v11 = vpop.f32.mrb[14].mxu1  ;;  %v436_v37 = vld [vmem:[#allocation2 + $0x58] sm:$0xff]  ;;  %v2005_v3 = vld [vmem:[%s2088_s2] ss:$0 sm:$0xff] (!%p1428_p11)  ;;  %v1025_v7 = vld [vmem:[#allocation2 + $0x10] sm:$0xff] (!%p1428_p11) }
 0x14b   : > { %v975_v13 = vpop.f32.mrb[15].mxu1  ;;  %v1046_v4 = vadd.f32 (!%p1428_p11), %v2005_v3, %v1023_v1 }
 0x14c   : > { %v993_v14 = vadd.f32 %v949_v9, %v431_v6  ;;  %v952_v15 = vadd.f32 %v1656_v43, %v1592_v10  ;;  %v1468_v6 = vld [vmem:[%s2089_s3] sm:$0xff] (!%p1428_p11)  }
 0x14d   : > { %v1469_v9 = vunpack.c.l.bf16 (!%p1428_p11), %v1468_v6  ;;  %v1470_v10 = vunpack.c.h.bf16 (!%p1428_p11), %v1468_v6 }
 0x14e   : > { %1009 = vst [vmem:[#allocation2 + $0x30] sm:$0xff] %v993_v14  ;;  %v994_v16 = vadd.f32 %v952_v15, %v432_v12  ;;  %v1593_v17 = vpop.f32.mrb[16].mxu0  ;;  %v1027_v14 = vld [vmem:[#allocation2 + $0x20] sm:$0xff] (!%p1428_p11) }
 0x14f   : > { %v1594_v18 = vpop.f32.mrb[17].mxu0  ;;  %v1028_v15 = vld [vmem:[#allocation2 + $0x28] sm:$0xff] (!%p1428_p11) }
 0x150   : > { %1010 = vst [vmem:[#allocation2 + $0x38] sm:$0xff] %v994_v16  ;;  %v1595_v19 = vadd.f32 %v1594_v18, %v1593_v17  ;;  %v1596_v20 = vpop.f32.mrb[18].mxu0  ;;  %v1050_v18 = vadd.f32 (!%p1428_p11), %v2005_v3, %v1027_v14 }
 0x151   : > { %v1597_v21 = vpop.f32.mrb[19].mxu0 }
 0x152   : > { %v1598_v23 = vadd.f32 %v1597_v21, %v1596_v20  ;;  %v957_v24 = vadd.f32 %v1595_v19, %v956_v56  ;;  %v1051_v19 = vadd.f32 (!%p1428_p11), %v2005_v3, %v1028_v15  ;;  %v1540_v20 = vld [vmem:[%s2089_s3 + $0x10] sm:$0xff] (!%p1428_p11)  }
 0x154   : > { %v995_v26 = vadd.f32 %v957_v24, %v433_v22  ;;  %v960_v27 = vadd.f32 %v1598_v23, %v959_v61  ;;  %v440_v61 = vld [vmem:[#allocation2 + $0x78] sm:$0xff]  ;;  %v1094_v23 = vadd.f32 (!%p1428_p11), %v1469_v9, %v1046_v4 }
 0x155   : > { %v1029_v21 = vld [vmem:[#allocation2 + $0x30] sm:$0xff] (!%p1428_p11) }
 0x156   : > { %1011 = vst [vmem:[#allocation2 + $0x40] sm:$0xff] %v995_v26  ;;  %v996_v28 = vadd.f32 %v960_v27, %v434_v25  ;;  %v1599_v29 = vpop.f32.mrb[20].mxu0  ;;  %v1477_v25 = vunpack.c.l.bf16 (!%p1428_p11), %v1540_v20  ;;  %v1478_v26 = vunpack.c.h.bf16 (!%p1428_p11), %v1540_v20  ;;  %v1541_v27 = vld [vmem:[%s2089_s3 + $0x18] sm:$0xff] (!%p1428_p11)  }
 0x157   : > { %v1600_v30 = vpop.f32.mrb[21].mxu0  ;;  %v1030_v22 = vld [vmem:[#allocation2 + $0x38] sm:$0xff] (!%p1428_p11) }
 0x158   : > { %1012 = vst [vmem:[#allocation2 + $0x48] sm:$0xff] %v996_v28  ;;  %v1601_v31 = vadd.f32 %v1600_v30, %v1599_v29  ;;  %v1602_v32 = vpop.f32.mrb[22].mxu0  ;;  %v1052_v30 = vadd.f32 (!%p1428_p11), %v2005_v3, %v1029_v21 }
 0x159   : > { %v1603_v34 = vpop.f32.mrb[23].mxu0 }
 0x15a   : > { %v965_v35 = vadd.f32 %v1659_v53, %v1601_v31  ;;  %v1604_v36 = vadd.f32 %v1603_v34, %v1602_v32  ;;  %v1053_v31 = vadd.f32 (!%p1428_p11), %v2005_v3, %v1030_v22 }
 0x15c   : > { %v997_v38 = vadd.f32 %v965_v35, %v435_v33  ;;  %v968_v39 = vadd.f32 %v1660_v59, %v1604_v36  ;;  %v1110_v33 = vmax.f32 (!%p1428_p11), %v1094_v23, 0.0  ;;  %v1098_v35 = vadd.f32 (!%p1428_p11), %v1477_v25, %v1050_v18 }
 0x15d   : > { %v1031_v32 = vld [vmem:[#allocation2 + $0x40] sm:$0xff] (!%p1428_p11)  ;;  %v1099_v36 = vadd.f32 (!%p1428_p11), %v1478_v26, %v1051_v19 }
 0x15e   : > { %1013 = vst [vmem:[#allocation2 + $0x50] sm:$0xff] %v997_v38  ;;  %v998_v40 = vadd.f32 %v968_v39, %v436_v37  ;;  %v1605_v41 = vpop.f32.mrb[24].mxu0 }
 0x15f   : > { %v1606_v42 = vpop.f32.mrb[25].mxu0  ;;  %v1032_v37 = vld [vmem:[#allocation2 + $0x48] sm:$0xff] (!%p1428_p11) }
 0x160   : > { %1014 = vst [vmem:[#allocation2 + $0x58] sm:$0xff] %v998_v40  ;;  %v1607_v43 = vadd.f32 %v1606_v42, %v1605_v41  ;;  %v1608_v44 = vpop.f32.mrb[26].mxu0  ;;  %v1481_v40 = vunpack.c.l.bf16 (!%p1428_p11), %v1541_v27  ;;  %v1482_v41 = vunpack.c.h.bf16 (!%p1428_p11), %v1541_v27  ;;  %v1542_v42 = vld [vmem:[%s2089_s3 + $0x20] sm:$0xff] (!%p1428_p11)  }
 0x161   : > { %v1609_v45 = vpop.f32.mrb[27].mxu0 }
 0x162   : > { %v1610_v47 = vadd.f32 %v1609_v45, %v1608_v44  ;;  %v973_v48 = vadd.f32 %v1607_v43, %v972_v8  ;;  %v1026_v8 = vld [vmem:[#allocation2 + $0x18] sm:$0xff] (!%p1428_p11)  ;;  %v1114_v45 = vmax.f32 (!%p1428_p11), %v1098_v35, 0.0 }
 0x163   : > { %v1049_v12 = vadd.f32 (!%p1428_p11), %v2005_v3, %v1026_v8 }
 0x164   : > { %v999_v50 = vadd.f32 %v973_v48, %v437_v46  ;;  %v976_v51 = vadd.f32 %v1610_v47, %v975_v13  ;;  %v1539_v13 = vld [vmem:[%s2089_s3 + $0x8] sm:$0xff] (!%p1428_p11)   ;;  %v1115_v46 = vmax.f32 (!%p1428_p11), %v1099_v36, 0.0  ;;  %v1054_v47 = vadd.f32 (!%p1428_p11), %v2005_v3, %v1031_v32 }
 0x165   : > { %v1473_v16 = vunpack.c.l.bf16 (!%p1428_p11), %v1539_v13  ;;  %v1474_v17 = vunpack.c.h.bf16 (!%p1428_p11), %v1539_v13  ;;  %v1033_v43 = vld [vmem:[#allocation2 + $0x50] sm:$0xff] (!%p1428_p11) }
 0x166   : > { %1015 = vst [vmem:[#allocation2 + $0x60] sm:$0xff] %v999_v50  ;;  %v1000_v52 = vadd.f32 %v976_v51, %v438_v49  ;;  %v1611_v53 = vpop.f32.mrb[28].mxu0  ;;  %v1543_v49 = vld [vmem:[%s2089_s3 + $0x28] sm:$0xff] (!%p1428_p11)   ;;  %v1100_v51 = vadd.f32 (!%p1428_p11), %v1481_v40, %v1052_v30 }
 0x167   : > { %v1612_v54 = vpop.f32.mrb[29].mxu0  ;;  %v1097_v29 = vadd.f32 (!%p1428_p11), %v1474_v17, %v1049_v12  ;;  %v1034_v48 = vld [vmem:[#allocation2 + $0x58] sm:$0xff] (!%p1428_p11)  ;;  %v1490_v4 = vunpack.c.h.bf16 (!%p1428_p11), %v1543_v49 }
 0x168   : > { %1016 = vst [vmem:[#allocation2 + $0x68] sm:$0xff] %v1000_v52  ;;  %v1613_v55 = vadd.f32 %v1612_v54, %v1611_v53  ;;  %v1614_v56 = vpop.f32.mrb[30].mxu0  ;;  %v1101_v52 = vadd.f32 (!%p1428_p11), %v1482_v41, %v1053_v31  ;;  %v1055_v53 = vadd.f32 (!%p1428_p11), %v2005_v3, %v1032_v37  ;;  %v1545_v12 = vld [vmem:[%s2089_s3 + $0x38] sm:$0xff] (!%p1428_p11)  }
 0x169   : > { %v1615_v58 = vpop.f32.mrb[31].mxu0  ;;  %v1113_v39 = vmax.f32 (!%p1428_p11), %v1097_v29, 0.0  ;;  %v1498_v26 = vunpack.c.h.bf16 (!%p1428_p11), %v1545_v12 }
 0x16a   : > { %v981_v59 = vadd.f32 %v1663_v5, %v1613_v55  ;;  %v1616_v60 = vadd.f32 %v1615_v58, %v1614_v56  ;;  %1022 = sbr.rel (%p1428_p11) target bundleno = 385 (0x181), region = 70  ;;  %v1047_v5 = vadd.f32 (!%p1428_p11), %v2005_v3, %v1024_v2  ;;  %v1512_v55 = vpack.c.bf16 (!%p1428_p11), %v1115_v46, %v1114_v45 }
 0x16b   : > { %v1485_v56 = vunpack.c.l.bf16 (!%p1428_p11), %v1542_v42  ;;  %v1056_v58 = vadd.f32 (!%p1428_p11), %v2005_v3, %v1033_v43 }
 0x16c   : > { %v1001_v62 = vadd.f32 %v981_v59, %v439_v57  ;;  %v984_v63 = vadd.f32 %v1664_v11, %v1616_v60  ;;  %v1048_v11 = vadd.f32 (!%p1428_p11), %v2005_v3, %v1025_v7  ;;  %v1095_v24 = vadd.f32 (!%p1428_p11), %v1470_v10, %v1047_v5  ;;  %v1544_v60 = vld [vmem:[%s2089_s3 + $0x30] sm:$0xff] (!%p1428_p11)   ;;  %1547 = vst [vmem:[%s2090_s4 + $0x10] sm:$0xff] (!%p1428_p11), %v1512_v55  }
 0x16d   : > { %v1035_v54 = vld [vmem:[#allocation2 + $0x60] sm:$0xff] (!%p1428_p11)  ;;  %v1486_v57 = vunpack.c.h.bf16 (!%p1428_p11), %v1542_v42  ;;  %v1102_v1 = vadd.f32 (!%p1428_p11), %v1485_v56, %v1054_v47 }
 0x16e   : > { %1017 = vst [vmem:[#allocation2 + $0x70] sm:$0xff] %v1001_v62  ;;  %v1002_v0 = vadd.f32 %v984_v63, %v440_v61  ;;  %v1096_v28 = vadd.f32 (!%p1428_p11), %v1473_v16, %v1048_v11  ;;  %v1111_v34 = vmax.f32 (!%p1428_p11), %v1095_v24, 0.0  ;;  %v1116_v61 = vmax.f32 (!%p1428_p11), %v1100_v51, 0.0 }
 0x16f   : > { %v1036_v59 = vld [vmem:[#allocation2 + $0x68] sm:$0xff] (!%p1428_p11)  ;;  %v1117_v62 = vmax.f32 (!%p1428_p11), %v1101_v52, 0.0  ;;  %v1057_v63 = vadd.f32 (!%p1428_p11), %v2005_v3, %v1034_v48  ;;  %v1103_v2 = vadd.f32 (!%p1428_p11), %v1486_v57, %v1055_v53  ;;  %v1058_v5 = vadd.f32 (!%p1428_p11), %v2005_v3, %v1035_v54 }
 0x170   : > { %1018 = vst [vmem:[#allocation2 + $0x78] sm:$0xff] %v1002_v0  ;;  %v1112_v38 = vmax.f32 (!%p1428_p11), %v1096_v28, 0.0  ;;  %v1502_v44 = vpack.c.bf16 (!%p1428_p11), %v1111_v34, %v1110_v33  ;;  %v1489_v0 = vunpack.c.l.bf16 (!%p1428_p11), %v1543_v49  ;;  %v1059_v10 = vadd.f32 (!%p1428_p11), %v2005_v3, %v1036_v59 }
 0x171   : > { %v1517_v8 = vpack.c.bf16 %v1117_v62, %v1116_v61  ;;  %v1493_v11 = vunpack.c.l.bf16 %v1544_v60  ;;  %v1118_v13 = vmax.f32 %v1102_v1, 0.0  ;;  %v1119_v14 = vmax.f32 %v1103_v2, 0.0 }
 0x172   : > { %v1507_v50 = vpack.c.bf16 %v1113_v39, %v1112_v38  ;;  %1503 = vst [vmem:[%s2090_s4] sm:$0xff] %v1502_v44   ;;  %v1104_v9 = vadd.f32 %v1489_v0, %v1056_v58  ;;  %v1105_v15 = vadd.f32 %v1490_v4, %v1057_v63  ;;  %v1494_v16 = vunpack.c.h.bf16 %v1544_v60 }
 0x173   : > { %1548 = vst [vmem:[%s2090_s4 + $0x18] sm:$0xff] %v1517_v8   ;;  %v1106_v18 = vadd.f32 %v1493_v11, %v1058_v5  ;;  %v1522_v21 = vpack.c.bf16 %v1119_v14, %v1118_v13  ;;  %v1497_v24 = vunpack.c.l.bf16 %v1545_v12 }
 0x174   : > { %1546 = vst [vmem:[%s2090_s4 + $0x8] sm:$0xff] %v1507_v50   ;;  %v1120_v17 = vmax.f32 %v1104_v9, 0.0  ;;  %v1121_v22 = vmax.f32 %v1105_v15, 0.0  ;;  %v1107_v23 = vadd.f32 %v1494_v16, %v1059_v10 }
 0x175   : > { %v1037_v6 = vld [vmem:[#allocation2 + $0x70] sm:$0xff]  ;;  %v1122_v25 = vmax.f32 %v1106_v18, 0.0  ;;  %1549 = vst [vmem:[%s2090_s4 + $0x20] sm:$0xff] %v1522_v21  }
 0x176   : > { %v1060_v19 = vadd.f32 %v2005_v3, %v1037_v6  ;;  %v1527_v27 = vpack.c.bf16 %v1121_v22, %v1120_v17  ;;  %v1123_v28 = vmax.f32 %v1107_v23, 0.0 }
 0x177   : > { %v1038_v7 = vld [vmem:[#allocation2 + $0x78] sm:$0xff] }
 0x178   : > { %v1061_v20 = vadd.f32 %v2005_v3, %v1038_v7  ;;  %v1108_v29 = vadd.f32 %v1497_v24, %v1060_v19  ;;  %1550 = vst [vmem:[%s2090_s4 + $0x28] sm:$0xff] %v1527_v27   ;;  %v1532_v31 = vpack.c.bf16 %v1123_v28, %v1122_v25 }
 0x17a   : > { %v1109_v30 = vadd.f32 %v1498_v26, %v1061_v20  ;;  %v1124_v3 = vmax.f32 %v1108_v29, 0.0  ;;  %1551 = vst [vmem:[%s2090_s4 + $0x30] sm:$0xff] %v1532_v31  }
 0x17c   : > { %v1125_v32 = vmax.f32 %v1109_v30, 0.0 }
 0x17e   : > { %v1537_v33 = vpack.c.bf16 %v1125_v32, %v1124_v3 }
 0x180   : > { %1552 = vst [vmem:[%s2090_s4 + $0x38] sm:$0xff] %v1537_v33  }
 0x181 PF: > { %s14_s19 = sadd.s32 1, %s1802_s19   ;;  %s2091_s15 = smov %s1790_s16 }
 0x182   : > { %p11_p12 = scmp.ge.s32.totalorder %s14_s19, 5   ;;  %s2092_s16 = smov %s1865_s23 }
 0x183   : > { %s2093_s17 = smov %s1798_s18  ;;  %s2094_s18 = smov %s2096_s20 }
 0x184   :  { %13 = sbr.rel (!%p11_p12) target bundleno = 3 (0x3), region = 120 }

// kernel: resnet34_forward.50
= control target key start
LH: loop header
LB: loop body
LE: loop exit
PB: predicated region body
PF: predicated region fallthrough
CT: control target
= control target key end

     0   :  { %s1659_s12 = smov 0   ;;  %s1661_s13 = smov 0   ;;  %s1873_s0 = inlined_call_operand.vmem [shape: bf16[128,1152], index: 0, kind: input, shape index: {}]   ;;  %s1874_s1 = inlined_call_operand.vmem [shape: bf16[1152,128], index: 1, kind: input, shape index: {}]   ;;  %s1875_s2 = inlined_call_operand.vmem [shape: f32[1,128], index: 2, kind: input, shape index: {}]   ;;  %s1876_s3 = inlined_call_operand.vmem [shape: bf16[128,128], index: 3, kind: output, shape index: {}]  }
   0x1   :  { %s1663_s14 = smov 0   ;;  %s1665_s15 = smov 0  }
   0x2   :  { %s1667_s16 = smov 0  }
   0x3 LB: > { %s25_s17 = sadd.s32 1, %s1632_s15  ;;  %p48_p1 = scmp.ne.s32.totalorder %s1624_s13, %s1620_s12  ;;  %s1636_s16 = sphi %s1667_s16, %s13_s16   ;;  %s1632_s15 = sphi %s1665_s15, %s1880_s15   ;;  %s1628_s14 = sphi %s1663_s14, %s1879_s14   ;;  %s1624_s13 = sphi %s1661_s13, %s1878_s13   ;;  %s1620_s12 = sphi %s1659_s12, %s1877_s12  }
   0x4   : > { %p26_p0 = scmp.ge.s32.totalorder %s25_s17, 3  ;;  %p49_p2 = scmp.eq.s32.totalorder %s1636_s16, 0 }
   0x5   : > { %s41_s19 = sadd.s32 1, %s1624_s13  ;;  %p1216_p5 = scmp.ge.s32.totalorder %s1636_s16, 3 }
   0x6   : > { %s1882_s17 = smov (%p26_p0, %s25_s17), 0  ;;  %p50_p3 = por %p49_p2, %p48_p1 }
   0x7   : > { %s37_s18 = ssub.s32 %s1632_s15, %s1882_s17  ;;  %162 = sbr.rel (%p1216_p5) target bundleno = 37 (0x25), region = 20 }
   0x8   : > { %p39_p4 = scmp.eq.s32.totalorder %s37_s18, 0 }
   0xa   : > { %s1694_s20 = scalar_select %p39_p4, %s1624_s13, %s41_s19  }
   0xe   : > { %165 = sbr.rel (!%p50_p3) target bundleno = 37 (0x25), region = 24  ;;  %s167_s21 = sand.u32 (%p50_p3), 1, %s1624_s13  }
   0xf   : > { %s1323_s22 = smul.u32 (%p50_p3), 12, %s1632_s15 }
  0x10   : > { %s1499_s23 = smul.u32 (%p50_p3), 192, %s167_s21 }
  0x11   : > { %s1702_s26 = scalar_lea.vmem (%p50_p3), %s1873_s0, %s1323_s22 }
  0x12   : > { %v190_v0 = vld [vmem:[%s1702_s26] sm:$0xff] (%p50_p3)  ;;  %v194_v2 = vld [vmem:[%s1702_s26 + $0x48] sm:$0xff] (%p50_p3)  ;;  %s1707_s27 = scalar_lea.vmem (%p50_p3), [#allocation3], %s1499_s23  ;;  %v198_v4 = vld [vmem:[%s1702_s26 + $0x90] sm:$0xff] (%p50_p3) }
  0x13   : > { %v192_v1 = vld [vmem:[%s1702_s26 + $0x24] sm:$0xff] (%p50_p3)  ;;  %191 = vst [vmem:[%s1707_s27] sm:$0xff] (%p50_p3), %v190_v0  ;;  %195 = vst [vmem:[%s1707_s27 + $0x18] sm:$0xff] (%p50_p3), %v194_v2  ;;  %v196_v3 = vld [vmem:[%s1702_s26 + $0x6c] sm:$0xff] (%p50_p3) }
  0x14   : > { %193 = vst [vmem:[%s1707_s27 + $0xc] sm:$0xff] (%p50_p3), %v192_v1  ;;  %v200_v5 = vld [vmem:[%s1702_s26 + $0xb4] sm:$0xff] (%p50_p3)  ;;  %197 = vst [vmem:[%s1707_s27 + $0x24] sm:$0xff] (%p50_p3), %v196_v3  ;;  %v204_v7 = vld [vmem:[%s1702_s26 + $0xfc] sm:$0xff] (%p50_p3) }
  0x15   : > { %199 = vst [vmem:[%s1707_s27 + $0x30] sm:$0xff] %v198_v4  ;;  %201 = vst [vmem:[%s1707_s27 + $0x3c] sm:$0xff] %v200_v5  ;;  %v202_v6 = vld [vmem:[%s1702_s26 + $0xd8] sm:$0xff]  ;;  %v206_v8 = vld [vmem:[%s1702_s26 + $0x120] sm:$0xff] }
  0x16   : > { %203 = vst [vmem:[%s1707_s27 + $0x48] sm:$0xff] %v202_v6  ;;  %205 = vst [vmem:[%s1707_s27 + $0x54] sm:$0xff] %v204_v7  ;;  %v208_v9 = vld [vmem:[%s1702_s26 + $0x144] sm:$0xff]  ;;  %v212_v11 = vld [vmem:[%s1702_s26 + $0x18c] sm:$0xff] }
  0x17   : > { %207 = vst [vmem:[%s1707_s27 + $0x60] sm:$0xff] %v206_v8  ;;  %v210_v10 = vld [vmem:[%s1702_s26 + $0x168] sm:$0xff]  ;;  %209 = vst [vmem:[%s1707_s27 + $0x6c] sm:$0xff] %v208_v9  ;;  %v214_v12 = vld [vmem:[%s1702_s26 + $0x1b0] sm:$0xff] }
  0x18   : > { %211 = vst [vmem:[%s1707_s27 + $0x78] sm:$0xff] %v210_v10  ;;  %213 = vst [vmem:[%s1707_s27 + $0x84] sm:$0xff] %v212_v11  ;;  %v216_v13 = vld [vmem:[%s1702_s26 + $0x1d4] sm:$0xff]  ;;  %v220_v15 = vld [vmem:[%s1702_s26 + $0x21c] sm:$0xff] }
  0x19   : > { %v218_v14 = vld [vmem:[%s1702_s26 + $0x1f8] sm:$0xff]  ;;  %215 = vst [vmem:[%s1707_s27 + $0x90] sm:$0xff] %v214_v12  ;;  %217 = vst [vmem:[%s1707_s27 + $0x9c] sm:$0xff] %v216_v13  ;;  %v1218_v16 = vld [vmem:[%s1702_s26 + $0x8] sm:$0xf] }
  0x1a   : > { %219 = vst [vmem:[%s1707_s27 + $0xa8] sm:$0xff] %v218_v14  ;;  %v1220_v17 = vld [vmem:[%s1702_s26 + $0x2c] sm:$0xf]  ;;  %221 = vst [vmem:[%s1707_s27 + $0xb4] sm:$0xff] %v220_v15  ;;  %v1222_v18 = vld [vmem:[%s1702_s26 + $0x50] sm:$0xf] }
  0x1b   : > { %1219 = vst [vmem:[%s1707_s27 + $0x8] sm:$0xf] %v1218_v16  ;;  %1221 = vst [vmem:[%s1707_s27 + $0x14] sm:$0xf] %v1220_v17  ;;  %v1224_v19 = vld [vmem:[%s1702_s26 + $0x74] sm:$0xf] }
  0x1c   : > { %v1226_v20 = vld [vmem:[%s1702_s26 + $0x98] sm:$0xf]  ;;  %1223 = vst [vmem:[%s1707_s27 + $0x20] sm:$0xf] %v1222_v18  ;;  %1225 = vst [vmem:[%s1707_s27 + $0x2c] sm:$0xf] %v1224_v19 }
  0x1d   : > { %1227 = vst [vmem:[%s1707_s27 + $0x38] sm:$0xf] %v1226_v20  ;;  %v1228_v21 = vld [vmem:[%s1702_s26 + $0xbc] sm:$0xf]  ;;  %v1230_v22 = vld [vmem:[%s1702_s26 + $0xe0] sm:$0xf] }
  0x1e   : > { %v1232_v23 = vld [vmem:[%s1702_s26 + $0x104] sm:$0xf]  ;;  %1229 = vst [vmem:[%s1707_s27 + $0x44] sm:$0xf] %v1228_v21  ;;  %1231 = vst [vmem:[%s1707_s27 + $0x50] sm:$0xf] %v1230_v22 }
  0x1f   : > { %1233 = vst [vmem:[%s1707_s27 + $0x5c] sm:$0xf] %v1232_v23  ;;  %v1234_v24 = vld [vmem:[%s1702_s26 + $0x128] sm:$0xf]  ;;  %v1236_v25 = vld [vmem:[%s1702_s26 + $0x14c] sm:$0xf] }
  0x20   : > { %v1238_v26 = vld [vmem:[%s1702_s26 + $0x170] sm:$0xf]  ;;  %1235 = vst [vmem:[%s1707_s27 + $0x68] sm:$0xf] %v1234_v24  ;;  %1237 = vst [vmem:[%s1707_s27 + $0x74] sm:$0xf] %v1236_v25 }
  0x21   : > { %1239 = vst [vmem:[%s1707_s27 + $0x80] sm:$0xf] %v1238_v26  ;;  %v1240_v27 = vld [vmem:[%s1702_s26 + $0x194] sm:$0xf]  ;;  %v1242_v28 = vld [vmem:[%s1702_s26 + $0x1b8] sm:$0xf] }
  0x22   : > { %v1244_v29 = vld [vmem:[%s1702_s26 + $0x1dc] sm:$0xf]  ;;  %1241 = vst [vmem:[%s1707_s27 + $0x8c] sm:$0xf] %v1240_v27  ;;  %1243 = vst [vmem:[%s1707_s27 + $0x98] sm:$0xf] %v1242_v28 }
  0x23   : > { %1245 = vst [vmem:[%s1707_s27 + $0xa4] sm:$0xf] %v1244_v29  ;;  %v1246_v30 = vld [vmem:[%s1702_s26 + $0x200] sm:$0xf]  ;;  %v1248_v31 = vld [vmem:[%s1702_s26 + $0x224] sm:$0xf] }
  0x24   : > { %1247 = vst [vmem:[%s1707_s27 + $0xb0] sm:$0xf] %v1246_v30  ;;  %1249 = vst [vmem:[%s1707_s27 + $0xbc] sm:$0xf] %v1248_v31 }
  0x25 PF: > { %p1250_p6 = scmp.ge.s32.totalorder %s1636_s16, 1  ;;  %p277_p7 = scmp.lt.s32.totalorder %s1636_s16, 4 }
  0x27   : > { %p278_p8 = pnand %p1250_p6, %p277_p7 }
  0x28   : > { %s284_s28 = sand.u32 (!%p278_p8), 1, %s1620_s12   ;;  %s323_s29 = smul.u32 (!%p278_p8), 48, %s1628_s14 }
  0x29   : > { %281 = sbr.rel (%p278_p8) target bundleno = 383 (0x17f), region = 54  ;;  %p1252_p10 = scmp.ne.s32.totalorder (!%p278_p8), %s1628_s14, 0 }
  0x2a   : > { %s1500_s30 = smul.u32 (!%p278_p8), 192, %s284_s28  ;;  %p324_p9 = scmp.lt.s32.totalorder (!%p278_p8), %s323_s29, 143 }
  0x2c   : > { %s1779_s8 = scalar_lea.vmem (!%p278_p8), [#allocation3], %s1500_s30 }
  0x30   : > { %s1884_s29 = smov (!%p324_p9, %s323_s29), 143  ;;  %348 = sbr.rel (%p1252_p10) target bundleno = 58 (0x3a), region = 62 }
  0x31   : > { %s1251_s4 = sshll.u32 %s1884_s29, 2  ;;  %v1638_v32 = vmov (!%p1252_p10), 0.0  }
  0x32   : > { %s1777_s7 = scalar_lea.vmem %s1874_s1, %s1251_s4  ;;  %349 = vst [vmem:[#allocation2] sm:$0xff] (!%p1252_p10), %v1638_v32  ;;  %350 = vst [vmem:[#allocation2 + $0x8] sm:$0xff] (!%p1252_p10), %v1638_v32 }
  0x33   : > { %351 = vst [vmem:[#allocation2 + $0x10] sm:$0xff] (!%p1252_p10), %v1638_v32  ;;  %352 = vst [vmem:[#allocation2 + $0x18] sm:$0xff] (!%p1252_p10), %v1638_v32 }
  0x34   : > { %353 = vst [vmem:[#allocation2 + $0x20] sm:$0xff] (!%p1252_p10), %v1638_v32  ;;  %354 = vst [vmem:[#allocation2 + $0x28] sm:$0xff] (!%p1252_p10), %v1638_v32 }
  0x35   : > { %355 = vst [vmem:[#allocation2 + $0x30] sm:$0xff] (!%p1252_p10), %v1638_v32  ;;  %356 = vst [vmem:[#allocation2 + $0x38] sm:$0xff] (!%p1252_p10), %v1638_v32 }
  0x36   : > { %357 = vst [vmem:[#allocation2 + $0x40] sm:$0xff] (!%p1252_p10), %v1638_v32  ;;  %358 = vst [vmem:[#allocation2 + $0x48] sm:$0xff] (!%p1252_p10), %v1638_v32 }
  0x37   : > { %359 = vst [vmem:[#allocation2 + $0x50] sm:$0xff] %v1638_v32  ;;  %360 = vst [vmem:[#allocation2 + $0x58] sm:$0xff] %v1638_v32 }
  0x38   : > { %361 = vst [vmem:[#allocation2 + $0x60] sm:$0xff] %v1638_v32  ;;  %362 = vst [vmem:[#allocation2 + $0x68] sm:$0xff] %v1638_v32 }
  0x39   : > { %363 = vst [vmem:[#allocation2 + $0x70] sm:$0xff] %v1638_v32  ;;  %364 = vst [vmem:[#allocation2 + $0x78] sm:$0xff] %v1638_v32 }
  0x3a PF: > { %v1542_v33 = vld [vmem:[%s1777_s7 + $0x40] sm:$0xff]   ;;  %v1545_v36 = vld [vmem:[%s1777_s7 + $0x48] sm:$0xff]   ;;  %v1548_v39 = vld [vmem:[%s1777_s7 + $0x50] sm:$0xff]   ;;  %p1301_p11 = scmp.ne.s32.totalorder %s1628_s14, 2 }
  0x3b   : > { %v1543_v34 = vld [vmem:[%s1777_s7] sm:$0xff]   ;;  %1387 = vmatprep.subr.bf16.mxu0 %v1542_v33  ;;  %v1546_v37 = vld [vmem:[%s1777_s7 + $0x8] sm:$0xff]   ;;  %v1549_v40 = vld [vmem:[%s1777_s7 + $0x10] sm:$0xff]  }
  0x3c   : > { %v1544_v35 = vld [vmem:[%s1777_s7 + $0x80] sm:$0xff]   ;;  %1388 = vmatpush3.bf16.msra.mxu0 %v1543_v34  ;;  %v1547_v38 = vld [vmem:[%s1777_s7 + $0x88] sm:$0xff]   ;;  %v1550_v41 = vld [vmem:[%s1777_s7 + $0x90] sm:$0xff]  }
  0x3d   : > { %1467 = vmatprep.subr.bf16.mxu1 %v1544_v35  ;;  %1389 = vmatprep.subr.bf16.mxu0 %v1545_v36  ;;  %v1551_v42 = vld [vmem:[%s1777_s7 + $0x58] sm:$0xff]   ;;  %v1554_v45 = vld [vmem:[%s1777_s7 + $0x60] sm:$0xff]   ;;  %v1557_v48 = vld [vmem:[%s1777_s7 + $0x68] sm:$0xff]  }
  0x3e   : > { %1468 = vmatpush3.bf16.msra.mxu1 %v1544_v35  ;;  %v1552_v43 = vld [vmem:[%s1777_s7 + $0x18] sm:$0xff]   ;;  %v1556_v46 = vld [vmem:[%s1777_s7 + $0xa0] sm:$0xff]   ;;  %v1559_v49 = vld [vmem:[%s1777_s7 + $0xa8] sm:$0xff]  }
  0x3f   : > { %1469 = vmatprep.subr.bf16.mxu1 %v1547_v38  ;;  %v1553_v44 = vld [vmem:[%s1777_s7 + $0x98] sm:$0xff]   ;;  %v1555_v47 = vld [vmem:[%s1777_s7 + $0x20] sm:$0xff]   ;;  %v1558_v50 = vld [vmem:[%s1777_s7 + $0x28] sm:$0xff]  }
  0x40   : > { %1390 = vmatpush3.bf16.msra.mxu0 %v1546_v37  ;;  %v1560_v51 = vld [vmem:[%s1777_s7 + $0x70] sm:$0xff]   ;;  %v1563_v54 = vld [vmem:[%s1777_s7 + $0x78] sm:$0xff]   ;;  %v1566_v59 = vld [vmem:[%s1779_s8] ss:$12 sps:$4 sm:$0xff]  }
  0x41   : > { %1391 = vmatprep.subr.bf16.mxu0 %v1548_v39  ;;  %v1561_v52 = vld [vmem:[%s1777_s7 + $0x30] sm:$0xff]   ;;  %v1565_v55 = vld [vmem:[%s1777_s7 + $0xb8] sm:$0xff]   ;;  %v1570_v61 = vld [vmem:[%s1779_s8 + $0x20] ss:$12 sps:$4 sm:$0xff]  }
  0x42   : > { %1470 = vmatpush3.bf16.msra.mxu1 %v1547_v38  ;;  %v1562_v53 = vld [vmem:[%s1777_s7 + $0xb0] sm:$0xff]   ;;  %v1564_v58 = vld [vmem:[%s1777_s7 + $0x38] sm:$0xff]   ;;  %v1586_v5 = vld [vmem:[%s1779_s8 + $0x80] ss:$12 sps:$4 sm:$0xff]  }
  0x43   : > { %1471 = vmatprep.subr.bf16.mxu1 %v1550_v41  ;;  %v1568_v56 = vld [vmem:[%s1779_s8 + $0x4] ss:$12 sps:$4 sm:$0xff]   ;;  %v1569_v57 = vld [vmem:[%s1779_s8 + $0x8] ss:$12 sps:$4 sm:$0xff]   ;;  %v1579_v4 = vld [vmem:[%s1779_s8 + $0x4c] ss:$12 sps:$4 sm:$0xff]  }
  0x44   : > { %1392 = vmatpush3.bf16.msra.mxu0 %v1549_v40  ;;  %765 = vmatprep.mubr.bf16.mxu0 %v1568_v56  ;;  %v1571_v60 = vld [vmem:[%s1779_s8 + $0x1c] ss:$12 sps:$4 sm:$0xff]   ;;  %v1577_v62 = vld [vmem:[%s1779_s8 + $0x38] ss:$12 sps:$4 sm:$0xff]   ;;  %v1574_v0 = vld [vmem:[%s1779_s8 + $0x34] ss:$12 sps:$4 sm:$0xff]  }
  0x45   : > { %1393 = vmatprep.subr.bf16.mxu0 %v1551_v42  ;;  %1483 = vmatprep.mubr.bf16.mxu1 %v1569_v57  ;;  %v1573_v63 = vld [vmem:[%s1779_s8 + $0x18] ss:$12 sps:$4 sm:$0xff]   ;;  %v1578_v1 = vld [vmem:[%s1779_s8 + $0x50] ss:$12 sps:$4 sm:$0xff]   ;;  %v1585_v2 = vld [vmem:[%s1779_s8 + $0x68] ss:$12 sps:$4 sm:$0xff]  }
  0x46   : > { %1472 = vmatpush3.bf16.msra.mxu1 %v1550_v41  ;;  %v1576_v3 = vld [vmem:[%s1779_s8 + $0x30] ss:$12 sps:$4 sm:$0xff]   ;;  %v1593_v6 = vld [vmem:[%s1779_s8 + $0x98] ss:$12 sps:$4 sm:$0xff]   ;;  %v1581_v7 = vld [vmem:[%s1779_s8 + $0x48] ss:$12 sps:$4 sm:$0xff]  }
  0x47   : > { %1473 = vmatprep.subr.bf16.mxu1 %v1553_v44  ;;  %v1582_v8 = vld [vmem:[%s1779_s8 + $0x64] ss:$12 sps:$4 sm:$0xff]   ;;  %v1584_v10 = vld [vmem:[%s1779_s8 + $0x60] ss:$12 sps:$4 sm:$0xff]   ;;  %v1587_v11 = vld [vmem:[%s1779_s8 + $0x7c] ss:$12 sps:$4 sm:$0xff]  }
  0x48   : > { %1394 = vmatpush3.bf16.msra.mxu0 %v1552_v43  ;;  %v1594_v9 = vld [vmem:[%s1779_s8 + $0xb0] ss:$12 sps:$4 sm:$0xff]   ;;  %v1589_v12 = vld [vmem:[%s1779_s8 + $0x78] ss:$12 sps:$4 sm:$0xff]   ;;  %v1590_v13 = vld [vmem:[%s1779_s8 + $0x94] ss:$12 sps:$4 sm:$0xff]  }
  0x49   : > { %1395 = vmatprep.subr.bf16.mxu0 %v1554_v45  ;;  %v1592_v14 = vld [vmem:[%s1779_s8 + $0x90] ss:$12 sps:$4 sm:$0xff]   ;;  %v1595_v15 = vld [vmem:[%s1779_s8 + $0xac] ss:$12 sps:$4 sm:$0xff]   ;;  %v1597_v16 = vld [vmem:[%s1779_s8 + $0xa8] ss:$12 sps:$4 sm:$0xff]  }
  0x4a   : > { %1474 = vmatpush3.bf16.msra.mxu1 %v1553_v44  ;;  %v365_v23 = vld [vmem:[#allocation2] sm:$0xff]  ;;  %v366_v28 = vld [vmem:[#allocation2 + $0x8] sm:$0xff]  ;;  %v367_v38 = vld [vmem:[#allocation2 + $0x10] sm:$0xff] }
  0x4b   : > { %1475 = vmatprep.subr.bf16.mxu1 %v1556_v46  ;;  %v368_v44 = vld [vmem:[#allocation2 + $0x18] sm:$0xff] }
  0x4c   : > { %1396 = vmatpush3.bf16.msra.mxu0 %v1555_v47 }
  0x4d   : > { %1397 = vmatprep.subr.bf16.mxu0 %v1557_v48 }
  0x4e   : > { %1476 = vmatpush3.bf16.msra.mxu1 %v1556_v46 }
  0x4f   : > { %1477 = vmatprep.subr.bf16.mxu1 %v1559_v49 }
  0x50   : > { %1398 = vmatpush3.bf16.msra.mxu0 %v1558_v50 }
  0x51   : > { %1399 = vmatprep.subr.bf16.mxu0 %v1560_v51 }
  0x52   : > { %1478 = vmatpush3.bf16.msra.mxu1 %v1559_v49 }
  0x53   : > { %1479 = vmatprep.subr.bf16.mxu1 %v1562_v53 }
  0x54   : > { %1400 = vmatpush3.bf16.msra.mxu0 %v1561_v52 }
  0x55   : > { %1401 = vmatprep.subr.bf16.mxu0 %v1563_v54 }
  0x56   : > { %1480 = vmatpush3.bf16.msra.mxu1 %v1562_v53 }
  0x57   : > { %1481 = vmatprep.subr.bf16.mxu1 %v1565_v55 }
  0x58   : > { %1402 = vmatpush3.bf16.msra.mxu0 %v1564_v58 }
  0x5a   : > { %1482 = vmatpush3.bf16.msra.mxu1 %v1565_v55  ;;  %v369_v55 = vld [vmem:[#allocation2 + $0x20] sm:$0xff] }
  0x5b   : > { %766 = vmatmul.mubr.bf16.vlgmr.msra.gmra.mrb[0].mxu0 %v1566_v59 }
  0x5c   : > { %773 = vmatprep.mubr.bf16.mxu0 %v1571_v60  ;;  %v370_v60 = vld [vmem:[#allocation2 + $0x28] sm:$0xff] }
  0x5d   : > { %1484 = vmatmul.mubr.bf16.vlgmr.msra.gmra.mrb[0].mxu1 %v1570_v61 }
  0x5e   : > { %1487 = vmatprep.mubr.bf16.mxu1 %v1577_v62 }
  0x63   : > { %774 = vmatmul.mubr.bf16.gmra.mrb[4].mxu0 %v1573_v63 }
  0x64   : > { %781 = vmatprep.mubr.bf16.mxu0 %v1574_v0 }
  0x65   : > { %1488 = vmatmul.mubr.bf16.gmra.mrb[4].mxu1 %v1578_v1 }
  0x66   : > { %1491 = vmatprep.mubr.bf16.mxu1 %v1585_v2 }
  0x6b   : > { %782 = vmatmul.mubr.bf16.gmra.mrb[8].mxu0 %v1576_v3 }
  0x6c   : > { %789 = vmatprep.mubr.bf16.mxu0 %v1579_v4 }
  0x6d   : > { %1492 = vmatmul.mubr.bf16.gmra.mrb[8].mxu1 %v1586_v5 }
  0x6e   : > { %1495 = vmatprep.mubr.bf16.mxu1 %v1593_v6  ;;  %v371_v6 = vld [vmem:[#allocation2 + $0x30] sm:$0xff] }
  0x73   : > { %790 = vmatmul.mubr.bf16.gmra.mrb[12].mxu0 %v1581_v7 }
  0x74   : > { %797 = vmatprep.mubr.bf16.mxu0 %v1582_v8 }
  0x75   : > { %1496 = vmatmul.mubr.bf16.gmra.mrb[12].mxu1 %v1594_v9 }
  0x7b   : > { %798 = vmatmul.mubr.bf16.gmra.mrb[16].mxu0 %v1584_v10 }
  0x7c   : > { %805 = vmatprep.mubr.bf16.mxu0 %v1587_v11 }
  0x83   : > { %806 = vmatmul.mubr.bf16.gmra.mrb[20].mxu0 %v1589_v12  ;;  %v372_v12 = vld [vmem:[#allocation2 + $0x38] sm:$0xff] }
  0x84   : > { %813 = vmatprep.mubr.bf16.mxu0 %v1590_v13 }
  0x8b   : > { %814 = vmatmul.mubr.bf16.gmra.mrb[24].mxu0 %v1592_v14 }
  0x8c   : > { %821 = vmatprep.mubr.bf16.mxu0 %v1595_v15 }
  0x93   : > { %822 = vmatmul.mubr.bf16.gmra.mrb[28].mxu0 %v1597_v16 }
 0x12e   : > { %v1403_v17 = vpop.f32.mrb[0].mxu0 }
 0x12f   : > { %v1404_v18 = vpop.f32.mrb[1].mxu0 }
 0x130   : > { %v1405_v19 = vadd.f32 %v1404_v18, %v1403_v17  ;;  %v1406_v20 = vpop.f32.mrb[2].mxu0  ;;  %v1485_v21 = vpop.f32.mrb[0].mxu1 }
 0x131   : > { %v1407_v22 = vpop.f32.mrb[3].mxu0  ;;  %v864_v24 = vpop.f32.mrb[1].mxu1 }
 0x132   : > { %v1408_v25 = vadd.f32 %v1407_v22, %v1406_v20  ;;  %v865_v26 = vadd.f32 %v1405_v19, %v864_v24  ;;  %v1486_v27 = vpop.f32.mrb[2].mxu1  ;;  %v373_v22 = vld [vmem:[#allocation2 + $0x40] sm:$0xff] }
 0x133   : > { %v867_v29 = vpop.f32.mrb[3].mxu1 }
 0x134   : > { %v927_v30 = vadd.f32 %v865_v26, %v365_v23  ;;  %v868_v31 = vadd.f32 %v1408_v25, %v867_v29  ;;  %v374_v25 = vld [vmem:[#allocation2 + $0x48] sm:$0xff] }
 0x136   : > { %943 = vst [vmem:[#allocation2] sm:$0xff] %v927_v30  ;;  %v928_v32 = vadd.f32 %v868_v31, %v366_v28  ;;  %v1409_v33 = vpop.f32.mrb[4].mxu0 }
 0x137   : > { %v1410_v34 = vpop.f32.mrb[5].mxu0 }
 0x138   : > { %944 = vst [vmem:[#allocation2 + $0x8] sm:$0xff] %v928_v32  ;;  %v1411_v35 = vadd.f32 %v1410_v34, %v1409_v33  ;;  %v1412_v36 = vpop.f32.mrb[6].mxu0  ;;  %v1489_v37 = vpop.f32.mrb[4].mxu1  ;;  %v375_v33 = vld [vmem:[#allocation2 + $0x50] sm:$0xff] }
 0x139   : > { %v1413_v39 = vpop.f32.mrb[7].mxu0  ;;  %v880_v40 = vpop.f32.mrb[5].mxu1 }
 0x13a   : > { %v873_v41 = vadd.f32 %v1485_v21, %v1411_v35  ;;  %v1414_v42 = vadd.f32 %v1413_v39, %v1412_v36  ;;  %v1490_v43 = vpop.f32.mrb[6].mxu1 }
 0x13b   : > { %v883_v45 = vpop.f32.mrb[7].mxu1 }
 0x13c   : > { %v929_v46 = vadd.f32 %v873_v41, %v367_v38  ;;  %v876_v47 = vadd.f32 %v1486_v27, %v1414_v42 }
 0x13e   : > { %945 = vst [vmem:[#allocation2 + $0x10] sm:$0xff] %v929_v46  ;;  %v930_v48 = vadd.f32 %v876_v47, %v368_v44  ;;  %v1415_v49 = vpop.f32.mrb[8].mxu0  ;;  %v377_v46 = vld [vmem:[#allocation2 + $0x60] sm:$0xff] }
 0x13f   : > { %v1416_v50 = vpop.f32.mrb[9].mxu0 }
 0x140   : > { %946 = vst [vmem:[#allocation2 + $0x18] sm:$0xff] %v930_v48  ;;  %v1417_v51 = vadd.f32 %v1416_v50, %v1415_v49  ;;  %v1418_v52 = vpop.f32.mrb[10].mxu0  ;;  %v1493_v53 = vpop.f32.mrb[8].mxu1  ;;  %v378_v49 = vld [vmem:[#allocation2 + $0x68] sm:$0xff] }
 0x141   : > { %v1419_v54 = vpop.f32.mrb[11].mxu0  ;;  %v896_v56 = vpop.f32.mrb[9].mxu1 }
 0x142   : > { %v1420_v57 = vadd.f32 %v1419_v54, %v1418_v52  ;;  %v881_v58 = vadd.f32 %v1417_v51, %v880_v40  ;;  %v1494_v59 = vpop.f32.mrb[10].mxu1 }
 0x143   : > { %v899_v61 = vpop.f32.mrb[11].mxu1 }
 0x144   : > { %v931_v62 = vadd.f32 %v881_v58, %v369_v55  ;;  %v884_v63 = vadd.f32 %v1420_v57, %v883_v45  ;;  %v379_v57 = vld [vmem:[#allocation2 + $0x70] sm:$0xff] }
 0x146   : > { %947 = vst [vmem:[#allocation2 + $0x20] sm:$0xff] %v931_v62  ;;  %v932_v0 = vadd.f32 %v884_v63, %v370_v60  ;;  %v1421_v1 = vpop.f32.mrb[12].mxu0 }
 0x147   : > { %v1422_v2 = vpop.f32.mrb[13].mxu0 }
 0x148   : > { %948 = vst [vmem:[#allocation2 + $0x28] sm:$0xff] %v932_v0  ;;  %v1423_v3 = vadd.f32 %v1422_v2, %v1421_v1  ;;  %v1424_v4 = vpop.f32.mrb[14].mxu0  ;;  %v1497_v5 = vpop.f32.mrb[12].mxu1  ;;  %v963_v1 = vld [vmem:[#allocation2] sm:$0xff] (!%p1301_p11)  ;;  %v964_v2 = vld [vmem:[#allocation2 + $0x8] sm:$0xff] (!%p1301_p11) }
 0x149   : > { %v1425_v7 = vpop.f32.mrb[15].mxu0  ;;  %v912_v8 = vpop.f32.mrb[13].mxu1 }
 0x14a   : > { %v889_v9 = vadd.f32 %v1489_v37, %v1423_v3  ;;  %v1426_v10 = vadd.f32 %v1425_v7, %v1424_v4  ;;  %v1498_v11 = vpop.f32.mrb[14].mxu1  ;;  %v376_v37 = vld [vmem:[#allocation2 + $0x58] sm:$0xff]  ;;  %v1302_v3 = vld [vmem:[%s1875_s2] ss:$0 sm:$0xff] (!%p1301_p11)  ;;  %v965_v7 = vld [vmem:[#allocation2 + $0x10] sm:$0xff] (!%p1301_p11) }
 0x14b   : > { %v915_v13 = vpop.f32.mrb[15].mxu1  ;;  %v986_v4 = vadd.f32 (!%p1301_p11), %v1302_v3, %v963_v1 }
 0x14c   : > { %v933_v14 = vadd.f32 %v889_v9, %v371_v6  ;;  %v892_v15 = vadd.f32 %v1490_v43, %v1426_v10  ;;  %v987_v6 = vadd.f32 (!%p1301_p11), %v1302_v3, %v964_v2  ;;  %v988_v9 = vadd.f32 (!%p1301_p11), %v1302_v3, %v965_v7 }
 0x14e   : > { %949 = vst [vmem:[#allocation2 + $0x30] sm:$0xff] %v933_v14  ;;  %v934_v16 = vadd.f32 %v892_v15, %v372_v12  ;;  %v1427_v17 = vpop.f32.mrb[16].mxu0  ;;  %v1002_v15 = vmax.f32 (!%p1301_p11), %v986_v4, 0.0 }
 0x14f   : > { %v1428_v18 = vpop.f32.mrb[17].mxu0 }
 0x150   : > { %950 = vst [vmem:[#allocation2 + $0x38] sm:$0xff] %v934_v16  ;;  %v1429_v19 = vadd.f32 %v1428_v18, %v1427_v17  ;;  %v1430_v20 = vpop.f32.mrb[18].mxu0  ;;  %v1003_v16 = vmax.f32 (!%p1301_p11), %v987_v6, 0.0 }
 0x151   : > { %v1431_v21 = vpop.f32.mrb[19].mxu0 }
 0x152   : > { %v1432_v23 = vadd.f32 %v1431_v21, %v1430_v20  ;;  %v897_v24 = vadd.f32 %v1429_v19, %v896_v56 }
 0x154   : > { %v935_v26 = vadd.f32 %v897_v24, %v373_v22  ;;  %v900_v27 = vadd.f32 %v1432_v23, %v899_v61  ;;  %v380_v61 = vld [vmem:[#allocation2 + $0x78] sm:$0xff]  ;;  %v1004_v22 = vmax.f32 (!%p1301_p11), %v988_v9, 0.0 }
 0x156   : > { %951 = vst [vmem:[#allocation2 + $0x40] sm:$0xff] %v935_v26  ;;  %v936_v28 = vadd.f32 %v900_v27, %v374_v25  ;;  %v1433_v29 = vpop.f32.mrb[20].mxu0 }
 0x157   : > { %v1434_v30 = vpop.f32.mrb[21].mxu0  ;;  %v970_v14 = vld [vmem:[#allocation2 + $0x38] sm:$0xff] (!%p1301_p11) }
 0x158   : > { %952 = vst [vmem:[#allocation2 + $0x48] sm:$0xff] %v936_v28  ;;  %v1435_v31 = vadd.f32 %v1434_v30, %v1433_v29  ;;  %v1436_v32 = vpop.f32.mrb[22].mxu0  ;;  %v993_v25 = vadd.f32 (!%p1301_p11), %v1302_v3, %v970_v14  ;;  %v1343_v28 = vpack.c.bf16 (!%p1301_p11), %v1003_v16, %v1002_v15 }
 0x159   : > { %v1437_v34 = vpop.f32.mrb[23].mxu0 }
 0x15a   : > { %v905_v35 = vadd.f32 %v1493_v53, %v1435_v31  ;;  %v1438_v36 = vadd.f32 %v1437_v34, %v1436_v32  ;;  %v1009_v34 = vmax.f32 (!%p1301_p11), %v993_v25, 0.0  ;;  %1344 = vst [vmem:[%s1876_s3] sm:$0xff] (!%p1301_p11), %v1343_v28  }
 0x15c   : > { %v937_v38 = vadd.f32 %v905_v35, %v375_v33  ;;  %v908_v39 = vadd.f32 %v1494_v59, %v1438_v36 }
 0x15d   : > { %v971_v19 = vld [vmem:[#allocation2 + $0x40] sm:$0xff] (!%p1301_p11) }
 0x15e   : > { %953 = vst [vmem:[#allocation2 + $0x50] sm:$0xff] %v937_v38  ;;  %v938_v40 = vadd.f32 %v908_v39, %v376_v37  ;;  %v1439_v41 = vpop.f32.mrb[24].mxu0  ;;  %v994_v31 = vadd.f32 (!%p1301_p11), %v1302_v3, %v971_v19 }
 0x15f   : > { %v1440_v42 = vpop.f32.mrb[25].mxu0  ;;  %v972_v20 = vld [vmem:[#allocation2 + $0x48] sm:$0xff] (!%p1301_p11) }
 0x160   : > { %954 = vst [vmem:[#allocation2 + $0x58] sm:$0xff] %v938_v40  ;;  %v1441_v43 = vadd.f32 %v1440_v42, %v1439_v41  ;;  %v1442_v44 = vpop.f32.mrb[26].mxu0  ;;  %v995_v35 = vadd.f32 (!%p1301_p11), %v1302_v3, %v972_v20  ;;  %v1010_v40 = vmax.f32 (!%p1301_p11), %v994_v31, 0.0 }
 0x161   : > { %v1443_v45 = vpop.f32.mrb[27].mxu0 }
 0x162   : > { %v1444_v47 = vadd.f32 %v1443_v45, %v1442_v44  ;;  %v913_v48 = vadd.f32 %v1441_v43, %v912_v8  ;;  %v967_v8 = vld [vmem:[#allocation2 + $0x20] sm:$0xff] (!%p1301_p11)  ;;  %v1011_v44 = vmax.f32 (!%p1301_p11), %v995_v35, 0.0 }
 0x163   : > { %v990_v12 = vadd.f32 (!%p1301_p11), %v1302_v3, %v967_v8 }
 0x164   : > { %v939_v50 = vadd.f32 %v913_v48, %v377_v46  ;;  %v916_v51 = vadd.f32 %v1444_v47, %v915_v13  ;;  %v969_v13 = vld [vmem:[#allocation2 + $0x30] sm:$0xff] (!%p1301_p11) }
 0x165   : > { %v992_v18 = vadd.f32 (!%p1301_p11), %v1302_v3, %v969_v13  ;;  %v973_v21 = vld [vmem:[#allocation2 + $0x50] sm:$0xff] (!%p1301_p11)  ;;  %v1006_v24 = vmax.f32 (!%p1301_p11), %v990_v12, 0.0 }
 0x166   : > { %955 = vst [vmem:[#allocation2 + $0x60] sm:$0xff] %v939_v50  ;;  %v940_v52 = vadd.f32 %v916_v51, %v378_v49  ;;  %v1445_v53 = vpop.f32.mrb[28].mxu0  ;;  %v996_v36 = vadd.f32 (!%p1301_p11), %v1302_v3, %v973_v21  ;;  %v1363_v51 = vpack.c.bf16 (!%p1301_p11), %v1011_v44, %v1010_v40 }
 0x167   : > { %v1446_v54 = vpop.f32.mrb[29].mxu0  ;;  %v974_v26 = vld [vmem:[#allocation2 + $0x58] sm:$0xff] (!%p1301_p11)  ;;  %v1008_v30 = vmax.f32 (!%p1301_p11), %v992_v18, 0.0 }
 0x168   : > { %956 = vst [vmem:[#allocation2 + $0x68] sm:$0xff] %v940_v52  ;;  %v1447_v55 = vadd.f32 %v1446_v54, %v1445_v53  ;;  %v1448_v56 = vpop.f32.mrb[30].mxu0  ;;  %v997_v41 = vadd.f32 (!%p1301_p11), %v1302_v3, %v974_v26  ;;  %v1012_v45 = vmax.f32 (!%p1301_p11), %v996_v36, 0.0  ;;  %1383 = vst [vmem:[%s1876_s3 + $0x20] sm:$0xff] (!%p1301_p11), %v1363_v51  }
 0x169   : > { %v1449_v58 = vpop.f32.mrb[31].mxu0  ;;  %v1358_v43 = vpack.c.bf16 (!%p1301_p11), %v1009_v34, %v1008_v30 }
 0x16a   : > { %v921_v59 = vadd.f32 %v1497_v5, %v1447_v55  ;;  %v1450_v60 = vadd.f32 %v1449_v58, %v1448_v56  ;;  %962 = sbr.rel (%p1301_p11) target bundleno = 383 (0x17f), region = 66  ;;  %v966_v5 = vld [vmem:[#allocation2 + $0x18] sm:$0xff] (!%p1301_p11)  ;;  %v1013_v47 = vmax.f32 (!%p1301_p11), %v997_v41, 0.0 }
 0x16b   : > { %v989_v10 = vadd.f32 (!%p1301_p11), %v1302_v3, %v966_v5  ;;  %1382 = vst [vmem:[%s1876_s3 + $0x18] sm:$0xff] (!%p1301_p11), %v1358_v43  }
 0x16c   : > { %v941_v62 = vadd.f32 %v921_v59, %v379_v57  ;;  %v924_v63 = vadd.f32 %v1498_v11, %v1450_v60  ;;  %v968_v11 = vld [vmem:[#allocation2 + $0x28] sm:$0xff] (!%p1301_p11)  ;;  %v1368_v53 = vpack.c.bf16 (!%p1301_p11), %v1013_v47, %v1012_v45 }
 0x16d   : > { %v991_v17 = vadd.f32 (!%p1301_p11), %v1302_v3, %v968_v11  ;;  %v1005_v23 = vmax.f32 (!%p1301_p11), %v989_v10, 0.0  ;;  %v975_v27 = vld [vmem:[#allocation2 + $0x60] sm:$0xff] (!%p1301_p11) }
 0x16e   : > { %957 = vst [vmem:[#allocation2 + $0x70] sm:$0xff] %v941_v62  ;;  %v942_v0 = vadd.f32 %v924_v63, %v380_v61  ;;  %v998_v42 = vadd.f32 (!%p1301_p11), %v1302_v3, %v975_v27  ;;  %1384 = vst [vmem:[%s1876_s3 + $0x28] sm:$0xff] (!%p1301_p11), %v1368_v53  }
 0x16f   : > { %v1007_v29 = vmax.f32 (!%p1301_p11), %v991_v17, 0.0  ;;  %v976_v32 = vld [vmem:[#allocation2 + $0x68] sm:$0xff] (!%p1301_p11)  ;;  %v1348_v33 = vpack.c.bf16 (!%p1301_p11), %v1005_v23, %v1004_v22 }
 0x170   : > { %958 = vst [vmem:[#allocation2 + $0x78] sm:$0xff] %v942_v0  ;;  %v999_v46 = vadd.f32 (!%p1301_p11), %v1302_v3, %v976_v32  ;;  %v1014_v48 = vmax.f32 (!%p1301_p11), %v998_v42, 0.0 }
 0x171   : > { %v1353_v39 = vpack.c.bf16 %v1007_v29, %v1006_v24  ;;  %1380 = vst [vmem:[%s1876_s3 + $0x8] sm:$0xff] %v1348_v33  }
 0x172   : > { %v1015_v52 = vmax.f32 %v999_v46, 0.0 }
 0x173   : > { %1381 = vst [vmem:[%s1876_s3 + $0x10] sm:$0xff] %v1353_v39  }
 0x174   : > { %v1373_v56 = vpack.c.bf16 %v1015_v52, %v1014_v48 }
 0x175   : > { %v977_v37 = vld [vmem:[#allocation2 + $0x70] sm:$0xff] }
 0x176   : > { %v1000_v49 = vadd.f32 %v1302_v3, %v977_v37  ;;  %1385 = vst [vmem:[%s1876_s3 + $0x30] sm:$0xff] %v1373_v56  }
 0x177   : > { %v978_v38 = vld [vmem:[#allocation2 + $0x78] sm:$0xff] }
 0x178   : > { %v1001_v50 = vadd.f32 %v1302_v3, %v978_v38  ;;  %v1016_v54 = vmax.f32 %v1000_v49, 0.0 }
 0x17a   : > { %v1017_v55 = vmax.f32 %v1001_v50, 0.0 }
 0x17c   : > { %v1378_v57 = vpack.c.bf16 %v1017_v55, %v1016_v54 }
 0x17e   : > { %1386 = vst [vmem:[%s1876_s3 + $0x38] sm:$0xff] %v1378_v57  }
 0x17f PF: > { %s13_s16 = sadd.s32 1, %s1636_s16   ;;  %s1877_s12 = smov %s1624_s13 }
 0x180   : > { %p10_p12 = scmp.ge.s32.totalorder %s13_s16, 5   ;;  %s1878_s13 = smov %s1694_s20 }
 0x181   : > { %s1879_s14 = smov %s1632_s15  ;;  %s1880_s15 = smov %s1882_s17 }
 0x182   :  { %12 = sbr.rel (!%p10_p12) target bundleno = 3 (0x3), region = 113 }

// kernel: resnet34_forward.57
= control target key start
LH: loop header
LB: loop body
LE: loop exit
PB: predicated region body
PF: predicated region fallthrough
CT: control target
= control target key end

     0   :  { %s1260_s12 = smov 0   ;;  %s1262_s13 = smov 0   ;;  %s1402_s0 = inlined_call_operand.vmem [shape: bf16[32,1152], index: 0, kind: input, shape index: {}]   ;;  %s1403_s1 = inlined_call_operand.vmem [shape: bf16[1152,256], index: 1, kind: input, shape index: {}]   ;;  %s1404_s2 = inlined_call_operand.vmem [shape: f32[1,256], index: 2, kind: input, shape index: {}]   ;;  %s1405_s3 = inlined_call_operand.vmem [shape: bf16[32,256], index: 3, kind: output, shape index: {}]  }
   0x1   :  { %s1264_s14 = smov 0   ;;  %s1266_s15 = smov 0  }
   0x2   :  { %s1268_s16 = smov 0  }
   0x3 LB: > { %s25_s17 = sadd.s32 1, %s1232_s15  ;;  %p48_p1 = scmp.ne.s32.totalorder %s1224_s13, %s1220_s12  ;;  %s1236_s16 = sphi %s1268_s16, %s13_s16   ;;  %s1232_s15 = sphi %s1266_s15, %s1409_s15   ;;  %s1228_s14 = sphi %s1264_s14, %s1408_s14   ;;  %s1224_s13 = sphi %s1262_s13, %s1407_s13   ;;  %s1220_s12 = sphi %s1260_s12, %s1406_s12  }
   0x4   : > { %p26_p0 = scmp.ge.s32.totalorder %s25_s17, 3  ;;  %p49_p2 = scmp.eq.s32.totalorder %s1236_s16, 0 }
   0x5   : > { %s41_s19 = sadd.s32 1, %s1224_s13  ;;  %p983_p5 = scmp.ge.s32.totalorder %s1236_s16, 3 }
   0x6   : > { %s1411_s17 = smov (%p26_p0, %s25_s17), 0  ;;  %p50_p3 = por %p49_p2, %p48_p1 }
   0x7   : > { %s37_s18 = ssub.s32 %s1232_s15, %s1411_s17  ;;  %164 = sbr.rel (%p983_p5) target bundleno = 23 (0x17), region = 20 }
   0x8   : > { %p39_p4 = scmp.eq.s32.totalorder %s37_s18, 0 }
   0xa   : > { %s1295_s20 = scalar_select %p39_p4, %s1224_s13, %s41_s19  }
   0xe   : > { %167 = sbr.rel (!%p50_p3) target bundleno = 23 (0x17), region = 24  ;;  %s169_s21 = sand.u32 (%p50_p3), 1, %s1224_s13  }
   0xf   : > { %s1060_s22 = smul.u32 (%p50_p3), 12, %s1232_s15 }
  0x10   : > { %s1074_s23 = smul.u32 (%p50_p3), 48, %s169_s21 }
  0x11   : > { %s177_s26 = scalar_lea.vmem (%p50_p3), %s1402_s0, %s1060_s22 }
  0x12   : > { %v192_v0 = vld [vmem:[%s177_s26] sm:$0xff] (%p50_p3)  ;;  %v196_v2 = vld [vmem:[%s177_s26 + $0x48] sm:$0xff] (%p50_p3)  ;;  %s171_s27 = scalar_lea.vmem (%p50_p3), [#allocation3], %s1074_s23  ;;  %v989_v6 = vld [vmem:[%s177_s26 + $0x50] sm:$0xf] (%p50_p3) }
  0x13   : > { %v194_v1 = vld [vmem:[%s177_s26 + $0x24] sm:$0xff] (%p50_p3)  ;;  %193 = vst [vmem:[%s171_s27] sm:$0xff] (%p50_p3), %v192_v0  ;;  %197 = vst [vmem:[%s171_s27 + $0x18] sm:$0xff] (%p50_p3), %v196_v2  ;;  %v198_v3 = vld [vmem:[%s177_s26 + $0x6c] sm:$0xff] (%p50_p3) }
  0x14   : > { %195 = vst [vmem:[%s171_s27 + $0xc] sm:$0xff] (%p50_p3), %v194_v1  ;;  %v985_v4 = vld [vmem:[%s177_s26 + $0x8] sm:$0xf] (%p50_p3)  ;;  %v987_v5 = vld [vmem:[%s177_s26 + $0x2c] sm:$0xf] (%p50_p3)  ;;  %199 = vst [vmem:[%s171_s27 + $0x24] sm:$0xff] (%p50_p3), %v198_v3 }
  0x15   : > { %986 = vst [vmem:[%s171_s27 + $0x8] sm:$0xf] %v985_v4  ;;  %988 = vst [vmem:[%s171_s27 + $0x14] sm:$0xf] %v987_v5  ;;  %v991_v7 = vld [vmem:[%s177_s26 + $0x74] sm:$0xf] }
  0x16   : > { %990 = vst [vmem:[%s171_s27 + $0x20] sm:$0xf] %v989_v6  ;;  %992 = vst [vmem:[%s171_s27 + $0x2c] sm:$0xf] %v991_v7 }
  0x17 PF: > { %p993_p6 = scmp.ge.s32.totalorder %s1236_s16, 1  ;;  %p234_p7 = scmp.lt.s32.totalorder %s1236_s16, 4 }
  0x19   : > { %p235_p8 = pnand %p993_p6, %p234_p7 }
  0x1a   : > { %s241_s28 = sand.u32 (!%p235_p8), 1, %s1220_s12   ;;  %s285_s29 = smul.u32 (!%p235_p8), 48, %s1228_s14 }
  0x1b   : > { %238 = sbr.rel (%p235_p8) target bundleno = 348 (0x15c), region = 54  ;;  %p996_p10 = scmp.ne.s32.totalorder (!%p235_p8), %s1228_s14, 0 }
  0x1c   : > { %s1075_s30 = smul.u32 (!%p235_p8), 48, %s241_s28  ;;  %p287_p9 = scmp.lt.s32.totalorder (!%p235_p8), %s285_s29, 143 }
  0x1e   : > { %s1312_s8 = scalar_lea.vmem (!%p235_p8), [#allocation3], %s1075_s30 }
  0x22   : > { %s1413_s29 = smov (!%p287_p9, %s285_s29), 143  ;;  %318 = sbr.rel (%p996_p10) target bundleno = 41 (0x29), region = 62 }
  0x23   : > { %s1061_s4 = sshll.u32 %s1413_s29, 3  ;;  %v1238_v8 = vmov (!%p996_p10), 0.0  }
  0x24   : > { %s1310_s7 = scalar_lea.vmem %s1403_s1, %s1061_s4  ;;  %319 = vst [vmem:[#allocation2] sm:$0xff] (!%p996_p10), %v1238_v8  ;;  %320 = vst [vmem:[#allocation2 + $0x8] sm:$0xff] (!%p996_p10), %v1238_v8 }
  0x25   : > { %321 = vst [vmem:[#allocation2 + $0x10] sm:$0xff] (!%p996_p10), %v1238_v8  ;;  %322 = vst [vmem:[#allocation2 + $0x18] sm:$0xff] (!%p996_p10), %v1238_v8 }
  0x26   : > { %323 = vst [vmem:[#allocation2 + $0x20] sm:$0xff] (!%p996_p10), %v1238_v8  ;;  %324 = vst [vmem:[#allocation2 + $0x28] sm:$0xff] (!%p996_p10), %v1238_v8 }
  0x27   : > { %325 = vst [vmem:[#allocation2 + $0x30] sm:$0xff] (!%p996_p10), %v1238_v8  ;;  %326 = vst [vmem:[#allocation2 + $0x38] sm:$0xff] (!%p996_p10), %v1238_v8 }
  0x29 PF: > { %v1118_v9 = vld [vmem:[%s1310_s7 + $0x4] ss:$8 sps:$4 sm:$0xff]   ;;  %v1120_v10 = vld [vmem:[%s1310_s7] ss:$8 sps:$4 sm:$0xff]   ;;  %v1239_v11 = vmov 0   ;;  %p1051_p11 = scmp.ne.s32.totalorder %s1228_s14, 2 }
  0x2a   : > { %748 = vmatprep.mubr.bf16.mxu0 %v1239_v11  ;;  %663 = vmatprep.subr.bf16.mxu1 %v1118_v9  ;;  %v1121_v12 = vld [vmem:[%s1310_s7 + $0x14] ss:$8 sps:$4 sm:$0xff]   ;;  %v1123_v13 = vld [vmem:[%s1310_s7 + $0x10] ss:$8 sps:$4 sm:$0xff]   ;;  %v1124_v14 = vld [vmem:[%s1310_s7 + $0x24] ss:$8 sps:$4 sm:$0xff]  }
  0x2b   : > { %664 = vmatpush1.bf16.msra.mxu1 %v1120_v10  ;;  %v1126_v15 = vld [vmem:[%s1310_s7 + $0x20] ss:$8 sps:$4 sm:$0xff]   ;;  %v1127_v16 = vld [vmem:[%s1310_s7 + $0x34] ss:$8 sps:$4 sm:$0xff]   ;;  %v1129_v17 = vld [vmem:[%s1310_s7 + $0x30] ss:$8 sps:$4 sm:$0xff]  }
  0x2c   : > { %665 = vmatprep.subr.bf16.mxu1 %v1121_v12  ;;  %v1142_v18 = vld [vmem:[%s1310_s7 + $0x104] ss:$8 sps:$4 sm:$0xff]   ;;  %v1144_v19 = vld [vmem:[%s1310_s7 + $0x100] ss:$8 sps:$4 sm:$0xff]   ;;  %v1148_v21 = vld [vmem:[%s1310_s7 + $0x114] ss:$8 sps:$4 sm:$0xff]  }
  0x2d   : > { %v1130_v20 = vld [vmem:[%s1310_s7 + $0x44] ss:$8 sps:$4 sm:$0xff]   ;;  %716 = vmatprep.subr.bf16.mxu0 %v1142_v18  ;;  %v1150_v22 = vld [vmem:[%s1310_s7 + $0x110] ss:$8 sps:$4 sm:$0xff]   ;;  %v1132_v23 = vld [vmem:[%s1310_s7 + $0x40] ss:$8 sps:$4 sm:$0xff]  }
  0x2e   : > { %717 = vmatpush1.bf16.msra.mxu0 %v1144_v19  ;;  %v1133_v24 = vld [vmem:[%s1310_s7 + $0x54] ss:$8 sps:$4 sm:$0xff]   ;;  %v1154_v25 = vld [vmem:[%s1310_s7 + $0x124] ss:$8 sps:$4 sm:$0xff]   ;;  %v1156_v26 = vld [vmem:[%s1310_s7 + $0x120] ss:$8 sps:$4 sm:$0xff]  }
  0x2f   : > { %666 = vmatpush1.bf16.msra.mxu1 %v1123_v13  ;;  %718 = vmatprep.subr.bf16.mxu0 %v1148_v21  ;;  %v1135_v27 = vld [vmem:[%s1310_s7 + $0x50] ss:$8 sps:$4 sm:$0xff]   ;;  %v1160_v28 = vld [vmem:[%s1310_s7 + $0x134] ss:$8 sps:$4 sm:$0xff]   ;;  %v1136_v29 = vld [vmem:[%s1310_s7 + $0x64] ss:$8 sps:$4 sm:$0xff]  }
  0x30   : > { %667 = vmatprep.subr.bf16.mxu1 %v1124_v14  ;;  %v1162_v30 = vld [vmem:[%s1310_s7 + $0x130] ss:$8 sps:$4 sm:$0xff]   ;;  %v1138_v31 = vld [vmem:[%s1310_s7 + $0x60] ss:$8 sps:$4 sm:$0xff]   ;;  %v1166_v32 = vld [vmem:[%s1310_s7 + $0x144] ss:$8 sps:$4 sm:$0xff]  }
  0x31   : > { %v1139_v33 = vld [vmem:[%s1310_s7 + $0x74] ss:$8 sps:$4 sm:$0xff]   ;;  %v1168_v34 = vld [vmem:[%s1310_s7 + $0x140] ss:$8 sps:$4 sm:$0xff]   ;;  %v1141_v35 = vld [vmem:[%s1310_s7 + $0x70] ss:$8 sps:$4 sm:$0xff]  }
  0x32   : > { %719 = vmatpush1.bf16.msra.mxu0 %v1150_v22  ;;  %v1172_v36 = vld [vmem:[%s1310_s7 + $0x154] ss:$8 sps:$4 sm:$0xff]   ;;  %v1145_v37 = vld [vmem:[%s1310_s7 + $0x84] ss:$8 sps:$4 sm:$0xff]   ;;  %v1174_v38 = vld [vmem:[%s1310_s7 + $0x150] ss:$8 sps:$4 sm:$0xff]  }
  0x33   : > { %668 = vmatpush1.bf16.msra.mxu1 %v1126_v15  ;;  %720 = vmatprep.subr.bf16.mxu0 %v1154_v25  ;;  %v1147_v39 = vld [vmem:[%s1310_s7 + $0x80] ss:$8 sps:$4 sm:$0xff]   ;;  %v1178_v40 = vld [vmem:[%s1310_s7 + $0x164] ss:$8 sps:$4 sm:$0xff]   ;;  %v1151_v41 = vld [vmem:[%s1310_s7 + $0x94] ss:$8 sps:$4 sm:$0xff]  }
  0x34   : > { %669 = vmatprep.subr.bf16.mxu1 %v1127_v16  ;;  %v1153_v42 = vld [vmem:[%s1310_s7 + $0x90] ss:$8 sps:$4 sm:$0xff]   ;;  %v1180_v43 = vld [vmem:[%s1310_s7 + $0x160] ss:$8 sps:$4 sm:$0xff]   ;;  %v1184_v45 = vld [vmem:[%s1310_s7 + $0x174] ss:$8 sps:$4 sm:$0xff]  }
  0x35   : > { %v1193_v44 = vld [vmem:[%s1312_s8 + $0x4] ss:$12 sps:$4 sm:$0xff]   ;;  %v1190_v50 = vld [vmem:[%s1312_s8 + $0x8] ss:$12 sps:$4 sm:$0xff]   ;;  %v1194_v55 = vld [vmem:[%s1312_s8 + $0x20] ss:$12 sps:$4 sm:$0xff]  }
  0x36   : > { %721 = vmatpush1.bf16.msra.mxu0 %v1156_v26  ;;  %v1157_v46 = vld [vmem:[%s1310_s7 + $0xa4] ss:$8 sps:$4 sm:$0xff]   ;;  %695 = vmatprep.mubr.bf16.mxu1 %v1193_v44  ;;  %v1186_v47 = vld [vmem:[%s1310_s7 + $0x170] ss:$8 sps:$4 sm:$0xff]   ;;  %v1159_v48 = vld [vmem:[%s1310_s7 + $0xa0] ss:$8 sps:$4 sm:$0xff]  }
  0x37   : > { %670 = vmatpush1.bf16.msra.mxu1 %v1129_v17  ;;  %722 = vmatprep.subr.bf16.mxu0 %v1160_v28  ;;  %v1163_v49 = vld [vmem:[%s1310_s7 + $0xb4] ss:$8 sps:$4 sm:$0xff]   ;;  %v1165_v51 = vld [vmem:[%s1310_s7 + $0xb0] ss:$8 sps:$4 sm:$0xff]   ;;  %v1169_v52 = vld [vmem:[%s1310_s7 + $0xc4] ss:$8 sps:$4 sm:$0xff]  }
  0x38   : > { %671 = vmatprep.subr.bf16.mxu1 %v1130_v20  ;;  %v1171_v53 = vld [vmem:[%s1310_s7 + $0xc0] ss:$8 sps:$4 sm:$0xff]   ;;  %v1175_v54 = vld [vmem:[%s1310_s7 + $0xd4] ss:$8 sps:$4 sm:$0xff]   ;;  %v1177_v56 = vld [vmem:[%s1310_s7 + $0xd0] ss:$8 sps:$4 sm:$0xff]  }
  0x39   : > { %v1181_v57 = vld [vmem:[%s1310_s7 + $0xe4] ss:$8 sps:$4 sm:$0xff]   ;;  %v1183_v58 = vld [vmem:[%s1310_s7 + $0xe0] ss:$8 sps:$4 sm:$0xff]   ;;  %v1187_v59 = vld [vmem:[%s1310_s7 + $0xf4] ss:$8 sps:$4 sm:$0xff]  }
  0x3a   : > { %723 = vmatpush1.bf16.msra.mxu0 %v1162_v30  ;;  %v1189_v60 = vld [vmem:[%s1310_s7 + $0xf0] ss:$8 sps:$4 sm:$0xff]   ;;  %v327_v8 = vld [vmem:[#allocation2] sm:$0xff] }
  0x3b   : > { %672 = vmatpush1.bf16.msra.mxu1 %v1132_v23  ;;  %724 = vmatprep.subr.bf16.mxu0 %v1166_v32  ;;  %v1191_v61 = vld [vmem:[%s1312_s8] ss:$12 sps:$4 sm:$0xff]   ;;  %v1195_v62 = vld [vmem:[%s1312_s8 + $0x1c] ss:$12 sps:$4 sm:$0xff]   ;;  %v1197_v63 = vld [vmem:[%s1312_s8 + $0x18] ss:$12 sps:$4 sm:$0xff]  }
  0x3c   : > { %673 = vmatprep.subr.bf16.mxu1 %v1133_v24  ;;  %v329_v14 = vld [vmem:[#allocation2 + $0x10] sm:$0xff]  ;;  %v330_v18 = vld [vmem:[#allocation2 + $0x18] sm:$0xff]  ;;  %v331_v24 = vld [vmem:[#allocation2 + $0x20] sm:$0xff] }
  0x3d   : > { %v333_v30 = vld [vmem:[#allocation2 + $0x30] sm:$0xff] }
  0x3e   : > { %725 = vmatpush1.bf16.msra.mxu0 %v1168_v34  ;;  %v334_v34 = vld [vmem:[#allocation2 + $0x38] sm:$0xff] }
  0x3f   : > { %674 = vmatpush1.bf16.msra.mxu1 %v1135_v27  ;;  %726 = vmatprep.subr.bf16.mxu0 %v1172_v36  ;;  %v332_v27 = vld [vmem:[#allocation2 + $0x28] sm:$0xff] }
  0x40   : > { %675 = vmatprep.subr.bf16.mxu1 %v1136_v29 }
  0x42   : > { %727 = vmatpush1.bf16.msra.mxu0 %v1174_v38 }
  0x43   : > { %676 = vmatpush1.bf16.msra.mxu1 %v1138_v31  ;;  %728 = vmatprep.subr.bf16.mxu0 %v1178_v40  ;;  %v799_v40 = vlaneseq (!%p1051_p11) }
  0x44   : > { %677 = vmatprep.subr.bf16.mxu1 %v1139_v33 }
  0x46   : > { %729 = vmatpush1.bf16.msra.mxu0 %v1180_v43 }
  0x47   : > { %678 = vmatpush1.bf16.msra.mxu1 %v1141_v35  ;;  %730 = vmatprep.subr.bf16.mxu0 %v1184_v45 }
  0x48   : > { %679 = vmatprep.subr.bf16.mxu1 %v1145_v37 }
  0x4a   : > { %731 = vmatpush1.bf16.msra.mxu0 %v1186_v47 }
  0x4b   : > { %680 = vmatpush1.bf16.msra.mxu1 %v1147_v39 }
  0x4c   : > { %681 = vmatprep.subr.bf16.mxu1 %v1151_v41  ;;  %v800_v41 = vshrl.u32 (!%p1051_p11), %v799_v40, 7 }
  0x4d   : > { %749 = vmatmul.mubr.bf16.vlgmr.msra.gmra.mrb[0].mxu0 %v1190_v50 }
  0x4e   : > { %758 = vmatprep.mubr.bf16.mxu0 %v1239_v11  ;;  %v328_v11 = vld [vmem:[#allocation2 + $0x8] sm:$0xff]  ;;  %v801_v45 = vsub.s32 (!%p1051_p11), 0, %v800_v41 }
  0x4f   : > { %682 = vmatpush1.bf16.msra.mxu1 %v1153_v42  ;;  %v797_v42 = vld [vmem:[%s1404_s2] sm:$0x3] (!%p1051_p11) }
  0x50   : > { %683 = vmatprep.subr.bf16.mxu1 %v1157_v46  ;;  %v805_v46 = vsub.s32 (!%p1051_p11), 1, %v800_v41  ;;  %v802_v50 = vrot.slane (!%p1051_p11), %v797_v42, %v801_v45 }
  0x53   : > { %684 = vmatpush1.bf16.msra.mxu1 %v1159_v48 }
  0x54   : > { %685 = vmatprep.subr.bf16.mxu1 %v1163_v49 }
  0x55   : > { %759 = vmatmul.mubr.bf16.gmra.mrb[4].mxu0 %v1194_v55 }
  0x57   : > { %686 = vmatpush1.bf16.msra.mxu1 %v1165_v51  ;;  %v806_v51 = vrot.slane (!%p1051_p11), %v797_v42, %v805_v46 }
  0x58   : > { %687 = vmatprep.subr.bf16.mxu1 %v1169_v52 }
  0x5b   : > { %688 = vmatpush1.bf16.msra.mxu1 %v1171_v53 }
  0x5c   : > { %689 = vmatprep.subr.bf16.mxu1 %v1175_v54 }
  0x5f   : > { %690 = vmatpush1.bf16.msra.mxu1 %v1177_v56 }
  0x60   : > { %691 = vmatprep.subr.bf16.mxu1 %v1181_v57 }
  0x63   : > { %692 = vmatpush1.bf16.msra.mxu1 %v1183_v58 }
  0x64   : > { %693 = vmatprep.subr.bf16.mxu1 %v1187_v59 }
  0x67   : > { %694 = vmatpush1.bf16.msra.mxu1 %v1189_v60 }
  0x6a   : > { %696 = vmatmul.mubr.bf16.vlgmr.msra.gmra.mrb[0].mxu1 %v1191_v61 }
  0x6b   : > { %705 = vmatprep.mubr.bf16.mxu1 %v1195_v62 }
  0x72   : > { %706 = vmatmul.mubr.bf16.gmra.mrb[4].mxu1 %v1197_v63 }
 0x120   : > { %v750_v0 = vpop.f32.mrb[0].mxu0 }
 0x121   : > { %v752_v1 = vpop.f32.mrb[1].mxu0 }
 0x122   : > { %v754_v2 = vpop.f32.mrb[2].mxu0 }
 0x123   : > { %v756_v3 = vpop.f32.mrb[3].mxu0 }
 0x128   : > { %v760_v4 = vpop.f32.mrb[4].mxu0 }
 0x129   : > { %v762_v5 = vpop.f32.mrb[5].mxu0 }
 0x12a   : > { %v764_v6 = vpop.f32.mrb[6].mxu0 }
 0x12b   : > { %v766_v7 = vpop.f32.mrb[7].mxu0 }
 0x13d   : > { %v697_v9 = vpop.f32.mrb[0].mxu1 }
 0x13e   : > { %v751_v10 = vadd.f32 %v750_v0, %v697_v9  ;;  %v699_v12 = vpop.f32.mrb[1].mxu1 }
 0x13f   : > { %v753_v13 = vadd.f32 %v752_v1, %v699_v12  ;;  %v701_v15 = vpop.f32.mrb[2].mxu1 }
 0x140   : > { %v769_v16 = vadd.f32 %v751_v10, %v327_v8  ;;  %v755_v17 = vadd.f32 %v754_v2, %v701_v15  ;;  %v703_v19 = vpop.f32.mrb[3].mxu1 }
 0x141   : > { %v770_v20 = vadd.f32 %v753_v13, %v328_v11  ;;  %v757_v21 = vadd.f32 %v756_v3, %v703_v19 }
 0x142   : > { %777 = vst [vmem:[#allocation2] sm:$0xff] %v769_v16  ;;  %v771_v22 = vadd.f32 %v755_v17, %v329_v14 }
 0x143   : > { %778 = vst [vmem:[#allocation2 + $0x8] sm:$0xff] %v770_v20  ;;  %v772_v23 = vadd.f32 %v757_v21, %v330_v18 }
 0x144   : > { %779 = vst [vmem:[#allocation2 + $0x10] sm:$0xff] %v771_v22 }
 0x145   : > { %780 = vst [vmem:[#allocation2 + $0x18] sm:$0xff] %v772_v23  ;;  %v707_v25 = vpop.f32.mrb[4].mxu1 }
 0x146   : > { %v761_v26 = vadd.f32 %v760_v4, %v707_v25  ;;  %v709_v28 = vpop.f32.mrb[5].mxu1 }
 0x147   : > { %v763_v29 = vadd.f32 %v762_v5, %v709_v28  ;;  %v711_v31 = vpop.f32.mrb[6].mxu1  ;;  %788 = sbr.rel (%p1051_p11) target bundleno = 348 (0x15c), region = 66 }
 0x148   : > { %v773_v32 = vadd.f32 %v761_v26, %v331_v24  ;;  %v765_v33 = vadd.f32 %v764_v6, %v711_v31  ;;  %v713_v35 = vpop.f32.mrb[7].mxu1 }
 0x149   : > { %v774_v36 = vadd.f32 %v763_v29, %v332_v27  ;;  %v767_v37 = vadd.f32 %v766_v7, %v713_v35  ;;  %v789_v43 = vld [vmem:[#allocation2] sm:$0xff] (!%p1051_p11) }
 0x14a   : > { %781 = vst [vmem:[#allocation2 + $0x20] sm:$0xff] %v773_v32  ;;  %v775_v38 = vadd.f32 %v765_v33, %v333_v30  ;;  %v790_v44 = vld [vmem:[#allocation2 + $0x8] sm:$0xff] (!%p1051_p11)  ;;  %v809_v55 = vadd.f32 (!%p1051_p11), %v802_v50, %v789_v43 }
 0x14b   : > { %782 = vst [vmem:[#allocation2 + $0x28] sm:$0xff] %v774_v36  ;;  %v776_v39 = vadd.f32 %v767_v37, %v334_v34  ;;  %v791_v47 = vld [vmem:[#allocation2 + $0x10] sm:$0xff] (!%p1051_p11)  ;;  %v810_v56 = vadd.f32 (!%p1051_p11), %v806_v51, %v790_v44 }
 0x14c   : > { %783 = vst [vmem:[#allocation2 + $0x30] sm:$0xff] %v775_v38  ;;  %v792_v48 = vld [vmem:[#allocation2 + $0x18] sm:$0xff] (!%p1051_p11)  ;;  %v811_v57 = vadd.f32 (!%p1051_p11), %v802_v50, %v791_v47  ;;  %v817_v63 = vmax.f32 (!%p1051_p11), %v809_v55, 0.0 }
 0x14d   : > { %784 = vst [vmem:[#allocation2 + $0x38] sm:$0xff] %v776_v39  ;;  %v812_v58 = vadd.f32 (!%p1051_p11), %v806_v51, %v792_v48  ;;  %v818_v0 = vmax.f32 (!%p1051_p11), %v810_v56, 0.0 }
 0x14e   : > { %v819_v1 = vmax.f32 %v811_v57, 0.0 }
 0x14f   : > { %v820_v2 = vmax.f32 %v812_v58, 0.0  ;;  %v1062_v7 = vpack.c.bf16 %v818_v0, %v817_v63 }
 0x151   : > { %v793_v49 = vld [vmem:[#allocation2 + $0x20] sm:$0xff]  ;;  %v1063_v8 = vpack.c.bf16 %v820_v2, %v819_v1  ;;  %849 = vst [vmem:[%s1405_s3] sm:$0xff] %v1062_v7 }
 0x152   : > { %v794_v52 = vld [vmem:[#allocation2 + $0x28] sm:$0xff]  ;;  %v813_v59 = vadd.f32 %v802_v50, %v793_v49 }
 0x153   : > { %v795_v53 = vld [vmem:[#allocation2 + $0x30] sm:$0xff]  ;;  %v814_v60 = vadd.f32 %v806_v51, %v794_v52  ;;  %850 = vst [vmem:[%s1405_s3 + $0x8] sm:$0xff] %v1063_v8 }
 0x154   : > { %v796_v54 = vld [vmem:[#allocation2 + $0x38] sm:$0xff]  ;;  %v815_v61 = vadd.f32 %v802_v50, %v795_v53  ;;  %v821_v3 = vmax.f32 %v813_v59, 0.0 }
 0x155   : > { %v816_v62 = vadd.f32 %v806_v51, %v796_v54  ;;  %v822_v4 = vmax.f32 %v814_v60, 0.0 }
 0x156   : > { %v823_v5 = vmax.f32 %v815_v61, 0.0 }
 0x157   : > { %v824_v6 = vmax.f32 %v816_v62, 0.0  ;;  %v1064_v9 = vpack.c.bf16 %v822_v4, %v821_v3 }
 0x159   : > { %v1065_v10 = vpack.c.bf16 %v824_v6, %v823_v5  ;;  %851 = vst [vmem:[%s1405_s3 + $0x10] sm:$0xff] %v1064_v9 }
 0x15b   : > { %852 = vst [vmem:[%s1405_s3 + $0x18] sm:$0xff] %v1065_v10 }
 0x15c PF: > { %s13_s16 = sadd.s32 1, %s1236_s16   ;;  %s1406_s12 = smov %s1224_s13 }
 0x15d   : > { %p10_p12 = scmp.ge.s32.totalorder %s13_s16, 5   ;;  %s1407_s13 = smov %s1295_s20 }
 0x15e   : > { %s1408_s14 = smov %s1232_s15  ;;  %s1409_s15 = smov %s1411_s17 }
 0x15f   :  { %12 = sbr.rel (!%p10_p12) target bundleno = 3 (0x3), region = 113 }

// kernel: resnet34_forward.56
= control target key start
LH: loop header
LB: loop body
LE: loop exit
PB: predicated region body
PF: predicated region fallthrough
CT: control target
= control target key end

     0   :  { %v348_v1 = vmov 0   ;;  %v229_v19 = vlaneseq  ;;  %s438_s1 = inlined_call_operand.vmem [shape: bf16[128,256], index: 1, kind: input, shape index: {}]   ;;  %s439_s0 = inlined_call_operand.vmem [shape: bf16[32,128], index: 0, kind: input, shape index: {}]   ;;  %s440_s2 = inlined_call_operand.vmem [shape: f32[1,256], index: 2, kind: input, shape index: {}]   ;;  %s441_s3 = inlined_call_operand.vmem [shape: bf16[32,256], index: 3, kind: output, shape index: {}]  }
   0x1   :  { %v322_v0 = vld [vmem:[%s438_s1 + $0x4] ss:$8 sps:$4 sm:$0xff]   ;;  %179 = vmatprep.mubr.bf16.mxu0 %v348_v1  ;;  %189 = vmatprep.mubr.bf16.mxu1 %v348_v1  ;;  %v324_v2 = vld [vmem:[%s438_s1] ss:$8 sps:$4 sm:$0xff]   ;;  %v325_v3 = vld [vmem:[%s438_s1 + $0x14] ss:$8 sps:$4 sm:$0xff]  }
   0x2   :  { %147 = vmatprep.subr.bf16.mxu0 %v322_v0  ;;  %305 = vmatprep.subr.bf16.mxu1 %v322_v0  ;;  %v327_v4 = vld [vmem:[%s438_s1 + $0x10] ss:$8 sps:$4 sm:$0xff]   ;;  %v328_v5 = vld [vmem:[%s438_s1 + $0x24] ss:$8 sps:$4 sm:$0xff]   ;;  %v330_v6 = vld [vmem:[%s438_s1 + $0x20] ss:$8 sps:$4 sm:$0xff]  }
   0x3   :  { %148 = vmatpush1.bf16.msra.mxu0 %v324_v2  ;;  %313 = vmatpush1.bf16.msra.mxu1 %v324_v2  ;;  %v331_v7 = vld [vmem:[%s438_s1 + $0x34] ss:$8 sps:$4 sm:$0xff]   ;;  %v333_v8 = vld [vmem:[%s438_s1 + $0x30] ss:$8 sps:$4 sm:$0xff]   ;;  %v334_v9 = vld [vmem:[%s438_s1 + $0x44] ss:$8 sps:$4 sm:$0xff]  }
   0x4   :  { %149 = vmatprep.subr.bf16.mxu0 %v325_v3  ;;  %306 = vmatprep.subr.bf16.mxu1 %v325_v3  ;;  %v336_v10 = vld [vmem:[%s438_s1 + $0x40] ss:$8 sps:$4 sm:$0xff]   ;;  %v337_v11 = vld [vmem:[%s438_s1 + $0x54] ss:$8 sps:$4 sm:$0xff]   ;;  %v339_v12 = vld [vmem:[%s438_s1 + $0x50] ss:$8 sps:$4 sm:$0xff]  }
   0x5   :  { %v340_v13 = vld [vmem:[%s438_s1 + $0x64] ss:$8 sps:$4 sm:$0xff]   ;;  %v342_v14 = vld [vmem:[%s438_s1 + $0x60] ss:$8 sps:$4 sm:$0xff]   ;;  %v343_v15 = vld [vmem:[%s438_s1 + $0x74] ss:$8 sps:$4 sm:$0xff]  }
   0x6   :  { %v345_v16 = vld [vmem:[%s438_s1 + $0x70] ss:$8 sps:$4 sm:$0xff]   ;;  %v346_v17 = vld [vmem:[%s439_s0] sm:$0xff]   ;;  %v347_v18 = vld [vmem:[%s439_s0 + $0x8] sm:$0xff]   ;;  %v230_v20 = vshrl.u32 %v229_v19, 7 }
   0x7   :  { %150 = vmatpush1.bf16.msra.mxu0 %v327_v4  ;;  %314 = vmatpush1.bf16.msra.mxu1 %v327_v4  ;;  %v227_v22 = vld [vmem:[%s440_s2] sm:$0x3] }
   0x8   :  { %151 = vmatprep.subr.bf16.mxu0 %v328_v5  ;;  %307 = vmatprep.subr.bf16.mxu1 %v328_v5  ;;  %v231_v21 = vsub.s32 0, %v230_v20  ;;  %v235_v23 = vsub.s32 1, %v230_v20 }
   0xa   :  { %v232_v24 = vrot.slane %v227_v22, %v231_v21  ;;  %v236_v25 = vrot.slane %v227_v22, %v235_v23 }
   0xb   :  { %152 = vmatpush1.bf16.msra.mxu0 %v330_v6  ;;  %315 = vmatpush1.bf16.msra.mxu1 %v330_v6 }
   0xc   :  { %153 = vmatprep.subr.bf16.mxu0 %v331_v7  ;;  %308 = vmatprep.subr.bf16.mxu1 %v331_v7 }
   0xf   :  { %154 = vmatpush1.bf16.msra.mxu0 %v333_v8  ;;  %316 = vmatpush1.bf16.msra.mxu1 %v333_v8 }
  0x10   :  { %155 = vmatprep.subr.bf16.mxu0 %v334_v9  ;;  %309 = vmatprep.subr.bf16.mxu1 %v334_v9 }
  0x13   :  { %156 = vmatpush1.bf16.msra.mxu0 %v336_v10  ;;  %317 = vmatpush1.bf16.msra.mxu1 %v336_v10 }
  0x14   :  { %157 = vmatprep.subr.bf16.mxu0 %v337_v11  ;;  %310 = vmatprep.subr.bf16.mxu1 %v337_v11 }
  0x17   :  { %158 = vmatpush1.bf16.msra.mxu0 %v339_v12  ;;  %318 = vmatpush1.bf16.msra.mxu1 %v339_v12 }
  0x18   :  { %159 = vmatprep.subr.bf16.mxu0 %v340_v13  ;;  %311 = vmatprep.subr.bf16.mxu1 %v340_v13 }
  0x1b   :  { %160 = vmatpush1.bf16.msra.mxu0 %v342_v14  ;;  %319 = vmatpush1.bf16.msra.mxu1 %v342_v14 }
  0x1c   :  { %161 = vmatprep.subr.bf16.mxu0 %v343_v15  ;;  %312 = vmatprep.subr.bf16.mxu1 %v343_v15 }
  0x1f   :  { %162 = vmatpush1.bf16.msra.mxu0 %v345_v16  ;;  %320 = vmatpush1.bf16.msra.mxu1 %v345_v16 }
  0x22   :  { %180 = vmatmul.mubr.bf16.vlgmr.msra.gmra.mrb[0].mxu0 %v346_v17  ;;  %190 = vmatmul.mubr.bf16.vlgmr.msra.gmra.mrb[0].mxu1 %v347_v18 }
  0xf5   :  { %v181_v26 = vpop.f32.mrb[0].mxu0  ;;  %v191_v27 = vpop.f32.mrb[0].mxu1 }
  0xf6   :  { %v239_v28 = vadd.f32 %v232_v24, %v181_v26  ;;  %v243_v29 = vadd.f32 %v232_v24, %v191_v27  ;;  %v183_v30 = vpop.f32.mrb[1].mxu0  ;;  %v193_v31 = vpop.f32.mrb[1].mxu1 }
  0xf7   :  { %v240_v32 = vadd.f32 %v236_v25, %v183_v30  ;;  %v244_v33 = vadd.f32 %v236_v25, %v193_v31  ;;  %v185_v34 = vpop.f32.mrb[2].mxu0  ;;  %v195_v35 = vpop.f32.mrb[2].mxu1 }
  0xf8   :  { %v241_v36 = vadd.f32 %v232_v24, %v185_v34  ;;  %v245_v37 = vadd.f32 %v232_v24, %v195_v35  ;;  %v187_v38 = vpop.f32.mrb[3].mxu0  ;;  %v197_v39 = vpop.f32.mrb[3].mxu1 }
  0xf9   :  { %v301_v40 = vpack.c.bf16 %v240_v32, %v239_v28  ;;  %v303_v41 = vpack.c.bf16 %v244_v33, %v243_v29  ;;  %v242_v42 = vadd.f32 %v236_v25, %v187_v38  ;;  %v246_v43 = vadd.f32 %v236_v25, %v197_v39 }
  0xfb   :  { %271 = vst [vmem:[%s441_s3] sm:$0xff] %v301_v40  ;;  %273 = vst [vmem:[%s441_s3 + $0x10] sm:$0xff] %v303_v41  ;;  %v302_v44 = vpack.c.bf16 %v242_v42, %v241_v36  ;;  %v304_v45 = vpack.c.bf16 %v246_v43, %v245_v37 }
  0xfd   :  { %272 = vst [vmem:[%s441_s3 + $0x8] sm:$0xff] %v302_v44  ;;  %274 = vst [vmem:[%s441_s3 + $0x18] sm:$0xff] %v304_v45 }

// kernel: resnet34_forward.58
= control target key start
LH: loop header
LB: loop body
LE: loop exit
PB: predicated region body
PF: predicated region fallthrough
CT: control target
= control target key end

     0   :  { %s1375_s15 = smov 0   ;;  %s1377_s16 = smov 0   ;;  %s1529_s0 = inlined_call_operand.vmem [shape: bf16[32,2304], index: 0, kind: input, shape index: {}]   ;;  %s1530_s1 = inlined_call_operand.vmem [shape: bf16[2304,256], index: 1, kind: input, shape index: {}]   ;;  %s1531_s2 = inlined_call_operand.vmem [shape: f32[1,256], index: 2, kind: input, shape index: {}]   ;;  %s1532_s3 = inlined_call_operand.vmem [shape: bf16[32,256], index: 3, kind: input, shape index: {}]   ;;  %s1533_s4 = inlined_call_operand.vmem [shape: bf16[32,256], index: 4, kind: output, shape index: {}]  }
   0x1   :  { %s1379_s17 = smov 0   ;;  %s1381_s18 = smov 0  }
   0x2   :  { %s1383_s19 = smov 0  }
   0x3 LB: > { %s26_s20 = sadd.s32 1, %s1342_s18  ;;  %p49_p1 = scmp.ne.s32.totalorder %s1334_s16, %s1330_s15  ;;  %s1346_s19 = sphi %s1383_s19, %s14_s19   ;;  %s1342_s18 = sphi %s1381_s18, %s1537_s18   ;;  %s1338_s17 = sphi %s1379_s17, %s1536_s17   ;;  %s1334_s16 = sphi %s1377_s16, %s1535_s16   ;;  %s1330_s15 = sphi %s1375_s15, %s1534_s15  }
   0x4   : > { %p27_p0 = scmp.ge.s32.totalorder %s26_s20, 6  ;;  %p50_p2 = scmp.eq.s32.totalorder %s1346_s19, 0 }
   0x5   : > { %s42_s22 = sadd.s32 1, %s1334_s16  ;;  %p1093_p5 = scmp.ge.s32.totalorder %s1346_s19, 6 }
   0x6   : > { %s1539_s20 = smov (%p27_p0, %s26_s20), 0  ;;  %p51_p3 = por %p50_p2, %p49_p1 }
   0x7   : > { %s38_s21 = ssub.s32 %s1342_s18, %s1539_s20  ;;  %208 = sbr.rel (%p1093_p5) target bundleno = 23 (0x17), region = 24 }
   0x8   : > { %p40_p4 = scmp.eq.s32.totalorder %s38_s21, 0 }
   0xa   : > { %s1410_s23 = scalar_select %p40_p4, %s1334_s16, %s42_s22  }
   0xe   : > { %211 = sbr.rel (!%p51_p3) target bundleno = 23 (0x17), region = 28  ;;  %s213_s24 = sand.u32 (%p51_p3), 1, %s1334_s16  }
   0xf   : > { %s1170_s25 = smul.u32 (%p51_p3), 12, %s1342_s18 }
  0x10   : > { %s1184_s26 = smul.u32 (%p51_p3), 48, %s213_s24 }
  0x11   : > { %s221_s29 = scalar_lea.vmem (%p51_p3), %s1529_s0, %s1170_s25 }
  0x12   : > { %v236_v0 = vld [vmem:[%s221_s29] sm:$0xff] (%p51_p3)  ;;  %v238_v1 = vld [vmem:[%s221_s29 + $0x48] sm:$0xff] (%p51_p3)  ;;  %v240_v2 = vld [vmem:[%s221_s29 + $0x90] sm:$0xff] (%p51_p3)  ;;  %s215_s30 = scalar_lea.vmem (%p51_p3), [#allocation3], %s1184_s26 }
  0x13   : > { %237 = vst [vmem:[%s215_s30] sm:$0xff] (%p51_p3), %v236_v0  ;;  %239 = vst [vmem:[%s215_s30 + $0xc] sm:$0xff] (%p51_p3), %v238_v1  ;;  %v242_v3 = vld [vmem:[%s221_s29 + $0xd8] sm:$0xff] (%p51_p3)  ;;  %v1095_v4 = vld [vmem:[%s221_s29 + $0x8] sm:$0xf] (%p51_p3) }
  0x14   : > { %241 = vst [vmem:[%s215_s30 + $0x18] sm:$0xff] (%p51_p3), %v240_v2  ;;  %v1097_v5 = vld [vmem:[%s221_s29 + $0x50] sm:$0xf] (%p51_p3)  ;;  %243 = vst [vmem:[%s215_s30 + $0x24] sm:$0xff] (%p51_p3), %v242_v3  ;;  %v1099_v6 = vld [vmem:[%s221_s29 + $0x98] sm:$0xf] (%p51_p3) }
  0x15   : > { %1096 = vst [vmem:[%s215_s30 + $0x8] sm:$0xf] %v1095_v4  ;;  %1098 = vst [vmem:[%s215_s30 + $0x14] sm:$0xf] %v1097_v5  ;;  %v1101_v7 = vld [vmem:[%s221_s29 + $0xe0] sm:$0xf] }
  0x16   : > { %1100 = vst [vmem:[%s215_s30 + $0x20] sm:$0xf] %v1099_v6  ;;  %1102 = vst [vmem:[%s215_s30 + $0x2c] sm:$0xf] %v1101_v7 }
  0x17 PF: > { %p1103_p6 = scmp.ge.s32.totalorder %s1346_s19, 1  ;;  %p278_p7 = scmp.lt.s32.totalorder %s1346_s19, 7 }
  0x19   : > { %p279_p8 = pnand %p1103_p6, %p278_p7 }
  0x1a   : > { %s285_s5 = sand.u32 (!%p279_p8), 1, %s1330_s15   ;;  %s341_s6 = smul.u32 (!%p279_p8), 48, %s1338_s17 }
  0x1b   : > { %282 = sbr.rel (%p279_p8) target bundleno = 350 (0x15e), region = 58  ;;  %p1106_p10 = scmp.ne.s32.totalorder (!%p279_p8), %s1338_s17, 0 }
  0x1c   : > { %s1185_s7 = smul.u32 (!%p279_p8), 48, %s285_s5  ;;  %p343_p9 = scmp.lt.s32.totalorder (!%p279_p8), %s341_s6, 287 }
  0x1e   : > { %s1427_s12 = scalar_lea.vmem (!%p279_p8), [#allocation3], %s1185_s7 }
  0x22   : > { %s1541_s6 = smov (!%p343_p9, %s341_s6), 287  ;;  %386 = sbr.rel (%p1106_p10) target bundleno = 41 (0x29), region = 66 }
  0x23   : > { %s1171_s8 = sshll.u32 %s1541_s6, 3  ;;  %v1348_v8 = vmov (!%p1106_p10), 0.0  }
  0x24   : > { %s1425_s11 = scalar_lea.vmem %s1530_s1, %s1171_s8  ;;  %387 = vst [vmem:[#allocation2] sm:$0xff] (!%p1106_p10), %v1348_v8  ;;  %388 = vst [vmem:[#allocation2 + $0x8] sm:$0xff] (!%p1106_p10), %v1348_v8 }
  0x25   : > { %389 = vst [vmem:[#allocation2 + $0x10] sm:$0xff] (!%p1106_p10), %v1348_v8  ;;  %390 = vst [vmem:[#allocation2 + $0x18] sm:$0xff] (!%p1106_p10), %v1348_v8 }
  0x26   : > { %391 = vst [vmem:[#allocation2 + $0x20] sm:$0xff] (!%p1106_p10), %v1348_v8  ;;  %392 = vst [vmem:[#allocation2 + $0x28] sm:$0xff] (!%p1106_p10), %v1348_v8 }
  0x27   : > { %393 = vst [vmem:[#allocation2 + $0x30] sm:$0xff] (!%p1106_p10), %v1348_v8  ;;  %394 = vst [vmem:[#allocation2 + $0x38] sm:$0xff] (!%p1106_p10), %v1348_v8 }
  0x29 PF: > { %v1228_v9 = vld [vmem:[%s1425_s11 + $0x4] ss:$8 sps:$4 sm:$0xff]   ;;  %v1230_v10 = vld [vmem:[%s1425_s11] ss:$8 sps:$4 sm:$0xff]   ;;  %v1349_v11 = vmov 0   ;;  %p1161_p11 = scmp.ne.s32.totalorder %s1338_s17, 5 }
  0x2a   : > { %816 = vmatprep.mubr.bf16.mxu0 %v1349_v11  ;;  %731 = vmatprep.subr.bf16.mxu1 %v1228_v9  ;;  %v1231_v12 = vld [vmem:[%s1425_s11 + $0x14] ss:$8 sps:$4 sm:$0xff]   ;;  %v1233_v13 = vld [vmem:[%s1425_s11 + $0x10] ss:$8 sps:$4 sm:$0xff]   ;;  %v1234_v14 = vld [vmem:[%s1425_s11 + $0x24] ss:$8 sps:$4 sm:$0xff]  }
  0x2b   : > { %732 = vmatpush1.bf16.msra.mxu1 %v1230_v10  ;;  %v1236_v15 = vld [vmem:[%s1425_s11 + $0x20] ss:$8 sps:$4 sm:$0xff]   ;;  %v1237_v16 = vld [vmem:[%s1425_s11 + $0x34] ss:$8 sps:$4 sm:$0xff]   ;;  %v1239_v17 = vld [vmem:[%s1425_s11 + $0x30] ss:$8 sps:$4 sm:$0xff]  }
  0x2c   : > { %733 = vmatprep.subr.bf16.mxu1 %v1231_v12  ;;  %v1252_v18 = vld [vmem:[%s1425_s11 + $0x104] ss:$8 sps:$4 sm:$0xff]   ;;  %v1254_v19 = vld [vmem:[%s1425_s11 + $0x100] ss:$8 sps:$4 sm:$0xff]   ;;  %v1258_v21 = vld [vmem:[%s1425_s11 + $0x114] ss:$8 sps:$4 sm:$0xff]  }
  0x2d   : > { %v1240_v20 = vld [vmem:[%s1425_s11 + $0x44] ss:$8 sps:$4 sm:$0xff]   ;;  %784 = vmatprep.subr.bf16.mxu0 %v1252_v18  ;;  %v1260_v22 = vld [vmem:[%s1425_s11 + $0x110] ss:$8 sps:$4 sm:$0xff]   ;;  %v1242_v23 = vld [vmem:[%s1425_s11 + $0x40] ss:$8 sps:$4 sm:$0xff]  }
  0x2e   : > { %785 = vmatpush1.bf16.msra.mxu0 %v1254_v19  ;;  %v1243_v24 = vld [vmem:[%s1425_s11 + $0x54] ss:$8 sps:$4 sm:$0xff]   ;;  %v1264_v25 = vld [vmem:[%s1425_s11 + $0x124] ss:$8 sps:$4 sm:$0xff]   ;;  %v1266_v26 = vld [vmem:[%s1425_s11 + $0x120] ss:$8 sps:$4 sm:$0xff]  }
  0x2f   : > { %734 = vmatpush1.bf16.msra.mxu1 %v1233_v13  ;;  %786 = vmatprep.subr.bf16.mxu0 %v1258_v21  ;;  %v1245_v27 = vld [vmem:[%s1425_s11 + $0x50] ss:$8 sps:$4 sm:$0xff]   ;;  %v1270_v28 = vld [vmem:[%s1425_s11 + $0x134] ss:$8 sps:$4 sm:$0xff]   ;;  %v1246_v29 = vld [vmem:[%s1425_s11 + $0x64] ss:$8 sps:$4 sm:$0xff]  }
  0x30   : > { %735 = vmatprep.subr.bf16.mxu1 %v1234_v14  ;;  %v1272_v30 = vld [vmem:[%s1425_s11 + $0x130] ss:$8 sps:$4 sm:$0xff]   ;;  %v1248_v31 = vld [vmem:[%s1425_s11 + $0x60] ss:$8 sps:$4 sm:$0xff]   ;;  %v1276_v32 = vld [vmem:[%s1425_s11 + $0x144] ss:$8 sps:$4 sm:$0xff]  }
  0x31   : > { %v1249_v33 = vld [vmem:[%s1425_s11 + $0x74] ss:$8 sps:$4 sm:$0xff]   ;;  %v1278_v34 = vld [vmem:[%s1425_s11 + $0x140] ss:$8 sps:$4 sm:$0xff]   ;;  %v1251_v35 = vld [vmem:[%s1425_s11 + $0x70] ss:$8 sps:$4 sm:$0xff]  }
  0x32   : > { %787 = vmatpush1.bf16.msra.mxu0 %v1260_v22  ;;  %v1282_v36 = vld [vmem:[%s1425_s11 + $0x154] ss:$8 sps:$4 sm:$0xff]   ;;  %v1255_v37 = vld [vmem:[%s1425_s11 + $0x84] ss:$8 sps:$4 sm:$0xff]   ;;  %v1284_v38 = vld [vmem:[%s1425_s11 + $0x150] ss:$8 sps:$4 sm:$0xff]  }
  0x33   : > { %736 = vmatpush1.bf16.msra.mxu1 %v1236_v15  ;;  %788 = vmatprep.subr.bf16.mxu0 %v1264_v25  ;;  %v1257_v39 = vld [vmem:[%s1425_s11 + $0x80] ss:$8 sps:$4 sm:$0xff]   ;;  %v1288_v40 = vld [vmem:[%s1425_s11 + $0x164] ss:$8 sps:$4 sm:$0xff]   ;;  %v1261_v41 = vld [vmem:[%s1425_s11 + $0x94] ss:$8 sps:$4 sm:$0xff]  }
  0x34   : > { %737 = vmatprep.subr.bf16.mxu1 %v1237_v16  ;;  %v1263_v42 = vld [vmem:[%s1425_s11 + $0x90] ss:$8 sps:$4 sm:$0xff]   ;;  %v1290_v43 = vld [vmem:[%s1425_s11 + $0x160] ss:$8 sps:$4 sm:$0xff]   ;;  %v1294_v45 = vld [vmem:[%s1425_s11 + $0x174] ss:$8 sps:$4 sm:$0xff]  }
  0x35   : > { %v1303_v44 = vld [vmem:[%s1427_s12 + $0x4] ss:$12 sps:$4 sm:$0xff]   ;;  %v1300_v50 = vld [vmem:[%s1427_s12 + $0x8] ss:$12 sps:$4 sm:$0xff]   ;;  %v1304_v55 = vld [vmem:[%s1427_s12 + $0x20] ss:$12 sps:$4 sm:$0xff]  }
  0x36   : > { %789 = vmatpush1.bf16.msra.mxu0 %v1266_v26  ;;  %v1267_v46 = vld [vmem:[%s1425_s11 + $0xa4] ss:$8 sps:$4 sm:$0xff]   ;;  %763 = vmatprep.mubr.bf16.mxu1 %v1303_v44  ;;  %v1296_v47 = vld [vmem:[%s1425_s11 + $0x170] ss:$8 sps:$4 sm:$0xff]   ;;  %v1269_v48 = vld [vmem:[%s1425_s11 + $0xa0] ss:$8 sps:$4 sm:$0xff]  }
  0x37   : > { %738 = vmatpush1.bf16.msra.mxu1 %v1239_v17  ;;  %790 = vmatprep.subr.bf16.mxu0 %v1270_v28  ;;  %v1273_v49 = vld [vmem:[%s1425_s11 + $0xb4] ss:$8 sps:$4 sm:$0xff]   ;;  %v1275_v51 = vld [vmem:[%s1425_s11 + $0xb0] ss:$8 sps:$4 sm:$0xff]   ;;  %v1279_v52 = vld [vmem:[%s1425_s11 + $0xc4] ss:$8 sps:$4 sm:$0xff]  }
  0x38   : > { %739 = vmatprep.subr.bf16.mxu1 %v1240_v20  ;;  %v1281_v53 = vld [vmem:[%s1425_s11 + $0xc0] ss:$8 sps:$4 sm:$0xff]   ;;  %v1285_v54 = vld [vmem:[%s1425_s11 + $0xd4] ss:$8 sps:$4 sm:$0xff]   ;;  %v1287_v56 = vld [vmem:[%s1425_s11 + $0xd0] ss:$8 sps:$4 sm:$0xff]  }
  0x39   : > { %v1291_v57 = vld [vmem:[%s1425_s11 + $0xe4] ss:$8 sps:$4 sm:$0xff]   ;;  %v1293_v58 = vld [vmem:[%s1425_s11 + $0xe0] ss:$8 sps:$4 sm:$0xff]   ;;  %v1297_v59 = vld [vmem:[%s1425_s11 + $0xf4] ss:$8 sps:$4 sm:$0xff]  }
  0x3a   : > { %791 = vmatpush1.bf16.msra.mxu0 %v1272_v30  ;;  %v1299_v60 = vld [vmem:[%s1425_s11 + $0xf0] ss:$8 sps:$4 sm:$0xff]   ;;  %v395_v8 = vld [vmem:[#allocation2] sm:$0xff] }
  0x3b   : > { %740 = vmatpush1.bf16.msra.mxu1 %v1242_v23  ;;  %792 = vmatprep.subr.bf16.mxu0 %v1276_v32  ;;  %v1301_v61 = vld [vmem:[%s1427_s12] ss:$12 sps:$4 sm:$0xff]   ;;  %v1305_v62 = vld [vmem:[%s1427_s12 + $0x1c] ss:$12 sps:$4 sm:$0xff]   ;;  %v1307_v63 = vld [vmem:[%s1427_s12 + $0x18] ss:$12 sps:$4 sm:$0xff]  }
  0x3c   : > { %741 = vmatprep.subr.bf16.mxu1 %v1243_v24  ;;  %v397_v14 = vld [vmem:[#allocation2 + $0x10] sm:$0xff]  ;;  %v398_v18 = vld [vmem:[#allocation2 + $0x18] sm:$0xff]  ;;  %v399_v24 = vld [vmem:[#allocation2 + $0x20] sm:$0xff] }
  0x3d   : > { %v401_v30 = vld [vmem:[#allocation2 + $0x30] sm:$0xff]  ;;  %v865_v44 = vld [vmem:[%s1531_s2] sm:$0x3] (!%p1161_p11) }
  0x3e   : > { %793 = vmatpush1.bf16.msra.mxu0 %v1278_v34  ;;  %v402_v34 = vld [vmem:[#allocation2 + $0x38] sm:$0xff] }
  0x3f   : > { %742 = vmatpush1.bf16.msra.mxu1 %v1245_v27  ;;  %794 = vmatprep.subr.bf16.mxu0 %v1282_v36  ;;  %v400_v27 = vld [vmem:[#allocation2 + $0x28] sm:$0xff] }
  0x40   : > { %743 = vmatprep.subr.bf16.mxu1 %v1246_v29 }
  0x42   : > { %795 = vmatpush1.bf16.msra.mxu0 %v1284_v38 }
  0x43   : > { %744 = vmatpush1.bf16.msra.mxu1 %v1248_v31  ;;  %796 = vmatprep.subr.bf16.mxu0 %v1288_v40  ;;  %v867_v40 = vlaneseq (!%p1161_p11) }
  0x44   : > { %745 = vmatprep.subr.bf16.mxu1 %v1249_v33 }
  0x46   : > { %797 = vmatpush1.bf16.msra.mxu0 %v1290_v43 }
  0x47   : > { %746 = vmatpush1.bf16.msra.mxu1 %v1251_v35  ;;  %798 = vmatprep.subr.bf16.mxu0 %v1294_v45  ;;  %v886_v45 = vld [vmem:[%s1532_s3 + $0x8] sm:$0xff] (!%p1161_p11) }
  0x48   : > { %747 = vmatprep.subr.bf16.mxu1 %v1255_v37 }
  0x4a   : > { %799 = vmatpush1.bf16.msra.mxu0 %v1296_v47 }
  0x4b   : > { %748 = vmatpush1.bf16.msra.mxu1 %v1257_v39 }
  0x4c   : > { %749 = vmatprep.subr.bf16.mxu1 %v1261_v41  ;;  %v868_v41 = vshrl.u32 (!%p1161_p11), %v867_v40, 7 }
  0x4d   : > { %817 = vmatmul.mubr.bf16.vlgmr.msra.gmra.mrb[0].mxu0 %v1300_v50  ;;  %v888_v50 = vld [vmem:[%s1532_s3 + $0x18] sm:$0xff] (!%p1161_p11) }
  0x4e   : > { %826 = vmatprep.mubr.bf16.mxu0 %v1349_v11  ;;  %v396_v11 = vld [vmem:[#allocation2 + $0x8] sm:$0xff]  ;;  %v869_v47 = vsub.s32 (!%p1161_p11), 0, %v868_v41 }
  0x4f   : > { %750 = vmatpush1.bf16.msra.mxu1 %v1263_v42  ;;  %v885_v42 = vld [vmem:[%s1532_s3] sm:$0xff] (!%p1161_p11) }
  0x50   : > { %751 = vmatprep.subr.bf16.mxu1 %v1267_v46 }
  0x53   : > { %752 = vmatpush1.bf16.msra.mxu1 %v1269_v48  ;;  %v873_v48 = vsub.s32 (!%p1161_p11), 1, %v868_v41 }
  0x54   : > { %753 = vmatprep.subr.bf16.mxu1 %v1273_v49  ;;  %v887_v49 = vld [vmem:[%s1532_s3 + $0x10] sm:$0xff] (!%p1161_p11) }
  0x55   : > { %827 = vmatmul.mubr.bf16.gmra.mrb[4].mxu0 %v1304_v55 }
  0x57   : > { %754 = vmatpush1.bf16.msra.mxu1 %v1275_v51  ;;  %v889_v51 = vunpack.c.l.bf16 (!%p1161_p11), %v885_v42 }
  0x58   : > { %755 = vmatprep.subr.bf16.mxu1 %v1279_v52  ;;  %v890_v52 = vunpack.c.h.bf16 (!%p1161_p11), %v885_v42 }
  0x5b   : > { %756 = vmatpush1.bf16.msra.mxu1 %v1281_v53 }
  0x5c   : > { %757 = vmatprep.subr.bf16.mxu1 %v1285_v54 }
  0x5f   : > { %758 = vmatpush1.bf16.msra.mxu1 %v1287_v56  ;;  %v870_v56 = vrot.slane (!%p1161_p11), %v865_v44, %v869_v47 }
  0x60   : > { %759 = vmatprep.subr.bf16.mxu1 %v1291_v57  ;;  %v874_v57 = vrot.slane (!%p1161_p11), %v865_v44, %v873_v48 }
  0x63   : > { %760 = vmatpush1.bf16.msra.mxu1 %v1293_v58  ;;  %v891_v58 = vunpack.c.l.bf16 (!%p1161_p11), %v886_v45 }
  0x64   : > { %761 = vmatprep.subr.bf16.mxu1 %v1297_v59  ;;  %v892_v59 = vunpack.c.h.bf16 (!%p1161_p11), %v886_v45 }
  0x67   : > { %762 = vmatpush1.bf16.msra.mxu1 %v1299_v60 }
  0x6a   : > { %764 = vmatmul.mubr.bf16.vlgmr.msra.gmra.mrb[0].mxu1 %v1301_v61 }
  0x6b   : > { %773 = vmatprep.mubr.bf16.mxu1 %v1305_v62 }
  0x72   : > { %774 = vmatmul.mubr.bf16.gmra.mrb[4].mxu1 %v1307_v63  ;;  %v893_v63 = vunpack.c.l.bf16 (!%p1161_p11), %v887_v49 }
 0x120   : > { %v818_v0 = vpop.f32.mrb[0].mxu0 }
 0x121   : > { %v820_v1 = vpop.f32.mrb[1].mxu0 }
 0x122   : > { %v822_v2 = vpop.f32.mrb[2].mxu0 }
 0x123   : > { %v824_v3 = vpop.f32.mrb[3].mxu0 }
 0x128   : > { %v828_v4 = vpop.f32.mrb[4].mxu0 }
 0x129   : > { %v830_v5 = vpop.f32.mrb[5].mxu0 }
 0x12a   : > { %v832_v6 = vpop.f32.mrb[6].mxu0 }
 0x12b   : > { %v834_v7 = vpop.f32.mrb[7].mxu0 }
 0x13d   : > { %v765_v9 = vpop.f32.mrb[0].mxu1 }
 0x13e   : > { %v819_v10 = vadd.f32 %v818_v0, %v765_v9  ;;  %v767_v12 = vpop.f32.mrb[1].mxu1  ;;  %v894_v0 = vunpack.c.h.bf16 (!%p1161_p11), %v887_v49 }
 0x13f   : > { %v821_v13 = vadd.f32 %v820_v1, %v767_v12  ;;  %v769_v15 = vpop.f32.mrb[2].mxu1  ;;  %v895_v1 = vunpack.c.l.bf16 (!%p1161_p11), %v888_v50 }
 0x140   : > { %v837_v16 = vadd.f32 %v819_v10, %v395_v8  ;;  %v823_v17 = vadd.f32 %v822_v2, %v769_v15  ;;  %v771_v19 = vpop.f32.mrb[3].mxu1  ;;  %v896_v2 = vunpack.c.h.bf16 (!%p1161_p11), %v888_v50 }
 0x141   : > { %v838_v20 = vadd.f32 %v821_v13, %v396_v11  ;;  %v825_v21 = vadd.f32 %v824_v3, %v771_v19 }
 0x142   : > { %845 = vst [vmem:[#allocation2] sm:$0xff] %v837_v16  ;;  %v839_v22 = vadd.f32 %v823_v17, %v397_v14 }
 0x143   : > { %846 = vst [vmem:[#allocation2 + $0x8] sm:$0xff] %v838_v20  ;;  %v840_v23 = vadd.f32 %v825_v21, %v398_v18 }
 0x144   : > { %847 = vst [vmem:[#allocation2 + $0x10] sm:$0xff] %v839_v22 }
 0x145   : > { %848 = vst [vmem:[#allocation2 + $0x18] sm:$0xff] %v840_v23  ;;  %v775_v25 = vpop.f32.mrb[4].mxu1 }
 0x146   : > { %v829_v26 = vadd.f32 %v828_v4, %v775_v25  ;;  %v777_v28 = vpop.f32.mrb[5].mxu1 }
 0x147   : > { %v831_v29 = vadd.f32 %v830_v5, %v777_v28  ;;  %v779_v31 = vpop.f32.mrb[6].mxu1  ;;  %856 = sbr.rel (%p1161_p11) target bundleno = 350 (0x15e), region = 70 }
 0x148   : > { %v841_v32 = vadd.f32 %v829_v26, %v399_v24  ;;  %v833_v33 = vadd.f32 %v832_v6, %v779_v31  ;;  %v781_v35 = vpop.f32.mrb[7].mxu1 }
 0x149   : > { %v842_v36 = vadd.f32 %v831_v29, %v400_v27  ;;  %v835_v37 = vadd.f32 %v834_v7, %v781_v35  ;;  %v857_v43 = vld [vmem:[#allocation2] sm:$0xff] (!%p1161_p11) }
 0x14a   : > { %849 = vst [vmem:[#allocation2 + $0x20] sm:$0xff] %v841_v32  ;;  %v843_v38 = vadd.f32 %v833_v33, %v401_v30  ;;  %v858_v46 = vld [vmem:[#allocation2 + $0x8] sm:$0xff] (!%p1161_p11)  ;;  %v877_v3 = vadd.f32 (!%p1161_p11), %v870_v56, %v857_v43 }
 0x14b   : > { %850 = vst [vmem:[#allocation2 + $0x28] sm:$0xff] %v842_v36  ;;  %v844_v39 = vadd.f32 %v835_v37, %v402_v34  ;;  %v859_v53 = vld [vmem:[#allocation2 + $0x10] sm:$0xff] (!%p1161_p11)  ;;  %v878_v4 = vadd.f32 (!%p1161_p11), %v874_v57, %v858_v46 }
 0x14c   : > { %851 = vst [vmem:[#allocation2 + $0x30] sm:$0xff] %v843_v38  ;;  %v860_v54 = vld [vmem:[#allocation2 + $0x18] sm:$0xff] (!%p1161_p11)  ;;  %v879_v5 = vadd.f32 (!%p1161_p11), %v870_v56, %v859_v53  ;;  %v897_v11 = vadd.f32 (!%p1161_p11), %v889_v51, %v877_v3 }
 0x14d   : > { %852 = vst [vmem:[#allocation2 + $0x38] sm:$0xff] %v844_v39  ;;  %v880_v6 = vadd.f32 (!%p1161_p11), %v874_v57, %v860_v54  ;;  %v898_v12 = vadd.f32 (!%p1161_p11), %v890_v52, %v878_v4 }
 0x14e   : > { %v899_v13 = vadd.f32 %v891_v58, %v879_v5  ;;  %v905_v19 = vmax.f32 %v897_v11, 0.0 }
 0x14f   : > { %v900_v14 = vadd.f32 %v892_v59, %v880_v6  ;;  %v906_v20 = vmax.f32 %v898_v12, 0.0 }
 0x150   : > { %v907_v21 = vmax.f32 %v899_v13, 0.0 }
 0x151   : > { %v861_v55 = vld [vmem:[#allocation2 + $0x20] sm:$0xff]  ;;  %v908_v22 = vmax.f32 %v900_v14, 0.0  ;;  %v1172_v27 = vpack.c.bf16 %v906_v20, %v905_v19 }
 0x152   : > { %v862_v60 = vld [vmem:[#allocation2 + $0x28] sm:$0xff]  ;;  %v881_v7 = vadd.f32 %v870_v56, %v861_v55 }
 0x153   : > { %v863_v61 = vld [vmem:[#allocation2 + $0x30] sm:$0xff]  ;;  %v882_v8 = vadd.f32 %v874_v57, %v862_v60  ;;  %v1173_v28 = vpack.c.bf16 %v908_v22, %v907_v21  ;;  %937 = vst [vmem:[%s1533_s4] sm:$0xff] %v1172_v27 }
 0x154   : > { %v864_v62 = vld [vmem:[#allocation2 + $0x38] sm:$0xff]  ;;  %v883_v9 = vadd.f32 %v870_v56, %v863_v61  ;;  %v901_v15 = vadd.f32 %v893_v63, %v881_v7 }
 0x155   : > { %v884_v10 = vadd.f32 %v874_v57, %v864_v62  ;;  %v902_v16 = vadd.f32 %v894_v0, %v882_v8  ;;  %938 = vst [vmem:[%s1533_s4 + $0x8] sm:$0xff] %v1173_v28 }
 0x156   : > { %v903_v17 = vadd.f32 %v895_v1, %v883_v9  ;;  %v909_v23 = vmax.f32 %v901_v15, 0.0 }
 0x157   : > { %v904_v18 = vadd.f32 %v896_v2, %v884_v10  ;;  %v910_v24 = vmax.f32 %v902_v16, 0.0 }
 0x158   : > { %v911_v25 = vmax.f32 %v903_v17, 0.0 }
 0x159   : > { %v912_v26 = vmax.f32 %v904_v18, 0.0  ;;  %v1174_v29 = vpack.c.bf16 %v910_v24, %v909_v23 }
 0x15b   : > { %v1175_v30 = vpack.c.bf16 %v912_v26, %v911_v25  ;;  %939 = vst [vmem:[%s1533_s4 + $0x10] sm:$0xff] %v1174_v29 }
 0x15d   : > { %940 = vst [vmem:[%s1533_s4 + $0x18] sm:$0xff] %v1175_v30 }
 0x15e PF: > { %s14_s19 = sadd.s32 1, %s1346_s19   ;;  %s1534_s15 = smov %s1334_s16 }
 0x15f   : > { %p11_p12 = scmp.ge.s32.totalorder %s14_s19, 8   ;;  %s1535_s16 = smov %s1410_s23 }
 0x160   : > { %s1536_s17 = smov %s1342_s18  ;;  %s1537_s18 = smov %s1539_s20 }
 0x161   :  { %13 = sbr.rel (!%p11_p12) target bundleno = 3 (0x3), region = 120 }

// kernel: resnet34_forward.59
= control target key start
LH: loop header
LB: loop body
LE: loop exit
PB: predicated region body
PF: predicated region fallthrough
CT: control target
= control target key end

     0   :  { %s1260_s12 = smov 0   ;;  %s1262_s13 = smov 0   ;;  %s1402_s0 = inlined_call_operand.vmem [shape: bf16[32,2304], index: 0, kind: input, shape index: {}]   ;;  %s1403_s1 = inlined_call_operand.vmem [shape: bf16[2304,256], index: 1, kind: input, shape index: {}]   ;;  %s1404_s2 = inlined_call_operand.vmem [shape: f32[1,256], index: 2, kind: input, shape index: {}]   ;;  %s1405_s3 = inlined_call_operand.vmem [shape: bf16[32,256], index: 3, kind: output, shape index: {}]  }
   0x1   :  { %s1264_s14 = smov 0   ;;  %s1266_s15 = smov 0  }
   0x2   :  { %s1268_s16 = smov 0  }
   0x3 LB: > { %s25_s17 = sadd.s32 1, %s1232_s15  ;;  %p48_p1 = scmp.ne.s32.totalorder %s1224_s13, %s1220_s12  ;;  %s1236_s16 = sphi %s1268_s16, %s13_s16   ;;  %s1232_s15 = sphi %s1266_s15, %s1409_s15   ;;  %s1228_s14 = sphi %s1264_s14, %s1408_s14   ;;  %s1224_s13 = sphi %s1262_s13, %s1407_s13   ;;  %s1220_s12 = sphi %s1260_s12, %s1406_s12  }
   0x4   : > { %p26_p0 = scmp.ge.s32.totalorder %s25_s17, 6  ;;  %p49_p2 = scmp.eq.s32.totalorder %s1236_s16, 0 }
   0x5   : > { %s41_s19 = sadd.s32 1, %s1224_s13  ;;  %p983_p5 = scmp.ge.s32.totalorder %s1236_s16, 6 }
   0x6   : > { %s1411_s17 = smov (%p26_p0, %s25_s17), 0  ;;  %p50_p3 = por %p49_p2, %p48_p1 }
   0x7   : > { %s37_s18 = ssub.s32 %s1232_s15, %s1411_s17  ;;  %164 = sbr.rel (%p983_p5) target bundleno = 23 (0x17), region = 20 }
   0x8   : > { %p39_p4 = scmp.eq.s32.totalorder %s37_s18, 0 }
   0xa   : > { %s1295_s20 = scalar_select %p39_p4, %s1224_s13, %s41_s19  }
   0xe   : > { %167 = sbr.rel (!%p50_p3) target bundleno = 23 (0x17), region = 24  ;;  %s169_s21 = sand.u32 (%p50_p3), 1, %s1224_s13  }
   0xf   : > { %s1060_s22 = smul.u32 (%p50_p3), 12, %s1232_s15 }
  0x10   : > { %s1074_s23 = smul.u32 (%p50_p3), 48, %s169_s21 }
  0x11   : > { %s177_s26 = scalar_lea.vmem (%p50_p3), %s1402_s0, %s1060_s22 }
  0x12   : > { %v192_v0 = vld [vmem:[%s177_s26] sm:$0xff] (%p50_p3)  ;;  %v194_v1 = vld [vmem:[%s177_s26 + $0x48] sm:$0xff] (%p50_p3)  ;;  %v196_v2 = vld [vmem:[%s177_s26 + $0x90] sm:$0xff] (%p50_p3)  ;;  %s171_s27 = scalar_lea.vmem (%p50_p3), [#allocation3], %s1074_s23 }
  0x13   : > { %193 = vst [vmem:[%s171_s27] sm:$0xff] (%p50_p3), %v192_v0  ;;  %195 = vst [vmem:[%s171_s27 + $0xc] sm:$0xff] (%p50_p3), %v194_v1  ;;  %v198_v3 = vld [vmem:[%s177_s26 + $0xd8] sm:$0xff] (%p50_p3)  ;;  %v985_v4 = vld [vmem:[%s177_s26 + $0x8] sm:$0xf] (%p50_p3) }
  0x14   : > { %197 = vst [vmem:[%s171_s27 + $0x18] sm:$0xff] (%p50_p3), %v196_v2  ;;  %v987_v5 = vld [vmem:[%s177_s26 + $0x50] sm:$0xf] (%p50_p3)  ;;  %199 = vst [vmem:[%s171_s27 + $0x24] sm:$0xff] (%p50_p3), %v198_v3  ;;  %v989_v6 = vld [vmem:[%s177_s26 + $0x98] sm:$0xf] (%p50_p3) }
  0x15   : > { %986 = vst [vmem:[%s171_s27 + $0x8] sm:$0xf] %v985_v4  ;;  %988 = vst [vmem:[%s171_s27 + $0x14] sm:$0xf] %v987_v5  ;;  %v991_v7 = vld [vmem:[%s177_s26 + $0xe0] sm:$0xf] }
  0x16   : > { %990 = vst [vmem:[%s171_s27 + $0x20] sm:$0xf] %v989_v6  ;;  %992 = vst [vmem:[%s171_s27 + $0x2c] sm:$0xf] %v991_v7 }
  0x17 PF: > { %p993_p6 = scmp.ge.s32.totalorder %s1236_s16, 1  ;;  %p234_p7 = scmp.lt.s32.totalorder %s1236_s16, 7 }
  0x19   : > { %p235_p8 = pnand %p993_p6, %p234_p7 }
  0x1a   : > { %s241_s28 = sand.u32 (!%p235_p8), 1, %s1220_s12   ;;  %s285_s29 = smul.u32 (!%p235_p8), 48, %s1228_s14 }
  0x1b   : > { %238 = sbr.rel (%p235_p8) target bundleno = 348 (0x15c), region = 54  ;;  %p996_p10 = scmp.ne.s32.totalorder (!%p235_p8), %s1228_s14, 0 }
  0x1c   : > { %s1075_s30 = smul.u32 (!%p235_p8), 48, %s241_s28  ;;  %p287_p9 = scmp.lt.s32.totalorder (!%p235_p8), %s285_s29, 287 }
  0x1e   : > { %s1312_s8 = scalar_lea.vmem (!%p235_p8), [#allocation3], %s1075_s30 }
  0x22   : > { %s1413_s29 = smov (!%p287_p9, %s285_s29), 287  ;;  %318 = sbr.rel (%p996_p10) target bundleno = 41 (0x29), region = 62 }
  0x23   : > { %s1061_s4 = sshll.u32 %s1413_s29, 3  ;;  %v1238_v8 = vmov (!%p996_p10), 0.0  }
  0x24   : > { %s1310_s7 = scalar_lea.vmem %s1403_s1, %s1061_s4  ;;  %319 = vst [vmem:[#allocation2] sm:$0xff] (!%p996_p10), %v1238_v8  ;;  %320 = vst [vmem:[#allocation2 + $0x8] sm:$0xff] (!%p996_p10), %v1238_v8 }
  0x25   : > { %321 = vst [vmem:[#allocation2 + $0x10] sm:$0xff] (!%p996_p10), %v1238_v8  ;;  %322 = vst [vmem:[#allocation2 + $0x18] sm:$0xff] (!%p996_p10), %v1238_v8 }
  0x26   : > { %323 = vst [vmem:[#allocation2 + $0x20] sm:$0xff] (!%p996_p10), %v1238_v8  ;;  %324 = vst [vmem:[#allocation2 + $0x28] sm:$0xff] (!%p996_p10), %v1238_v8 }
  0x27   : > { %325 = vst [vmem:[#allocation2 + $0x30] sm:$0xff] (!%p996_p10), %v1238_v8  ;;  %326 = vst [vmem:[#allocation2 + $0x38] sm:$0xff] (!%p996_p10), %v1238_v8 }
  0x29 PF: > { %v1118_v9 = vld [vmem:[%s1310_s7 + $0x4] ss:$8 sps:$4 sm:$0xff]   ;;  %v1120_v10 = vld [vmem:[%s1310_s7] ss:$8 sps:$4 sm:$0xff]   ;;  %v1239_v11 = vmov 0   ;;  %p1051_p11 = scmp.ne.s32.totalorder %s1228_s14, 5 }
  0x2a   : > { %748 = vmatprep.mubr.bf16.mxu0 %v1239_v11  ;;  %663 = vmatprep.subr.bf16.mxu1 %v1118_v9  ;;  %v1121_v12 = vld [vmem:[%s1310_s7 + $0x14] ss:$8 sps:$4 sm:$0xff]   ;;  %v1123_v13 = vld [vmem:[%s1310_s7 + $0x10] ss:$8 sps:$4 sm:$0xff]   ;;  %v1124_v14 = vld [vmem:[%s1310_s7 + $0x24] ss:$8 sps:$4 sm:$0xff]  }
  0x2b   : > { %664 = vmatpush1.bf16.msra.mxu1 %v1120_v10  ;;  %v1126_v15 = vld [vmem:[%s1310_s7 + $0x20] ss:$8 sps:$4 sm:$0xff]   ;;  %v1127_v16 = vld [vmem:[%s1310_s7 + $0x34] ss:$8 sps:$4 sm:$0xff]   ;;  %v1129_v17 = vld [vmem:[%s1310_s7 + $0x30] ss:$8 sps:$4 sm:$0xff]  }
  0x2c   : > { %665 = vmatprep.subr.bf16.mxu1 %v1121_v12  ;;  %v1142_v18 = vld [vmem:[%s1310_s7 + $0x104] ss:$8 sps:$4 sm:$0xff]   ;;  %v1144_v19 = vld [vmem:[%s1310_s7 + $0x100] ss:$8 sps:$4 sm:$0xff]   ;;  %v1148_v21 = vld [vmem:[%s1310_s7 + $0x114] ss:$8 sps:$4 sm:$0xff]  }
  0x2d   : > { %v1130_v20 = vld [vmem:[%s1310_s7 + $0x44] ss:$8 sps:$4 sm:$0xff]   ;;  %716 = vmatprep.subr.bf16.mxu0 %v1142_v18  ;;  %v1150_v22 = vld [vmem:[%s1310_s7 + $0x110] ss:$8 sps:$4 sm:$0xff]   ;;  %v1132_v23 = vld [vmem:[%s1310_s7 + $0x40] ss:$8 sps:$4 sm:$0xff]  }
  0x2e   : > { %717 = vmatpush1.bf16.msra.mxu0 %v1144_v19  ;;  %v1133_v24 = vld [vmem:[%s1310_s7 + $0x54] ss:$8 sps:$4 sm:$0xff]   ;;  %v1154_v25 = vld [vmem:[%s1310_s7 + $0x124] ss:$8 sps:$4 sm:$0xff]   ;;  %v1156_v26 = vld [vmem:[%s1310_s7 + $0x120] ss:$8 sps:$4 sm:$0xff]  }
  0x2f   : > { %666 = vmatpush1.bf16.msra.mxu1 %v1123_v13  ;;  %718 = vmatprep.subr.bf16.mxu0 %v1148_v21  ;;  %v1135_v27 = vld [vmem:[%s1310_s7 + $0x50] ss:$8 sps:$4 sm:$0xff]   ;;  %v1160_v28 = vld [vmem:[%s1310_s7 + $0x134] ss:$8 sps:$4 sm:$0xff]   ;;  %v1136_v29 = vld [vmem:[%s1310_s7 + $0x64] ss:$8 sps:$4 sm:$0xff]  }
  0x30   : > { %667 = vmatprep.subr.bf16.mxu1 %v1124_v14  ;;  %v1162_v30 = vld [vmem:[%s1310_s7 + $0x130] ss:$8 sps:$4 sm:$0xff]   ;;  %v1138_v31 = vld [vmem:[%s1310_s7 + $0x60] ss:$8 sps:$4 sm:$0xff]   ;;  %v1166_v32 = vld [vmem:[%s1310_s7 + $0x144] ss:$8 sps:$4 sm:$0xff]  }
  0x31   : > { %v1139_v33 = vld [vmem:[%s1310_s7 + $0x74] ss:$8 sps:$4 sm:$0xff]   ;;  %v1168_v34 = vld [vmem:[%s1310_s7 + $0x140] ss:$8 sps:$4 sm:$0xff]   ;;  %v1141_v35 = vld [vmem:[%s1310_s7 + $0x70] ss:$8 sps:$4 sm:$0xff]  }
  0x32   : > { %719 = vmatpush1.bf16.msra.mxu0 %v1150_v22  ;;  %v1172_v36 = vld [vmem:[%s1310_s7 + $0x154] ss:$8 sps:$4 sm:$0xff]   ;;  %v1145_v37 = vld [vmem:[%s1310_s7 + $0x84] ss:$8 sps:$4 sm:$0xff]   ;;  %v1174_v38 = vld [vmem:[%s1310_s7 + $0x150] ss:$8 sps:$4 sm:$0xff]  }
  0x33   : > { %668 = vmatpush1.bf16.msra.mxu1 %v1126_v15  ;;  %720 = vmatprep.subr.bf16.mxu0 %v1154_v25  ;;  %v1147_v39 = vld [vmem:[%s1310_s7 + $0x80] ss:$8 sps:$4 sm:$0xff]   ;;  %v1178_v40 = vld [vmem:[%s1310_s7 + $0x164] ss:$8 sps:$4 sm:$0xff]   ;;  %v1151_v41 = vld [vmem:[%s1310_s7 + $0x94] ss:$8 sps:$4 sm:$0xff]  }
  0x34   : > { %669 = vmatprep.subr.bf16.mxu1 %v1127_v16  ;;  %v1153_v42 = vld [vmem:[%s1310_s7 + $0x90] ss:$8 sps:$4 sm:$0xff]   ;;  %v1180_v43 = vld [vmem:[%s1310_s7 + $0x160] ss:$8 sps:$4 sm:$0xff]   ;;  %v1184_v45 = vld [vmem:[%s1310_s7 + $0x174] ss:$8 sps:$4 sm:$0xff]  }
  0x35   : > { %v1193_v44 = vld [vmem:[%s1312_s8 + $0x4] ss:$12 sps:$4 sm:$0xff]   ;;  %v1190_v50 = vld [vmem:[%s1312_s8 + $0x8] ss:$12 sps:$4 sm:$0xff]   ;;  %v1194_v55 = vld [vmem:[%s1312_s8 + $0x20] ss:$12 sps:$4 sm:$0xff]  }
  0x36   : > { %721 = vmatpush1.bf16.msra.mxu0 %v1156_v26  ;;  %v1157_v46 = vld [vmem:[%s1310_s7 + $0xa4] ss:$8 sps:$4 sm:$0xff]   ;;  %695 = vmatprep.mubr.bf16.mxu1 %v1193_v44  ;;  %v1186_v47 = vld [vmem:[%s1310_s7 + $0x170] ss:$8 sps:$4 sm:$0xff]   ;;  %v1159_v48 = vld [vmem:[%s1310_s7 + $0xa0] ss:$8 sps:$4 sm:$0xff]  }
  0x37   : > { %670 = vmatpush1.bf16.msra.mxu1 %v1129_v17  ;;  %722 = vmatprep.subr.bf16.mxu0 %v1160_v28  ;;  %v1163_v49 = vld [vmem:[%s1310_s7 + $0xb4] ss:$8 sps:$4 sm:$0xff]   ;;  %v1165_v51 = vld [vmem:[%s1310_s7 + $0xb0] ss:$8 sps:$4 sm:$0xff]   ;;  %v1169_v52 = vld [vmem:[%s1310_s7 + $0xc4] ss:$8 sps:$4 sm:$0xff]  }
  0x38   : > { %671 = vmatprep.subr.bf16.mxu1 %v1130_v20  ;;  %v1171_v53 = vld [vmem:[%s1310_s7 + $0xc0] ss:$8 sps:$4 sm:$0xff]   ;;  %v1175_v54 = vld [vmem:[%s1310_s7 + $0xd4] ss:$8 sps:$4 sm:$0xff]   ;;  %v1177_v56 = vld [vmem:[%s1310_s7 + $0xd0] ss:$8 sps:$4 sm:$0xff]  }
  0x39   : > { %v1181_v57 = vld [vmem:[%s1310_s7 + $0xe4] ss:$8 sps:$4 sm:$0xff]   ;;  %v1183_v58 = vld [vmem:[%s1310_s7 + $0xe0] ss:$8 sps:$4 sm:$0xff]   ;;  %v1187_v59 = vld [vmem:[%s1310_s7 + $0xf4] ss:$8 sps:$4 sm:$0xff]  }
  0x3a   : > { %723 = vmatpush1.bf16.msra.mxu0 %v1162_v30  ;;  %v1189_v60 = vld [vmem:[%s1310_s7 + $0xf0] ss:$8 sps:$4 sm:$0xff]   ;;  %v327_v8 = vld [vmem:[#allocation2] sm:$0xff] }
  0x3b   : > { %672 = vmatpush1.bf16.msra.mxu1 %v1132_v23  ;;  %724 = vmatprep.subr.bf16.mxu0 %v1166_v32  ;;  %v1191_v61 = vld [vmem:[%s1312_s8] ss:$12 sps:$4 sm:$0xff]   ;;  %v1195_v62 = vld [vmem:[%s1312_s8 + $0x1c] ss:$12 sps:$4 sm:$0xff]   ;;  %v1197_v63 = vld [vmem:[%s1312_s8 + $0x18] ss:$12 sps:$4 sm:$0xff]  }
  0x3c   : > { %673 = vmatprep.subr.bf16.mxu1 %v1133_v24  ;;  %v329_v14 = vld [vmem:[#allocation2 + $0x10] sm:$0xff]  ;;  %v330_v18 = vld [vmem:[#allocation2 + $0x18] sm:$0xff]  ;;  %v331_v24 = vld [vmem:[#allocation2 + $0x20] sm:$0xff] }
  0x3d   : > { %v333_v30 = vld [vmem:[#allocation2 + $0x30] sm:$0xff] }
  0x3e   : > { %725 = vmatpush1.bf16.msra.mxu0 %v1168_v34  ;;  %v334_v34 = vld [vmem:[#allocation2 + $0x38] sm:$0xff] }
  0x3f   : > { %674 = vmatpush1.bf16.msra.mxu1 %v1135_v27  ;;  %726 = vmatprep.subr.bf16.mxu0 %v1172_v36  ;;  %v332_v27 = vld [vmem:[#allocation2 + $0x28] sm:$0xff] }
  0x40   : > { %675 = vmatprep.subr.bf16.mxu1 %v1136_v29 }
  0x42   : > { %727 = vmatpush1.bf16.msra.mxu0 %v1174_v38 }
  0x43   : > { %676 = vmatpush1.bf16.msra.mxu1 %v1138_v31  ;;  %728 = vmatprep.subr.bf16.mxu0 %v1178_v40  ;;  %v799_v40 = vlaneseq (!%p1051_p11) }
  0x44   : > { %677 = vmatprep.subr.bf16.mxu1 %v1139_v33 }
  0x46   : > { %729 = vmatpush1.bf16.msra.mxu0 %v1180_v43 }
  0x47   : > { %678 = vmatpush1.bf16.msra.mxu1 %v1141_v35  ;;  %730 = vmatprep.subr.bf16.mxu0 %v1184_v45 }
  0x48   : > { %679 = vmatprep.subr.bf16.mxu1 %v1145_v37 }
  0x4a   : > { %731 = vmatpush1.bf16.msra.mxu0 %v1186_v47 }
  0x4b   : > { %680 = vmatpush1.bf16.msra.mxu1 %v1147_v39 }
  0x4c   : > { %681 = vmatprep.subr.bf16.mxu1 %v1151_v41  ;;  %v800_v41 = vshrl.u32 (!%p1051_p11), %v799_v40, 7 }
  0x4d   : > { %749 = vmatmul.mubr.bf16.vlgmr.msra.gmra.mrb[0].mxu0 %v1190_v50 }
  0x4e   : > { %758 = vmatprep.mubr.bf16.mxu0 %v1239_v11  ;;  %v328_v11 = vld [vmem:[#allocation2 + $0x8] sm:$0xff]  ;;  %v801_v45 = vsub.s32 (!%p1051_p11), 0, %v800_v41 }
  0x4f   : > { %682 = vmatpush1.bf16.msra.mxu1 %v1153_v42  ;;  %v797_v42 = vld [vmem:[%s1404_s2] sm:$0x3] (!%p1051_p11) }
  0x50   : > { %683 = vmatprep.subr.bf16.mxu1 %v1157_v46  ;;  %v805_v46 = vsub.s32 (!%p1051_p11), 1, %v800_v41  ;;  %v802_v50 = vrot.slane (!%p1051_p11), %v797_v42, %v801_v45 }
  0x53   : > { %684 = vmatpush1.bf16.msra.mxu1 %v1159_v48 }
  0x54   : > { %685 = vmatprep.subr.bf16.mxu1 %v1163_v49 }
  0x55   : > { %759 = vmatmul.mubr.bf16.gmra.mrb[4].mxu0 %v1194_v55 }
  0x57   : > { %686 = vmatpush1.bf16.msra.mxu1 %v1165_v51  ;;  %v806_v51 = vrot.slane (!%p1051_p11), %v797_v42, %v805_v46 }
  0x58   : > { %687 = vmatprep.subr.bf16.mxu1 %v1169_v52 }
  0x5b   : > { %688 = vmatpush1.bf16.msra.mxu1 %v1171_v53 }
  0x5c   : > { %689 = vmatprep.subr.bf16.mxu1 %v1175_v54 }
  0x5f   : > { %690 = vmatpush1.bf16.msra.mxu1 %v1177_v56 }
  0x60   : > { %691 = vmatprep.subr.bf16.mxu1 %v1181_v57 }
  0x63   : > { %692 = vmatpush1.bf16.msra.mxu1 %v1183_v58 }
  0x64   : > { %693 = vmatprep.subr.bf16.mxu1 %v1187_v59 }
  0x67   : > { %694 = vmatpush1.bf16.msra.mxu1 %v1189_v60 }
  0x6a   : > { %696 = vmatmul.mubr.bf16.vlgmr.msra.gmra.mrb[0].mxu1 %v1191_v61 }
  0x6b   : > { %705 = vmatprep.mubr.bf16.mxu1 %v1195_v62 }
  0x72   : > { %706 = vmatmul.mubr.bf16.gmra.mrb[4].mxu1 %v1197_v63 }
 0x120   : > { %v750_v0 = vpop.f32.mrb[0].mxu0 }
 0x121   : > { %v752_v1 = vpop.f32.mrb[1].mxu0 }
 0x122   : > { %v754_v2 = vpop.f32.mrb[2].mxu0 }
 0x123   : > { %v756_v3 = vpop.f32.mrb[3].mxu0 }
 0x128   : > { %v760_v4 = vpop.f32.mrb[4].mxu0 }
 0x129   : > { %v762_v5 = vpop.f32.mrb[5].mxu0 }
 0x12a   : > { %v764_v6 = vpop.f32.mrb[6].mxu0 }
 0x12b   : > { %v766_v7 = vpop.f32.mrb[7].mxu0 }
 0x13d   : > { %v697_v9 = vpop.f32.mrb[0].mxu1 }
 0x13e   : > { %v751_v10 = vadd.f32 %v750_v0, %v697_v9  ;;  %v699_v12 = vpop.f32.mrb[1].mxu1 }
 0x13f   : > { %v753_v13 = vadd.f32 %v752_v1, %v699_v12  ;;  %v701_v15 = vpop.f32.mrb[2].mxu1 }
 0x140   : > { %v769_v16 = vadd.f32 %v751_v10, %v327_v8  ;;  %v755_v17 = vadd.f32 %v754_v2, %v701_v15  ;;  %v703_v19 = vpop.f32.mrb[3].mxu1 }
 0x141   : > { %v770_v20 = vadd.f32 %v753_v13, %v328_v11  ;;  %v757_v21 = vadd.f32 %v756_v3, %v703_v19 }
 0x142   : > { %777 = vst [vmem:[#allocation2] sm:$0xff] %v769_v16  ;;  %v771_v22 = vadd.f32 %v755_v17, %v329_v14 }
 0x143   : > { %778 = vst [vmem:[#allocation2 + $0x8] sm:$0xff] %v770_v20  ;;  %v772_v23 = vadd.f32 %v757_v21, %v330_v18 }
 0x144   : > { %779 = vst [vmem:[#allocation2 + $0x10] sm:$0xff] %v771_v22 }
 0x145   : > { %780 = vst [vmem:[#allocation2 + $0x18] sm:$0xff] %v772_v23  ;;  %v707_v25 = vpop.f32.mrb[4].mxu1 }
 0x146   : > { %v761_v26 = vadd.f32 %v760_v4, %v707_v25  ;;  %v709_v28 = vpop.f32.mrb[5].mxu1 }
 0x147   : > { %v763_v29 = vadd.f32 %v762_v5, %v709_v28  ;;  %v711_v31 = vpop.f32.mrb[6].mxu1  ;;  %788 = sbr.rel (%p1051_p11) target bundleno = 348 (0x15c), region = 66 }
 0x148   : > { %v773_v32 = vadd.f32 %v761_v26, %v331_v24  ;;  %v765_v33 = vadd.f32 %v764_v6, %v711_v31  ;;  %v713_v35 = vpop.f32.mrb[7].mxu1 }
 0x149   : > { %v774_v36 = vadd.f32 %v763_v29, %v332_v27  ;;  %v767_v37 = vadd.f32 %v766_v7, %v713_v35  ;;  %v789_v43 = vld [vmem:[#allocation2] sm:$0xff] (!%p1051_p11) }
 0x14a   : > { %781 = vst [vmem:[#allocation2 + $0x20] sm:$0xff] %v773_v32  ;;  %v775_v38 = vadd.f32 %v765_v33, %v333_v30  ;;  %v790_v44 = vld [vmem:[#allocation2 + $0x8] sm:$0xff] (!%p1051_p11)  ;;  %v809_v55 = vadd.f32 (!%p1051_p11), %v802_v50, %v789_v43 }
 0x14b   : > { %782 = vst [vmem:[#allocation2 + $0x28] sm:$0xff] %v774_v36  ;;  %v776_v39 = vadd.f32 %v767_v37, %v334_v34  ;;  %v791_v47 = vld [vmem:[#allocation2 + $0x10] sm:$0xff] (!%p1051_p11)  ;;  %v810_v56 = vadd.f32 (!%p1051_p11), %v806_v51, %v790_v44 }
 0x14c   : > { %783 = vst [vmem:[#allocation2 + $0x30] sm:$0xff] %v775_v38  ;;  %v792_v48 = vld [vmem:[#allocation2 + $0x18] sm:$0xff] (!%p1051_p11)  ;;  %v811_v57 = vadd.f32 (!%p1051_p11), %v802_v50, %v791_v47  ;;  %v817_v63 = vmax.f32 (!%p1051_p11), %v809_v55, 0.0 }
 0x14d   : > { %784 = vst [vmem:[#allocation2 + $0x38] sm:$0xff] %v776_v39  ;;  %v812_v58 = vadd.f32 (!%p1051_p11), %v806_v51, %v792_v48  ;;  %v818_v0 = vmax.f32 (!%p1051_p11), %v810_v56, 0.0 }
 0x14e   : > { %v819_v1 = vmax.f32 %v811_v57, 0.0 }
 0x14f   : > { %v820_v2 = vmax.f32 %v812_v58, 0.0  ;;  %v1062_v7 = vpack.c.bf16 %v818_v0, %v817_v63 }
 0x151   : > { %v793_v49 = vld [vmem:[#allocation2 + $0x20] sm:$0xff]  ;;  %v1063_v8 = vpack.c.bf16 %v820_v2, %v819_v1  ;;  %849 = vst [vmem:[%s1405_s3] sm:$0xff] %v1062_v7 }
 0x152   : > { %v794_v52 = vld [vmem:[#allocation2 + $0x28] sm:$0xff]  ;;  %v813_v59 = vadd.f32 %v802_v50, %v793_v49 }
 0x153   : > { %v795_v53 = vld [vmem:[#allocation2 + $0x30] sm:$0xff]  ;;  %v814_v60 = vadd.f32 %v806_v51, %v794_v52  ;;  %850 = vst [vmem:[%s1405_s3 + $0x8] sm:$0xff] %v1063_v8 }
 0x154   : > { %v796_v54 = vld [vmem:[#allocation2 + $0x38] sm:$0xff]  ;;  %v815_v61 = vadd.f32 %v802_v50, %v795_v53  ;;  %v821_v3 = vmax.f32 %v813_v59, 0.0 }
 0x155   : > { %v816_v62 = vadd.f32 %v806_v51, %v796_v54  ;;  %v822_v4 = vmax.f32 %v814_v60, 0.0 }
 0x156   : > { %v823_v5 = vmax.f32 %v815_v61, 0.0 }
 0x157   : > { %v824_v6 = vmax.f32 %v816_v62, 0.0  ;;  %v1064_v9 = vpack.c.bf16 %v822_v4, %v821_v3 }
 0x159   : > { %v1065_v10 = vpack.c.bf16 %v824_v6, %v823_v5  ;;  %851 = vst [vmem:[%s1405_s3 + $0x10] sm:$0xff] %v1064_v9 }
 0x15b   : > { %852 = vst [vmem:[%s1405_s3 + $0x18] sm:$0xff] %v1065_v10 }
 0x15c PF: > { %s13_s16 = sadd.s32 1, %s1236_s16   ;;  %s1406_s12 = smov %s1224_s13 }
 0x15d   : > { %p10_p12 = scmp.ge.s32.totalorder %s13_s16, 8   ;;  %s1407_s13 = smov %s1295_s20 }
 0x15e   : > { %s1408_s14 = smov %s1232_s15  ;;  %s1409_s15 = smov %s1411_s17 }
 0x15f   :  { %12 = sbr.rel (!%p10_p12) target bundleno = 3 (0x3), region = 113 }

// kernel: resnet34_forward.70
= control target key start
LH: loop header
LB: loop body
LE: loop exit
PB: predicated region body
PF: predicated region fallthrough
CT: control target
= control target key end

     0   :  { %s1319_s12 = smov 0   ;;  %s1321_s13 = smov 0   ;;  %s1582_s0 = inlined_call_operand.vmem [shape: bf16[8,2304], index: 0, kind: input, shape index: {}]   ;;  %s1583_s1 = inlined_call_operand.vmem [shape: bf16[2304,512], index: 1, kind: input, shape index: {}]   ;;  %s1584_s2 = inlined_call_operand.vmem [shape: f32[1,512], index: 2, kind: input, shape index: {}]   ;;  %s1585_s3 = inlined_call_operand.vmem [shape: bf16[8,512], index: 3, kind: output, shape index: {}]  }
   0x1   :  { %s1323_s14 = smov 0   ;;  %s1325_s15 = smov 0  }
   0x2   :  { %s1327_s16 = smov 0   ;;  %s1329_s17 = smov 0  }
   0x3   :  { %s1331_s18 = smov 0  }
   0x4 LB: > { %s25_s19 = sadd.s32 1, %s1287_s16  ;;  %s28_s20 = sadd.s32 1, %s1291_s17  ;;  %s1295_s18 = sphi %s1331_s18, %s13_s18   ;;  %s1291_s17 = sphi %s1329_s17, %s1591_s17   ;;  %s1287_s16 = sphi %s1327_s16, %s1590_s16   ;;  %s1283_s15 = sphi %s1325_s15, %s1589_s15   ;;  %s1279_s14 = sphi %s1323_s14, %s1588_s14   ;;  %s1275_s13 = sphi %s1321_s13, %s1587_s13   ;;  %s1271_s12 = sphi %s1319_s12, %s1586_s12  }
   0x5   : > { %p26_p0 = scmp.ge.s32.totalorder %s25_s19, 6  ;;  %p76_p1 = scmp.ne.s32.totalorder %s1275_s13, %s1271_s12 }
   0x6   : > { %p77_p2 = scmp.eq.s32.totalorder %s1295_s18, 0  ;;  %s69_s24 = sadd.s32 1, %s1275_s13 }
   0x7   : > { %s1593_s19 = smov (%p26_p0, %s25_s19), 0  ;;  %s1595_s20 = smov (!%p26_p0, %s28_s20), %s1291_s17 }
   0x8   : > { %p78_p3 = por %p77_p2, %p76_p1  ;;  %p30_p4 = scmp.ge.s32.totalorder %s1595_s20, 2 }
   0x9   : > { %s64_s21 = ssub.s32 %s1287_s16, %s1593_s19  ;;  %p1039_p6 = scmp.ge.s32.totalorder %s1295_s18, 12 }
   0xa   : > { %s1597_s20 = smov (%p30_p4, %s1595_s20), 0 }
   0xb   : > { %s65_s22 = ssub.s32 %s1291_s17, %s1597_s20  ;;  %156 = sbr.rel (%p1039_p6) target bundleno = 50 (0x32), region = 16 }
   0xc   : > { %s66_s23 = sor.u32 %s65_s22, %s64_s21 }
   0xd   : > { %p67_p5 = scmp.eq.s32.totalorder %s66_s23, 0 }
   0xf   : > { %s1370_s25 = scalar_select %p67_p5, %s1275_s13, %s69_s24  }
  0x12   : > { %172 = sbr.rel (!%p78_p3) target bundleno = 50 (0x32), region = 24  ;;  %s174_s26 = sand.u32 (%p78_p3), 1, %s1275_s13  }
  0x13   : > { %s1106_s27 = smul.u32 (%p78_p3), 384, %s174_s26  ;;  %s1040_s28 = sshll.u32 (%p78_p3), %s1291_s17, 1 }
  0x14   : > { %s1104_s29 = smul.u32 (%p78_p3), 192, %s1287_s16 }
  0x15   : > { %s1384_s8 = scalar_lea.vmem (%p78_p3), [#allocation3], %s1106_s27 }
  0x16   : > { %s180_s30 = sadd.s32 (%p78_p3), %s1104_s29, %s1040_s28 }
  0x17   : > { %s1042_s4 = sshll.u32 (%p78_p3), %s180_s30, 2 }
  0x18   : > { %s1379_s7 = scalar_lea.vmem (%p78_p3), %s1583_s1, %s1042_s4 }
  0x19   : > { %v304_v0 = vld [vmem:[%s1379_s7] sm:$0xff]  ;;  %v306_v1 = vld [vmem:[%s1379_s7 + $0x10] sm:$0xff] }
  0x1a   : > { %v308_v2 = vld [vmem:[%s1379_s7 + $0x20] sm:$0xff]  ;;  %305 = vst [vmem:[%s1384_s8] sm:$0xff] %v304_v0  ;;  %307 = vst [vmem:[%s1384_s8 + $0x8] sm:$0xff] %v306_v1  ;;  %v310_v3 = vld [vmem:[%s1379_s7 + $0x30] sm:$0xff] }
  0x1b   : > { %309 = vst [vmem:[%s1384_s8 + $0x10] sm:$0xff] %v308_v2  ;;  %v312_v4 = vld [vmem:[%s1379_s7 + $0x40] sm:$0xff]  ;;  %v314_v5 = vld [vmem:[%s1379_s7 + $0x50] sm:$0xff]  ;;  %311 = vst [vmem:[%s1384_s8 + $0x18] sm:$0xff] %v310_v3 }
  0x1c   : > { %313 = vst [vmem:[%s1384_s8 + $0x20] sm:$0xff] %v312_v4  ;;  %315 = vst [vmem:[%s1384_s8 + $0x28] sm:$0xff] %v314_v5  ;;  %v316_v6 = vld [vmem:[%s1379_s7 + $0x60] sm:$0xff]  ;;  %v318_v7 = vld [vmem:[%s1379_s7 + $0x70] sm:$0xff] }
  0x1d   : > { %v320_v8 = vld [vmem:[%s1379_s7 + $0x80] sm:$0xff]  ;;  %317 = vst [vmem:[%s1384_s8 + $0x30] sm:$0xff] %v316_v6  ;;  %319 = vst [vmem:[%s1384_s8 + $0x38] sm:$0xff] %v318_v7  ;;  %v322_v9 = vld [vmem:[%s1379_s7 + $0x90] sm:$0xff] }
  0x1e   : > { %321 = vst [vmem:[%s1384_s8 + $0x40] sm:$0xff] %v320_v8  ;;  %v324_v10 = vld [vmem:[%s1379_s7 + $0xa0] sm:$0xff]  ;;  %v326_v11 = vld [vmem:[%s1379_s7 + $0xb0] sm:$0xff]  ;;  %323 = vst [vmem:[%s1384_s8 + $0x48] sm:$0xff] %v322_v9 }
  0x1f   : > { %325 = vst [vmem:[%s1384_s8 + $0x50] sm:$0xff] %v324_v10  ;;  %327 = vst [vmem:[%s1384_s8 + $0x58] sm:$0xff] %v326_v11  ;;  %v328_v12 = vld [vmem:[%s1379_s7 + $0xc0] sm:$0xff]  ;;  %v330_v13 = vld [vmem:[%s1379_s7 + $0xd0] sm:$0xff] }
  0x20   : > { %v332_v14 = vld [vmem:[%s1379_s7 + $0xe0] sm:$0xff]  ;;  %329 = vst [vmem:[%s1384_s8 + $0x60] sm:$0xff] %v328_v12  ;;  %331 = vst [vmem:[%s1384_s8 + $0x68] sm:$0xff] %v330_v13  ;;  %v334_v15 = vld [vmem:[%s1379_s7 + $0xf0] sm:$0xff] }
  0x21   : > { %333 = vst [vmem:[%s1384_s8 + $0x70] sm:$0xff] %v332_v14  ;;  %v336_v16 = vld [vmem:[%s1379_s7 + $0x100] sm:$0xff]  ;;  %v338_v17 = vld [vmem:[%s1379_s7 + $0x110] sm:$0xff]  ;;  %335 = vst [vmem:[%s1384_s8 + $0x78] sm:$0xff] %v334_v15 }
  0x22   : > { %337 = vst [vmem:[%s1384_s8 + $0x80] sm:$0xff] %v336_v16  ;;  %339 = vst [vmem:[%s1384_s8 + $0x88] sm:$0xff] %v338_v17  ;;  %v340_v18 = vld [vmem:[%s1379_s7 + $0x120] sm:$0xff]  ;;  %v342_v19 = vld [vmem:[%s1379_s7 + $0x130] sm:$0xff] }
  0x23   : > { %v344_v20 = vld [vmem:[%s1379_s7 + $0x140] sm:$0xff]  ;;  %341 = vst [vmem:[%s1384_s8 + $0x90] sm:$0xff] %v340_v18  ;;  %343 = vst [vmem:[%s1384_s8 + $0x98] sm:$0xff] %v342_v19  ;;  %v346_v21 = vld [vmem:[%s1379_s7 + $0x150] sm:$0xff] }
  0x24   : > { %345 = vst [vmem:[%s1384_s8 + $0xa0] sm:$0xff] %v344_v20  ;;  %v348_v22 = vld [vmem:[%s1379_s7 + $0x160] sm:$0xff]  ;;  %v350_v23 = vld [vmem:[%s1379_s7 + $0x170] sm:$0xff]  ;;  %347 = vst [vmem:[%s1384_s8 + $0xa8] sm:$0xff] %v346_v21 }
  0x25   : > { %349 = vst [vmem:[%s1384_s8 + $0xb0] sm:$0xff] %v348_v22  ;;  %351 = vst [vmem:[%s1384_s8 + $0xb8] sm:$0xff] %v350_v23  ;;  %v352_v24 = vld [vmem:[%s1379_s7 + $0x180] sm:$0xff]  ;;  %v354_v25 = vld [vmem:[%s1379_s7 + $0x190] sm:$0xff] }
  0x26   : > { %v356_v26 = vld [vmem:[%s1379_s7 + $0x1a0] sm:$0xff]  ;;  %353 = vst [vmem:[%s1384_s8 + $0xc0] sm:$0xff] %v352_v24  ;;  %355 = vst [vmem:[%s1384_s8 + $0xc8] sm:$0xff] %v354_v25  ;;  %v358_v27 = vld [vmem:[%s1379_s7 + $0x1b0] sm:$0xff] }
  0x27   : > { %357 = vst [vmem:[%s1384_s8 + $0xd0] sm:$0xff] %v356_v26  ;;  %v360_v28 = vld [vmem:[%s1379_s7 + $0x1c0] sm:$0xff]  ;;  %v362_v29 = vld [vmem:[%s1379_s7 + $0x1d0] sm:$0xff]  ;;  %359 = vst [vmem:[%s1384_s8 + $0xd8] sm:$0xff] %v358_v27 }
  0x28   : > { %361 = vst [vmem:[%s1384_s8 + $0xe0] sm:$0xff] %v360_v28  ;;  %363 = vst [vmem:[%s1384_s8 + $0xe8] sm:$0xff] %v362_v29  ;;  %v364_v30 = vld [vmem:[%s1379_s7 + $0x1e0] sm:$0xff]  ;;  %v366_v31 = vld [vmem:[%s1379_s7 + $0x1f0] sm:$0xff] }
  0x29   : > { %v368_v32 = vld [vmem:[%s1379_s7 + $0x200] sm:$0xff]  ;;  %365 = vst [vmem:[%s1384_s8 + $0xf0] sm:$0xff] %v364_v30  ;;  %367 = vst [vmem:[%s1384_s8 + $0xf8] sm:$0xff] %v366_v31  ;;  %v370_v33 = vld [vmem:[%s1379_s7 + $0x210] sm:$0xff] }
  0x2a   : > { %369 = vst [vmem:[%s1384_s8 + $0x100] sm:$0xff] %v368_v32  ;;  %v372_v34 = vld [vmem:[%s1379_s7 + $0x220] sm:$0xff]  ;;  %v374_v35 = vld [vmem:[%s1379_s7 + $0x230] sm:$0xff]  ;;  %371 = vst [vmem:[%s1384_s8 + $0x108] sm:$0xff] %v370_v33 }
  0x2b   : > { %373 = vst [vmem:[%s1384_s8 + $0x110] sm:$0xff] %v372_v34  ;;  %375 = vst [vmem:[%s1384_s8 + $0x118] sm:$0xff] %v374_v35  ;;  %v376_v36 = vld [vmem:[%s1379_s7 + $0x240] sm:$0xff]  ;;  %v378_v37 = vld [vmem:[%s1379_s7 + $0x250] sm:$0xff] }
  0x2c   : > { %v380_v38 = vld [vmem:[%s1379_s7 + $0x260] sm:$0xff]  ;;  %377 = vst [vmem:[%s1384_s8 + $0x120] sm:$0xff] %v376_v36  ;;  %379 = vst [vmem:[%s1384_s8 + $0x128] sm:$0xff] %v378_v37  ;;  %v382_v39 = vld [vmem:[%s1379_s7 + $0x270] sm:$0xff] }
  0x2d   : > { %381 = vst [vmem:[%s1384_s8 + $0x130] sm:$0xff] %v380_v38  ;;  %v384_v40 = vld [vmem:[%s1379_s7 + $0x280] sm:$0xff]  ;;  %v386_v41 = vld [vmem:[%s1379_s7 + $0x290] sm:$0xff]  ;;  %383 = vst [vmem:[%s1384_s8 + $0x138] sm:$0xff] %v382_v39 }
  0x2e   : > { %385 = vst [vmem:[%s1384_s8 + $0x140] sm:$0xff] %v384_v40  ;;  %387 = vst [vmem:[%s1384_s8 + $0x148] sm:$0xff] %v386_v41  ;;  %v388_v42 = vld [vmem:[%s1379_s7 + $0x2a0] sm:$0xff]  ;;  %v390_v43 = vld [vmem:[%s1379_s7 + $0x2b0] sm:$0xff] }
  0x2f   : > { %v392_v44 = vld [vmem:[%s1379_s7 + $0x2c0] sm:$0xff]  ;;  %389 = vst [vmem:[%s1384_s8 + $0x150] sm:$0xff] %v388_v42  ;;  %391 = vst [vmem:[%s1384_s8 + $0x158] sm:$0xff] %v390_v43  ;;  %v394_v45 = vld [vmem:[%s1379_s7 + $0x2d0] sm:$0xff] }
  0x30   : > { %393 = vst [vmem:[%s1384_s8 + $0x160] sm:$0xff] %v392_v44  ;;  %v396_v46 = vld [vmem:[%s1379_s7 + $0x2e0] sm:$0xff]  ;;  %v398_v47 = vld [vmem:[%s1379_s7 + $0x2f0] sm:$0xff]  ;;  %395 = vst [vmem:[%s1384_s8 + $0x168] sm:$0xff] %v394_v45 }
  0x31   : > { %397 = vst [vmem:[%s1384_s8 + $0x170] sm:$0xff] %v396_v46  ;;  %399 = vst [vmem:[%s1384_s8 + $0x178] sm:$0xff] %v398_v47 }
  0x32 PF: > { %p1043_p7 = scmp.ge.s32.totalorder %s1295_s18, 1  ;;  %p412_p8 = scmp.lt.s32.totalorder %s1295_s18, 13 }
  0x34   : > { %p413_p9 = pnand %p1043_p7, %p412_p8 }
  0x35   : > { %s419_s9 = sand.u32 (!%p413_p9), 1, %s1271_s12   ;;  %s459_s10 = smul.u32 (!%p413_p9), 3, %s1279_s14 }
  0x36   : > { %416 = sbr.rel (%p413_p9) target bundleno = 368 (0x170), region = 66  ;;  %s1045_s21 = sshll.u32 (!%p413_p9), %s1283_s15, 1 }
  0x37   : > { %s1107_s11 = smul.u32 (!%p413_p9), 384, %s419_s9  ;;  %p462_p10 = scmp.lt.s32.totalorder (!%p413_p9), %s459_s10, 17 }
  0x38   : > { %p472_p11 = scmp.lt.s32.totalorder (!%p413_p9), %s1045_s21, 3  ;;  %p1048_p12 = scmp.ne.s32.totalorder (!%p413_p9), %s1279_s14, 0 }
  0x39   : > { %s1501_s5 = scalar_lea.vmem (!%p413_p9), [#allocation3], %s1107_s11 }
  0x3d   : > { %s1599_s10 = smov (!%p462_p10, %s459_s10), 17  ;;  %s1601_s21 = smov (!%p472_p11, %s1045_s21), 3 }
  0x3e   : > { %s1044_s22 = sshll.u32 %s1599_s10, 2  ;;  %s474_s12 = scalar_lea.vmem %s1584_s2, %s1601_s21  ;;  %v1297_v48 = vmov (!%p1048_p12), 0.0  }
  0x3f   : > { %s1489_s26 = scalar_lea.vmem %s1582_s0, %s1044_s22  ;;  %s1047_s29 = sshll.u32 %s1601_s21, 2  ;;  %491 = vst [vmem:[#allocation2] sm:$0xff] (!%p1048_p12), %v1297_v48  ;;  %492 = vst [vmem:[#allocation2 + $0x8] sm:$0xff] (!%p1048_p12), %v1297_v48 }
  0x40   : > { %s1499_s4 = scalar_lea.vmem %s1585_s3, %s1047_s29  ;;  %490 = sbr.rel (%p1048_p12) target bundleno = 71 (0x47), region = 74 }
  0x47 PF: > { %v1166_v49 = vld [vmem:[%s1501_s5 + $0x4] ss:$8 sps:$4 sm:$0xff]   ;;  %v1168_v50 = vld [vmem:[%s1501_s5] ss:$8 sps:$4 sm:$0xff]   ;;  %v1298_v51 = vmov 0   ;;  %v495_v18 = vld [vmem:[%s1489_s26] sm:$0xff] }
  0x48   : > { %869 = vmatprep.mubr.bf16.mxu1 %v1298_v51  ;;  %796 = vmatprep.subr.bf16.mxu0 %v1166_v49  ;;  %v1169_v52 = vld [vmem:[%s1501_s5 + $0x14] ss:$8 sps:$4 sm:$0xff]   ;;  %v1171_v53 = vld [vmem:[%s1501_s5 + $0x10] ss:$8 sps:$4 sm:$0xff]   ;;  %v1172_v54 = vld [vmem:[%s1501_s5 + $0x24] ss:$8 sps:$4 sm:$0xff]   ;;  %v1050_v19 = vcombine.high %v495_v18, %v495_v18  ;;  %v1049_v37 = vcombine.low %v495_v18, %v495_v18 }
  0x49   : > { %797 = vmatpush1.bf16.msra.mxu0 %v1168_v50  ;;  %v1174_v55 = vld [vmem:[%s1501_s5 + $0x20] ss:$8 sps:$4 sm:$0xff]   ;;  %v1175_v56 = vld [vmem:[%s1501_s5 + $0x34] ss:$8 sps:$4 sm:$0xff]   ;;  %v1177_v57 = vld [vmem:[%s1501_s5 + $0x30] ss:$8 sps:$4 sm:$0xff]  }
  0x4a   : > { %798 = vmatprep.subr.bf16.mxu0 %v1169_v52  ;;  %v1190_v58 = vld [vmem:[%s1501_s5 + $0x104] ss:$8 sps:$4 sm:$0xff]   ;;  %v1192_v59 = vld [vmem:[%s1501_s5 + $0x100] ss:$8 sps:$4 sm:$0xff]   ;;  %v1196_v61 = vld [vmem:[%s1501_s5 + $0x114] ss:$8 sps:$4 sm:$0xff]   ;;  %828 = vmatprep.mubr.bf16.mxu0 %v1050_v19 }
  0x4b   : > { %v1178_v60 = vld [vmem:[%s1501_s5 + $0x44] ss:$8 sps:$4 sm:$0xff]   ;;  %837 = vmatprep.subr.bf16.mxu1 %v1190_v58  ;;  %v1198_v62 = vld [vmem:[%s1501_s5 + $0x110] ss:$8 sps:$4 sm:$0xff]   ;;  %v1180_v63 = vld [vmem:[%s1501_s5 + $0x40] ss:$8 sps:$4 sm:$0xff]  }
  0x4c   : > { %838 = vmatpush1.bf16.msra.mxu1 %v1192_v59  ;;  %v1181_v0 = vld [vmem:[%s1501_s5 + $0x54] ss:$8 sps:$4 sm:$0xff]   ;;  %v1202_v1 = vld [vmem:[%s1501_s5 + $0x124] ss:$8 sps:$4 sm:$0xff]   ;;  %v1204_v2 = vld [vmem:[%s1501_s5 + $0x120] ss:$8 sps:$4 sm:$0xff]  }
  0x4d   : > { %799 = vmatpush1.bf16.msra.mxu0 %v1171_v53  ;;  %839 = vmatprep.subr.bf16.mxu1 %v1196_v61  ;;  %v1183_v3 = vld [vmem:[%s1501_s5 + $0x50] ss:$8 sps:$4 sm:$0xff]   ;;  %v1208_v4 = vld [vmem:[%s1501_s5 + $0x134] ss:$8 sps:$4 sm:$0xff]   ;;  %v1184_v5 = vld [vmem:[%s1501_s5 + $0x64] ss:$8 sps:$4 sm:$0xff]  }
  0x4e   : > { %800 = vmatprep.subr.bf16.mxu0 %v1172_v54  ;;  %v1210_v6 = vld [vmem:[%s1501_s5 + $0x130] ss:$8 sps:$4 sm:$0xff]   ;;  %v1186_v7 = vld [vmem:[%s1501_s5 + $0x60] ss:$8 sps:$4 sm:$0xff]   ;;  %v1214_v8 = vld [vmem:[%s1501_s5 + $0x144] ss:$8 sps:$4 sm:$0xff]  }
  0x4f   : > { %v1187_v9 = vld [vmem:[%s1501_s5 + $0x74] ss:$8 sps:$4 sm:$0xff]   ;;  %v1216_v10 = vld [vmem:[%s1501_s5 + $0x140] ss:$8 sps:$4 sm:$0xff]   ;;  %v1189_v11 = vld [vmem:[%s1501_s5 + $0x70] ss:$8 sps:$4 sm:$0xff]  }
  0x50   : > { %840 = vmatpush1.bf16.msra.mxu1 %v1198_v62  ;;  %v1220_v12 = vld [vmem:[%s1501_s5 + $0x154] ss:$8 sps:$4 sm:$0xff]   ;;  %v1193_v13 = vld [vmem:[%s1501_s5 + $0x84] ss:$8 sps:$4 sm:$0xff]   ;;  %v1222_v14 = vld [vmem:[%s1501_s5 + $0x150] ss:$8 sps:$4 sm:$0xff]  }
  0x51   : > { %801 = vmatpush1.bf16.msra.mxu0 %v1174_v55  ;;  %841 = vmatprep.subr.bf16.mxu1 %v1202_v1  ;;  %v1195_v15 = vld [vmem:[%s1501_s5 + $0x80] ss:$8 sps:$4 sm:$0xff]   ;;  %v1226_v16 = vld [vmem:[%s1501_s5 + $0x164] ss:$8 sps:$4 sm:$0xff]   ;;  %v1199_v17 = vld [vmem:[%s1501_s5 + $0x94] ss:$8 sps:$4 sm:$0xff]  }
  0x52   : > { %802 = vmatprep.subr.bf16.mxu0 %v1175_v56  ;;  %v1228_v20 = vld [vmem:[%s1501_s5 + $0x160] ss:$8 sps:$4 sm:$0xff]   ;;  %v1201_v21 = vld [vmem:[%s1501_s5 + $0x90] ss:$8 sps:$4 sm:$0xff]   ;;  %v1232_v22 = vld [vmem:[%s1501_s5 + $0x174] ss:$8 sps:$4 sm:$0xff]  }
  0x53   : > { %v1205_v23 = vld [vmem:[%s1501_s5 + $0xa4] ss:$8 sps:$4 sm:$0xff]   ;;  %v1234_v24 = vld [vmem:[%s1501_s5 + $0x170] ss:$8 sps:$4 sm:$0xff]   ;;  %v1207_v25 = vld [vmem:[%s1501_s5 + $0xa0] ss:$8 sps:$4 sm:$0xff]  }
  0x54   : > { %842 = vmatpush1.bf16.msra.mxu1 %v1204_v2  ;;  %v1211_v26 = vld [vmem:[%s1501_s5 + $0xb4] ss:$8 sps:$4 sm:$0xff]   ;;  %v1238_v27 = vld [vmem:[%s1489_s26 + $0x8] ss:$0 sps:$4 sm:$0xff]   ;;  %v1217_v29 = vld [vmem:[%s1501_s5 + $0xc4] ss:$8 sps:$4 sm:$0xff]  }
  0x55   : > { %803 = vmatpush1.bf16.msra.mxu0 %v1177_v57  ;;  %843 = vmatprep.subr.bf16.mxu1 %v1208_v4  ;;  %v1213_v28 = vld [vmem:[%s1501_s5 + $0xb0] ss:$8 sps:$4 sm:$0xff]   ;;  %v1219_v30 = vld [vmem:[%s1501_s5 + $0xc0] ss:$8 sps:$4 sm:$0xff]   ;;  %v1223_v31 = vld [vmem:[%s1501_s5 + $0xd4] ss:$8 sps:$4 sm:$0xff]  }
  0x56   : > { %804 = vmatprep.subr.bf16.mxu0 %v1178_v60  ;;  %v1225_v32 = vld [vmem:[%s1501_s5 + $0xd0] ss:$8 sps:$4 sm:$0xff]   ;;  %v1229_v33 = vld [vmem:[%s1501_s5 + $0xe4] ss:$8 sps:$4 sm:$0xff]   ;;  %v1231_v34 = vld [vmem:[%s1501_s5 + $0xe0] ss:$8 sps:$4 sm:$0xff]  }
  0x57   : > { %v1235_v35 = vld [vmem:[%s1501_s5 + $0xf4] ss:$8 sps:$4 sm:$0xff]   ;;  %v1237_v36 = vld [vmem:[%s1501_s5 + $0xf0] ss:$8 sps:$4 sm:$0xff]   ;;  %p1100_p13 = scmp.ne.s32.totalorder %s1279_s14, 5 }
  0x58   : > { %844 = vmatpush1.bf16.msra.mxu1 %v1210_v6  ;;  %v493_v42 = vld [vmem:[#allocation2] sm:$0xff]  ;;  %v494_v45 = vld [vmem:[#allocation2 + $0x8] sm:$0xff]  ;;  %v890_v52 = vlaneseq (!%p1100_p13) }
  0x59   : > { %805 = vmatpush1.bf16.msra.mxu0 %v1180_v63  ;;  %845 = vmatprep.subr.bf16.mxu1 %v1214_v8  ;;  %v888_v54 = vld [vmem:[%s474_s12] sm:$0x3] (!%p1100_p13) }
  0x5a   : > { %806 = vmatprep.subr.bf16.mxu0 %v1181_v0  ;;  %v891_v53 = vshrl.u32 (!%p1100_p13), %v890_v52, 7 }
  0x5c   : > { %846 = vmatpush1.bf16.msra.mxu1 %v1216_v10  ;;  %v892_v55 = vsub.s32 (!%p1100_p13), 0, %v891_v53  ;;  %v896_v56 = vsub.s32 (!%p1100_p13), 1, %v891_v53 }
  0x5d   : > { %807 = vmatpush1.bf16.msra.mxu0 %v1183_v3  ;;  %847 = vmatprep.subr.bf16.mxu1 %v1220_v12 }
  0x5e   : > { %808 = vmatprep.subr.bf16.mxu0 %v1184_v5  ;;  %v893_v59 = vrot.slane (!%p1100_p13), %v888_v54, %v892_v55  ;;  %v897_v60 = vrot.slane (!%p1100_p13), %v888_v54, %v896_v56 }
  0x60   : > { %848 = vmatpush1.bf16.msra.mxu1 %v1222_v14 }
  0x61   : > { %809 = vmatpush1.bf16.msra.mxu0 %v1186_v7  ;;  %849 = vmatprep.subr.bf16.mxu1 %v1226_v16 }
  0x62   : > { %810 = vmatprep.subr.bf16.mxu0 %v1187_v9 }
  0x64   : > { %850 = vmatpush1.bf16.msra.mxu1 %v1228_v20 }
  0x65   : > { %811 = vmatpush1.bf16.msra.mxu0 %v1189_v11  ;;  %851 = vmatprep.subr.bf16.mxu1 %v1232_v22 }
  0x66   : > { %812 = vmatprep.subr.bf16.mxu0 %v1193_v13 }
  0x68   : > { %852 = vmatpush1.bf16.msra.mxu1 %v1234_v24 }
  0x69   : > { %813 = vmatpush1.bf16.msra.mxu0 %v1195_v15 }
  0x6a   : > { %814 = vmatprep.subr.bf16.mxu0 %v1199_v17 }
  0x6b   : > { %870 = vmatmul.mubr.bf16.vlgmr.msra.gmra.mrb[0].mxu1 %v1238_v27 }
  0x6d   : > { %815 = vmatpush1.bf16.msra.mxu0 %v1201_v21 }
  0x6e   : > { %816 = vmatprep.subr.bf16.mxu0 %v1205_v23 }
  0x71   : > { %817 = vmatpush1.bf16.msra.mxu0 %v1207_v25 }
  0x72   : > { %818 = vmatprep.subr.bf16.mxu0 %v1211_v26 }
  0x75   : > { %819 = vmatpush1.bf16.msra.mxu0 %v1213_v28 }
  0x76   : > { %820 = vmatprep.subr.bf16.mxu0 %v1217_v29 }
  0x79   : > { %821 = vmatpush1.bf16.msra.mxu0 %v1219_v30 }
  0x7a   : > { %822 = vmatprep.subr.bf16.mxu0 %v1223_v31 }
  0x7d   : > { %823 = vmatpush1.bf16.msra.mxu0 %v1225_v32 }
  0x7e   : > { %824 = vmatprep.subr.bf16.mxu0 %v1229_v33 }
  0x81   : > { %825 = vmatpush1.bf16.msra.mxu0 %v1231_v34 }
  0x82   : > { %826 = vmatprep.subr.bf16.mxu0 %v1235_v35 }
  0x85   : > { %827 = vmatpush1.bf16.msra.mxu0 %v1237_v36 }
  0x88   : > { %829 = vmatmul.mubr.bf16.vlgmr.msra.gmra.mrb[0].mxu0 %v1049_v37 }
 0x13e   : > { %v871_v38 = vpop.f32.mrb[0].mxu1 }
 0x13f   : > { %v873_v39 = vpop.f32.mrb[1].mxu1 }
 0x140   : > { %v875_v40 = vpop.f32.mrb[2].mxu1 }
 0x141   : > { %v876_v41 = vpop.f32.mrb[3].mxu1 }
 0x15b   : > { %v830_v43 = vpop.f32.mrb[0].mxu0  ;;  %885 = sbr.rel (%p1100_p13) target bundleno = 368 (0x170), region = 78 }
 0x15c   : > { %v872_v44 = vadd.f32 %v871_v38, %v830_v43  ;;  %v832_v46 = vpop.f32.mrb[1].mxu0 }
 0x15d   : > { %v874_v47 = vadd.f32 %v873_v39, %v832_v46  ;;  %v834_v48 = vpop.f32.mrb[2].mxu0 }
 0x15e   : > { %v878_v49 = vadd.f32 %v872_v44, %v493_v42  ;;  %v835_v50 = vpop.f32.mrb[3].mxu0 }
 0x15f   : > { %v879_v51 = vadd.f32 %v874_v47, %v494_v45 }
 0x160   : > { %880 = vst [vmem:[#allocation2] sm:$0xff] %v878_v49 }
 0x161   : > { %881 = vst [vmem:[#allocation2 + $0x8] sm:$0xff] %v879_v51 }
 0x167   : > { %v886_v57 = vld [vmem:[#allocation2] sm:$0xff] }
 0x168   : > { %v887_v58 = vld [vmem:[#allocation2 + $0x8] sm:$0xff]  ;;  %v900_v61 = vadd.f32 %v893_v59, %v886_v57 }
 0x169   : > { %v901_v62 = vadd.f32 %v897_v60, %v887_v58 }
 0x16a   : > { %v902_v63 = vmax.f32 %v900_v61, 0.0 }
 0x16b   : > { %v903_v0 = vmax.f32 %v901_v62, 0.0 }
 0x16d   : > { %v1105_v1 = vpack.c.bf16 %v903_v0, %v902_v63 }
 0x16f   : > { %912 = vst [vmem:[%s1499_s4] sm:$0xff] %v1105_v1 }
 0x170 PF: > { %s13_s18 = sadd.s32 1, %s1295_s18   ;;  %s1586_s12 = smov %s1275_s13 }
 0x171   : > { %p10_p0 = scmp.ge.s32.totalorder %s13_s18, 14   ;;  %s1587_s13 = smov %s1370_s25 }
 0x172   : > { %s1588_s14 = smov %s1287_s16  ;;  %s1589_s15 = smov %s1291_s17 }
 0x173   : > { %s1590_s16 = smov %s1593_s19  ;;  %s1591_s17 = smov %s1597_s20 }
 0x174   :  { %12 = sbr.rel (!%p10_p0) target bundleno = 4 (0x4), region = 119 }

// kernel: resnet34_forward.69
= control target key start
LH: loop header
LB: loop body
LE: loop exit
PB: predicated region body
PF: predicated region fallthrough
CT: control target
= control target key end

     0   :  { %s1028_s12 = smov 0   ;;  %s1030_s13 = smov 0   ;;  %s1207_s0 = inlined_call_operand.vmem [shape: bf16[8,256], index: 0, kind: input, shape index: {}]   ;;  %s1208_s1 = inlined_call_operand.vmem [shape: bf16[256,512], index: 1, kind: input, shape index: {}]   ;;  %s1209_s2 = inlined_call_operand.vmem [shape: f32[1,512], index: 2, kind: input, shape index: {}]   ;;  %s1210_s3 = inlined_call_operand.vmem [shape: bf16[8,512], index: 3, kind: output, shape index: {}]  }
   0x1   :  { %s1032_s14 = smov 0   ;;  %s1034_s15 = smov 0  }
   0x2   :  { %s1036_s16 = smov 0  }
   0x3 LB: > { %s28_s17 = sadd.s32 1, %s1002_s15  ;;  %p76_p1 = scmp.ne.s32.totalorder %s994_s13, %s990_s12  ;;  %s1006_s16 = sphi %s1036_s16, %s13_s16   ;;  %s1002_s15 = sphi %s1034_s15, %s1214_s15   ;;  %s998_s14 = sphi %s1032_s14, %s1213_s14   ;;  %s994_s13 = sphi %s1030_s13, %s1212_s13   ;;  %s990_s12 = sphi %s1028_s12, %s1211_s12  }
   0x4   : > { %p30_p0 = scmp.ge.s32.totalorder %s28_s17, 2  ;;  %p77_p2 = scmp.eq.s32.totalorder %s1006_s16, 0 }
   0x5   : > { %s69_s19 = sadd.s32 1, %s994_s13  ;;  %p830_p5 = scmp.ge.s32.totalorder %s1006_s16, 2 }
   0x6   : > { %s1216_s17 = smov (%p30_p0, %s28_s17), 0  ;;  %p78_p3 = por %p77_p2, %p76_p1 }
   0x7   : > { %s65_s18 = ssub.s32 %s1002_s15, %s1216_s17  ;;  %169 = sbr.rel (%p830_p5) target bundleno = 34 (0x22), region = 20 }
   0x8   : > { %p67_p4 = scmp.eq.s32.totalorder %s65_s18, 0 }
   0xa   : > { %s1063_s20 = scalar_select %p67_p4, %s994_s13, %s69_s19  }
   0xe   : > { %172 = sbr.rel (!%p78_p3) target bundleno = 34 (0x22), region = 24  ;;  %s174_s21 = sand.u32 (%p78_p3), 1, %s994_s13  }
   0xf   : > { %s876_s22 = sshll.u32 (%p78_p3), %s1002_s15, 3  ;;  %s831_s23 = sshll.u32 (%p78_p3), %s174_s21, 8 }
  0x10   : > { %s1071_s26 = scalar_lea.vmem (%p78_p3), %s1208_s1, %s876_s22  ;;  %s1076_s27 = scalar_lea.vmem (%p78_p3), [#allocation3], %s831_s23 }
  0x11   : > { %v272_v0 = vld [vmem:[%s1071_s26] sm:$0xff] (%p78_p3)  ;;  %v274_v1 = vld [vmem:[%s1071_s26 + $0x10] sm:$0xff] (%p78_p3) }
  0x12   : > { %v276_v2 = vld [vmem:[%s1071_s26 + $0x20] sm:$0xff] (%p78_p3)  ;;  %273 = vst [vmem:[%s1076_s27] sm:$0xff] (%p78_p3), %v272_v0  ;;  %275 = vst [vmem:[%s1076_s27 + $0x8] sm:$0xff] (%p78_p3), %v274_v1  ;;  %v278_v3 = vld [vmem:[%s1071_s26 + $0x30] sm:$0xff] (%p78_p3) }
  0x13   : > { %277 = vst [vmem:[%s1076_s27 + $0x10] sm:$0xff] (%p78_p3), %v276_v2  ;;  %v280_v4 = vld [vmem:[%s1071_s26 + $0x40] sm:$0xff] (%p78_p3)  ;;  %v282_v5 = vld [vmem:[%s1071_s26 + $0x50] sm:$0xff] (%p78_p3)  ;;  %279 = vst [vmem:[%s1076_s27 + $0x18] sm:$0xff] (%p78_p3), %v278_v3 }
  0x14   : > { %281 = vst [vmem:[%s1076_s27 + $0x20] sm:$0xff] (%p78_p3), %v280_v4  ;;  %283 = vst [vmem:[%s1076_s27 + $0x28] sm:$0xff] (%p78_p3), %v282_v5  ;;  %v284_v6 = vld [vmem:[%s1071_s26 + $0x60] sm:$0xff] (%p78_p3)  ;;  %v286_v7 = vld [vmem:[%s1071_s26 + $0x70] sm:$0xff] (%p78_p3) }
  0x15   : > { %v288_v8 = vld [vmem:[%s1071_s26 + $0x80] sm:$0xff]  ;;  %285 = vst [vmem:[%s1076_s27 + $0x30] sm:$0xff] %v284_v6  ;;  %287 = vst [vmem:[%s1076_s27 + $0x38] sm:$0xff] %v286_v7  ;;  %v290_v9 = vld [vmem:[%s1071_s26 + $0x90] sm:$0xff] }
  0x16   : > { %289 = vst [vmem:[%s1076_s27 + $0x40] sm:$0xff] %v288_v8  ;;  %v292_v10 = vld [vmem:[%s1071_s26 + $0xa0] sm:$0xff]  ;;  %v294_v11 = vld [vmem:[%s1071_s26 + $0xb0] sm:$0xff]  ;;  %291 = vst [vmem:[%s1076_s27 + $0x48] sm:$0xff] %v290_v9 }
  0x17   : > { %293 = vst [vmem:[%s1076_s27 + $0x50] sm:$0xff] %v292_v10  ;;  %295 = vst [vmem:[%s1076_s27 + $0x58] sm:$0xff] %v294_v11  ;;  %v296_v12 = vld [vmem:[%s1071_s26 + $0xc0] sm:$0xff]  ;;  %v298_v13 = vld [vmem:[%s1071_s26 + $0xd0] sm:$0xff] }
  0x18   : > { %v300_v14 = vld [vmem:[%s1071_s26 + $0xe0] sm:$0xff]  ;;  %297 = vst [vmem:[%s1076_s27 + $0x60] sm:$0xff] %v296_v12  ;;  %299 = vst [vmem:[%s1076_s27 + $0x68] sm:$0xff] %v298_v13  ;;  %v302_v15 = vld [vmem:[%s1071_s26 + $0xf0] sm:$0xff] }
  0x19   : > { %301 = vst [vmem:[%s1076_s27 + $0x70] sm:$0xff] %v300_v14  ;;  %v304_v16 = vld [vmem:[%s1071_s26 + $0x100] sm:$0xff]  ;;  %v306_v17 = vld [vmem:[%s1071_s26 + $0x110] sm:$0xff]  ;;  %303 = vst [vmem:[%s1076_s27 + $0x78] sm:$0xff] %v302_v15 }
  0x1a   : > { %305 = vst [vmem:[%s1076_s27 + $0x80] sm:$0xff] %v304_v16  ;;  %307 = vst [vmem:[%s1076_s27 + $0x88] sm:$0xff] %v306_v17  ;;  %v308_v18 = vld [vmem:[%s1071_s26 + $0x120] sm:$0xff]  ;;  %v310_v19 = vld [vmem:[%s1071_s26 + $0x130] sm:$0xff] }
  0x1b   : > { %v312_v20 = vld [vmem:[%s1071_s26 + $0x140] sm:$0xff]  ;;  %309 = vst [vmem:[%s1076_s27 + $0x90] sm:$0xff] %v308_v18  ;;  %311 = vst [vmem:[%s1076_s27 + $0x98] sm:$0xff] %v310_v19  ;;  %v314_v21 = vld [vmem:[%s1071_s26 + $0x150] sm:$0xff] }
  0x1c   : > { %313 = vst [vmem:[%s1076_s27 + $0xa0] sm:$0xff] %v312_v20  ;;  %v316_v22 = vld [vmem:[%s1071_s26 + $0x160] sm:$0xff]  ;;  %v318_v23 = vld [vmem:[%s1071_s26 + $0x170] sm:$0xff]  ;;  %315 = vst [vmem:[%s1076_s27 + $0xa8] sm:$0xff] %v314_v21 }
  0x1d   : > { %317 = vst [vmem:[%s1076_s27 + $0xb0] sm:$0xff] %v316_v22  ;;  %319 = vst [vmem:[%s1076_s27 + $0xb8] sm:$0xff] %v318_v23  ;;  %v320_v24 = vld [vmem:[%s1071_s26 + $0x180] sm:$0xff]  ;;  %v322_v25 = vld [vmem:[%s1071_s26 + $0x190] sm:$0xff] }
  0x1e   : > { %v324_v26 = vld [vmem:[%s1071_s26 + $0x1a0] sm:$0xff]  ;;  %321 = vst [vmem:[%s1076_s27 + $0xc0] sm:$0xff] %v320_v24  ;;  %323 = vst [vmem:[%s1076_s27 + $0xc8] sm:$0xff] %v322_v25  ;;  %v326_v27 = vld [vmem:[%s1071_s26 + $0x1b0] sm:$0xff] }
  0x1f   : > { %325 = vst [vmem:[%s1076_s27 + $0xd0] sm:$0xff] %v324_v26  ;;  %v328_v28 = vld [vmem:[%s1071_s26 + $0x1c0] sm:$0xff]  ;;  %v330_v29 = vld [vmem:[%s1071_s26 + $0x1d0] sm:$0xff]  ;;  %327 = vst [vmem:[%s1076_s27 + $0xd8] sm:$0xff] %v326_v27 }
  0x20   : > { %329 = vst [vmem:[%s1076_s27 + $0xe0] sm:$0xff] %v328_v28  ;;  %331 = vst [vmem:[%s1076_s27 + $0xe8] sm:$0xff] %v330_v29  ;;  %v332_v30 = vld [vmem:[%s1071_s26 + $0x1e0] sm:$0xff]  ;;  %v334_v31 = vld [vmem:[%s1071_s26 + $0x1f0] sm:$0xff] }
  0x21   : > { %333 = vst [vmem:[%s1076_s27 + $0xf0] sm:$0xff] %v332_v30  ;;  %335 = vst [vmem:[%s1076_s27 + $0xf8] sm:$0xff] %v334_v31 }
  0x22 PF: > { %p834_p6 = scmp.ge.s32.totalorder %s1006_s16, 1  ;;  %p348_p7 = scmp.lt.s32.totalorder %s1006_s16, 3 }
  0x24   : > { %p349_p8 = pnand %p834_p6, %p348_p7 }
  0x25   : > { %s355_s28 = sand.u32 (!%p349_p8), 1, %s990_s12   ;;  %v1145_v32 = vld [vmem:[%s1207_s0] sm:$0xff] (!%p349_p8)  ;;  %s836_s6 = sshll.u32 (!%p349_p8), %s998_s14, 1  ;;  %v682_v3 = vlaneseq (!%p349_p8) }
  0x26   : > { %352 = sbr.rel (%p349_p8) target bundleno = 323 (0x143), region = 66  ;;  %s835_s4 = sshll.u32 (!%p349_p8), %s355_s28, 8  ;;  %v840_v33 = vcombine.high (!%p349_p8), %v1145_v32, %v1145_v32  ;;  %v839_v2 = vcombine.low (!%p349_p8), %v1145_v32, %v1145_v32 }
  0x27   : > { %s1149_s5 = scalar_lea.vmem (!%p349_p8), [#allocation3], %s835_s4  ;;  %p408_p9 = scmp.lt.s32.totalorder (!%p349_p8), %s836_s6, 3  ;;  %v683_v4 = vshrl.u32 (!%p349_p8), %v682_v3, 7 }
  0x28   : > { %v918_v34 = vld [vmem:[%s1149_s5 + $0x4] ss:$8 sps:$4 sm:$0xff] (!%p349_p8)   ;;  %662 = vmatprep.mubr.bf16.mxu0 (!%p349_p8), %v840_v33  ;;  %v920_v35 = vld [vmem:[%s1149_s5] ss:$8 sps:$4 sm:$0xff] (!%p349_p8)   ;;  %v921_v36 = vld [vmem:[%s1149_s5 + $0x14] ss:$8 sps:$4 sm:$0xff] (!%p349_p8)  }
  0x29   : > { %630 = vmatprep.subr.bf16.mxu0 (!%p349_p8), %v918_v34  ;;  %v923_v37 = vld [vmem:[%s1149_s5 + $0x10] ss:$8 sps:$4 sm:$0xff] (!%p349_p8)   ;;  %v924_v38 = vld [vmem:[%s1149_s5 + $0x24] ss:$8 sps:$4 sm:$0xff] (!%p349_p8)   ;;  %v926_v39 = vld [vmem:[%s1149_s5 + $0x20] ss:$8 sps:$4 sm:$0xff] (!%p349_p8)  }
  0x2a   : > { %631 = vmatpush1.bf16.msra.mxu0 (!%p349_p8), %v920_v35  ;;  %v927_v40 = vld [vmem:[%s1149_s5 + $0x34] ss:$8 sps:$4 sm:$0xff] (!%p349_p8)   ;;  %v929_v41 = vld [vmem:[%s1149_s5 + $0x30] ss:$8 sps:$4 sm:$0xff] (!%p349_p8)   ;;  %v930_v42 = vld [vmem:[%s1149_s5 + $0x44] ss:$8 sps:$4 sm:$0xff] (!%p349_p8)  }
  0x2b   : > { %632 = vmatprep.subr.bf16.mxu0 (!%p349_p8), %v921_v36  ;;  %v932_v43 = vld [vmem:[%s1149_s5 + $0x40] ss:$8 sps:$4 sm:$0xff] (!%p349_p8)   ;;  %v933_v44 = vld [vmem:[%s1149_s5 + $0x54] ss:$8 sps:$4 sm:$0xff] (!%p349_p8)   ;;  %v935_v45 = vld [vmem:[%s1149_s5 + $0x50] ss:$8 sps:$4 sm:$0xff] (!%p349_p8)  }
  0x2c   : > { %v936_v46 = vld [vmem:[%s1149_s5 + $0x64] ss:$8 sps:$4 sm:$0xff] (!%p349_p8)   ;;  %v938_v47 = vld [vmem:[%s1149_s5 + $0x60] ss:$8 sps:$4 sm:$0xff] (!%p349_p8)   ;;  %v939_v48 = vld [vmem:[%s1149_s5 + $0x74] ss:$8 sps:$4 sm:$0xff] (!%p349_p8)  }
  0x2d   : > { %v941_v49 = vld [vmem:[%s1149_s5 + $0x70] ss:$8 sps:$4 sm:$0xff]   ;;  %v942_v50 = vld [vmem:[%s1149_s5 + $0x84] ss:$8 sps:$4 sm:$0xff]   ;;  %v944_v51 = vld [vmem:[%s1149_s5 + $0x80] ss:$8 sps:$4 sm:$0xff]  }
  0x2e   : > { %633 = vmatpush1.bf16.msra.mxu0 %v923_v37  ;;  %v945_v52 = vld [vmem:[%s1149_s5 + $0x94] ss:$8 sps:$4 sm:$0xff]   ;;  %v947_v53 = vld [vmem:[%s1149_s5 + $0x90] ss:$8 sps:$4 sm:$0xff]   ;;  %v948_v54 = vld [vmem:[%s1149_s5 + $0xa4] ss:$8 sps:$4 sm:$0xff]  }
  0x2f   : > { %634 = vmatprep.subr.bf16.mxu0 %v924_v38  ;;  %v950_v55 = vld [vmem:[%s1149_s5 + $0xa0] ss:$8 sps:$4 sm:$0xff]   ;;  %v951_v56 = vld [vmem:[%s1149_s5 + $0xb4] ss:$8 sps:$4 sm:$0xff]   ;;  %v953_v57 = vld [vmem:[%s1149_s5 + $0xb0] ss:$8 sps:$4 sm:$0xff]  }
  0x30   : > { %v954_v58 = vld [vmem:[%s1149_s5 + $0xc4] ss:$8 sps:$4 sm:$0xff]   ;;  %v956_v59 = vld [vmem:[%s1149_s5 + $0xc0] ss:$8 sps:$4 sm:$0xff]   ;;  %v957_v60 = vld [vmem:[%s1149_s5 + $0xd4] ss:$8 sps:$4 sm:$0xff]  }
  0x31   : > { %v959_v61 = vld [vmem:[%s1149_s5 + $0xd0] ss:$8 sps:$4 sm:$0xff]   ;;  %v960_v62 = vld [vmem:[%s1149_s5 + $0xe4] ss:$8 sps:$4 sm:$0xff]   ;;  %v962_v63 = vld [vmem:[%s1149_s5 + $0xe0] ss:$8 sps:$4 sm:$0xff]  }
  0x32   : > { %635 = vmatpush1.bf16.msra.mxu0 %v926_v39  ;;  %v963_v0 = vld [vmem:[%s1149_s5 + $0xf4] ss:$8 sps:$4 sm:$0xff]   ;;  %v965_v1 = vld [vmem:[%s1149_s5 + $0xf0] ss:$8 sps:$4 sm:$0xff]   ;;  %s1218_s6 = smov (!%p408_p9, %s836_s6), 3  ;;  %v684_v5 = vsub.s32 0, %v683_v4 }
  0x33   : > { %636 = vmatprep.subr.bf16.mxu0 %v927_v40  ;;  %s410_s9 = scalar_lea.vmem %s1209_s2, %s1218_s6  ;;  %v688_v7 = vsub.s32 1, %v683_v4  ;;  %s838_s10 = sshll.u32 %s1218_s6, 2 }
  0x34   : > { %v680_v6 = vld [vmem:[%s410_s9] sm:$0x3]  ;;  %s420_s14 = scalar_lea.vmem %s1210_s3, %s838_s10 }
  0x35   : > { %v685_v8 = vrot.slane %v680_v6, %v684_v5  ;;  %v689_v9 = vrot.slane %v680_v6, %v688_v7 }
  0x36   : > { %637 = vmatpush1.bf16.msra.mxu0 %v929_v41 }
  0x37   : > { %638 = vmatprep.subr.bf16.mxu0 %v930_v42 }
  0x3a   : > { %639 = vmatpush1.bf16.msra.mxu0 %v932_v43 }
  0x3b   : > { %640 = vmatprep.subr.bf16.mxu0 %v933_v44 }
  0x3e   : > { %641 = vmatpush1.bf16.msra.mxu0 %v935_v45 }
  0x3f   : > { %642 = vmatprep.subr.bf16.mxu0 %v936_v46 }
  0x42   : > { %643 = vmatpush1.bf16.msra.mxu0 %v938_v47 }
  0x43   : > { %644 = vmatprep.subr.bf16.mxu0 %v939_v48 }
  0x46   : > { %645 = vmatpush1.bf16.msra.mxu0 %v941_v49 }
  0x47   : > { %646 = vmatprep.subr.bf16.mxu0 %v942_v50 }
  0x4a   : > { %647 = vmatpush1.bf16.msra.mxu0 %v944_v51 }
  0x4b   : > { %648 = vmatprep.subr.bf16.mxu0 %v945_v52 }
  0x4e   : > { %649 = vmatpush1.bf16.msra.mxu0 %v947_v53 }
  0x4f   : > { %650 = vmatprep.subr.bf16.mxu0 %v948_v54 }
  0x52   : > { %651 = vmatpush1.bf16.msra.mxu0 %v950_v55 }
  0x53   : > { %652 = vmatprep.subr.bf16.mxu0 %v951_v56 }
  0x56   : > { %653 = vmatpush1.bf16.msra.mxu0 %v953_v57 }
  0x57   : > { %654 = vmatprep.subr.bf16.mxu0 %v954_v58 }
  0x5a   : > { %655 = vmatpush1.bf16.msra.mxu0 %v956_v59 }
  0x5b   : > { %656 = vmatprep.subr.bf16.mxu0 %v957_v60 }
  0x5e   : > { %657 = vmatpush1.bf16.msra.mxu0 %v959_v61 }
  0x5f   : > { %658 = vmatprep.subr.bf16.mxu0 %v960_v62 }
  0x62   : > { %659 = vmatpush1.bf16.msra.mxu0 %v962_v63 }
  0x63   : > { %660 = vmatprep.subr.bf16.mxu0 %v963_v0 }
  0x66   : > { %661 = vmatpush1.bf16.msra.mxu0 %v965_v1 }
  0x69   : > { %663 = vmatmul.mubr.bf16.vlgmr.msra.gmra.mrb[0].mxu0 %v839_v2 }
 0x13c   : > { %v664_v10 = vpop.f32.mrb[0].mxu0 }
 0x13d   : > { %v692_v11 = vadd.f32 %v685_v8, %v664_v10  ;;  %v666_v12 = vpop.f32.mrb[1].mxu0 }
 0x13e   : > { %v693_v13 = vadd.f32 %v689_v9, %v666_v12  ;;  %v668_v14 = vpop.f32.mrb[2].mxu0 }
 0x13f   : > { %v669_v15 = vpop.f32.mrb[3].mxu0 }
 0x140   : > { %v877_v16 = vpack.c.bf16 %v693_v13, %v692_v11 }
 0x142   : > { %702 = vst [vmem:[%s420_s14] sm:$0xff] %v877_v16 }
 0x143 PF: > { %s13_s16 = sadd.s32 1, %s1006_s16   ;;  %s1211_s12 = smov %s994_s13 }
 0x144   : > { %p10_p10 = scmp.ge.s32.totalorder %s13_s16, 4   ;;  %s1212_s13 = smov %s1063_s20 }
 0x145   : > { %s1213_s14 = smov %s1002_s15  ;;  %s1214_s15 = smov %s1216_s17 }
 0x146   :  { %12 = sbr.rel (!%p10_p10) target bundleno = 3 (0x3), region = 119 }

// kernel: resnet34_forward.71
= control target key start
LH: loop header
LB: loop body
LE: loop exit
PB: predicated region body
PF: predicated region fallthrough
CT: control target
= control target key end

     0   :  { %s1616_s15 = smov 0   ;;  %s1618_s16 = smov 0   ;;  %s1933_s0 = inlined_call_operand.vmem [shape: bf16[8,4608], index: 0, kind: input, shape index: {}]   ;;  %s1934_s1 = inlined_call_operand.vmem [shape: bf16[4608,512], index: 1, kind: input, shape index: {}]   ;;  %s1935_s2 = inlined_call_operand.vmem [shape: f32[1,512], index: 2, kind: input, shape index: {}]   ;;  %s1936_s3 = inlined_call_operand.vmem [shape: bf16[8,512], index: 3, kind: input, shape index: {}]   ;;  %s1937_s4 = inlined_call_operand.vmem [shape: bf16[8,512], index: 4, kind: output, shape index: {}]  }
   0x1   :  { %s1620_s17 = smov 0   ;;  %s1622_s18 = smov 0  }
   0x2   :  { %s1624_s19 = smov 0   ;;  %s1626_s20 = smov 0  }
   0x3   :  { %s1628_s21 = smov 0  }
   0x4 LB: > { %s26_s22 = sadd.s32 1, %s1580_s19  ;;  %s29_s23 = sadd.s32 1, %s1584_s20  ;;  %s1588_s21 = sphi %s1628_s21, %s14_s21   ;;  %s1584_s20 = sphi %s1626_s20, %s1943_s20   ;;  %s1580_s19 = sphi %s1624_s19, %s1942_s19   ;;  %s1576_s18 = sphi %s1622_s18, %s1941_s18   ;;  %s1572_s17 = sphi %s1620_s17, %s1940_s17   ;;  %s1568_s16 = sphi %s1618_s16, %s1939_s16   ;;  %s1564_s15 = sphi %s1616_s15, %s1938_s15  }
   0x5   : > { %p27_p0 = scmp.ge.s32.totalorder %s26_s22, 9  ;;  %p77_p1 = scmp.ne.s32.totalorder %s1568_s16, %s1564_s15 }
   0x6   : > { %p78_p2 = scmp.eq.s32.totalorder %s1588_s21, 0  ;;  %s70_s27 = sadd.s32 1, %s1568_s16 }
   0x7   : > { %s1945_s22 = smov (%p27_p0, %s26_s22), 0  ;;  %s1947_s23 = smov (!%p27_p0, %s29_s23), %s1584_s20 }
   0x8   : > { %p79_p3 = por %p78_p2, %p77_p1  ;;  %p31_p4 = scmp.ge.s32.totalorder %s1947_s23, 2 }
   0x9   : > { %s65_s24 = ssub.s32 %s1580_s19, %s1945_s22  ;;  %p1287_p6 = scmp.ge.s32.totalorder %s1588_s21, 18 }
   0xa   : > { %s1949_s23 = smov (%p31_p4, %s1947_s23), 0 }
   0xb   : > { %s66_s25 = ssub.s32 %s1584_s20, %s1949_s23  ;;  %185 = sbr.rel (%p1287_p6) target bundleno = 57 (0x39), region = 16 }
   0xc   : > { %s67_s26 = sor.u32 %s66_s25, %s65_s24 }
   0xd   : > { %p68_p5 = scmp.eq.s32.totalorder %s67_s26, 0 }
   0xf   : > { %s1667_s28 = scalar_select %p68_p5, %s1568_s16, %s70_s27  }
  0x12   : > { %201 = sbr.rel (!%p79_p3) target bundleno = 57 (0x39), region = 24  ;;  %s203_s29 = sand.u32 (%p79_p3), 1, %s1568_s16  }
  0x13   : > { %s1290_s30 = sshll.u32 (%p79_p3), %s1584_s20, 1  ;;  %s1288_s5 = sshll.u32 (%p79_p3), %s203_s29, 9 }
  0x14   : > { %s1375_s6 = sshll.u32 (%p79_p3), %s1580_s19, 8  ;;  %s1681_s12 = scalar_lea.vmem (%p79_p3), [#allocation3], %s1288_s5 }
  0x15   : > { %s209_s7 = sadd.s32 (%p79_p3), %s1375_s6, %s1290_s30 }
  0x16   : > { %s1292_s8 = sshll.u32 (%p79_p3), %s209_s7, 2 }
  0x17   : > { %s1676_s11 = scalar_lea.vmem (%p79_p3), %s1934_s1, %s1292_s8 }
  0x18   : > { %v365_v0 = vld [vmem:[%s1676_s11] sm:$0xff] (%p79_p3)  ;;  %v367_v1 = vld [vmem:[%s1676_s11 + $0x10] sm:$0xff] (%p79_p3) }
  0x19   : > { %v369_v2 = vld [vmem:[%s1676_s11 + $0x20] sm:$0xff]  ;;  %366 = vst [vmem:[%s1681_s12] sm:$0xff] %v365_v0  ;;  %368 = vst [vmem:[%s1681_s12 + $0x8] sm:$0xff] %v367_v1  ;;  %v371_v3 = vld [vmem:[%s1676_s11 + $0x30] sm:$0xff] }
  0x1a   : > { %370 = vst [vmem:[%s1681_s12 + $0x10] sm:$0xff] %v369_v2  ;;  %v373_v4 = vld [vmem:[%s1676_s11 + $0x40] sm:$0xff]  ;;  %v375_v5 = vld [vmem:[%s1676_s11 + $0x50] sm:$0xff]  ;;  %372 = vst [vmem:[%s1681_s12 + $0x18] sm:$0xff] %v371_v3 }
  0x1b   : > { %374 = vst [vmem:[%s1681_s12 + $0x20] sm:$0xff] %v373_v4  ;;  %376 = vst [vmem:[%s1681_s12 + $0x28] sm:$0xff] %v375_v5  ;;  %v377_v6 = vld [vmem:[%s1676_s11 + $0x60] sm:$0xff]  ;;  %v379_v7 = vld [vmem:[%s1676_s11 + $0x70] sm:$0xff] }
  0x1c   : > { %v381_v8 = vld [vmem:[%s1676_s11 + $0x80] sm:$0xff]  ;;  %378 = vst [vmem:[%s1681_s12 + $0x30] sm:$0xff] %v377_v6  ;;  %380 = vst [vmem:[%s1681_s12 + $0x38] sm:$0xff] %v379_v7  ;;  %v383_v9 = vld [vmem:[%s1676_s11 + $0x90] sm:$0xff] }
  0x1d   : > { %382 = vst [vmem:[%s1681_s12 + $0x40] sm:$0xff] %v381_v8  ;;  %v385_v10 = vld [vmem:[%s1676_s11 + $0xa0] sm:$0xff]  ;;  %v387_v11 = vld [vmem:[%s1676_s11 + $0xb0] sm:$0xff]  ;;  %384 = vst [vmem:[%s1681_s12 + $0x48] sm:$0xff] %v383_v9 }
  0x1e   : > { %386 = vst [vmem:[%s1681_s12 + $0x50] sm:$0xff] %v385_v10  ;;  %388 = vst [vmem:[%s1681_s12 + $0x58] sm:$0xff] %v387_v11  ;;  %v389_v12 = vld [vmem:[%s1676_s11 + $0xc0] sm:$0xff]  ;;  %v391_v13 = vld [vmem:[%s1676_s11 + $0xd0] sm:$0xff] }
  0x1f   : > { %v393_v14 = vld [vmem:[%s1676_s11 + $0xe0] sm:$0xff]  ;;  %390 = vst [vmem:[%s1681_s12 + $0x60] sm:$0xff] %v389_v12  ;;  %392 = vst [vmem:[%s1681_s12 + $0x68] sm:$0xff] %v391_v13  ;;  %v395_v15 = vld [vmem:[%s1676_s11 + $0xf0] sm:$0xff] }
  0x20   : > { %394 = vst [vmem:[%s1681_s12 + $0x70] sm:$0xff] %v393_v14  ;;  %v397_v16 = vld [vmem:[%s1676_s11 + $0x100] sm:$0xff]  ;;  %v399_v17 = vld [vmem:[%s1676_s11 + $0x110] sm:$0xff]  ;;  %396 = vst [vmem:[%s1681_s12 + $0x78] sm:$0xff] %v395_v15 }
  0x21   : > { %398 = vst [vmem:[%s1681_s12 + $0x80] sm:$0xff] %v397_v16  ;;  %400 = vst [vmem:[%s1681_s12 + $0x88] sm:$0xff] %v399_v17  ;;  %v401_v18 = vld [vmem:[%s1676_s11 + $0x120] sm:$0xff]  ;;  %v403_v19 = vld [vmem:[%s1676_s11 + $0x130] sm:$0xff] }
  0x22   : > { %v405_v20 = vld [vmem:[%s1676_s11 + $0x140] sm:$0xff]  ;;  %402 = vst [vmem:[%s1681_s12 + $0x90] sm:$0xff] %v401_v18  ;;  %404 = vst [vmem:[%s1681_s12 + $0x98] sm:$0xff] %v403_v19  ;;  %v407_v21 = vld [vmem:[%s1676_s11 + $0x150] sm:$0xff] }
  0x23   : > { %406 = vst [vmem:[%s1681_s12 + $0xa0] sm:$0xff] %v405_v20  ;;  %v409_v22 = vld [vmem:[%s1676_s11 + $0x160] sm:$0xff]  ;;  %v411_v23 = vld [vmem:[%s1676_s11 + $0x170] sm:$0xff]  ;;  %408 = vst [vmem:[%s1681_s12 + $0xa8] sm:$0xff] %v407_v21 }
  0x24   : > { %410 = vst [vmem:[%s1681_s12 + $0xb0] sm:$0xff] %v409_v22  ;;  %412 = vst [vmem:[%s1681_s12 + $0xb8] sm:$0xff] %v411_v23  ;;  %v413_v24 = vld [vmem:[%s1676_s11 + $0x180] sm:$0xff]  ;;  %v415_v25 = vld [vmem:[%s1676_s11 + $0x190] sm:$0xff] }
  0x25   : > { %v417_v26 = vld [vmem:[%s1676_s11 + $0x1a0] sm:$0xff]  ;;  %414 = vst [vmem:[%s1681_s12 + $0xc0] sm:$0xff] %v413_v24  ;;  %416 = vst [vmem:[%s1681_s12 + $0xc8] sm:$0xff] %v415_v25  ;;  %v419_v27 = vld [vmem:[%s1676_s11 + $0x1b0] sm:$0xff] }
  0x26   : > { %418 = vst [vmem:[%s1681_s12 + $0xd0] sm:$0xff] %v417_v26  ;;  %v421_v28 = vld [vmem:[%s1676_s11 + $0x1c0] sm:$0xff]  ;;  %v423_v29 = vld [vmem:[%s1676_s11 + $0x1d0] sm:$0xff]  ;;  %420 = vst [vmem:[%s1681_s12 + $0xd8] sm:$0xff] %v419_v27 }
  0x27   : > { %422 = vst [vmem:[%s1681_s12 + $0xe0] sm:$0xff] %v421_v28  ;;  %424 = vst [vmem:[%s1681_s12 + $0xe8] sm:$0xff] %v423_v29  ;;  %v425_v30 = vld [vmem:[%s1676_s11 + $0x1e0] sm:$0xff]  ;;  %v427_v31 = vld [vmem:[%s1676_s11 + $0x1f0] sm:$0xff] }
  0x28   : > { %v429_v32 = vld [vmem:[%s1676_s11 + $0x200] sm:$0xff]  ;;  %426 = vst [vmem:[%s1681_s12 + $0xf0] sm:$0xff] %v425_v30  ;;  %428 = vst [vmem:[%s1681_s12 + $0xf8] sm:$0xff] %v427_v31  ;;  %v431_v33 = vld [vmem:[%s1676_s11 + $0x210] sm:$0xff] }
  0x29   : > { %430 = vst [vmem:[%s1681_s12 + $0x100] sm:$0xff] %v429_v32  ;;  %v433_v34 = vld [vmem:[%s1676_s11 + $0x220] sm:$0xff]  ;;  %v435_v35 = vld [vmem:[%s1676_s11 + $0x230] sm:$0xff]  ;;  %432 = vst [vmem:[%s1681_s12 + $0x108] sm:$0xff] %v431_v33 }
  0x2a   : > { %434 = vst [vmem:[%s1681_s12 + $0x110] sm:$0xff] %v433_v34  ;;  %436 = vst [vmem:[%s1681_s12 + $0x118] sm:$0xff] %v435_v35  ;;  %v437_v36 = vld [vmem:[%s1676_s11 + $0x240] sm:$0xff]  ;;  %v439_v37 = vld [vmem:[%s1676_s11 + $0x250] sm:$0xff] }
  0x2b   : > { %v441_v38 = vld [vmem:[%s1676_s11 + $0x260] sm:$0xff]  ;;  %438 = vst [vmem:[%s1681_s12 + $0x120] sm:$0xff] %v437_v36  ;;  %440 = vst [vmem:[%s1681_s12 + $0x128] sm:$0xff] %v439_v37  ;;  %v443_v39 = vld [vmem:[%s1676_s11 + $0x270] sm:$0xff] }
  0x2c   : > { %442 = vst [vmem:[%s1681_s12 + $0x130] sm:$0xff] %v441_v38  ;;  %v445_v40 = vld [vmem:[%s1676_s11 + $0x280] sm:$0xff]  ;;  %v447_v41 = vld [vmem:[%s1676_s11 + $0x290] sm:$0xff]  ;;  %444 = vst [vmem:[%s1681_s12 + $0x138] sm:$0xff] %v443_v39 }
  0x2d   : > { %446 = vst [vmem:[%s1681_s12 + $0x140] sm:$0xff] %v445_v40  ;;  %448 = vst [vmem:[%s1681_s12 + $0x148] sm:$0xff] %v447_v41  ;;  %v449_v42 = vld [vmem:[%s1676_s11 + $0x2a0] sm:$0xff]  ;;  %v451_v43 = vld [vmem:[%s1676_s11 + $0x2b0] sm:$0xff] }
  0x2e   : > { %v453_v44 = vld [vmem:[%s1676_s11 + $0x2c0] sm:$0xff]  ;;  %450 = vst [vmem:[%s1681_s12 + $0x150] sm:$0xff] %v449_v42  ;;  %452 = vst [vmem:[%s1681_s12 + $0x158] sm:$0xff] %v451_v43  ;;  %v455_v45 = vld [vmem:[%s1676_s11 + $0x2d0] sm:$0xff] }
  0x2f   : > { %454 = vst [vmem:[%s1681_s12 + $0x160] sm:$0xff] %v453_v44  ;;  %v457_v46 = vld [vmem:[%s1676_s11 + $0x2e0] sm:$0xff]  ;;  %v459_v47 = vld [vmem:[%s1676_s11 + $0x2f0] sm:$0xff]  ;;  %456 = vst [vmem:[%s1681_s12 + $0x168] sm:$0xff] %v455_v45 }
  0x30   : > { %458 = vst [vmem:[%s1681_s12 + $0x170] sm:$0xff] %v457_v46  ;;  %460 = vst [vmem:[%s1681_s12 + $0x178] sm:$0xff] %v459_v47  ;;  %v461_v48 = vld [vmem:[%s1676_s11 + $0x300] sm:$0xff]  ;;  %v463_v49 = vld [vmem:[%s1676_s11 + $0x310] sm:$0xff] }
  0x31   : > { %v465_v50 = vld [vmem:[%s1676_s11 + $0x320] sm:$0xff]  ;;  %462 = vst [vmem:[%s1681_s12 + $0x180] sm:$0xff] %v461_v48  ;;  %464 = vst [vmem:[%s1681_s12 + $0x188] sm:$0xff] %v463_v49  ;;  %v467_v51 = vld [vmem:[%s1676_s11 + $0x330] sm:$0xff] }
  0x32   : > { %466 = vst [vmem:[%s1681_s12 + $0x190] sm:$0xff] %v465_v50  ;;  %v469_v52 = vld [vmem:[%s1676_s11 + $0x340] sm:$0xff]  ;;  %v471_v53 = vld [vmem:[%s1676_s11 + $0x350] sm:$0xff]  ;;  %468 = vst [vmem:[%s1681_s12 + $0x198] sm:$0xff] %v467_v51 }
  0x33   : > { %470 = vst [vmem:[%s1681_s12 + $0x1a0] sm:$0xff] %v469_v52  ;;  %472 = vst [vmem:[%s1681_s12 + $0x1a8] sm:$0xff] %v471_v53  ;;  %v473_v54 = vld [vmem:[%s1676_s11 + $0x360] sm:$0xff]  ;;  %v475_v55 = vld [vmem:[%s1676_s11 + $0x370] sm:$0xff] }
  0x34   : > { %v477_v56 = vld [vmem:[%s1676_s11 + $0x380] sm:$0xff]  ;;  %474 = vst [vmem:[%s1681_s12 + $0x1b0] sm:$0xff] %v473_v54  ;;  %476 = vst [vmem:[%s1681_s12 + $0x1b8] sm:$0xff] %v475_v55  ;;  %v479_v57 = vld [vmem:[%s1676_s11 + $0x390] sm:$0xff] }
  0x35   : > { %478 = vst [vmem:[%s1681_s12 + $0x1c0] sm:$0xff] %v477_v56  ;;  %v481_v58 = vld [vmem:[%s1676_s11 + $0x3a0] sm:$0xff]  ;;  %v483_v59 = vld [vmem:[%s1676_s11 + $0x3b0] sm:$0xff]  ;;  %480 = vst [vmem:[%s1681_s12 + $0x1c8] sm:$0xff] %v479_v57 }
  0x36   : > { %482 = vst [vmem:[%s1681_s12 + $0x1d0] sm:$0xff] %v481_v58  ;;  %484 = vst [vmem:[%s1681_s12 + $0x1d8] sm:$0xff] %v483_v59  ;;  %v485_v60 = vld [vmem:[%s1676_s11 + $0x3c0] sm:$0xff]  ;;  %v487_v61 = vld [vmem:[%s1676_s11 + $0x3d0] sm:$0xff] }
  0x37   : > { %v489_v62 = vld [vmem:[%s1676_s11 + $0x3e0] sm:$0xff]  ;;  %486 = vst [vmem:[%s1681_s12 + $0x1e0] sm:$0xff] %v485_v60  ;;  %488 = vst [vmem:[%s1681_s12 + $0x1e8] sm:$0xff] %v487_v61  ;;  %v491_v63 = vld [vmem:[%s1676_s11 + $0x3f0] sm:$0xff] }
  0x38   : > { %490 = vst [vmem:[%s1681_s12 + $0x1f0] sm:$0xff] %v489_v62  ;;  %492 = vst [vmem:[%s1681_s12 + $0x1f8] sm:$0xff] %v491_v63 }
  0x39 PF: > { %p1293_p7 = scmp.ge.s32.totalorder %s1588_s21, 1  ;;  %p518_p8 = scmp.lt.s32.totalorder %s1588_s21, 19 }
  0x3b   : > { %p519_p9 = pnand %p1293_p7, %p518_p8 }
  0x3c   : > { %s525_s13 = sand.u32 (!%p519_p9), 1, %s1564_s15   ;;  %s1295_s14 = sshll.u32 (!%p519_p9), %s1572_s17, 2 }
  0x3d   : > { %522 = sbr.rel (%p519_p9) target bundleno = 379 (0x17b), region = 70  ;;  %s1294_s24 = sshll.u32 (!%p519_p9), %s525_s13, 9 }
  0x3e   : > { %p579_p10 = scmp.lt.s32.totalorder (!%p519_p9), %s1295_s14, 35  ;;  %s1297_s25 = sshll.u32 (!%p519_p9), %s1576_s18, 1 }
  0x3f   : > { %p589_p11 = scmp.lt.s32.totalorder (!%p519_p9), %s1297_s25, 3  ;;  %s1835_s13 = scalar_lea.vmem (!%p519_p9), [#allocation3], %s1294_s24 }
  0x40   : > { %p1302_p12 = scmp.ne.s32.totalorder (!%p519_p9), %s1572_s17, 0 }
  0x44   : > { %s1951_s14 = smov (!%p579_p10, %s1295_s14), 35  ;;  %s1953_s25 = smov (!%p589_p11, %s1297_s25), 3 }
  0x45   : > { %s1296_s26 = sshll.u32 %s1951_s14, 2  ;;  %s591_s15 = scalar_lea.vmem %s1935_s2, %s1953_s25  ;;  %v1590_v0 = vmov (!%p1302_p12), 0.0  }
  0x46   : > { %s1816_s30 = scalar_lea.vmem %s1933_s0, %s1296_s26  ;;  %s1299_s7 = sshll.u32 %s1953_s25, 2  ;;  %617 = vst [vmem:[#allocation2] sm:$0xff] (!%p1302_p12), %v1590_v0  ;;  %618 = vst [vmem:[#allocation2 + $0x8] sm:$0xff] (!%p1302_p12), %v1590_v0 }
  0x47   : > { %s1828_s18 = scalar_lea.vmem %s1936_s3, %s1299_s7  ;;  %s1833_s12 = scalar_lea.vmem %s1937_s4, %s1299_s7 }
  0x48   : > { %616 = sbr.rel (%p1302_p12) target bundleno = 79 (0x4f), region = 78 }
  0x4f PF: > { %v1434_v1 = vld [vmem:[%s1835_s13 + $0x4] ss:$8 sps:$4 sm:$0xff]   ;;  %v1438_v3 = vld [vmem:[%s1835_s13] ss:$8 sps:$4 sm:$0xff]   ;;  %v1440_v5 = vld [vmem:[%s1835_s13 + $0x14] ss:$8 sps:$4 sm:$0xff]  }
  0x50   : > { %v1436_v2 = vld [vmem:[%s1835_s13 + $0x104] ss:$8 sps:$4 sm:$0xff]   ;;  %1021 = vmatprep.subr.bf16.mxu0 %v1434_v1  ;;  %v1439_v4 = vld [vmem:[%s1835_s13 + $0x100] ss:$8 sps:$4 sm:$0xff]   ;;  %v1442_v6 = vld [vmem:[%s1835_s13 + $0x114] ss:$8 sps:$4 sm:$0xff]  }
  0x51   : > { %1062 = vmatprep.subr.bf16.mxu1 %v1436_v2  ;;  %1022 = vmatpush1.bf16.msra.mxu0 %v1438_v3  ;;  %v1444_v7 = vld [vmem:[%s1835_s13 + $0x10] ss:$8 sps:$4 sm:$0xff]   ;;  %v1446_v9 = vld [vmem:[%s1835_s13 + $0x24] ss:$8 sps:$4 sm:$0xff]   ;;  %v1450_v11 = vld [vmem:[%s1835_s13 + $0x20] ss:$8 sps:$4 sm:$0xff]  }
  0x52   : > { %1063 = vmatpush1.bf16.msra.mxu1 %v1439_v4  ;;  %1023 = vmatprep.subr.bf16.mxu0 %v1440_v5  ;;  %v1445_v8 = vld [vmem:[%s1835_s13 + $0x110] ss:$8 sps:$4 sm:$0xff]   ;;  %v1448_v10 = vld [vmem:[%s1835_s13 + $0x124] ss:$8 sps:$4 sm:$0xff]   ;;  %v1451_v12 = vld [vmem:[%s1835_s13 + $0x120] ss:$8 sps:$4 sm:$0xff]  }
  0x53   : > { %1064 = vmatprep.subr.bf16.mxu1 %v1442_v6  ;;  %v1452_v13 = vld [vmem:[%s1835_s13 + $0x34] ss:$8 sps:$4 sm:$0xff]   ;;  %v1456_v15 = vld [vmem:[%s1835_s13 + $0x30] ss:$8 sps:$4 sm:$0xff]   ;;  %v1458_v17 = vld [vmem:[%s1835_s13 + $0x44] ss:$8 sps:$4 sm:$0xff]  }
  0x54   : > { %v1454_v14 = vld [vmem:[%s1835_s13 + $0x134] ss:$8 sps:$4 sm:$0xff]   ;;  %v1457_v16 = vld [vmem:[%s1835_s13 + $0x130] ss:$8 sps:$4 sm:$0xff]   ;;  %v1460_v18 = vld [vmem:[%s1835_s13 + $0x144] ss:$8 sps:$4 sm:$0xff]  }
  0x55   : > { %1024 = vmatpush1.bf16.msra.mxu0 %v1444_v7  ;;  %v1462_v19 = vld [vmem:[%s1835_s13 + $0x40] ss:$8 sps:$4 sm:$0xff]   ;;  %v1464_v21 = vld [vmem:[%s1835_s13 + $0x54] ss:$8 sps:$4 sm:$0xff]   ;;  %v1468_v23 = vld [vmem:[%s1835_s13 + $0x50] ss:$8 sps:$4 sm:$0xff]  }
  0x56   : > { %1065 = vmatpush1.bf16.msra.mxu1 %v1445_v8  ;;  %1025 = vmatprep.subr.bf16.mxu0 %v1446_v9  ;;  %v1463_v20 = vld [vmem:[%s1835_s13 + $0x140] ss:$8 sps:$4 sm:$0xff]   ;;  %v1466_v22 = vld [vmem:[%s1835_s13 + $0x154] ss:$8 sps:$4 sm:$0xff]   ;;  %v1469_v24 = vld [vmem:[%s1835_s13 + $0x150] ss:$8 sps:$4 sm:$0xff]  }
  0x57   : > { %1066 = vmatprep.subr.bf16.mxu1 %v1448_v10  ;;  %v1470_v25 = vld [vmem:[%s1835_s13 + $0x64] ss:$8 sps:$4 sm:$0xff]   ;;  %v1474_v27 = vld [vmem:[%s1835_s13 + $0x60] ss:$8 sps:$4 sm:$0xff]   ;;  %v1476_v29 = vld [vmem:[%s1835_s13 + $0x74] ss:$8 sps:$4 sm:$0xff]  }
  0x58   : > { %v1472_v26 = vld [vmem:[%s1835_s13 + $0x164] ss:$8 sps:$4 sm:$0xff]   ;;  %v1475_v28 = vld [vmem:[%s1835_s13 + $0x160] ss:$8 sps:$4 sm:$0xff]   ;;  %v1478_v30 = vld [vmem:[%s1835_s13 + $0x174] ss:$8 sps:$4 sm:$0xff]  }
  0x59   : > { %1026 = vmatpush1.bf16.msra.mxu0 %v1450_v11  ;;  %v1480_v31 = vld [vmem:[%s1835_s13 + $0x70] ss:$8 sps:$4 sm:$0xff]   ;;  %v1482_v33 = vld [vmem:[%s1835_s13 + $0x84] ss:$8 sps:$4 sm:$0xff]   ;;  %v1486_v35 = vld [vmem:[%s1835_s13 + $0x80] ss:$8 sps:$4 sm:$0xff]  }
  0x5a   : > { %1067 = vmatpush1.bf16.msra.mxu1 %v1451_v12  ;;  %1027 = vmatprep.subr.bf16.mxu0 %v1452_v13  ;;  %v1481_v32 = vld [vmem:[%s1835_s13 + $0x170] ss:$8 sps:$4 sm:$0xff]   ;;  %v1484_v34 = vld [vmem:[%s1835_s13 + $0x184] ss:$8 sps:$4 sm:$0xff]   ;;  %v1487_v36 = vld [vmem:[%s1835_s13 + $0x180] ss:$8 sps:$4 sm:$0xff]  }
  0x5b   : > { %1068 = vmatprep.subr.bf16.mxu1 %v1454_v14  ;;  %v1488_v37 = vld [vmem:[%s1835_s13 + $0x94] ss:$8 sps:$4 sm:$0xff]   ;;  %v1492_v39 = vld [vmem:[%s1835_s13 + $0x90] ss:$8 sps:$4 sm:$0xff]   ;;  %v1494_v41 = vld [vmem:[%s1835_s13 + $0xa4] ss:$8 sps:$4 sm:$0xff]  }
  0x5c   : > { %v1490_v38 = vld [vmem:[%s1835_s13 + $0x194] ss:$8 sps:$4 sm:$0xff]   ;;  %v1493_v40 = vld [vmem:[%s1835_s13 + $0x190] ss:$8 sps:$4 sm:$0xff]   ;;  %v1496_v42 = vld [vmem:[%s1835_s13 + $0x1a4] ss:$8 sps:$4 sm:$0xff]  }
  0x5d   : > { %1028 = vmatpush1.bf16.msra.mxu0 %v1456_v15  ;;  %v1498_v43 = vld [vmem:[%s1835_s13 + $0xa0] ss:$8 sps:$4 sm:$0xff]   ;;  %v1500_v45 = vld [vmem:[%s1835_s13 + $0xb4] ss:$8 sps:$4 sm:$0xff]   ;;  %v1504_v50 = vld [vmem:[%s1835_s13 + $0xb0] ss:$8 sps:$4 sm:$0xff]  }
  0x5e   : > { %1069 = vmatpush1.bf16.msra.mxu1 %v1457_v16  ;;  %1029 = vmatprep.subr.bf16.mxu0 %v1458_v17  ;;  %v1499_v44 = vld [vmem:[%s1835_s13 + $0x1a0] ss:$8 sps:$4 sm:$0xff]   ;;  %v1502_v46 = vld [vmem:[%s1835_s13 + $0x1b4] ss:$8 sps:$4 sm:$0xff]   ;;  %v1505_v51 = vld [vmem:[%s1835_s13 + $0x1b0] ss:$8 sps:$4 sm:$0xff]  }
  0x5f   : > { %1070 = vmatprep.subr.bf16.mxu1 %v1460_v18  ;;  %v621_v47 = vld [vmem:[%s1816_s30] sm:$0xff]  ;;  %v622_v49 = vld [vmem:[%s1816_s30 + $0x8] sm:$0xff]  ;;  %v1506_v53 = vld [vmem:[%s1835_s13 + $0xc4] ss:$8 sps:$4 sm:$0xff]   ;;  %p1371_p13 = scmp.ne.s32.totalorder %s1572_s17, 8 }
  0x60   : > { %v1304_v48 = vcombine.high %v621_v47, %v621_v47  ;;  %v1306_v52 = vcombine.high %v622_v49, %v622_v49  ;;  %v1508_v54 = vld [vmem:[%s1835_s13 + $0x1c4] ss:$8 sps:$4 sm:$0xff]   ;;  %v1510_v55 = vld [vmem:[%s1835_s13 + $0xc0] ss:$8 sps:$4 sm:$0xff]   ;;  %v1512_v57 = vld [vmem:[%s1835_s13 + $0xd4] ss:$8 sps:$4 sm:$0xff]   ;;  %v1303_v5 = vcombine.low %v621_v47, %v621_v47  ;;  %v1305_v6 = vcombine.low %v622_v49, %v622_v49 }
  0x61   : > { %1030 = vmatpush1.bf16.msra.mxu0 %v1462_v19  ;;  %v1511_v56 = vld [vmem:[%s1835_s13 + $0x1c0] ss:$8 sps:$4 sm:$0xff]   ;;  %v1514_v58 = vld [vmem:[%s1835_s13 + $0x1d4] ss:$8 sps:$4 sm:$0xff]   ;;  %v1516_v59 = vld [vmem:[%s1835_s13 + $0xd0] ss:$8 sps:$4 sm:$0xff]  }
  0x62   : > { %1071 = vmatpush1.bf16.msra.mxu1 %v1463_v20  ;;  %1031 = vmatprep.subr.bf16.mxu0 %v1464_v21  ;;  %v1517_v60 = vld [vmem:[%s1835_s13 + $0x1d0] ss:$8 sps:$4 sm:$0xff]   ;;  %v1518_v61 = vld [vmem:[%s1835_s13 + $0xe4] ss:$8 sps:$4 sm:$0xff]   ;;  %v1522_v63 = vld [vmem:[%s1835_s13 + $0xe0] ss:$8 sps:$4 sm:$0xff]   ;;  %v1115_v21 = vlaneseq (!%p1371_p13) }
  0x63   : > { %1072 = vmatprep.subr.bf16.mxu1 %v1466_v22  ;;  %1053 = vmatprep.mubr.bf16.mxu0 %v1304_v48  ;;  %v1520_v62 = vld [vmem:[%s1835_s13 + $0x1e4] ss:$8 sps:$4 sm:$0xff]   ;;  %v1523_v0 = vld [vmem:[%s1835_s13 + $0x1e0] ss:$8 sps:$4 sm:$0xff]   ;;  %v1524_v1 = vld [vmem:[%s1835_s13 + $0xf4] ss:$8 sps:$4 sm:$0xff]  }
  0x64   : > { %1094 = vmatprep.mubr.bf16.mxu1 %v1306_v52  ;;  %v1526_v2 = vld [vmem:[%s1835_s13 + $0x1f4] ss:$8 sps:$4 sm:$0xff]   ;;  %v1528_v3 = vld [vmem:[%s1835_s13 + $0xf0] ss:$8 sps:$4 sm:$0xff]   ;;  %v1116_v22 = vshrl.u32 (!%p1371_p13), %v1115_v21, 7 }
  0x65   : > { %1032 = vmatpush1.bf16.msra.mxu0 %v1468_v23  ;;  %v1529_v4 = vld [vmem:[%s1835_s13 + $0x1f0] ss:$8 sps:$4 sm:$0xff]  }
  0x66   : > { %1073 = vmatpush1.bf16.msra.mxu1 %v1469_v24  ;;  %1033 = vmatprep.subr.bf16.mxu0 %v1470_v25  ;;  %v619_v8 = vld [vmem:[#allocation2] sm:$0xff]  ;;  %v620_v12 = vld [vmem:[#allocation2 + $0x8] sm:$0xff]  ;;  %v1117_v25 = vsub.s32 (!%p1371_p13), 0, %v1116_v22 }
  0x67   : > { %1074 = vmatprep.subr.bf16.mxu1 %v1472_v26  ;;  %v1113_v23 = vld [vmem:[%s591_s15] sm:$0x3] (!%p1371_p13)  ;;  %v1121_v26 = vsub.s32 (!%p1371_p13), 1, %v1116_v22 }
  0x68   : > { %v1127_v24 = vld [vmem:[%s1828_s18] sm:$0xff] (!%p1371_p13) }
  0x69   : > { %1034 = vmatpush1.bf16.msra.mxu0 %v1474_v27 }
  0x6a   : > { %1075 = vmatpush1.bf16.msra.mxu1 %v1475_v28  ;;  %1035 = vmatprep.subr.bf16.mxu0 %v1476_v29  ;;  %v1118_v29 = vrot.slane (!%p1371_p13), %v1113_v23, %v1117_v25 }
  0x6b   : > { %1076 = vmatprep.subr.bf16.mxu1 %v1478_v30  ;;  %v1122_v30 = vrot.slane (!%p1371_p13), %v1113_v23, %v1121_v26 }
  0x6d   : > { %1036 = vmatpush1.bf16.msra.mxu0 %v1480_v31  ;;  %v1128_v31 = vunpack.c.l.bf16 (!%p1371_p13), %v1127_v24 }
  0x6e   : > { %1077 = vmatpush1.bf16.msra.mxu1 %v1481_v32  ;;  %1037 = vmatprep.subr.bf16.mxu0 %v1482_v33  ;;  %v1129_v32 = vunpack.c.h.bf16 (!%p1371_p13), %v1127_v24 }
  0x6f   : > { %1078 = vmatprep.subr.bf16.mxu1 %v1484_v34 }
  0x71   : > { %1038 = vmatpush1.bf16.msra.mxu0 %v1486_v35 }
  0x72   : > { %1079 = vmatpush1.bf16.msra.mxu1 %v1487_v36  ;;  %1039 = vmatprep.subr.bf16.mxu0 %v1488_v37 }
  0x73   : > { %1080 = vmatprep.subr.bf16.mxu1 %v1490_v38 }
  0x75   : > { %1040 = vmatpush1.bf16.msra.mxu0 %v1492_v39 }
  0x76   : > { %1081 = vmatpush1.bf16.msra.mxu1 %v1493_v40  ;;  %1041 = vmatprep.subr.bf16.mxu0 %v1494_v41 }
  0x77   : > { %1082 = vmatprep.subr.bf16.mxu1 %v1496_v42 }
  0x79   : > { %1042 = vmatpush1.bf16.msra.mxu0 %v1498_v43 }
  0x7a   : > { %1083 = vmatpush1.bf16.msra.mxu1 %v1499_v44  ;;  %1043 = vmatprep.subr.bf16.mxu0 %v1500_v45 }
  0x7b   : > { %1084 = vmatprep.subr.bf16.mxu1 %v1502_v46 }
  0x7d   : > { %1044 = vmatpush1.bf16.msra.mxu0 %v1504_v50 }
  0x7e   : > { %1085 = vmatpush1.bf16.msra.mxu1 %v1505_v51  ;;  %1045 = vmatprep.subr.bf16.mxu0 %v1506_v53 }
  0x7f   : > { %1086 = vmatprep.subr.bf16.mxu1 %v1508_v54 }
  0x81   : > { %1046 = vmatpush1.bf16.msra.mxu0 %v1510_v55 }
  0x82   : > { %1087 = vmatpush1.bf16.msra.mxu1 %v1511_v56  ;;  %1047 = vmatprep.subr.bf16.mxu0 %v1512_v57 }
  0x83   : > { %1088 = vmatprep.subr.bf16.mxu1 %v1514_v58 }
  0x85   : > { %1048 = vmatpush1.bf16.msra.mxu0 %v1516_v59 }
  0x86   : > { %1089 = vmatpush1.bf16.msra.mxu1 %v1517_v60  ;;  %1049 = vmatprep.subr.bf16.mxu0 %v1518_v61 }
  0x87   : > { %1090 = vmatprep.subr.bf16.mxu1 %v1520_v62 }
  0x89   : > { %1050 = vmatpush1.bf16.msra.mxu0 %v1522_v63 }
  0x8a   : > { %1091 = vmatpush1.bf16.msra.mxu1 %v1523_v0  ;;  %1051 = vmatprep.subr.bf16.mxu0 %v1524_v1 }
  0x8b   : > { %1092 = vmatprep.subr.bf16.mxu1 %v1526_v2 }
  0x8d   : > { %1052 = vmatpush1.bf16.msra.mxu0 %v1528_v3 }
  0x8e   : > { %1093 = vmatpush1.bf16.msra.mxu1 %v1529_v4 }
  0x90   : > { %1054 = vmatmul.mubr.bf16.vlgmr.msra.gmra.mrb[0].mxu0 %v1303_v5 }
  0x91   : > { %1095 = vmatmul.mubr.bf16.vlgmr.msra.gmra.mrb[0].mxu1 %v1305_v6 }
 0x163   : > { %v1055_v7 = vpop.f32.mrb[0].mxu0 }
 0x164   : > { %v1096_v9 = vpop.f32.mrb[0].mxu1  ;;  %v1057_v11 = vpop.f32.mrb[1].mxu0  ;;  %1110 = sbr.rel (%p1371_p13) target bundleno = 379 (0x17b), region = 82 }
 0x165   : > { %v1097_v10 = vadd.f32 %v1096_v9, %v1055_v7  ;;  %v1098_v13 = vpop.f32.mrb[1].mxu1  ;;  %v1059_v15 = vpop.f32.mrb[2].mxu0 }
 0x166   : > { %v1099_v14 = vadd.f32 %v1098_v13, %v1057_v11  ;;  %v1100_v16 = vpop.f32.mrb[2].mxu1  ;;  %v1060_v18 = vpop.f32.mrb[3].mxu0 }
 0x167   : > { %v1103_v17 = vadd.f32 %v1097_v10, %v619_v8  ;;  %v1101_v19 = vpop.f32.mrb[3].mxu1 }
 0x168   : > { %v1104_v20 = vadd.f32 %v1099_v14, %v620_v12 }
 0x169   : > { %1105 = vst [vmem:[#allocation2] sm:$0xff] %v1103_v17 }
 0x16a   : > { %1106 = vst [vmem:[#allocation2 + $0x8] sm:$0xff] %v1104_v20 }
 0x170   : > { %v1111_v27 = vld [vmem:[#allocation2] sm:$0xff] }
 0x171   : > { %v1112_v28 = vld [vmem:[#allocation2 + $0x8] sm:$0xff]  ;;  %v1125_v33 = vadd.f32 %v1118_v29, %v1111_v27 }
 0x172   : > { %v1126_v34 = vadd.f32 %v1122_v30, %v1112_v28 }
 0x173   : > { %v1130_v35 = vadd.f32 %v1128_v31, %v1125_v33 }
 0x174   : > { %v1131_v36 = vadd.f32 %v1129_v32, %v1126_v34 }
 0x175   : > { %v1132_v37 = vmax.f32 %v1130_v35, 0.0 }
 0x176   : > { %v1133_v38 = vmax.f32 %v1131_v36, 0.0 }
 0x178   : > { %v1376_v39 = vpack.c.bf16 %v1133_v38, %v1132_v37 }
 0x17a   : > { %1142 = vst [vmem:[%s1833_s12] sm:$0xff] %v1376_v39 }
 0x17b PF: > { %s14_s21 = sadd.s32 1, %s1588_s21   ;;  %s1938_s15 = smov %s1568_s16 }
 0x17c   : > { %p11_p0 = scmp.ge.s32.totalorder %s14_s21, 20   ;;  %s1939_s16 = smov %s1667_s28 }
 0x17d   : > { %s1940_s17 = smov %s1580_s19  ;;  %s1941_s18 = smov %s1584_s20 }
 0x17e   : > { %s1942_s19 = smov %s1945_s22  ;;  %s1943_s20 = smov %s1949_s23 }
 0x17f   :  { %13 = sbr.rel (!%p11_p0) target bundleno = 4 (0x4), region = 126 }

// kernel: resnet34_forward.72
= control target key start
LH: loop header
LB: loop body
LE: loop exit
PB: predicated region body
PF: predicated region fallthrough
CT: control target
= control target key end

     0   :  { %s1523_s12 = smov 0   ;;  %s1525_s13 = smov 0   ;;  %s1834_s0 = inlined_call_operand.vmem [shape: bf16[8,4608], index: 0, kind: input, shape index: {}]   ;;  %s1835_s1 = inlined_call_operand.vmem [shape: bf16[4608,512], index: 1, kind: input, shape index: {}]   ;;  %s1836_s2 = inlined_call_operand.vmem [shape: f32[1,512], index: 2, kind: input, shape index: {}]   ;;  %s1837_s3 = inlined_call_operand.vmem [shape: bf16[8,512], index: 3, kind: output, shape index: {}]  }
   0x1   :  { %s1527_s14 = smov 0   ;;  %s1529_s15 = smov 0  }
   0x2   :  { %s1531_s16 = smov 0   ;;  %s1533_s17 = smov 0  }
   0x3   :  { %s1535_s18 = smov 0  }
   0x4 LB: > { %s25_s19 = sadd.s32 1, %s1492_s16  ;;  %s28_s20 = sadd.s32 1, %s1496_s17  ;;  %s1500_s18 = sphi %s1535_s18, %s13_s18   ;;  %s1496_s17 = sphi %s1533_s17, %s1843_s17   ;;  %s1492_s16 = sphi %s1531_s16, %s1842_s16   ;;  %s1488_s15 = sphi %s1529_s15, %s1841_s15   ;;  %s1484_s14 = sphi %s1527_s14, %s1840_s14   ;;  %s1480_s13 = sphi %s1525_s13, %s1839_s13   ;;  %s1476_s12 = sphi %s1523_s12, %s1838_s12  }
   0x5   : > { %p26_p0 = scmp.ge.s32.totalorder %s25_s19, 9  ;;  %p76_p1 = scmp.ne.s32.totalorder %s1480_s13, %s1476_s12 }
   0x6   : > { %p77_p2 = scmp.eq.s32.totalorder %s1500_s18, 0  ;;  %s69_s24 = sadd.s32 1, %s1480_s13 }
   0x7   : > { %s1845_s19 = smov (%p26_p0, %s25_s19), 0  ;;  %s1847_s20 = smov (!%p26_p0, %s28_s20), %s1496_s17 }
   0x8   : > { %p78_p3 = por %p77_p2, %p76_p1  ;;  %p30_p4 = scmp.ge.s32.totalorder %s1847_s20, 2 }
   0x9   : > { %s64_s21 = ssub.s32 %s1492_s16, %s1845_s19  ;;  %p1201_p6 = scmp.ge.s32.totalorder %s1500_s18, 18 }
   0xa   : > { %s1849_s20 = smov (%p30_p4, %s1847_s20), 0 }
   0xb   : > { %s65_s22 = ssub.s32 %s1496_s17, %s1849_s20  ;;  %156 = sbr.rel (%p1201_p6) target bundleno = 57 (0x39), region = 16 }
   0xc   : > { %s66_s23 = sor.u32 %s65_s22, %s64_s21 }
   0xd   : > { %p67_p5 = scmp.eq.s32.totalorder %s66_s23, 0 }
   0xf   : > { %s1574_s25 = scalar_select %p67_p5, %s1480_s13, %s69_s24  }
  0x12   : > { %172 = sbr.rel (!%p78_p3) target bundleno = 57 (0x39), region = 24  ;;  %s174_s26 = sand.u32 (%p78_p3), 1, %s1480_s13  }
  0x13   : > { %s1204_s27 = sshll.u32 (%p78_p3), %s1496_s17, 1  ;;  %s1202_s28 = sshll.u32 (%p78_p3), %s174_s26, 9 }
  0x14   : > { %s1287_s29 = sshll.u32 (%p78_p3), %s1492_s16, 8  ;;  %s1588_s8 = scalar_lea.vmem (%p78_p3), [#allocation3], %s1202_s28 }
  0x15   : > { %s180_s30 = sadd.s32 (%p78_p3), %s1287_s29, %s1204_s27 }
  0x16   : > { %s1206_s4 = sshll.u32 (%p78_p3), %s180_s30, 2 }
  0x17   : > { %s1583_s7 = scalar_lea.vmem (%p78_p3), %s1835_s1, %s1206_s4 }
  0x18   : > { %v336_v0 = vld [vmem:[%s1583_s7] sm:$0xff] (%p78_p3)  ;;  %v338_v1 = vld [vmem:[%s1583_s7 + $0x10] sm:$0xff] (%p78_p3) }
  0x19   : > { %v340_v2 = vld [vmem:[%s1583_s7 + $0x20] sm:$0xff]  ;;  %337 = vst [vmem:[%s1588_s8] sm:$0xff] %v336_v0  ;;  %339 = vst [vmem:[%s1588_s8 + $0x8] sm:$0xff] %v338_v1  ;;  %v342_v3 = vld [vmem:[%s1583_s7 + $0x30] sm:$0xff] }
  0x1a   : > { %341 = vst [vmem:[%s1588_s8 + $0x10] sm:$0xff] %v340_v2  ;;  %v344_v4 = vld [vmem:[%s1583_s7 + $0x40] sm:$0xff]  ;;  %v346_v5 = vld [vmem:[%s1583_s7 + $0x50] sm:$0xff]  ;;  %343 = vst [vmem:[%s1588_s8 + $0x18] sm:$0xff] %v342_v3 }
  0x1b   : > { %345 = vst [vmem:[%s1588_s8 + $0x20] sm:$0xff] %v344_v4  ;;  %347 = vst [vmem:[%s1588_s8 + $0x28] sm:$0xff] %v346_v5  ;;  %v348_v6 = vld [vmem:[%s1583_s7 + $0x60] sm:$0xff]  ;;  %v350_v7 = vld [vmem:[%s1583_s7 + $0x70] sm:$0xff] }
  0x1c   : > { %v352_v8 = vld [vmem:[%s1583_s7 + $0x80] sm:$0xff]  ;;  %349 = vst [vmem:[%s1588_s8 + $0x30] sm:$0xff] %v348_v6  ;;  %351 = vst [vmem:[%s1588_s8 + $0x38] sm:$0xff] %v350_v7  ;;  %v354_v9 = vld [vmem:[%s1583_s7 + $0x90] sm:$0xff] }
  0x1d   : > { %353 = vst [vmem:[%s1588_s8 + $0x40] sm:$0xff] %v352_v8  ;;  %v356_v10 = vld [vmem:[%s1583_s7 + $0xa0] sm:$0xff]  ;;  %v358_v11 = vld [vmem:[%s1583_s7 + $0xb0] sm:$0xff]  ;;  %355 = vst [vmem:[%s1588_s8 + $0x48] sm:$0xff] %v354_v9 }
  0x1e   : > { %357 = vst [vmem:[%s1588_s8 + $0x50] sm:$0xff] %v356_v10  ;;  %359 = vst [vmem:[%s1588_s8 + $0x58] sm:$0xff] %v358_v11  ;;  %v360_v12 = vld [vmem:[%s1583_s7 + $0xc0] sm:$0xff]  ;;  %v362_v13 = vld [vmem:[%s1583_s7 + $0xd0] sm:$0xff] }
  0x1f   : > { %v364_v14 = vld [vmem:[%s1583_s7 + $0xe0] sm:$0xff]  ;;  %361 = vst [vmem:[%s1588_s8 + $0x60] sm:$0xff] %v360_v12  ;;  %363 = vst [vmem:[%s1588_s8 + $0x68] sm:$0xff] %v362_v13  ;;  %v366_v15 = vld [vmem:[%s1583_s7 + $0xf0] sm:$0xff] }
  0x20   : > { %365 = vst [vmem:[%s1588_s8 + $0x70] sm:$0xff] %v364_v14  ;;  %v368_v16 = vld [vmem:[%s1583_s7 + $0x100] sm:$0xff]  ;;  %v370_v17 = vld [vmem:[%s1583_s7 + $0x110] sm:$0xff]  ;;  %367 = vst [vmem:[%s1588_s8 + $0x78] sm:$0xff] %v366_v15 }
  0x21   : > { %369 = vst [vmem:[%s1588_s8 + $0x80] sm:$0xff] %v368_v16  ;;  %371 = vst [vmem:[%s1588_s8 + $0x88] sm:$0xff] %v370_v17  ;;  %v372_v18 = vld [vmem:[%s1583_s7 + $0x120] sm:$0xff]  ;;  %v374_v19 = vld [vmem:[%s1583_s7 + $0x130] sm:$0xff] }
  0x22   : > { %v376_v20 = vld [vmem:[%s1583_s7 + $0x140] sm:$0xff]  ;;  %373 = vst [vmem:[%s1588_s8 + $0x90] sm:$0xff] %v372_v18  ;;  %375 = vst [vmem:[%s1588_s8 + $0x98] sm:$0xff] %v374_v19  ;;  %v378_v21 = vld [vmem:[%s1583_s7 + $0x150] sm:$0xff] }
  0x23   : > { %377 = vst [vmem:[%s1588_s8 + $0xa0] sm:$0xff] %v376_v20  ;;  %v380_v22 = vld [vmem:[%s1583_s7 + $0x160] sm:$0xff]  ;;  %v382_v23 = vld [vmem:[%s1583_s7 + $0x170] sm:$0xff]  ;;  %379 = vst [vmem:[%s1588_s8 + $0xa8] sm:$0xff] %v378_v21 }
  0x24   : > { %381 = vst [vmem:[%s1588_s8 + $0xb0] sm:$0xff] %v380_v22  ;;  %383 = vst [vmem:[%s1588_s8 + $0xb8] sm:$0xff] %v382_v23  ;;  %v384_v24 = vld [vmem:[%s1583_s7 + $0x180] sm:$0xff]  ;;  %v386_v25 = vld [vmem:[%s1583_s7 + $0x190] sm:$0xff] }
  0x25   : > { %v388_v26 = vld [vmem:[%s1583_s7 + $0x1a0] sm:$0xff]  ;;  %385 = vst [vmem:[%s1588_s8 + $0xc0] sm:$0xff] %v384_v24  ;;  %387 = vst [vmem:[%s1588_s8 + $0xc8] sm:$0xff] %v386_v25  ;;  %v390_v27 = vld [vmem:[%s1583_s7 + $0x1b0] sm:$0xff] }
  0x26   : > { %389 = vst [vmem:[%s1588_s8 + $0xd0] sm:$0xff] %v388_v26  ;;  %v392_v28 = vld [vmem:[%s1583_s7 + $0x1c0] sm:$0xff]  ;;  %v394_v29 = vld [vmem:[%s1583_s7 + $0x1d0] sm:$0xff]  ;;  %391 = vst [vmem:[%s1588_s8 + $0xd8] sm:$0xff] %v390_v27 }
  0x27   : > { %393 = vst [vmem:[%s1588_s8 + $0xe0] sm:$0xff] %v392_v28  ;;  %395 = vst [vmem:[%s1588_s8 + $0xe8] sm:$0xff] %v394_v29  ;;  %v396_v30 = vld [vmem:[%s1583_s7 + $0x1e0] sm:$0xff]  ;;  %v398_v31 = vld [vmem:[%s1583_s7 + $0x1f0] sm:$0xff] }
  0x28   : > { %v400_v32 = vld [vmem:[%s1583_s7 + $0x200] sm:$0xff]  ;;  %397 = vst [vmem:[%s1588_s8 + $0xf0] sm:$0xff] %v396_v30  ;;  %399 = vst [vmem:[%s1588_s8 + $0xf8] sm:$0xff] %v398_v31  ;;  %v402_v33 = vld [vmem:[%s1583_s7 + $0x210] sm:$0xff] }
  0x29   : > { %401 = vst [vmem:[%s1588_s8 + $0x100] sm:$0xff] %v400_v32  ;;  %v404_v34 = vld [vmem:[%s1583_s7 + $0x220] sm:$0xff]  ;;  %v406_v35 = vld [vmem:[%s1583_s7 + $0x230] sm:$0xff]  ;;  %403 = vst [vmem:[%s1588_s8 + $0x108] sm:$0xff] %v402_v33 }
  0x2a   : > { %405 = vst [vmem:[%s1588_s8 + $0x110] sm:$0xff] %v404_v34  ;;  %407 = vst [vmem:[%s1588_s8 + $0x118] sm:$0xff] %v406_v35  ;;  %v408_v36 = vld [vmem:[%s1583_s7 + $0x240] sm:$0xff]  ;;  %v410_v37 = vld [vmem:[%s1583_s7 + $0x250] sm:$0xff] }
  0x2b   : > { %v412_v38 = vld [vmem:[%s1583_s7 + $0x260] sm:$0xff]  ;;  %409 = vst [vmem:[%s1588_s8 + $0x120] sm:$0xff] %v408_v36  ;;  %411 = vst [vmem:[%s1588_s8 + $0x128] sm:$0xff] %v410_v37  ;;  %v414_v39 = vld [vmem:[%s1583_s7 + $0x270] sm:$0xff] }
  0x2c   : > { %413 = vst [vmem:[%s1588_s8 + $0x130] sm:$0xff] %v412_v38  ;;  %v416_v40 = vld [vmem:[%s1583_s7 + $0x280] sm:$0xff]  ;;  %v418_v41 = vld [vmem:[%s1583_s7 + $0x290] sm:$0xff]  ;;  %415 = vst [vmem:[%s1588_s8 + $0x138] sm:$0xff] %v414_v39 }
  0x2d   : > { %417 = vst [vmem:[%s1588_s8 + $0x140] sm:$0xff] %v416_v40  ;;  %419 = vst [vmem:[%s1588_s8 + $0x148] sm:$0xff] %v418_v41  ;;  %v420_v42 = vld [vmem:[%s1583_s7 + $0x2a0] sm:$0xff]  ;;  %v422_v43 = vld [vmem:[%s1583_s7 + $0x2b0] sm:$0xff] }
  0x2e   : > { %v424_v44 = vld [vmem:[%s1583_s7 + $0x2c0] sm:$0xff]  ;;  %421 = vst [vmem:[%s1588_s8 + $0x150] sm:$0xff] %v420_v42  ;;  %423 = vst [vmem:[%s1588_s8 + $0x158] sm:$0xff] %v422_v43  ;;  %v426_v45 = vld [vmem:[%s1583_s7 + $0x2d0] sm:$0xff] }
  0x2f   : > { %425 = vst [vmem:[%s1588_s8 + $0x160] sm:$0xff] %v424_v44  ;;  %v428_v46 = vld [vmem:[%s1583_s7 + $0x2e0] sm:$0xff]  ;;  %v430_v47 = vld [vmem:[%s1583_s7 + $0x2f0] sm:$0xff]  ;;  %427 = vst [vmem:[%s1588_s8 + $0x168] sm:$0xff] %v426_v45 }
  0x30   : > { %429 = vst [vmem:[%s1588_s8 + $0x170] sm:$0xff] %v428_v46  ;;  %431 = vst [vmem:[%s1588_s8 + $0x178] sm:$0xff] %v430_v47  ;;  %v432_v48 = vld [vmem:[%s1583_s7 + $0x300] sm:$0xff]  ;;  %v434_v49 = vld [vmem:[%s1583_s7 + $0x310] sm:$0xff] }
  0x31   : > { %v436_v50 = vld [vmem:[%s1583_s7 + $0x320] sm:$0xff]  ;;  %433 = vst [vmem:[%s1588_s8 + $0x180] sm:$0xff] %v432_v48  ;;  %435 = vst [vmem:[%s1588_s8 + $0x188] sm:$0xff] %v434_v49  ;;  %v438_v51 = vld [vmem:[%s1583_s7 + $0x330] sm:$0xff] }
  0x32   : > { %437 = vst [vmem:[%s1588_s8 + $0x190] sm:$0xff] %v436_v50  ;;  %v440_v52 = vld [vmem:[%s1583_s7 + $0x340] sm:$0xff]  ;;  %v442_v53 = vld [vmem:[%s1583_s7 + $0x350] sm:$0xff]  ;;  %439 = vst [vmem:[%s1588_s8 + $0x198] sm:$0xff] %v438_v51 }
  0x33   : > { %441 = vst [vmem:[%s1588_s8 + $0x1a0] sm:$0xff] %v440_v52  ;;  %443 = vst [vmem:[%s1588_s8 + $0x1a8] sm:$0xff] %v442_v53  ;;  %v444_v54 = vld [vmem:[%s1583_s7 + $0x360] sm:$0xff]  ;;  %v446_v55 = vld [vmem:[%s1583_s7 + $0x370] sm:$0xff] }
  0x34   : > { %v448_v56 = vld [vmem:[%s1583_s7 + $0x380] sm:$0xff]  ;;  %445 = vst [vmem:[%s1588_s8 + $0x1b0] sm:$0xff] %v444_v54  ;;  %447 = vst [vmem:[%s1588_s8 + $0x1b8] sm:$0xff] %v446_v55  ;;  %v450_v57 = vld [vmem:[%s1583_s7 + $0x390] sm:$0xff] }
  0x35   : > { %449 = vst [vmem:[%s1588_s8 + $0x1c0] sm:$0xff] %v448_v56  ;;  %v452_v58 = vld [vmem:[%s1583_s7 + $0x3a0] sm:$0xff]  ;;  %v454_v59 = vld [vmem:[%s1583_s7 + $0x3b0] sm:$0xff]  ;;  %451 = vst [vmem:[%s1588_s8 + $0x1c8] sm:$0xff] %v450_v57 }
  0x36   : > { %453 = vst [vmem:[%s1588_s8 + $0x1d0] sm:$0xff] %v452_v58  ;;  %455 = vst [vmem:[%s1588_s8 + $0x1d8] sm:$0xff] %v454_v59  ;;  %v456_v60 = vld [vmem:[%s1583_s7 + $0x3c0] sm:$0xff]  ;;  %v458_v61 = vld [vmem:[%s1583_s7 + $0x3d0] sm:$0xff] }
  0x37   : > { %v460_v62 = vld [vmem:[%s1583_s7 + $0x3e0] sm:$0xff]  ;;  %457 = vst [vmem:[%s1588_s8 + $0x1e0] sm:$0xff] %v456_v60  ;;  %459 = vst [vmem:[%s1588_s8 + $0x1e8] sm:$0xff] %v458_v61  ;;  %v462_v63 = vld [vmem:[%s1583_s7 + $0x3f0] sm:$0xff] }
  0x38   : > { %461 = vst [vmem:[%s1588_s8 + $0x1f0] sm:$0xff] %v460_v62  ;;  %463 = vst [vmem:[%s1588_s8 + $0x1f8] sm:$0xff] %v462_v63 }
  0x39 PF: > { %p1207_p7 = scmp.ge.s32.totalorder %s1500_s18, 1  ;;  %p476_p8 = scmp.lt.s32.totalorder %s1500_s18, 19 }
  0x3b   : > { %p477_p9 = pnand %p1207_p7, %p476_p8 }
  0x3c   : > { %s483_s9 = sand.u32 (!%p477_p9), 1, %s1476_s12   ;;  %s1209_s10 = sshll.u32 (!%p477_p9), %s1484_s14, 2 }
  0x3d   : > { %480 = sbr.rel (%p477_p9) target bundleno = 376 (0x178), region = 66  ;;  %s1208_s11 = sshll.u32 (!%p477_p9), %s483_s9, 9 }
  0x3e   : > { %p526_p10 = scmp.lt.s32.totalorder (!%p477_p9), %s1209_s10, 35  ;;  %s1211_s21 = sshll.u32 (!%p477_p9), %s1488_s15, 1 }
  0x3f   : > { %p536_p11 = scmp.lt.s32.totalorder (!%p477_p9), %s1211_s21, 3  ;;  %s1737_s5 = scalar_lea.vmem (!%p477_p9), [#allocation3], %s1208_s11 }
  0x40   : > { %p1214_p12 = scmp.ne.s32.totalorder (!%p477_p9), %s1484_s14, 0 }
  0x44   : > { %s1851_s10 = smov (!%p526_p10, %s1209_s10), 35  ;;  %s1853_s21 = smov (!%p536_p11, %s1211_s21), 3 }
  0x45   : > { %s1210_s22 = sshll.u32 %s1851_s10, 2  ;;  %s538_s12 = scalar_lea.vmem %s1836_s2, %s1853_s21  ;;  %v1502_v0 = vmov (!%p1214_p12), 0.0  }
  0x46   : > { %s1723_s26 = scalar_lea.vmem %s1834_s0, %s1210_s22  ;;  %s1213_s29 = sshll.u32 %s1853_s21, 2  ;;  %554 = vst [vmem:[#allocation2] sm:$0xff] (!%p1214_p12), %v1502_v0  ;;  %555 = vst [vmem:[#allocation2 + $0x8] sm:$0xff] (!%p1214_p12), %v1502_v0 }
  0x47   : > { %s1735_s15 = scalar_lea.vmem %s1837_s3, %s1213_s29  ;;  %553 = sbr.rel (%p1214_p12) target bundleno = 78 (0x4e), region = 74 }
  0x4e PF: > { %v1346_v1 = vld [vmem:[%s1737_s5 + $0x4] ss:$8 sps:$4 sm:$0xff]   ;;  %v1350_v3 = vld [vmem:[%s1737_s5] ss:$8 sps:$4 sm:$0xff]   ;;  %v1352_v5 = vld [vmem:[%s1737_s5 + $0x14] ss:$8 sps:$4 sm:$0xff]  }
  0x4f   : > { %v1348_v2 = vld [vmem:[%s1737_s5 + $0x104] ss:$8 sps:$4 sm:$0xff]   ;;  %958 = vmatprep.subr.bf16.mxu0 %v1346_v1  ;;  %v1351_v4 = vld [vmem:[%s1737_s5 + $0x100] ss:$8 sps:$4 sm:$0xff]   ;;  %v1354_v6 = vld [vmem:[%s1737_s5 + $0x114] ss:$8 sps:$4 sm:$0xff]  }
  0x50   : > { %999 = vmatprep.subr.bf16.mxu1 %v1348_v2  ;;  %959 = vmatpush1.bf16.msra.mxu0 %v1350_v3  ;;  %v1356_v7 = vld [vmem:[%s1737_s5 + $0x10] ss:$8 sps:$4 sm:$0xff]   ;;  %v1358_v9 = vld [vmem:[%s1737_s5 + $0x24] ss:$8 sps:$4 sm:$0xff]   ;;  %v1362_v11 = vld [vmem:[%s1737_s5 + $0x20] ss:$8 sps:$4 sm:$0xff]  }
  0x51   : > { %1000 = vmatpush1.bf16.msra.mxu1 %v1351_v4  ;;  %960 = vmatprep.subr.bf16.mxu0 %v1352_v5  ;;  %v1357_v8 = vld [vmem:[%s1737_s5 + $0x110] ss:$8 sps:$4 sm:$0xff]   ;;  %v1360_v10 = vld [vmem:[%s1737_s5 + $0x124] ss:$8 sps:$4 sm:$0xff]   ;;  %v1363_v12 = vld [vmem:[%s1737_s5 + $0x120] ss:$8 sps:$4 sm:$0xff]  }
  0x52   : > { %1001 = vmatprep.subr.bf16.mxu1 %v1354_v6  ;;  %v1364_v13 = vld [vmem:[%s1737_s5 + $0x34] ss:$8 sps:$4 sm:$0xff]   ;;  %v1368_v15 = vld [vmem:[%s1737_s5 + $0x30] ss:$8 sps:$4 sm:$0xff]   ;;  %v1370_v17 = vld [vmem:[%s1737_s5 + $0x44] ss:$8 sps:$4 sm:$0xff]  }
  0x53   : > { %v1366_v14 = vld [vmem:[%s1737_s5 + $0x134] ss:$8 sps:$4 sm:$0xff]   ;;  %v1369_v16 = vld [vmem:[%s1737_s5 + $0x130] ss:$8 sps:$4 sm:$0xff]   ;;  %v1372_v18 = vld [vmem:[%s1737_s5 + $0x144] ss:$8 sps:$4 sm:$0xff]  }
  0x54   : > { %961 = vmatpush1.bf16.msra.mxu0 %v1356_v7  ;;  %v1374_v19 = vld [vmem:[%s1737_s5 + $0x40] ss:$8 sps:$4 sm:$0xff]   ;;  %v1376_v21 = vld [vmem:[%s1737_s5 + $0x54] ss:$8 sps:$4 sm:$0xff]   ;;  %v1380_v23 = vld [vmem:[%s1737_s5 + $0x50] ss:$8 sps:$4 sm:$0xff]  }
  0x55   : > { %1002 = vmatpush1.bf16.msra.mxu1 %v1357_v8  ;;  %962 = vmatprep.subr.bf16.mxu0 %v1358_v9  ;;  %v1375_v20 = vld [vmem:[%s1737_s5 + $0x140] ss:$8 sps:$4 sm:$0xff]   ;;  %v1378_v22 = vld [vmem:[%s1737_s5 + $0x154] ss:$8 sps:$4 sm:$0xff]   ;;  %v1381_v24 = vld [vmem:[%s1737_s5 + $0x150] ss:$8 sps:$4 sm:$0xff]  }
  0x56   : > { %1003 = vmatprep.subr.bf16.mxu1 %v1360_v10  ;;  %v1382_v25 = vld [vmem:[%s1737_s5 + $0x64] ss:$8 sps:$4 sm:$0xff]   ;;  %v1386_v27 = vld [vmem:[%s1737_s5 + $0x60] ss:$8 sps:$4 sm:$0xff]   ;;  %v1388_v29 = vld [vmem:[%s1737_s5 + $0x74] ss:$8 sps:$4 sm:$0xff]  }
  0x57   : > { %v1384_v26 = vld [vmem:[%s1737_s5 + $0x164] ss:$8 sps:$4 sm:$0xff]   ;;  %v1387_v28 = vld [vmem:[%s1737_s5 + $0x160] ss:$8 sps:$4 sm:$0xff]   ;;  %v1390_v30 = vld [vmem:[%s1737_s5 + $0x174] ss:$8 sps:$4 sm:$0xff]  }
  0x58   : > { %963 = vmatpush1.bf16.msra.mxu0 %v1362_v11  ;;  %v1392_v31 = vld [vmem:[%s1737_s5 + $0x70] ss:$8 sps:$4 sm:$0xff]   ;;  %v1394_v33 = vld [vmem:[%s1737_s5 + $0x84] ss:$8 sps:$4 sm:$0xff]   ;;  %v1398_v35 = vld [vmem:[%s1737_s5 + $0x80] ss:$8 sps:$4 sm:$0xff]  }
  0x59   : > { %1004 = vmatpush1.bf16.msra.mxu1 %v1363_v12  ;;  %964 = vmatprep.subr.bf16.mxu0 %v1364_v13  ;;  %v1393_v32 = vld [vmem:[%s1737_s5 + $0x170] ss:$8 sps:$4 sm:$0xff]   ;;  %v1396_v34 = vld [vmem:[%s1737_s5 + $0x184] ss:$8 sps:$4 sm:$0xff]   ;;  %v1399_v36 = vld [vmem:[%s1737_s5 + $0x180] ss:$8 sps:$4 sm:$0xff]  }
  0x5a   : > { %1005 = vmatprep.subr.bf16.mxu1 %v1366_v14  ;;  %v1400_v37 = vld [vmem:[%s1737_s5 + $0x94] ss:$8 sps:$4 sm:$0xff]   ;;  %v1404_v39 = vld [vmem:[%s1737_s5 + $0x90] ss:$8 sps:$4 sm:$0xff]   ;;  %v1406_v41 = vld [vmem:[%s1737_s5 + $0xa4] ss:$8 sps:$4 sm:$0xff]  }
  0x5b   : > { %v1402_v38 = vld [vmem:[%s1737_s5 + $0x194] ss:$8 sps:$4 sm:$0xff]   ;;  %v1405_v40 = vld [vmem:[%s1737_s5 + $0x190] ss:$8 sps:$4 sm:$0xff]   ;;  %v1408_v42 = vld [vmem:[%s1737_s5 + $0x1a4] ss:$8 sps:$4 sm:$0xff]  }
  0x5c   : > { %965 = vmatpush1.bf16.msra.mxu0 %v1368_v15  ;;  %v1410_v43 = vld [vmem:[%s1737_s5 + $0xa0] ss:$8 sps:$4 sm:$0xff]   ;;  %v1412_v45 = vld [vmem:[%s1737_s5 + $0xb4] ss:$8 sps:$4 sm:$0xff]   ;;  %v1416_v50 = vld [vmem:[%s1737_s5 + $0xb0] ss:$8 sps:$4 sm:$0xff]  }
  0x5d   : > { %1006 = vmatpush1.bf16.msra.mxu1 %v1369_v16  ;;  %966 = vmatprep.subr.bf16.mxu0 %v1370_v17  ;;  %v1411_v44 = vld [vmem:[%s1737_s5 + $0x1a0] ss:$8 sps:$4 sm:$0xff]   ;;  %v1414_v46 = vld [vmem:[%s1737_s5 + $0x1b4] ss:$8 sps:$4 sm:$0xff]   ;;  %v1417_v51 = vld [vmem:[%s1737_s5 + $0x1b0] ss:$8 sps:$4 sm:$0xff]  }
  0x5e   : > { %1007 = vmatprep.subr.bf16.mxu1 %v1372_v18  ;;  %v558_v47 = vld [vmem:[%s1723_s26] sm:$0xff]  ;;  %v559_v49 = vld [vmem:[%s1723_s26 + $0x8] sm:$0xff]  ;;  %v1418_v53 = vld [vmem:[%s1737_s5 + $0xc4] ss:$8 sps:$4 sm:$0xff]   ;;  %p1283_p13 = scmp.ne.s32.totalorder %s1484_s14, 8 }
  0x5f   : > { %v1216_v48 = vcombine.high %v558_v47, %v558_v47  ;;  %v1218_v52 = vcombine.high %v559_v49, %v559_v49  ;;  %v1420_v54 = vld [vmem:[%s1737_s5 + $0x1c4] ss:$8 sps:$4 sm:$0xff]   ;;  %v1422_v55 = vld [vmem:[%s1737_s5 + $0xc0] ss:$8 sps:$4 sm:$0xff]   ;;  %v1424_v57 = vld [vmem:[%s1737_s5 + $0xd4] ss:$8 sps:$4 sm:$0xff]   ;;  %v1215_v5 = vcombine.low %v558_v47, %v558_v47  ;;  %v1217_v6 = vcombine.low %v559_v49, %v559_v49 }
  0x60   : > { %967 = vmatpush1.bf16.msra.mxu0 %v1374_v19  ;;  %v1423_v56 = vld [vmem:[%s1737_s5 + $0x1c0] ss:$8 sps:$4 sm:$0xff]   ;;  %v1426_v58 = vld [vmem:[%s1737_s5 + $0x1d4] ss:$8 sps:$4 sm:$0xff]   ;;  %v1428_v59 = vld [vmem:[%s1737_s5 + $0xd0] ss:$8 sps:$4 sm:$0xff]  }
  0x61   : > { %1008 = vmatpush1.bf16.msra.mxu1 %v1375_v20  ;;  %968 = vmatprep.subr.bf16.mxu0 %v1376_v21  ;;  %v1429_v60 = vld [vmem:[%s1737_s5 + $0x1d0] ss:$8 sps:$4 sm:$0xff]   ;;  %v1430_v61 = vld [vmem:[%s1737_s5 + $0xe4] ss:$8 sps:$4 sm:$0xff]   ;;  %v1434_v63 = vld [vmem:[%s1737_s5 + $0xe0] ss:$8 sps:$4 sm:$0xff]   ;;  %v1052_v21 = vlaneseq (!%p1283_p13) }
  0x62   : > { %1009 = vmatprep.subr.bf16.mxu1 %v1378_v22  ;;  %990 = vmatprep.mubr.bf16.mxu0 %v1216_v48  ;;  %v1432_v62 = vld [vmem:[%s1737_s5 + $0x1e4] ss:$8 sps:$4 sm:$0xff]   ;;  %v1435_v0 = vld [vmem:[%s1737_s5 + $0x1e0] ss:$8 sps:$4 sm:$0xff]   ;;  %v1436_v1 = vld [vmem:[%s1737_s5 + $0xf4] ss:$8 sps:$4 sm:$0xff]  }
  0x63   : > { %1031 = vmatprep.mubr.bf16.mxu1 %v1218_v52  ;;  %v1438_v2 = vld [vmem:[%s1737_s5 + $0x1f4] ss:$8 sps:$4 sm:$0xff]   ;;  %v1440_v3 = vld [vmem:[%s1737_s5 + $0xf0] ss:$8 sps:$4 sm:$0xff]   ;;  %v1053_v22 = vshrl.u32 (!%p1283_p13), %v1052_v21, 7 }
  0x64   : > { %969 = vmatpush1.bf16.msra.mxu0 %v1380_v23  ;;  %v1441_v4 = vld [vmem:[%s1737_s5 + $0x1f0] ss:$8 sps:$4 sm:$0xff]  }
  0x65   : > { %1010 = vmatpush1.bf16.msra.mxu1 %v1381_v24  ;;  %970 = vmatprep.subr.bf16.mxu0 %v1382_v25  ;;  %v556_v8 = vld [vmem:[#allocation2] sm:$0xff]  ;;  %v557_v12 = vld [vmem:[#allocation2 + $0x8] sm:$0xff]  ;;  %v1054_v24 = vsub.s32 (!%p1283_p13), 0, %v1053_v22  ;;  %v1058_v25 = vsub.s32 (!%p1283_p13), 1, %v1053_v22 }
  0x66   : > { %1011 = vmatprep.subr.bf16.mxu1 %v1384_v26  ;;  %v1050_v23 = vld [vmem:[%s538_s12] sm:$0x3] (!%p1283_p13) }
  0x68   : > { %971 = vmatpush1.bf16.msra.mxu0 %v1386_v27 }
  0x69   : > { %1012 = vmatpush1.bf16.msra.mxu1 %v1387_v28  ;;  %972 = vmatprep.subr.bf16.mxu0 %v1388_v29  ;;  %v1055_v28 = vrot.slane (!%p1283_p13), %v1050_v23, %v1054_v24  ;;  %v1059_v29 = vrot.slane (!%p1283_p13), %v1050_v23, %v1058_v25 }
  0x6a   : > { %1013 = vmatprep.subr.bf16.mxu1 %v1390_v30 }
  0x6c   : > { %973 = vmatpush1.bf16.msra.mxu0 %v1392_v31 }
  0x6d   : > { %1014 = vmatpush1.bf16.msra.mxu1 %v1393_v32  ;;  %974 = vmatprep.subr.bf16.mxu0 %v1394_v33 }
  0x6e   : > { %1015 = vmatprep.subr.bf16.mxu1 %v1396_v34 }
  0x70   : > { %975 = vmatpush1.bf16.msra.mxu0 %v1398_v35 }
  0x71   : > { %1016 = vmatpush1.bf16.msra.mxu1 %v1399_v36  ;;  %976 = vmatprep.subr.bf16.mxu0 %v1400_v37 }
  0x72   : > { %1017 = vmatprep.subr.bf16.mxu1 %v1402_v38 }
  0x74   : > { %977 = vmatpush1.bf16.msra.mxu0 %v1404_v39 }
  0x75   : > { %1018 = vmatpush1.bf16.msra.mxu1 %v1405_v40  ;;  %978 = vmatprep.subr.bf16.mxu0 %v1406_v41 }
  0x76   : > { %1019 = vmatprep.subr.bf16.mxu1 %v1408_v42 }
  0x78   : > { %979 = vmatpush1.bf16.msra.mxu0 %v1410_v43 }
  0x79   : > { %1020 = vmatpush1.bf16.msra.mxu1 %v1411_v44  ;;  %980 = vmatprep.subr.bf16.mxu0 %v1412_v45 }
  0x7a   : > { %1021 = vmatprep.subr.bf16.mxu1 %v1414_v46 }
  0x7c   : > { %981 = vmatpush1.bf16.msra.mxu0 %v1416_v50 }
  0x7d   : > { %1022 = vmatpush1.bf16.msra.mxu1 %v1417_v51  ;;  %982 = vmatprep.subr.bf16.mxu0 %v1418_v53 }
  0x7e   : > { %1023 = vmatprep.subr.bf16.mxu1 %v1420_v54 }
  0x80   : > { %983 = vmatpush1.bf16.msra.mxu0 %v1422_v55 }
  0x81   : > { %1024 = vmatpush1.bf16.msra.mxu1 %v1423_v56  ;;  %984 = vmatprep.subr.bf16.mxu0 %v1424_v57 }
  0x82   : > { %1025 = vmatprep.subr.bf16.mxu1 %v1426_v58 }
  0x84   : > { %985 = vmatpush1.bf16.msra.mxu0 %v1428_v59 }
  0x85   : > { %1026 = vmatpush1.bf16.msra.mxu1 %v1429_v60  ;;  %986 = vmatprep.subr.bf16.mxu0 %v1430_v61 }
  0x86   : > { %1027 = vmatprep.subr.bf16.mxu1 %v1432_v62 }
  0x88   : > { %987 = vmatpush1.bf16.msra.mxu0 %v1434_v63 }
  0x89   : > { %1028 = vmatpush1.bf16.msra.mxu1 %v1435_v0  ;;  %988 = vmatprep.subr.bf16.mxu0 %v1436_v1 }
  0x8a   : > { %1029 = vmatprep.subr.bf16.mxu1 %v1438_v2 }
  0x8c   : > { %989 = vmatpush1.bf16.msra.mxu0 %v1440_v3 }
  0x8d   : > { %1030 = vmatpush1.bf16.msra.mxu1 %v1441_v4 }
  0x8f   : > { %991 = vmatmul.mubr.bf16.vlgmr.msra.gmra.mrb[0].mxu0 %v1215_v5 }
  0x90   : > { %1032 = vmatmul.mubr.bf16.vlgmr.msra.gmra.mrb[0].mxu1 %v1217_v6 }
 0x162   : > { %v992_v7 = vpop.f32.mrb[0].mxu0 }
 0x163   : > { %v1033_v9 = vpop.f32.mrb[0].mxu1  ;;  %v994_v11 = vpop.f32.mrb[1].mxu0  ;;  %1047 = sbr.rel (%p1283_p13) target bundleno = 376 (0x178), region = 78 }
 0x164   : > { %v1034_v10 = vadd.f32 %v1033_v9, %v992_v7  ;;  %v1035_v13 = vpop.f32.mrb[1].mxu1  ;;  %v996_v15 = vpop.f32.mrb[2].mxu0 }
 0x165   : > { %v1036_v14 = vadd.f32 %v1035_v13, %v994_v11  ;;  %v1037_v16 = vpop.f32.mrb[2].mxu1  ;;  %v997_v18 = vpop.f32.mrb[3].mxu0 }
 0x166   : > { %v1040_v17 = vadd.f32 %v1034_v10, %v556_v8  ;;  %v1038_v19 = vpop.f32.mrb[3].mxu1 }
 0x167   : > { %v1041_v20 = vadd.f32 %v1036_v14, %v557_v12 }
 0x168   : > { %1042 = vst [vmem:[#allocation2] sm:$0xff] %v1040_v17 }
 0x169   : > { %1043 = vst [vmem:[#allocation2 + $0x8] sm:$0xff] %v1041_v20 }
 0x16f   : > { %v1048_v26 = vld [vmem:[#allocation2] sm:$0xff] }
 0x170   : > { %v1049_v27 = vld [vmem:[#allocation2 + $0x8] sm:$0xff]  ;;  %v1062_v30 = vadd.f32 %v1055_v28, %v1048_v26 }
 0x171   : > { %v1063_v31 = vadd.f32 %v1059_v29, %v1049_v27 }
 0x172   : > { %v1064_v32 = vmax.f32 %v1062_v30, 0.0 }
 0x173   : > { %v1065_v33 = vmax.f32 %v1063_v31, 0.0 }
 0x175   : > { %v1288_v34 = vpack.c.bf16 %v1065_v33, %v1064_v32 }
 0x177   : > { %1074 = vst [vmem:[%s1735_s15] sm:$0xff] %v1288_v34 }
 0x178 PF: > { %s13_s18 = sadd.s32 1, %s1500_s18   ;;  %s1838_s12 = smov %s1480_s13 }
 0x179   : > { %p10_p0 = scmp.ge.s32.totalorder %s13_s18, 20   ;;  %s1839_s13 = smov %s1574_s25 }
 0x17a   : > { %s1840_s14 = smov %s1492_s16  ;;  %s1841_s15 = smov %s1496_s17 }
 0x17b   : > { %s1842_s16 = smov %s1845_s19  ;;  %s1843_s17 = smov %s1849_s20 }
 0x17c   :  { %12 = sbr.rel (!%p10_p0) target bundleno = 4 (0x4), region = 119 }

// kernel: resnet34_forward.76
= control target key start
LH: loop header
LB: loop body
LE: loop exit
PB: predicated region body
PF: predicated region fallthrough
CT: control target
= control target key end

     0   :  { %vm26_vm0 = vcmask 1043456   ;;  %v218_v2 = vmov 1983009808   ;;  %v169_v9 = vlaneseq  ;;  %vm203_vm1 = vcmask 1041409   ;;  %s311_s0 = inlined_call_operand.vmem [shape: bf16[2,4,512], index: 0, kind: input, shape index: {}]   ;;  %s312_s1 = inlined_call_operand.vmem [shape: f32[2,512], index: 1, kind: output, shape index: {}]  }
   0x1   :  { %v8_v0 = vld [vmem:[%s311_s0] sm:$0xff]  ;;  %v9_v1 = vld [vmem:[%s311_s0 + $0x8] sm:$0xff]  ;;  %v235_v3 = vunpack.c.l.s4 %v218_v2  ;;  %vm205_vm2 = vcmask 1043459   ;;  %vm207_vm3 = vcmask 1045509   ;;  %vm209_vm4 = vcmask 1047559  }
   0x2   :  { %v237_v4 = vunpack.c.l.bf16 %v8_v0  ;;  %v239_v5 = vunpack.c.h.bf16 %v8_v0  ;;  %v241_v6 = vunpack.c.l.bf16 %v9_v1  ;;  %v243_v7 = vunpack.c.h.bf16 %v9_v1 }
   0x3   :  { %v168_v8 = vunpack.c.0.s8 %v235_v3 }
   0x4   :  { %v248_v10 = vcombine.high %v237_v4, %v237_v4  ;;  %v252_v11 = vcombine.high %v239_v5, %v239_v5  ;;  %v256_v12 = vcombine.high %v241_v6, %v241_v6  ;;  %v260_v13 = vcombine.high %v243_v7, %v243_v7 }
   0x5   :  { %v27_v14 = vsel %vm26_vm0, %v237_v4, 0.0  ;;  %v41_v15 = vsel %vm26_vm0, %v239_v5, 0.0  ;;  %v55_v16 = vsel %vm26_vm0, %v241_v6, 0.0  ;;  %v69_v17 = vsel %vm26_vm0, %v243_v7, 0.0 }
   0x6   :  { %v28_v18 = vrot.slane %v27_v14, 4  ;;  %v34_v19 = vsel %vm26_vm0, %v248_v10, 0.0  ;;  %v42_v20 = vrot.slane %v41_v15, 4  ;;  %v48_v21 = vsel %vm26_vm0, %v252_v11, 0.0 }
   0x7   :  { %v35_v22 = vrot.slane %v34_v19, 4  ;;  %v49_v23 = vrot.slane %v48_v21, 4  ;;  %v56_v24 = vrot.slane %v55_v16, 4  ;;  %v62_v25 = vsel %vm26_vm0, %v256_v12, 0.0 }
   0x8   :  { %v29_v26 = vadd.f32 %v28_v18, %v27_v14  ;;  %v43_v27 = vadd.f32 %v42_v20, %v41_v15  ;;  %v63_v28 = vrot.slane %v62_v25, 4  ;;  %v70_v29 = vrot.slane %v69_v17, 4 }
   0x9   :  { %v36_v30 = vadd.f32 %v35_v22, %v34_v19  ;;  %v50_v31 = vadd.f32 %v49_v23, %v48_v21  ;;  %v57_v32 = vadd.f32 %v56_v24, %v55_v16  ;;  %v76_v33 = vsel %vm26_vm0, %v260_v13, 0.0 }
   0xa   :  { %v30_v34 = vrot.slane %v29_v26, 2  ;;  %v44_v35 = vrot.slane %v43_v27, 2  ;;  %v64_v36 = vadd.f32 %v63_v28, %v62_v25  ;;  %v71_v37 = vadd.f32 %v70_v29, %v69_v17 }
   0xb   :  { %v37_v38 = vrot.slane %v36_v30, 2  ;;  %v51_v39 = vrot.slane %v50_v31, 2  ;;  %v58_v40 = vrot.slane %v57_v32, 2  ;;  %v77_v41 = vrot.slane %v76_v33, 4 }
   0xc   :  { %v31_v42 = vadd.f32 %v30_v34, %v29_v26  ;;  %v45_v43 = vadd.f32 %v44_v35, %v43_v27  ;;  %v65_v44 = vrot.slane %v64_v36, 2  ;;  %v72_v45 = vrot.slane %v71_v37, 2 }
   0xd   :  { %v38_v46 = vadd.f32 %v37_v38, %v36_v30  ;;  %v52_v47 = vadd.f32 %v51_v39, %v50_v31  ;;  %v59_v48 = vadd.f32 %v58_v40, %v57_v32  ;;  %v78_v49 = vadd.f32 %v77_v41, %v76_v33 }
   0xe   :  { %v32_v50 = vrot.slane %v31_v42, 1  ;;  %v46_v51 = vrot.slane %v45_v43, 1  ;;  %v66_v52 = vadd.f32 %v65_v44, %v64_v36  ;;  %v73_v53 = vadd.f32 %v72_v45, %v71_v37 }
   0xf   :  { %v39_v54 = vrot.slane %v38_v46, 1  ;;  %v53_v55 = vrot.slane %v52_v47, 1  ;;  %v60_v56 = vrot.slane %v59_v48, 1  ;;  %v79_v57 = vrot.slane %v78_v49, 2 }
  0x10   :  { %v33_v58 = vadd.f32 %v32_v50, %v31_v42  ;;  %v47_v59 = vadd.f32 %v46_v51, %v45_v43  ;;  %v67_v60 = vrot.slane %v66_v52, 1  ;;  %v74_v61 = vrot.slane %v73_v53, 1 }
  0x11   :  { %v40_v62 = vadd.f32 %v39_v54, %v38_v46  ;;  %v54_v63 = vadd.f32 %v53_v55, %v52_v47  ;;  %v61_v0 = vadd.f32 %v60_v56, %v59_v48  ;;  %v80_v1 = vadd.f32 %v79_v57, %v78_v49 }
  0x12   :  { %v68_v2 = vadd.f32 %v67_v60, %v66_v52  ;;  %v75_v14 = vadd.f32 %v74_v61, %v73_v53  ;;  %v84_v15 = vmul.f32 0.25, %v33_v58  ;;  %v278_v16 = vshrl.u32 %v169_v9, 7 }
  0x13   :  { %v81_v17 = vrot.slane %v80_v1, 1  ;;  %v85_v18 = vmul.f32 0.25, %v40_v62  ;;  %v86_v19 = vmul.f32 0.25, %v47_v59  ;;  %v87_v20 = vmul.f32 0.25, %v54_v63 }
  0x14   :  { %v280_v21 = vmul.f32 0.25, %v61_v0  ;;  %v282_v22 = vmul.f32 0.25, %v68_v2  ;;  %v92_v23 = vsel %vm26_vm0, %v237_v4, -inf  ;;  %v99_v24 = vsel %vm26_vm0, %v248_v10, -inf }
  0x15   :  { %v288_v25 = vmul.f32 0.25, %v75_v14  ;;  %v93_v26 = vrot.slane %v92_v23, 4  ;;  %v100_v27 = vrot.slane %v99_v24, 4  ;;  %v106_v9 = vsel %vm26_vm0, %v239_v5, -inf }
  0x16   :  { %v107_v28 = vrot.slane %v106_v9, 4  ;;  %v113_v29 = vsel %vm26_vm0, %v252_v11, -inf  ;;  %v120_v30 = vsel %vm26_vm0, %v241_v6, -inf  ;;  %v127_v4 = vsel %vm26_vm0, %v256_v12, -inf }
  0x17   :  { %v82_v31 = vadd.f32 %v81_v17, %v80_v1  ;;  %v94_v32 = vmax.f32 %v92_v23, %v93_v26  ;;  %v101_v10 = vmax.f32 %v99_v24, %v100_v27  ;;  %v114_v33 = vrot.slane %v113_v29, 4 }
  0x18   :  { %v108_v34 = vmax.f32 %v106_v9, %v107_v28  ;;  %v121_v35 = vrot.slane %v120_v30, 4  ;;  %v128_v36 = vrot.slane %v127_v4, 4  ;;  %v134_v5 = vsel %vm26_vm0, %v243_v7, -inf }
  0x19   :  { %v95_v37 = vrot.slane %v94_v32, 2  ;;  %v102_v38 = vrot.slane %v101_v10, 2  ;;  %v115_v39 = vmax.f32 %v113_v29, %v114_v33  ;;  %v135_v11 = vrot.slane %v134_v5, 4 }
  0x1a   :  { %v109_v40 = vrot.slane %v108_v34, 2  ;;  %v122_v41 = vmax.f32 %v120_v30, %v121_v35  ;;  %v129_v6 = vmax.f32 %v127_v4, %v128_v36  ;;  %v141_v12 = vsel %vm26_vm0, %v260_v13, -inf }
  0x1b   :  { %v96_v42 = vmax.f32 %v94_v32, %v95_v37  ;;  %v103_v43 = vmax.f32 %v101_v10, %v102_v38  ;;  %v116_v44 = vrot.slane %v115_v39, 2  ;;  %v136_v45 = vmax.f32 %v134_v5, %v135_v11 }
  0x1c   :  { %v110_v46 = vmax.f32 %v108_v34, %v109_v40  ;;  %v123_v47 = vrot.slane %v122_v41, 2  ;;  %v130_v48 = vrot.slane %v129_v6, 2  ;;  %v142_v49 = vrot.slane %v141_v12, 4 }
  0x1d   :  { %v97_v50 = vrot.slane %v96_v42, 1  ;;  %v104_v7 = vrot.slane %v103_v43, 1  ;;  %v117_v51 = vmax.f32 %v115_v39, %v116_v44  ;;  %v137_v52 = vrot.slane %v136_v45, 2 }
  0x1e   :  { %v111_v53 = vrot.slane %v110_v46, 1  ;;  %v124_v54 = vmax.f32 %v122_v41, %v123_v47  ;;  %v131_v55 = vmax.f32 %v129_v6, %v130_v48  ;;  %v143_v56 = vmax.f32 %v141_v12, %v142_v49 }
  0x1f   :  { %v98_v57 = vmax.f32 %v96_v42, %v97_v50  ;;  %v105_v58 = vmax.f32 %v103_v43, %v104_v7  ;;  %v118_v59 = vrot.slane %v117_v51, 1  ;;  %v138_v13 = vmax.f32 %v136_v45, %v137_v52 }
  0x20   :  { %v112_v60 = vmax.f32 %v110_v46, %v111_v53  ;;  %v125_v61 = vrot.slane %v124_v54, 1  ;;  %v132_v62 = vrot.slane %v131_v55, 1  ;;  %v144_v63 = vrot.slane %v143_v56, 2 }
  0x21   :  { %v119_v0 = vmax.f32 %v117_v51, %v118_v59  ;;  %v139_v1 = vrot.slane %v138_v13, 1  ;;  %v148_v2 = vadd.f32 %v98_v57, %v84_v15  ;;  %v149_v14 = vadd.f32 %v105_v58, %v85_v18 }
  0x22   :  { %v126_v17 = vmax.f32 %v124_v54, %v125_v61  ;;  %v133_v23 = vmax.f32 %v131_v55, %v132_v62  ;;  %v145_v24 = vmax.f32 %v143_v56, %v144_v63  ;;  %v150_v26 = vadd.f32 %v112_v60, %v86_v19 }
  0x23   :  { %v140_v27 = vmax.f32 %v138_v13, %v139_v1  ;;  %v151_v9 = vadd.f32 %v119_v0, %v87_v20  ;;  %v91_v28 = vmul.f32 0.25, %v82_v31  ;;  %v164_v32 = vcombine.low %v148_v2, %v149_v14 }
  0x24   :  { %v146_v29 = vrot.slane %v145_v24, 1  ;;  %v152_v30 = vadd.f32 %v126_v17, %v280_v21  ;;  %v153_v4 = vadd.f32 %v133_v23, %v282_v22  ;;  %v171_v10 = vsub.s32 %v168_v8, %v278_v16 }
  0x25   :  { %v154_v15 = vadd.f32 %v140_v27, %v288_v25  ;;  %v165_v18 = vcombine.low %v150_v26, %v151_v9 }
  0x26   :  { %v147_v33 = vmax.f32 %v145_v24, %v146_v29  ;;  %v181_v34 = vcombine.low %v152_v30, %v153_v4  ;;  %v172_v19 = vrot.slane %v164_v32, %v171_v10 }
  0x27   :  { %v179_v36 = vrot.slane %v165_v18, %v171_v10 }
  0x28   :  { %v155_v35 = vadd.f32 %v147_v33, %v91_v28  ;;  %v189_v31 = vrot.slane %v181_v34, %v171_v10 }
  0x29   :  { %v180_v37 = vcombine.low %v172_v19, %v179_v36 }
  0x2a   :  { %v182_v20 = vcombine.low %v154_v15, %v155_v35 }
  0x2c   :  { %v196_v5 = vrot.slane %v182_v20, %v171_v10 }
  0x2e   :  { %v197_v21 = vcombine.low %v189_v31, %v196_v5 }
  0x30   :  { %v202_v22 = vrot.slane %v197_v21, 7 }
  0x32   :  { %v204_v38 = vsel %vm203_vm1, %v202_v22, %v180_v37 }
  0x33   :  { %v206_v3 = vsel %vm205_vm2, %v202_v22, %v204_v38 }
  0x34   :  { %v208_v8 = vsel %vm207_vm3, %v202_v22, %v206_v3 }
  0x35   :  { %v210_v16 = vsel %vm209_vm4, %v202_v22, %v208_v8 }
  0x36   :  { %212 = vst [vmem:[%s312_s1] sm:$0xff] %v210_v16 }

// kernel: resnet34_forward.77
= control target key start
LH: loop header
LB: loop body
LE: loop exit
PB: predicated region body
PF: predicated region fallthrough
CT: control target
= control target key end

     0   :  { %v436_v47 = vmov 1983009808   ;;  %v92_v49 = vlaneseq  ;;  %s668_s0 = inlined_call_operand.vmem [shape: f32[2,512], index: 0, kind: input, shape index: {}]   ;;  %s669_s1 = inlined_call_operand.vmem [shape: f32[512,128], index: 1, kind: input, shape index: {}]   ;;  %s670_s2 = inlined_call_operand.vmem [shape: f32[1,128], index: 2, kind: input, shape index: {}]   ;;  %s671_s3 = inlined_call_operand.hbm [shape: f32[2,128], index: 3, kind: output, shape index: {}]  }
   0x1   :  { %v32_v0 = vld [vmem:[%s669_s1 + $0x80] sm:$0xff]  ;;  %v33_v1 = vld [vmem:[%s669_s1 + $0x88] sm:$0xff]  ;;  %v34_v11 = vld [vmem:[%s669_s1 + $0x90] sm:$0xff]  ;;  %v90_v48 = vunpack.c.l.s4 %v436_v47 }
   0x2   :  { %v16_v2 = vld [vmem:[%s669_s1] sm:$0xff]  ;;  %v343_v3 = vpack.c.bf16 %v33_v1, %v32_v0  ;;  %v17_v4 = vld [vmem:[%s669_s1 + $0x8] sm:$0xff]  ;;  %v35_v13 = vld [vmem:[%s669_s1 + $0x98] sm:$0xff]  ;;  %v93_v0 = vshrl.u32 %v92_v49, 7 }
   0x3   :  { %v64_v5 = vld [vmem:[%s669_s1 + $0x180] sm:$0xff]  ;;  %v65_v6 = vld [vmem:[%s669_s1 + $0x188] sm:$0xff]  ;;  %v345_v7 = vpack.c.bf16 %v17_v4, %v16_v2  ;;  %v18_v14 = vld [vmem:[%s669_s1 + $0x10] sm:$0xff]  ;;  %v347_v16 = vpack.c.bf16 %v35_v13, %v34_v11  ;;  %v91_v63 = vunpack.c.0.s8 %v90_v48 }
   0x4   :  { %v375_v8 = vpack.c.bf16 %v65_v6, %v64_v5  ;;  %v48_v9 = vld [vmem:[%s669_s1 + $0x100] sm:$0xff]  ;;  %v49_v10 = vld [vmem:[%s669_s1 + $0x108] sm:$0xff]  ;;  %344 = vmatprep.subr.bf16.mxu0 %v343_v3  ;;  %v19_v15 = vld [vmem:[%s669_s1 + $0x18] sm:$0xff] }
   0x5   :  { %v377_v12 = vpack.c.bf16 %v49_v10, %v48_v9  ;;  %346 = vmatpush3.bf16.msra.mxu0 %v345_v7  ;;  %v349_v17 = vpack.c.bf16 %v19_v15, %v18_v14  ;;  %v66_v18 = vld [vmem:[%s669_s1 + $0x190] sm:$0xff]  ;;  %v67_v19 = vld [vmem:[%s669_s1 + $0x198] sm:$0xff]  ;;  %v36_v23 = vld [vmem:[%s669_s1 + $0xa0] sm:$0xff]  ;;  %v94_v13 = vsub.s32 %v91_v63, %v93_v0 }
   0x6   :  { %376 = vmatprep.subr.bf16.mxu1 %v375_v8  ;;  %v50_v20 = vld [vmem:[%s669_s1 + $0x110] sm:$0xff]  ;;  %v379_v21 = vpack.c.bf16 %v67_v19, %v66_v18  ;;  %v51_v22 = vld [vmem:[%s669_s1 + $0x118] sm:$0xff]  ;;  %v37_v24 = vld [vmem:[%s669_s1 + $0xa8] sm:$0xff]  ;;  %348 = vmatprep.subr.bf16.mxu0 %v347_v16 }
   0x7   :  { %378 = vmatpush3.bf16.msra.mxu1 %v377_v12  ;;  %v381_v25 = vpack.c.bf16 %v51_v22, %v50_v20  ;;  %v351_v26 = vpack.c.bf16 %v37_v24, %v36_v23  ;;  %v20_v27 = vld [vmem:[%s669_s1 + $0x20] sm:$0xff]  ;;  %v21_v28 = vld [vmem:[%s669_s1 + $0x28] sm:$0xff]  ;;  %v38_v35 = vld [vmem:[%s669_s1 + $0xb0] sm:$0xff] }
   0x8   :  { %v68_v29 = vld [vmem:[%s669_s1 + $0x1a0] sm:$0xff]  ;;  %380 = vmatprep.subr.bf16.mxu1 %v379_v21  ;;  %v69_v30 = vld [vmem:[%s669_s1 + $0x1a8] sm:$0xff]  ;;  %v353_v33 = vpack.c.bf16 %v21_v28, %v20_v27  ;;  %v39_v36 = vld [vmem:[%s669_s1 + $0xb8] sm:$0xff] }
   0x9   :  { %v52_v31 = vld [vmem:[%s669_s1 + $0x120] sm:$0xff]  ;;  %v53_v32 = vld [vmem:[%s669_s1 + $0x128] sm:$0xff]  ;;  %350 = vmatpush3.bf16.msra.mxu0 %v349_v17  ;;  %v383_v34 = vpack.c.bf16 %v69_v30, %v68_v29  ;;  %v22_v37 = vld [vmem:[%s669_s1 + $0x30] sm:$0xff]  ;;  %v355_v39 = vpack.c.bf16 %v39_v36, %v38_v35 }
   0xa   :  { %352 = vmatprep.subr.bf16.mxu0 %v351_v26  ;;  %v385_v38 = vpack.c.bf16 %v53_v32, %v52_v31  ;;  %v23_v40 = vld [vmem:[%s669_s1 + $0x38] sm:$0xff]  ;;  %v70_v41 = vld [vmem:[%s669_s1 + $0x1b0] sm:$0xff]  ;;  %v40_v46 = vld [vmem:[%s669_s1 + $0xc0] sm:$0xff] }
   0xb   :  { %382 = vmatpush3.bf16.msra.mxu1 %v381_v25  ;;  %v71_v42 = vld [vmem:[%s669_s1 + $0x1b8] sm:$0xff]  ;;  %v54_v44 = vld [vmem:[%s669_s1 + $0x130] sm:$0xff]  ;;  %v41_v50 = vld [vmem:[%s669_s1 + $0xc8] sm:$0xff]  ;;  %v357_v51 = vpack.c.bf16 %v23_v40, %v22_v37 }
   0xc   :  { %384 = vmatprep.subr.bf16.mxu1 %v383_v34  ;;  %v387_v43 = vpack.c.bf16 %v71_v42, %v70_v41  ;;  %v55_v45 = vld [vmem:[%s669_s1 + $0x138] sm:$0xff]  ;;  %v72_v52 = vld [vmem:[%s669_s1 + $0x1c0] sm:$0xff]  ;;  %v73_v53 = vld [vmem:[%s669_s1 + $0x1c8] sm:$0xff]  ;;  %v359_v55 = vpack.c.bf16 %v41_v50, %v40_v46 }
   0xd   :  { %354 = vmatpush3.bf16.msra.mxu0 %v353_v33  ;;  %v389_v54 = vpack.c.bf16 %v55_v45, %v54_v44  ;;  %v24_v56 = vld [vmem:[%s669_s1 + $0x40] sm:$0xff]  ;;  %v25_v57 = vld [vmem:[%s669_s1 + $0x48] sm:$0xff]  ;;  %v391_v59 = vpack.c.bf16 %v73_v53, %v72_v52  ;;  %v42_v61 = vld [vmem:[%s669_s1 + $0xd0] sm:$0xff] }
   0xe   :  { %356 = vmatprep.subr.bf16.mxu0 %v355_v39  ;;  %v56_v58 = vld [vmem:[%s669_s1 + $0x140] sm:$0xff]  ;;  %v57_v60 = vld [vmem:[%s669_s1 + $0x148] sm:$0xff]  ;;  %v43_v62 = vld [vmem:[%s669_s1 + $0xd8] sm:$0xff]  ;;  %v361_v3 = vpack.c.bf16 %v25_v57, %v24_v56 }
   0xf   :  { %386 = vmatpush3.bf16.msra.mxu1 %v385_v38  ;;  %v74_v1 = vld [vmem:[%s669_s1 + $0x1d0] sm:$0xff]  ;;  %v75_v2 = vld [vmem:[%s669_s1 + $0x1d8] sm:$0xff]  ;;  %v393_v4 = vpack.c.bf16 %v57_v60, %v56_v58  ;;  %v363_v5 = vpack.c.bf16 %v43_v62, %v42_v61  ;;  %v44_v11 = vld [vmem:[%s669_s1 + $0xe0] sm:$0xff] }
  0x10   :  { %388 = vmatprep.subr.bf16.mxu1 %v387_v43  ;;  %v26_v6 = vld [vmem:[%s669_s1 + $0x50] sm:$0xff]  ;;  %v27_v7 = vld [vmem:[%s669_s1 + $0x58] sm:$0xff]  ;;  %v395_v9 = vpack.c.bf16 %v75_v2, %v74_v1  ;;  %v45_v12 = vld [vmem:[%s669_s1 + $0xe8] sm:$0xff] }
  0x11   :  { %358 = vmatpush3.bf16.msra.mxu0 %v357_v51  ;;  %v58_v8 = vld [vmem:[%s669_s1 + $0x150] sm:$0xff]  ;;  %v59_v10 = vld [vmem:[%s669_s1 + $0x158] sm:$0xff]  ;;  %v76_v14 = vld [vmem:[%s669_s1 + $0x1e0] sm:$0xff]  ;;  %v365_v16 = vpack.c.bf16 %v27_v7, %v26_v6  ;;  %v367_v20 = vpack.c.bf16 %v45_v12, %v44_v11 }
  0x12   :  { %360 = vmatprep.subr.bf16.mxu0 %v359_v55  ;;  %v77_v15 = vld [vmem:[%s669_s1 + $0x1e8] sm:$0xff]  ;;  %v28_v17 = vld [vmem:[%s669_s1 + $0x60] sm:$0xff]  ;;  %v397_v19 = vpack.c.bf16 %v59_v10, %v58_v8 }
  0x13   :  { %390 = vmatpush3.bf16.msra.mxu1 %v389_v54  ;;  %v29_v18 = vld [vmem:[%s669_s1 + $0x68] sm:$0xff]  ;;  %v60_v21 = vld [vmem:[%s669_s1 + $0x160] sm:$0xff] }
  0x14   :  { %392 = vmatprep.subr.bf16.mxu1 %v391_v59  ;;  %v15_v22 = vld [vmem:[%s668_s0] sm:$0xff] }
  0x15   :  { %362 = vmatpush3.bf16.msra.mxu0 %v361_v3 }
  0x16   :  { %364 = vmatprep.subr.bf16.mxu0 %v363_v5 }
  0x17   :  { %394 = vmatpush3.bf16.msra.mxu1 %v393_v4 }
  0x18   :  { %8 = vsyncpa [#allocation3], 0  ;;  %396 = vmatprep.subr.bf16.mxu1 %v395_v9  ;;  %v399_v23 = vpack.c.bf16 %v77_v15, %v76_v14  ;;  %v61_v24 = vld [vmem:[%s669_s1 + $0x168] sm:$0xff]  ;;  %v46_v25 = vld [vmem:[%s669_s1 + $0xf0] sm:$0xff]  ;;  %v95_v27 = vrot.slane %v15_v22, %v94_v13  ;;  %v88_v28 = vcombine.high %v15_v22, %v15_v22  ;;  %v369_v31 = vpack.c.bf16 %v29_v18, %v28_v17 }
  0x19   :  { %v47_v26 = vld [vmem:[%s669_s1 + $0xf8] sm:$0xff]  ;;  %v78_v29 = vld [vmem:[%s669_s1 + $0x1f0] sm:$0xff]  ;;  %366 = vmatpush3.bf16.msra.mxu0 %v365_v16  ;;  %v401_v34 = vpack.c.bf16 %v61_v24, %v60_v21  ;;  %v272_v45 = vld [vmem:[%s670_s2] ss:$0 sm:$0xff]  ;;  %vm250_vm0 = vcmask 1041408  }
  0x1a   :  { %v79_v30 = vld [vmem:[%s669_s1 + $0x1f8] sm:$0xff]  ;;  %v103_v32 = vcombine.high %v95_v27, %v95_v27  ;;  %v102_v33 = vrot.slane %v88_v28, %v94_v13  ;;  %368 = vmatprep.subr.bf16.mxu0 %v367_v20  ;;  %v371_v35 = vpack.c.bf16 %v47_v26, %v46_v25  ;;  %v30_v36 = vld [vmem:[%s669_s1 + $0x70] sm:$0xff] }
  0x1b   :  { %398 = vmatpush3.bf16.msra.mxu1 %v397_v19  ;;  %v31_v37 = vld [vmem:[%s669_s1 + $0x78] sm:$0xff]  ;;  %v403_v38 = vpack.c.bf16 %v79_v30, %v78_v29  ;;  %v62_v39 = vld [vmem:[%s669_s1 + $0x170] sm:$0xff] }
  0x1c   :  { %400 = vmatprep.subr.bf16.mxu1 %v399_v23  ;;  %v63_v40 = vld [vmem:[%s669_s1 + $0x178] sm:$0xff]  ;;  %173 = vmatprep.mubr.f32.mxu0 %v103_v32  ;;  %v104_v41 = vcombine.high %v102_v33, %v102_v33  ;;  %v373_v42 = vpack.c.bf16 %v31_v37, %v30_v36  ;;  %s437_s1 = smov [#allocation2]  }
  0x1d   :  { %370 = vmatpush3.bf16.msra.mxu0 %v369_v31  ;;  %v405_v43 = vpack.c.bf16 %v63_v40, %v62_v39  ;;  %s264_s8 = sshll.u32 %s437_s1, 4  ;;  %s265_s8 = int_to_ptr.vmem [resolvable:$true] %s264_s8 }
  0x1e   :  { %243 = vmatprep.mubr.f32.mxu1 %v104_v41  ;;  %372 = vmatprep.subr.bf16.mxu0 %v371_v35  ;;  %s412_s2 = scalar_lea.vmem %s265_s8, 32  ;;  %p417_p1 = scmp.lt.s32.totalorder %s265_s8, %s265_s8 }
  0x1f   :  { %402 = vmatpush3.bf16.msra.mxu1 %v401_v34  ;;  %p413_p0 = scmp.ne.s32.totalorder %s265_s8, %s412_s2  ;;  %p418_p2 = scmp.lt.s32.totalorder %s412_s2, %s412_s2 }
  0x20   :  { %404 = vmatprep.subr.bf16.mxu1 %v403_v38 }
  0x21   :  { %374 = vmatpush3.bf16.msra.mxu0 %v373_v42  ;;  %p419_p3 = por %p418_p2, %p417_p1 }
  0x23   :  { %406 = vmatpush3.bf16.msra.mxu1 %v405_v43  ;;  %p420_p4 = pnand %p419_p3, %p413_p0 }
  0x24   :  { %174 = vmatmul.mubr.f32.vlgmr.msra.gmra.mrb[0].mxu0 %v95_v27 }
  0x26   :  { %244 = vmatmul.mubr.f32.vlgmr.msra.gmra.mrb[0].mxu1 %v102_v33 }
  0xf7   :  { %v305_v44 = vpop.f32.mrb[0].mxu0 }
  0xf8   :  { %v306_v46 = vpop.f32.mrb[1].mxu0 }
  0xf9   :  { %v340_v47 = vpop.f32.mrb[0].mxu1  ;;  %v307_v48 = vadd.f32 %v306_v46, %v305_v44 }
  0xfa   :  { %v341_v49 = vpop.f32.mrb[1].mxu1 }
  0xfb   :  { %v342_v50 = vadd.f32 %v341_v49, %v340_v47  ;;  %v176_v51 = vadd.f32 %v307_v48, %v272_v45 }
  0xfd   :  { %v246_v52 = vadd.f32 %v342_v50, %v176_v51 }
  0xff   :  { %v249_v53 = vmul.f32 %v246_v52, %v246_v52 }
 0x101   :  { %v251_v54 = vsel %vm250_vm0, %v249_v53, 0.0 }
 0x102   :  { %252 = vadd.xlane.f32.xlu0 %v251_v54 }
 0x18f   :  { %v253_v55 = vpop.xlane.xlu0 %252 }
 0x190   :  { %v254_v56 = vadd.f32 1e-12, %v253_v55 }
 0x192   :  { %410 = vrsqrt.f32 %v254_v56 }
 0x19c   :  { %v411_v57 = vpop.eup %410 }
 0x19d   :  { %v256_v58 = vmul.f32 %v411_v57, %v246_v52 }
 0x19f   :  { %257 = vst [vmem:[#allocation2] sm:$0x3] %v256_v58 }
 0x1a0   :  { %423 = shalt.err (!%p420_p4)
}
 0x1a1   :  { %s424_s11 = scalar_lea.hbm %s671_s3, 32 }
 0x1a2   :  { %p425_p5 = scmp.ne.s32.totalorder %s671_s3, %s424_s11  ;;  %p428_p6 = scmp.lt.u32.totalorder %s424_s11, %s671_s3 }
 0x1a4   :  { %p430_p7 = pnand %p428_p6, %p425_p5 }
 0x1a6   :  { %433 = shalt.err (!%p430_p7)
}
 0x1a7   :  { %267 = dma.vmem_to_hbm [thread:$0]  %s265_s8, 32, %s671_s3, [#allocation3]  }
 0x1a8   :  { %434 = dma.done.wait [#allocation3], 32  }
 0x1a9   :  { %435 = vsyncadd [#allocation3], 4294967264 }
 0x1aa   :  { %271 = vsyncpa [#allocation3], 1 }

</bundles_post_ra>
